<compile_context>
chip_gen: v7x
topology: tpu7x:2x2x1
jax: 0.10.0
libtpu: 0.0.40
codegen_flags: <defaults>
</compile_context>

<pallas_src>
import math
import jax
import jax.numpy as jnp
from jax import lax
from jax.experimental import pallas as pl
from jax.experimental.pallas import tpu as pltpu

# ----------------------------- small synthetic config -----------------------------
B = 2                     # batch
IN_CHANS = 3
IMG = 32
PATCH = 16
NUM_PATCHES = (IMG // PATCH) ** 2          # 4
EMBED_DIM = 192                            # must equal SAT d_model=192 (as in the module)
DEPTH = 2                                  # small depth for the synthetic test
NUM_HEADS = 3
HEAD_DIM = EMBED_DIM // NUM_HEADS          # 64
MLP_HIDDEN = int(EMBED_DIM * 4.0)          # mlp_ratio = 4.0
VOC_K = 16                                 # BoF vocabulary size
SAT_H = 8
SAT_DK = 32
SAT_DV = 32
SEQ = NUM_PATCHES + 1                      # cls token + patches
LN_EPS = 1e-5                              # nn.LayerNorm default

assert SAT_DV == SAT_DK                    # shared per-head selector matrices

_NUM_LEAD = 20                             # fixed leading kernel inputs (before block weights)
_INV_SQRT2 = 0.7071067811865476


# ----------------------------- in-kernel helpers -----------------------------------
def _erf(x):
    # Abramowitz & Stegun 7.1.26 rational approximation, |err| <= 1.5e-7
    # (exact at float32 precision); avoids relying on an erf primitive lowering.
    a1, a2, a3, a4, a5 = 0.254829592, -0.284496736, 1.421413741, -1.453152027, 1.061405429
    p = 0.3275911
    s = jnp.where(x >= 0.0, 1.0, -1.0)
    ax = jnp.abs(x)
    t = 1.0 / (1.0 + p * ax)
    poly = ((((a5 * t + a4) * t + a3) * t + a2) * t + a1) * t
    return s * (1.0 - poly * jnp.exp(-ax * ax))


def _gelu_exact(x):
    # matches torch.nn.GELU (erf formulation)
    return 0.5 * x * (1.0 + _erf(x * _INV_SQRT2))


def _layernorm(z, g_ref, b_ref):
    mu = jnp.mean(z, axis=-1, keepdims=True)
    var = jnp.mean((z - mu) ** 2, axis=-1, keepdims=True)
    return (z - mu) * lax.rsqrt(var + LN_EPS) * g_ref[...] + b_ref[...]


# ----------------------------- the single fused kernel ------------------------------
def _fused_forward_kernel(*refs):
    (xp_ref, pw_ref, pb_ref,                       # patch embedding
     sli_ref, semb_ref, t2i_ref,                   # BoF sift embedding
     wq_ref, bq_ref, wk_ref, bk_ref,               # SAT linears
     wv_ref, bv_ref, wo_ref, bo_ref,
     selr_ref, sele_ref,                           # per-head selector matrices
     scat_ref, base_ref,                           # cls/pos assembly helpers
     bias_ref, selcls_ref) = refs[:_NUM_LEAD]      # block-diag attn mask, CLS selector
    blk_refs = refs[_NUM_LEAD:-4]                  # 11 refs per encoder block
    ng_ref, nb_ref = refs[-4], refs[-3]            # final LayerNorm
    o_ref = refs[-2]                               # (B, D) output (CLS rows)
    cat_ref = refs[-1]                             # (B*SEQ, D) VMEM scratch (head concat)

    f32 = jnp.float32
    n_batch, d = o_ref.shape
    depth = len(blk_refs) // 11
    head_dim = d // NUM_HEADS

    # ---- 1. patch embedding: Conv2d(k=stride=PATCH) as one matmul -------------------
    tok = jnp.dot(xp_ref[...], pw_ref[...], preferred_element_type=f32) + pb_ref[...]

    # ---- 2. BoF sift embedding, replicated onto the matching token rows -------------
    sift_em = jnp.dot(sli_ref[...], semb_ref[...], preferred_element_type=f32)   # (Bt, D)
    sift_tok = jnp.dot(t2i_ref[...], sift_em, preferred_element_type=f32)        # (B*P, D)

    # ---- 3. SAT fusion (seq len 2: [token, sift]); all 8 heads vectorized -----------
    inv_sqrt_dk = 1.0 / math.sqrt(SAT_DK)

    def lin(z, w_ref, b_ref):
        return jnp.dot(z, w_ref[...], preferred_element_type=f32) + b_ref[...]

    q_t, k_t, v_t = lin(tok, wq_ref, bq_ref), lin(tok, wk_ref, bk_ref), lin(tok, wv_ref, bv_ref)
    q_s, k_s, v_s = (lin(sift_tok, wq_ref, bq_ref), lin(sift_tok, wk_ref, bk_ref),
                     lin(sift_tok, wv_ref, bv_ref))

    selr = selr_ref[...]                       # (H*dk, H): per-head sum reduction
    sele = sele_ref[...]                       # (H, H*dv): per-head broadcast back
    s00 = jnp.dot(q_t * k_t, selr, preferred_element_type=f32) * inv_sqrt_dk      # (B*P, H)
    s01 = jnp.dot(q_t * k_s, selr, preferred_element_type=f32) * inv_sqrt_dk
    s10 = jnp.dot(q_s * k_t, selr, preferred_element_type=f32) * inv_sqrt_dk
    s11 = jnp.dot(q_s * k_s, selr, preferred_element_type=f32) * inv_sqrt_dk

    m0 = jnp.maximum(s00, s01)                 # softmax over the 2 keys, query = token row
    e00, e01 = jnp.exp(s00 - m0), jnp.exp(s01 - m0)
    inv0 = 1.0 / (e00 + e01)
    m1 = jnp.maximum(s10, s11)                 # softmax over the 2 keys, query = sift row
    e10, e11 = jnp.exp(s10 - m1), jnp.exp(s11 - m1)
    inv1 = 1.0 / (e10 + e11)
    # reference sums the two SAT output rows, so fold both softmaxes into combined
    # per-head weights on v_t / v_s and hit fc_o with ONE matmul (+ bias counted twice).
    w_vt = jnp.dot(e00 * inv0 + e10 * inv1, sele, preferred_element_type=f32)     # (B*P, H*dv)
    w_vs = jnp.dot(e01 * inv0 + e11 * inv1, sele, preferred_element_type=f32)
    fused_tok = (jnp.dot(w_vt * v_t + w_vs * v_s, wo_ref[...],
                         preferred_element_type=f32) + 2.0 * bo_ref[...])         # (B*P, D)

    # ---- 4. [cls | patch tokens] + positional embedding, batch folded into rows -----
    x2 = jnp.dot(scat_ref[...], fused_tok, preferred_element_type=f32) + base_ref[...]

    attn_bias = bias_ref[...]                  # block-diagonal mask over (B*SEQ)^2
    scale = head_dim ** -0.5

    # ---- 5. ViT encoder blocks -------------------------------------------------------
    for blk in range(depth):
        (ln1g, ln1b, wqkv, wproj, bproj,
         ln2g, ln2b, w1, b1, w2, b2) = blk_refs[11 * blk:11 * (blk + 1)]

        xn = _layernorm(x2, ln1g, ln1b)
        qkv = jnp.dot(xn, wqkv[...], preferred_element_type=f32)                  # (B*SEQ, 3D)
        q = qkv[:, 0:d] * scale
        k = qkv[:, d:2 * d]
        v = qkv[:, 2 * d:3 * d]
        for h in range(NUM_HEADS):
            sl = slice(h * head_dim, (h + 1) * head_dim)
            logits = lax.dot_general(q[:, sl], k[:, sl], (((1,), (1,)), ((), ())),
                                     preferred_element_type=f32) + attn_bias      # (BN, BN)
            logits = logits - jnp.max(logits, axis=-1, keepdims=True)
            p = jnp.exp(logits)
            p = p / jnp.sum(p, axis=-1, keepdims=True)
            cat_ref[:, sl] = jnp.dot(p, v[:, sl], preferred_element_type=f32)
        # one projection matmul over the concatenated heads
        x2 = x2 + jnp.dot(cat_ref[...], wproj[...], preferred_element_type=f32) + bproj[...]

        xn2 = _layernorm(x2, ln2g, ln2b)
        h1 = _gelu_exact(jnp.dot(xn2, w1[...], preferred_element_type=f32) + b1[...])
        x2 = x2 + jnp.dot(h1, w2[...], preferred_element_type=f32) + b2[...]

    # ---- 6. final LayerNorm on the CLS rows only (LN is row-wise, so equivalent) -----
    cls_rows = jnp.dot(selcls_ref[...], x2, preferred_element_type=f32)           # (B, D)
    o_ref[...] = _layernorm(cls_rows, ng_ref, nb_ref).astype(o_ref.dtype)


# ----------------------------- parameters (deterministic) ---------------------------
def make_params(key):
    keys = iter(jax.random.split(key, 64))

    def tn(shape, std=0.02):
        return (std * jax.random.truncated_normal(next(keys), -2.0, 2.0, shape)
                ).astype(jnp.float32)

    zeros = lambda shape: jnp.zeros(shape, jnp.float32)
    ones = lambda shape: jnp.ones(shape, jnp.float32)

    params = {}
    # PatchEmbed: Conv2d(IN_CHANS, EMBED_DIM, kernel=stride=PATCH)
    w_conv = tn((EMBED_DIM, IN_CHANS, PATCH, PATCH))
    params['patch_w_t'] = w_conv.reshape(EMBED_DIM, IN_CHANS * PATCH * PATCH).T
    params['patch_b'] = zeros((1, EMBED_DIM))
    # tokens / positional / sift embeddings (trunc_normal std=0.02, like the module)
    params['cls_token'] = tn((1, 1, EMBED_DIM))
    params['pos_embed'] = tn((1, SEQ, EMBED_DIM))
    params['sift_embed'] = tn((VOC_K, EMBED_DIM))
    # ScaledDotProductAttention(d_model=192, d_k=32, d_v=32, h=8)
    params['sat_wq_t'] = tn((SAT_H * SAT_DK, EMBED_DIM)).T
    params['sat_bq'] = zeros((1, SAT_H * SAT_DK))
    params['sat_wk_t'] = tn((SAT_H * SAT_DK, EMBED_DIM)).T
    params['sat_bk'] = zeros((1, SAT_H * SAT_DK))
    params['sat_wv_t'] = tn((SAT_H * SAT_DV, EMBED_DIM)).T
    params['sat_bv'] = zeros((1, SAT_H * SAT_DV))
    params['sat_wo_t'] = tn((EMBED_DIM, SAT_H * SAT_DV)).T
    params['sat_bo'] = zeros((1, EMBED_DIM))
    # transformer blocks
    blocks = []
    for _ in range(DEPTH):
        blocks.append(dict(
            ln1_g=ones((1, EMBED_DIM)), ln1_b=zeros((1, EMBED_DIM)),
            wqkv_t=tn((3 * EMBED_DIM, EMBED_DIM)).T,
            wproj_t=tn((EMBED_DIM, EMBED_DIM)).T, bproj=zeros((1, EMBED_DIM)),
            ln2_g=ones((1, EMBED_DIM)), ln2_b=zeros((1, EMBED_DIM)),
            w1_t=tn((MLP_HIDDEN, EMBED_DIM)).T, b1=zeros((1, MLP_HIDDEN)),
            w2_t=tn((EMBED_DIM, MLP_HIDDEN)).T, b2=zeros((1, EMBED_DIM)),
        ))
    params['blocks'] = blocks
    params['norm_g'] = ones((1, EMBED_DIM))
    params['norm_b'] = zeros((1, EMBED_DIM))
    return params


# ----------------------------- forward pass (single pallas_call) --------------------
def forward(params, x, x_g_norm, sift_hist):
    b_, c, h, w = x.shape
    batch_true = x_g_norm.shape[0]          # crops = b_ // batch_true (as in the module)
    n_patch = (h // PATCH) * (w // PATCH)
    seq = n_patch + 1
    f32 = jnp.float32

    # ---- BoF / SIFT bag-of-features ----
    # TODO(synk): cv2.SIFT_create + vq bag-of-features quantization has no Pallas/JAX
    # equivalent; a deterministic synthetic BoF histogram (sift_hist) stands in for it.
    hist_sum = jnp.sum(sift_hist, axis=1, keepdims=True)
    sift_li = jnp.where(hist_sum > 0, sift_hist / jnp.maximum(hist_sum, 1e-30), 0.0)
    sift_li = sift_li[:batch_true]          # only the first batch_true rows are used

    # ---- patch extraction: Conv2d(k=stride=PATCH) == pure layout reshuffle (glue) ----
    xp = x.reshape(b_, c, h // PATCH, PATCH, w // PATCH, PATCH)
    xp = xp.transpose(0, 2, 4, 1, 3, 5).reshape(b_ * n_patch, c * PATCH * PATCH)

    # ---- tiny constant helper matrices (constant-folded by XLA, keep kernel gather-free)
    rows = jnp.arange(b_ * n_patch)
    tok2img = (((rows[:, None] // n_patch) % batch_true)
               == jnp.arange(batch_true)[None, :]).astype(f32)                 # (B*P, Bt)
    j = jnp.arange(SAT_H * SAT_DK)
    sel_red = (j[:, None] // SAT_DK == jnp.arange(SAT_H)[None, :]).astype(f32)  # (H*dk, H)
    sel_exp = sel_red.T                                                         # (H, H*dv)

    r = jnp.arange(b_ * seq)
    s_of_r = r % seq
    tcol = jnp.arange(b_ * n_patch)
    scat_tok = ((s_of_r[:, None] >= 1)
                & (tcol[None, :] == (r // seq)[:, None] * n_patch
                   + (s_of_r[:, None] - 1))).astype(f32)                        # (B*SEQ, B*P)
    cls_pos0 = params['cls_token'][0] + params['pos_embed'][0, 0:1]             # (1, D)
    base = jnp.tile(jnp.concatenate([cls_pos0, params['pos_embed'][0, 1:]], axis=0),
                    (b_, 1))                                                    # (B*SEQ, D)
    img_id = r // seq
    attn_bias = jnp.where(img_id[:, None] == img_id[None, :], 0.0, -1e30).astype(f32)
    sel_cls = (r[None, :] == jnp.arange(b_)[:, None] * seq).astype(f32)         # (B, B*SEQ)

    inputs = [xp, params['patch_w_t'], params['patch_b'],
              sift_li, params['sift_embed'], tok2img,
              params['sat_wq_t'], params['sat_bq'],
              params['sat_wk_t'], params['sat_bk'],
              params['sat_wv_t'], params['sat_bv'],
              params['sat_wo_t'], params['sat_bo'],
              sel_red, sel_exp, scat_tok, base, attn_bias, sel_cls]
    for blk in params['blocks']:
        inputs += [blk['ln1_g'], blk['ln1_b'], blk['wqkv_t'], blk['wproj_t'], blk['bproj'],
                   blk['ln2_g'], blk['ln2_b'], blk['w1_t'], blk['b1'], blk['w2_t'], blk['b2']]
    inputs += [params['norm_g'], params['norm_b']]

    # Single fused kernel; everything fits in VMEM (~6 MB padded), no grid needed.
    return pl.pallas_call(
        _fused_forward_kernel,
        out_shape=jax.ShapeDtypeStruct((b_, EMBED_DIM), jnp.float32),
        scratch_shapes=[pltpu.VMEM((b_ * seq, EMBED_DIM), jnp.float32)],
    )(*inputs)


# ----------------------------- demo -------------------------------------------------
if __name__ == "__main__":
    key = jax.random.PRNGKey(0)
    k_params, k_x, k_hist = jax.random.split(key, 3)

    params = make_params(k_params)
    x = jax.random.normal(k_x, (B, IN_CHANS, IMG, IMG), jnp.float32)
    x_g_norm = jnp.zeros((B, 1), jnp.float32)   # only its batch dimension is used
    # deterministic synthetic BoF histogram (stand-in for cv2 SIFT + vq)
    sift_hist = jnp.floor(jax.random.uniform(k_hist, (B, VOC_K),
                                             minval=0.0, maxval=6.0)).astype(jnp.float32)

    out = jax.jit(forward)(params, x, x_g_norm, sift_hist)
    out = jax.block_until_ready(out)

    assert out.shape == (B, EMBED_DIM), out.shape
    assert bool(jnp.all(jnp.isfinite(out)))
    print("KERNEL_OK")
</pallas_src>

<mosaic_0001>
module attributes {stable_mosaic.version = 11 : i64} {
  func.func @_fused_forward_kernel(%arg0: memref<8x768xf32, #tpu.memory_space<vmem>>, %arg1: memref<768x192xf32, #tpu.memory_space<vmem>>, %arg2: memref<1x192xf32, #tpu.memory_space<vmem>>, %arg3: memref<2x16xf32, #tpu.memory_space<vmem>>, %arg4: memref<16x192xf32, #tpu.memory_space<vmem>>, %arg5: memref<8x2xf32, #tpu.memory_space<vmem>>, %arg6: memref<192x256xf32, #tpu.memory_space<vmem>>, %arg7: memref<1x256xf32, #tpu.memory_space<vmem>>, %arg8: memref<192x256xf32, #tpu.memory_space<vmem>>, %arg9: memref<1x256xf32, #tpu.memory_space<vmem>>, %arg10: memref<192x256xf32, #tpu.memory_space<vmem>>, %arg11: memref<1x256xf32, #tpu.memory_space<vmem>>, %arg12: memref<256x192xf32, #tpu.memory_space<vmem>>, %arg13: memref<1x192xf32, #tpu.memory_space<vmem>>, %arg14: memref<256x8xf32, #tpu.memory_space<vmem>>, %arg15: memref<8x256xf32, #tpu.memory_space<vmem>>, %arg16: memref<10x8xf32, #tpu.memory_space<vmem>>, %arg17: memref<10x192xf32, #tpu.memory_space<vmem>>, %arg18: memref<10x10xf32, #tpu.memory_space<vmem>>, %arg19: memref<2x10xf32, #tpu.memory_space<vmem>>, %arg20: memref<1x192xf32, #tpu.memory_space<vmem>>, %arg21: memref<1x192xf32, #tpu.memory_space<vmem>>, %arg22: memref<192x576xf32, #tpu.memory_space<vmem>>, %arg23: memref<192x192xf32, #tpu.memory_space<vmem>>, %arg24: memref<1x192xf32, #tpu.memory_space<vmem>>, %arg25: memref<1x192xf32, #tpu.memory_space<vmem>>, %arg26: memref<1x192xf32, #tpu.memory_space<vmem>>, %arg27: memref<192x768xf32, #tpu.memory_space<vmem>>, %arg28: memref<1x768xf32, #tpu.memory_space<vmem>>, %arg29: memref<768x192xf32, #tpu.memory_space<vmem>>, %arg30: memref<1x192xf32, #tpu.memory_space<vmem>>, %arg31: memref<1x192xf32, #tpu.memory_space<vmem>>, %arg32: memref<1x192xf32, #tpu.memory_space<vmem>>, %arg33: memref<192x576xf32, #tpu.memory_space<vmem>>, %arg34: memref<192x192xf32, #tpu.memory_space<vmem>>, %arg35: memref<1x192xf32, #tpu.memory_space<vmem>>, %arg36: memref<1x192xf32, #tpu.memory_space<vmem>>, %arg37: memref<1x192xf32, #tpu.memory_space<vmem>>, %arg38: memref<192x768xf32, #tpu.memory_space<vmem>>, %arg39: memref<1x768xf32, #tpu.memory_space<vmem>>, %arg40: memref<768x192xf32, #tpu.memory_space<vmem>>, %arg41: memref<1x192xf32, #tpu.memory_space<vmem>>, %arg42: memref<1x192xf32, #tpu.memory_space<vmem>>, %arg43: memref<1x192xf32, #tpu.memory_space<vmem>>, %arg44: memref<2x192xf32, #tpu.memory_space<vmem>>, %arg45: memref<10x192xf32, #tpu.memory_space<vmem>>) attributes {dimension_semantics = [], scalar_prefetch = 0 : i64, scratch_operands = 1 : i64, tpu.core_type = #tpu.core_type<tc>} {
    %c0 = arith.constant 0 : index
    %c0_0 = arith.constant 0 : index
    %0 = vector.load %arg0[%c0, %c0_0] : memref<8x768xf32, #tpu.memory_space<vmem>>, vector<8x768xf32>
    %c0_1 = arith.constant 0 : index
    %c0_2 = arith.constant 0 : index
    %1 = vector.load %arg1[%c0_1, %c0_2] : memref<768x192xf32, #tpu.memory_space<vmem>>, vector<768x192xf32>
    %cst = arith.constant dense<0.000000e+00> : vector<8x192xf32>
    %2 = tpu.matmul %0, %1, %cst {dimension_numbers = #tpu.dot_dimension_numbers<[1], [0], [0], [1], [0, 0, 1, 1], [], []>} : vector<8x768xf32>, vector<768x192xf32>, vector<8x192xf32> -> vector<8x192xf32>
    %c0_3 = arith.constant 0 : index
    %c0_4 = arith.constant 0 : index
    %3 = vector.load %arg2[%c0_3, %c0_4] : memref<1x192xf32, #tpu.memory_space<vmem>>, vector<1x192xf32>
    %4 = vector.broadcast %3 : vector<1x192xf32> to vector<8x192xf32>
    %5 = arith.addf %2, %4 : vector<8x192xf32>
    %c0_5 = arith.constant 0 : index
    %c0_6 = arith.constant 0 : index
    %6 = vector.load %arg3[%c0_5, %c0_6] : memref<2x16xf32, #tpu.memory_space<vmem>>, vector<2x16xf32>
    %c0_7 = arith.constant 0 : index
    %c0_8 = arith.constant 0 : index
    %7 = vector.load %arg4[%c0_7, %c0_8] : memref<16x192xf32, #tpu.memory_space<vmem>>, vector<16x192xf32>
    %cst_9 = arith.constant dense<0.000000e+00> : vector<2x192xf32>
    %8 = tpu.matmul %6, %7, %cst_9 {dimension_numbers = #tpu.dot_dimension_numbers<[1], [0], [0], [1], [0, 0, 1, 1], [], []>} : vector<2x16xf32>, vector<16x192xf32>, vector<2x192xf32> -> vector<2x192xf32>
    %c0_10 = arith.constant 0 : index
    %c0_11 = arith.constant 0 : index
    %9 = vector.load %arg5[%c0_10, %c0_11] : memref<8x2xf32, #tpu.memory_space<vmem>>, vector<8x2xf32>
    %cst_12 = arith.constant dense<0.000000e+00> : vector<8x192xf32>
    %10 = tpu.matmul %9, %8, %cst_12 {dimension_numbers = #tpu.dot_dimension_numbers<[1], [0], [0], [1], [0, 0, 1, 1], [], []>} : vector<8x2xf32>, vector<2x192xf32>, vector<8x192xf32> -> vector<8x192xf32>
    %c0_13 = arith.constant 0 : index
    %c0_14 = arith.constant 0 : index
    %11 = vector.load %arg6[%c0_13, %c0_14] : memref<192x256xf32, #tpu.memory_space<vmem>>, vector<192x256xf32>
    %cst_15 = arith.constant dense<0.000000e+00> : vector<8x256xf32>
    %12 = tpu.matmul %5, %11, %cst_15 {dimension_numbers = #tpu.dot_dimension_numbers<[1], [0], [0], [1], [0, 0, 1, 1], [], []>} : vector<8x192xf32>, vector<192x256xf32>, vector<8x256xf32> -> vector<8x256xf32>
    %c0_16 = arith.constant 0 : index
    %c0_17 = arith.constant 0 : index
    %13 = vector.load %arg7[%c0_16, %c0_17] : memref<1x256xf32, #tpu.memory_space<vmem>>, vector<1x256xf32>
    %14 = vector.broadcast %13 : vector<1x256xf32> to vector<8x256xf32>
    %15 = arith.addf %12, %14 : vector<8x256xf32>
    %c0_18 = arith.constant 0 : index
    %c0_19 = arith.constant 0 : index
    %16 = vector.load %arg8[%c0_18, %c0_19] : memref<192x256xf32, #tpu.memory_space<vmem>>, vector<192x256xf32>
    %cst_20 = arith.constant dense<0.000000e+00> : vector<8x256xf32>
    %17 = tpu.matmul %5, %16, %cst_20 {dimension_numbers = #tpu.dot_dimension_numbers<[1], [0], [0], [1], [0, 0, 1, 1], [], []>} : vector<8x192xf32>, vector<192x256xf32>, vector<8x256xf32> -> vector<8x256xf32>
    %c0_21 = arith.constant 0 : index
    %c0_22 = arith.constant 0 : index
    %18 = vector.load %arg9[%c0_21, %c0_22] : memref<1x256xf32, #tpu.memory_space<vmem>>, vector<1x256xf32>
    %19 = vector.broadcast %18 : vector<1x256xf32> to vector<8x256xf32>
    %20 = arith.addf %17, %19 : vector<8x256xf32>
    %c0_23 = arith.constant 0 : index
    %c0_24 = arith.constant 0 : index
    %21 = vector.load %arg10[%c0_23, %c0_24] : memref<192x256xf32, #tpu.memory_space<vmem>>, vector<192x256xf32>
    %cst_25 = arith.constant dense<0.000000e+00> : vector<8x256xf32>
    %22 = tpu.matmul %5, %21, %cst_25 {dimension_numbers = #tpu.dot_dimension_numbers<[1], [0], [0], [1], [0, 0, 1, 1], [], []>} : vector<8x192xf32>, vector<192x256xf32>, vector<8x256xf32> -> vector<8x256xf32>
    %c0_26 = arith.constant 0 : index
    %c0_27 = arith.constant 0 : index
    %23 = vector.load %arg11[%c0_26, %c0_27] : memref<1x256xf32, #tpu.memory_space<vmem>>, vector<1x256xf32>
    %24 = vector.broadcast %23 : vector<1x256xf32> to vector<8x256xf32>
    %25 = arith.addf %22, %24 : vector<8x256xf32>
    %c0_28 = arith.constant 0 : index
    %c0_29 = arith.constant 0 : index
    %26 = vector.load %arg6[%c0_28, %c0_29] : memref<192x256xf32, #tpu.memory_space<vmem>>, vector<192x256xf32>
    %cst_30 = arith.constant dense<0.000000e+00> : vector<8x256xf32>
    %27 = tpu.matmul %10, %26, %cst_30 {dimension_numbers = #tpu.dot_dimension_numbers<[1], [0], [0], [1], [0, 0, 1, 1], [], []>} : vector<8x192xf32>, vector<192x256xf32>, vector<8x256xf32> -> vector<8x256xf32>
    %c0_31 = arith.constant 0 : index
    %c0_32 = arith.constant 0 : index
    %28 = vector.load %arg7[%c0_31, %c0_32] : memref<1x256xf32, #tpu.memory_space<vmem>>, vector<1x256xf32>
    %29 = vector.broadcast %28 : vector<1x256xf32> to vector<8x256xf32>
    %30 = arith.addf %27, %29 : vector<8x256xf32>
    %c0_33 = arith.constant 0 : index
    %c0_34 = arith.constant 0 : index
    %31 = vector.load %arg8[%c0_33, %c0_34] : memref<192x256xf32, #tpu.memory_space<vmem>>, vector<192x256xf32>
    %cst_35 = arith.constant dense<0.000000e+00> : vector<8x256xf32>
    %32 = tpu.matmul %10, %31, %cst_35 {dimension_numbers = #tpu.dot_dimension_numbers<[1], [0], [0], [1], [0, 0, 1, 1], [], []>} : vector<8x192xf32>, vector<192x256xf32>, vector<8x256xf32> -> vector<8x256xf32>
    %c0_36 = arith.constant 0 : index
    %c0_37 = arith.constant 0 : index
    %33 = vector.load %arg9[%c0_36, %c0_37] : memref<1x256xf32, #tpu.memory_space<vmem>>, vector<1x256xf32>
    %34 = vector.broadcast %33 : vector<1x256xf32> to vector<8x256xf32>
    %35 = arith.addf %32, %34 : vector<8x256xf32>
    %c0_38 = arith.constant 0 : index
    %c0_39 = arith.constant 0 : index
    %36 = vector.load %arg10[%c0_38, %c0_39] : memref<192x256xf32, #tpu.memory_space<vmem>>, vector<192x256xf32>
    %cst_40 = arith.constant dense<0.000000e+00> : vector<8x256xf32>
    %37 = tpu.matmul %10, %36, %cst_40 {dimension_numbers = #tpu.dot_dimension_numbers<[1], [0], [0], [1], [0, 0, 1, 1], [], []>} : vector<8x192xf32>, vector<192x256xf32>, vector<8x256xf32> -> vector<8x256xf32>
    %c0_41 = arith.constant 0 : index
    %c0_42 = arith.constant 0 : index
    %38 = vector.load %arg11[%c0_41, %c0_42] : memref<1x256xf32, #tpu.memory_space<vmem>>, vector<1x256xf32>
    %39 = vector.broadcast %38 : vector<1x256xf32> to vector<8x256xf32>
    %40 = arith.addf %37, %39 : vector<8x256xf32>
    %c0_43 = arith.constant 0 : index
    %c0_44 = arith.constant 0 : index
    %41 = vector.load %arg14[%c0_43, %c0_44] : memref<256x8xf32, #tpu.memory_space<vmem>>, vector<256x8xf32>
    %c0_45 = arith.constant 0 : index
    %c0_46 = arith.constant 0 : index
    %42 = vector.load %arg15[%c0_45, %c0_46] : memref<8x256xf32, #tpu.memory_space<vmem>>, vector<8x256xf32>
    %43 = arith.mulf %15, %20 : vector<8x256xf32>
    %cst_47 = arith.constant dense<0.000000e+00> : vector<8x8xf32>
    %44 = tpu.matmul %43, %41, %cst_47 {dimension_numbers = #tpu.dot_dimension_numbers<[1], [0], [0], [1], [0, 0, 1, 1], [], []>} : vector<8x256xf32>, vector<256x8xf32>, vector<8x8xf32> -> vector<8x8xf32>
    %cst_48 = arith.constant 0.176776692 : f32
    %45 = vector.broadcast %cst_48 : f32 to vector<8x8xf32>
    %46 = arith.mulf %44, %45 : vector<8x8xf32>
    %47 = arith.mulf %15, %35 : vector<8x256xf32>
    %cst_49 = arith.constant dense<0.000000e+00> : vector<8x8xf32>
    %48 = tpu.matmul %47, %41, %cst_49 {dimension_numbers = #tpu.dot_dimension_numbers<[1], [0], [0], [1], [0, 0, 1, 1], [], []>} : vector<8x256xf32>, vector<256x8xf32>, vector<8x8xf32> -> vector<8x8xf32>
    %cst_50 = arith.constant 0.176776692 : f32
    %49 = vector.broadcast %cst_50 : f32 to vector<8x8xf32>
    %50 = arith.mulf %48, %49 : vector<8x8xf32>
    %51 = arith.mulf %30, %20 : vector<8x256xf32>
    %cst_51 = arith.constant dense<0.000000e+00> : vector<8x8xf32>
    %52 = tpu.matmul %51, %41, %cst_51 {dimension_numbers = #tpu.dot_dimension_numbers<[1], [0], [0], [1], [0, 0, 1, 1], [], []>} : vector<8x256xf32>, vector<256x8xf32>, vector<8x8xf32> -> vector<8x8xf32>
    %cst_52 = arith.constant 0.176776692 : f32
    %53 = vector.broadcast %cst_52 : f32 to vector<8x8xf32>
    %54 = arith.mulf %52, %53 : vector<8x8xf32>
    %55 = arith.mulf %30, %35 : vector<8x256xf32>
    %cst_53 = arith.constant dense<0.000000e+00> : vector<8x8xf32>
    %56 = tpu.matmul %55, %41, %cst_53 {dimension_numbers = #tpu.dot_dimension_numbers<[1], [0], [0], [1], [0, 0, 1, 1], [], []>} : vector<8x256xf32>, vector<256x8xf32>, vector<8x8xf32> -> vector<8x8xf32>
    %cst_54 = arith.constant 0.176776692 : f32
    %57 = vector.broadcast %cst_54 : f32 to vector<8x8xf32>
    %58 = arith.mulf %56, %57 : vector<8x8xf32>
    %59 = arith.maximumf %46, %50 : vector<8x8xf32>
    %60 = arith.subf %46, %59 : vector<8x8xf32>
    %61 = math.exp %60 : vector<8x8xf32>
    %62 = arith.subf %50, %59 : vector<8x8xf32>
    %63 = math.exp %62 : vector<8x8xf32>
    %64 = arith.addf %61, %63 : vector<8x8xf32>
    %cst_55 = arith.constant 1.000000e+00 : f32
    %65 = vector.broadcast %cst_55 : f32 to vector<8x8xf32>
    %66 = arith.divf %65, %64 : vector<8x8xf32>
    %67 = arith.maximumf %54, %58 : vector<8x8xf32>
    %68 = arith.subf %54, %67 : vector<8x8xf32>
    %69 = math.exp %68 : vector<8x8xf32>
    %70 = arith.subf %58, %67 : vector<8x8xf32>
    %71 = math.exp %70 : vector<8x8xf32>
    %72 = arith.addf %69, %71 : vector<8x8xf32>
    %cst_56 = arith.constant 1.000000e+00 : f32
    %73 = vector.broadcast %cst_56 : f32 to vector<8x8xf32>
    %74 = arith.divf %73, %72 : vector<8x8xf32>
    %75 = arith.mulf %61, %66 : vector<8x8xf32>
    %76 = arith.mulf %69, %74 : vector<8x8xf32>
    %77 = arith.addf %75, %76 : vector<8x8xf32>
    %cst_57 = arith.constant dense<0.000000e+00> : vector<8x256xf32>
    %78 = tpu.matmul %77, %42, %cst_57 {dimension_numbers = #tpu.dot_dimension_numbers<[1], [0], [0], [1], [0, 0, 1, 1], [], []>} : vector<8x8xf32>, vector<8x256xf32>, vector<8x256xf32> -> vector<8x256xf32>
    %79 = arith.mulf %63, %66 : vector<8x8xf32>
    %80 = arith.mulf %71, %74 : vector<8x8xf32>
    %81 = arith.addf %79, %80 : vector<8x8xf32>
    %cst_58 = arith.constant dense<0.000000e+00> : vector<8x256xf32>
    %82 = tpu.matmul %81, %42, %cst_58 {dimension_numbers = #tpu.dot_dimension_numbers<[1], [0], [0], [1], [0, 0, 1, 1], [], []>} : vector<8x8xf32>, vector<8x256xf32>, vector<8x256xf32> -> vector<8x256xf32>
    %83 = arith.mulf %78, %25 : vector<8x256xf32>
    %84 = arith.mulf %82, %40 : vector<8x256xf32>
    %85 = arith.addf %83, %84 : vector<8x256xf32>
    %c0_59 = arith.constant 0 : index
    %c0_60 = arith.constant 0 : index
    %86 = vector.load %arg12[%c0_59, %c0_60] : memref<256x192xf32, #tpu.memory_space<vmem>>, vector<256x192xf32>
    %cst_61 = arith.constant dense<0.000000e+00> : vector<8x192xf32>
    %87 = tpu.matmul %85, %86, %cst_61 {dimension_numbers = #tpu.dot_dimension_numbers<[1], [0], [0], [1], [0, 0, 1, 1], [], []>} : vector<8x256xf32>, vector<256x192xf32>, vector<8x192xf32> -> vector<8x192xf32>
    %c0_62 = arith.constant 0 : index
    %c0_63 = arith.constant 0 : index
    %88 = vector.load %arg13[%c0_62, %c0_63] : memref<1x192xf32, #tpu.memory_space<vmem>>, vector<1x192xf32>
    %cst_64 = arith.constant 2.000000e+00 : f32
    %89 = vector.broadcast %cst_64 : f32 to vector<1x192xf32>
    %90 = arith.mulf %89, %88 : vector<1x192xf32>
    %91 = vector.broadcast %90 : vector<1x192xf32> to vector<8x192xf32>
    %92 = arith.addf %87, %91 : vector<8x192xf32>
    %c0_65 = arith.constant 0 : index
    %c0_66 = arith.constant 0 : index
    %93 = vector.load %arg16[%c0_65, %c0_66] : memref<10x8xf32, #tpu.memory_space<vmem>>, vector<10x8xf32>
    %cst_67 = arith.constant dense<0.000000e+00> : vector<10x192xf32>
    %94 = tpu.matmul %93, %92, %cst_67 {dimension_numbers = #tpu.dot_dimension_numbers<[1], [0], [0], [1], [0, 0, 1, 1], [], []>} : vector<10x8xf32>, vector<8x192xf32>, vector<10x192xf32> -> vector<10x192xf32>
    %c0_68 = arith.constant 0 : index
    %c0_69 = arith.constant 0 : index
    %95 = vector.load %arg17[%c0_68, %c0_69] : memref<10x192xf32, #tpu.memory_space<vmem>>, vector<10x192xf32>
    %96 = arith.addf %94, %95 : vector<10x192xf32>
    %c0_70 = arith.constant 0 : index
    %c0_71 = arith.constant 0 : index
    %97 = vector.load %arg18[%c0_70, %c0_71] : memref<10x10xf32, #tpu.memory_space<vmem>>, vector<10x10xf32>
    %cst_72 = arith.constant dense<0.000000e+00> : vector<10xf32>
    %98 = vector.multi_reduction <add>, %96, %cst_72 [1] : vector<10x192xf32> to vector<10xf32>
    %99 = vector.shape_cast %98 : vector<10xf32> to vector<10x1xf32>
    %cst_73 = arith.constant 1.920000e+02 : f32
    %100 = vector.broadcast %cst_73 : f32 to vector<10x1xf32>
    %101 = arith.divf %99, %100 : vector<10x1xf32>
    %102 = vector.broadcast %101 : vector<10x1xf32> to vector<10x192xf32>
    %103 = arith.subf %96, %102 : vector<10x192xf32>
    %104 = arith.mulf %103, %103 : vector<10x192xf32>
    %cst_74 = arith.constant dense<0.000000e+00> : vector<10xf32>
    %105 = vector.multi_reduction <add>, %104, %cst_74 [1] : vector<10x192xf32> to vector<10xf32>
    %106 = vector.shape_cast %105 : vector<10xf32> to vector<10x1xf32>
    %cst_75 = arith.constant 1.920000e+02 : f32
    %107 = vector.broadcast %cst_75 : f32 to vector<10x1xf32>
    %108 = arith.divf %106, %107 : vector<10x1xf32>
    %109 = vector.broadcast %101 : vector<10x1xf32> to vector<10x192xf32>
    %110 = arith.subf %96, %109 : vector<10x192xf32>
    %cst_76 = arith.constant 9.99999974E-6 : f32
    %111 = vector.broadcast %cst_76 : f32 to vector<10x1xf32>
    %112 = arith.addf %108, %111 : vector<10x1xf32>
    %113 = math.rsqrt %112 : vector<10x1xf32>
    %114 = vector.broadcast %113 : vector<10x1xf32> to vector<10x192xf32>
    %115 = arith.mulf %110, %114 : vector<10x192xf32>
    %c0_77 = arith.constant 0 : index
    %c0_78 = arith.constant 0 : index
    %116 = vector.load %arg20[%c0_77, %c0_78] : memref<1x192xf32, #tpu.memory_space<vmem>>, vector<1x192xf32>
    %117 = vector.broadcast %116 : vector<1x192xf32> to vector<10x192xf32>
    %118 = arith.mulf %115, %117 : vector<10x192xf32>
    %c0_79 = arith.constant 0 : index
    %c0_80 = arith.constant 0 : index
    %119 = vector.load %arg21[%c0_79, %c0_80] : memref<1x192xf32, #tpu.memory_space<vmem>>, vector<1x192xf32>
    %120 = vector.broadcast %119 : vector<1x192xf32> to vector<10x192xf32>
    %121 = arith.addf %118, %120 : vector<10x192xf32>
    %c0_81 = arith.constant 0 : index
    %c0_82 = arith.constant 0 : index
    %122 = vector.load %arg22[%c0_81, %c0_82] : memref<192x576xf32, #tpu.memory_space<vmem>>, vector<192x576xf32>
    %cst_83 = arith.constant dense<0.000000e+00> : vector<10x576xf32>
    %123 = tpu.matmul %121, %122, %cst_83 {dimension_numbers = #tpu.dot_dimension_numbers<[1], [0], [0], [1], [0, 0, 1, 1], [], []>} : vector<10x192xf32>, vector<192x576xf32>, vector<10x576xf32> -> vector<10x576xf32>
    %124 = vector.extract_strided_slice %123 {offsets = [0, 0], sizes = [10, 192], strides = [1, 1]} : vector<10x576xf32> to vector<10x192xf32>
    %cst_84 = arith.constant 1.250000e-01 : f32
    %125 = vector.broadcast %cst_84 : f32 to vector<10x192xf32>
    %126 = arith.mulf %124, %125 : vector<10x192xf32>
    %127 = vector.extract_strided_slice %123 {offsets = [0, 192], sizes = [10, 192], strides = [1, 1]} : vector<10x576xf32> to vector<10x192xf32>
    %128 = vector.extract_strided_slice %123 {offsets = [0, 384], sizes = [10, 192], strides = [1, 1]} : vector<10x576xf32> to vector<10x192xf32>
    %129 = vector.extract_strided_slice %126 {offsets = [0, 0], sizes = [10, 64], strides = [1, 1]} : vector<10x192xf32> to vector<10x64xf32>
    %130 = vector.extract_strided_slice %127 {offsets = [0, 0], sizes = [10, 64], strides = [1, 1]} : vector<10x192xf32> to vector<10x64xf32>
    %cst_85 = arith.constant dense<0.000000e+00> : vector<10x10xf32>
    %131 = tpu.matmul %129, %130, %cst_85 {dimension_numbers = #tpu.dot_dimension_numbers<[1], [1], [0], [0], [0, 0, 1, 0], [], []>} : vector<10x64xf32>, vector<10x64xf32>, vector<10x10xf32> -> vector<10x10xf32>
    %132 = arith.addf %131, %97 : vector<10x10xf32>
    %cst_86 = arith.constant dense<0xFF800000> : vector<10xf32>
    %133 = vector.multi_reduction <maximumf>, %132, %cst_86 [1] : vector<10x10xf32> to vector<10xf32>
    %134 = vector.shape_cast %133 : vector<10xf32> to vector<10x1xf32>
    %135 = vector.broadcast %134 : vector<10x1xf32> to vector<10x10xf32>
    %136 = arith.subf %132, %135 : vector<10x10xf32>
    %137 = math.exp %136 : vector<10x10xf32>
    %cst_87 = arith.constant dense<0.000000e+00> : vector<10xf32>
    %138 = vector.multi_reduction <add>, %137, %cst_87 [1] : vector<10x10xf32> to vector<10xf32>
    %139 = vector.shape_cast %138 : vector<10xf32> to vector<10x1xf32>
    %140 = vector.broadcast %139 : vector<10x1xf32> to vector<10x10xf32>
    %141 = arith.divf %137, %140 : vector<10x10xf32>
    %142 = vector.extract_strided_slice %128 {offsets = [0, 0], sizes = [10, 64], strides = [1, 1]} : vector<10x192xf32> to vector<10x64xf32>
    %cst_88 = arith.constant dense<0.000000e+00> : vector<10x64xf32>
    %143 = tpu.matmul %141, %142, %cst_88 {dimension_numbers = #tpu.dot_dimension_numbers<[1], [0], [0], [1], [0, 0, 1, 1], [], []>} : vector<10x10xf32>, vector<10x64xf32>, vector<10x64xf32> -> vector<10x64xf32>
    %c0_89 = arith.constant 0 : index
    %c0_90 = arith.constant 0 : index
    %144 = vector.load %arg45[%c0_89, %c0_90] : memref<10x192xf32, #tpu.memory_space<vmem>>, vector<10x64xf32>
    tpu.vector_store %arg45[%c0_89, %c0_90], %143 {strides = array<i32>} : memref<10x192xf32, #tpu.memory_space<vmem>>, vector<10x64xf32>,
    %145 = vector.extract_strided_slice %126 {offsets = [0, 64], sizes = [10, 64], strides = [1, 1]} : vector<10x192xf32> to vector<10x64xf32>
    %146 = vector.extract_strided_slice %127 {offsets = [0, 64], sizes = [10, 64], strides = [1, 1]} : vector<10x192xf32> to vector<10x64xf32>
    %cst_91 = arith.constant dense<0.000000e+00> : vector<10x10xf32>
    %147 = tpu.matmul %145, %146, %cst_91 {dimension_numbers = #tpu.dot_dimension_numbers<[1], [1], [0], [0], [0, 0, 1, 0], [], []>} : vector<10x64xf32>, vector<10x64xf32>, vector<10x10xf32> -> vector<10x10xf32>
    %148 = arith.addf %147, %97 : vector<10x10xf32>
    %cst_92 = arith.constant dense<0xFF800000> : vector<10xf32>
    %149 = vector.multi_reduction <maximumf>, %148, %cst_92 [1] : vector<10x10xf32> to vector<10xf32>
    %150 = vector.shape_cast %149 : vector<10xf32> to vector<10x1xf32>
    %151 = vector.broadcast %150 : vector<10x1xf32> to vector<10x10xf32>
    %152 = arith.subf %148, %151 : vector<10x10xf32>
    %153 = math.exp %152 : vector<10x10xf32>
    %cst_93 = arith.constant dense<0.000000e+00> : vector<10xf32>
    %154 = vector.multi_reduction <add>, %153, %cst_93 [1] : vector<10x10xf32> to vector<10xf32>
    %155 = vector.shape_cast %154 : vector<10xf32> to vector<10x1xf32>
    %156 = vector.broadcast %155 : vector<10x1xf32> to vector<10x10xf32>
    %157 = arith.divf %153, %156 : vector<10x10xf32>
    %158 = vector.extract_strided_slice %128 {offsets = [0, 64], sizes = [10, 64], strides = [1, 1]} : vector<10x192xf32> to vector<10x64xf32>
    %cst_94 = arith.constant dense<0.000000e+00> : vector<10x64xf32>
    %159 = tpu.matmul %157, %158, %cst_94 {dimension_numbers = #tpu.dot_dimension_numbers<[1], [0], [0], [1], [0, 0, 1, 1], [], []>} : vector<10x10xf32>, vector<10x64xf32>, vector<10x64xf32> -> vector<10x64xf32>
    %c0_95 = arith.constant 0 : index
    %c64 = arith.constant 64 : index
    %160 = vector.load %arg45[%c0_95, %c64] : memref<10x192xf32, #tpu.memory_space<vmem>>, vector<10x64xf32>
    tpu.vector_store %arg45[%c0_95, %c64], %159 {strides = array<i32>} : memref<10x192xf32, #tpu.memory_space<vmem>>, vector<10x64xf32>,
    %161 = vector.extract_strided_slice %126 {offsets = [0, 128], sizes = [10, 64], strides = [1, 1]} : vector<10x192xf32> to vector<10x64xf32>
    %162 = vector.extract_strided_slice %127 {offsets = [0, 128], sizes = [10, 64], strides = [1, 1]} : vector<10x192xf32> to vector<10x64xf32>
    %cst_96 = arith.constant dense<0.000000e+00> : vector<10x10xf32>
    %163 = tpu.matmul %161, %162, %cst_96 {dimension_numbers = #tpu.dot_dimension_numbers<[1], [1], [0], [0], [0, 0, 1, 0], [], []>} : vector<10x64xf32>, vector<10x64xf32>, vector<10x10xf32> -> vector<10x10xf32>
    %164 = arith.addf %163, %97 : vector<10x10xf32>
    %cst_97 = arith.constant dense<0xFF800000> : vector<10xf32>
    %165 = vector.multi_reduction <maximumf>, %164, %cst_97 [1] : vector<10x10xf32> to vector<10xf32>
    %166 = vector.shape_cast %165 : vector<10xf32> to vector<10x1xf32>
    %167 = vector.broadcast %166 : vector<10x1xf32> to vector<10x10xf32>
    %168 = arith.subf %164, %167 : vector<10x10xf32>
    %169 = math.exp %168 : vector<10x10xf32>
    %cst_98 = arith.constant dense<0.000000e+00> : vector<10xf32>
    %170 = vector.multi_reduction <add>, %169, %cst_98 [1] : vector<10x10xf32> to vector<10xf32>
    %171 = vector.shape_cast %170 : vector<10xf32> to vector<10x1xf32>
    %172 = vector.broadcast %171 : vector<10x1xf32> to vector<10x10xf32>
    %173 = arith.divf %169, %172 : vector<10x10xf32>
    %174 = vector.extract_strided_slice %128 {offsets = [0, 128], sizes = [10, 64], strides = [1, 1]} : vector<10x192xf32> to vector<10x64xf32>
    %cst_99 = arith.constant dense<0.000000e+00> : vector<10x64xf32>
    %175 = tpu.matmul %173, %174, %cst_99 {dimension_numbers = #tpu.dot_dimension_numbers<[1], [0], [0], [1], [0, 0, 1, 1], [], []>} : vector<10x10xf32>, vector<10x64xf32>, vector<10x64xf32> -> vector<10x64xf32>
    %c0_100 = arith.constant 0 : index
    %c128 = arith.constant 128 : index
    %176 = vector.load %arg45[%c0_100, %c128] : memref<10x192xf32, #tpu.memory_space<vmem>>, vector<10x64xf32>
    tpu.vector_store %arg45[%c0_100, %c128], %175 {strides = array<i32>} : memref<10x192xf32, #tpu.memory_space<vmem>>, vector<10x64xf32>,
    %c0_101 = arith.constant 0 : index
    %c0_102 = arith.constant 0 : index
    %177 = vector.load %arg45[%c0_101, %c0_102] : memref<10x192xf32, #tpu.memory_space<vmem>>, vector<10x192xf32>
    %c0_103 = arith.constant 0 : index
    %c0_104 = arith.constant 0 : index
    %178 = vector.load %arg23[%c0_103, %c0_104] : memref<192x192xf32, #tpu.memory_space<vmem>>, vector<192x192xf32>
    %cst_105 = arith.constant dense<0.000000e+00> : vector<10x192xf32>
    %179 = tpu.matmul %177, %178, %cst_105 {dimension_numbers = #tpu.dot_dimension_numbers<[1], [0], [0], [1], [0, 0, 1, 1], [], []>} : vector<10x192xf32>, vector<192x192xf32>, vector<10x192xf32> -> vector<10x192xf32>
    %180 = arith.addf %96, %179 : vector<10x192xf32>
    %c0_106 = arith.constant 0 : index
    %c0_107 = arith.constant 0 : index
    %181 = vector.load %arg24[%c0_106, %c0_107] : memref<1x192xf32, #tpu.memory_space<vmem>>, vector<1x192xf32>
    %182 = vector.broadcast %181 : vector<1x192xf32> to vector<10x192xf32>
    %183 = arith.addf %180, %182 : vector<10x192xf32>
    %cst_108 = arith.constant dense<0.000000e+00> : vector<10xf32>
    %184 = vector.multi_reduction <add>, %183, %cst_108 [1] : vector<10x192xf32> to vector<10xf32>
    %185 = vector.shape_cast %184 : vector<10xf32> to vector<10x1xf32>
    %cst_109 = arith.constant 1.920000e+02 : f32
    %186 = vector.broadcast %cst_109 : f32 to vector<10x1xf32>
    %187 = arith.divf %185, %186 : vector<10x1xf32>
    %188 = vector.broadcast %187 : vector<10x1xf32> to vector<10x192xf32>
    %189 = arith.subf %183, %188 : vector<10x192xf32>
    %190 = arith.mulf %189, %189 : vector<10x192xf32>
    %cst_110 = arith.constant dense<0.000000e+00> : vector<10xf32>
    %191 = vector.multi_reduction <add>, %190, %cst_110 [1] : vector<10x192xf32> to vector<10xf32>
    %192 = vector.shape_cast %191 : vector<10xf32> to vector<10x1xf32>
    %cst_111 = arith.constant 1.920000e+02 : f32
    %193 = vector.broadcast %cst_111 : f32 to vector<10x1xf32>
    %194 = arith.divf %192, %193 : vector<10x1xf32>
    %195 = vector.broadcast %187 : vector<10x1xf32> to vector<10x192xf32>
    %196 = arith.subf %183, %195 : vector<10x192xf32>
    %cst_112 = arith.constant 9.99999974E-6 : f32
    %197 = vector.broadcast %cst_112 : f32 to vector<10x1xf32>
    %198 = arith.addf %194, %197 : vector<10x1xf32>
    %199 = math.rsqrt %198 : vector<10x1xf32>
    %200 = vector.broadcast %199 : vector<10x1xf32> to vector<10x192xf32>
    %201 = arith.mulf %196, %200 : vector<10x192xf32>
    %c0_113 = arith.constant 0 : index
    %c0_114 = arith.constant 0 : index
    %202 = vector.load %arg25[%c0_113, %c0_114] : memref<1x192xf32, #tpu.memory_space<vmem>>, vector<1x192xf32>
    %203 = vector.broadcast %202 : vector<1x192xf32> to vector<10x192xf32>
    %204 = arith.mulf %201, %203 : vector<10x192xf32>
    %c0_115 = arith.constant 0 : index
    %c0_116 = arith.constant 0 : index
    %205 = vector.load %arg26[%c0_115, %c0_116] : memref<1x192xf32, #tpu.memory_space<vmem>>, vector<1x192xf32>
    %206 = vector.broadcast %205 : vector<1x192xf32> to vector<10x192xf32>
    %207 = arith.addf %204, %206 : vector<10x192xf32>
    %c0_117 = arith.constant 0 : index
    %c0_118 = arith.constant 0 : index
    %208 = vector.load %arg27[%c0_117, %c0_118] : memref<192x768xf32, #tpu.memory_space<vmem>>, vector<192x768xf32>
    %cst_119 = arith.constant dense<0.000000e+00> : vector<10x768xf32>
    %209 = tpu.matmul %207, %208, %cst_119 {dimension_numbers = #tpu.dot_dimension_numbers<[1], [0], [0], [1], [0, 0, 1, 1], [], []>} : vector<10x192xf32>, vector<192x768xf32>, vector<10x768xf32> -> vector<10x768xf32>
    %c0_120 = arith.constant 0 : index
    %c0_121 = arith.constant 0 : index
    %210 = vector.load %arg28[%c0_120, %c0_121] : memref<1x768xf32, #tpu.memory_space<vmem>>, vector<1x768xf32>
    %211 = vector.broadcast %210 : vector<1x768xf32> to vector<10x768xf32>
    %212 = arith.addf %209, %211 : vector<10x768xf32>
    %cst_122 = arith.constant 5.000000e-01 : f32
    %213 = vector.broadcast %cst_122 : f32 to vector<10x768xf32>
    %214 = arith.mulf %213, %212 : vector<10x768xf32>
    %cst_123 = arith.constant 0.707106769 : f32
    %215 = vector.broadcast %cst_123 : f32 to vector<10x768xf32>
    %216 = arith.mulf %212, %215 : vector<10x768xf32>
    %cst_124 = arith.constant 0.000000e+00 : f32
    %217 = vector.broadcast %cst_124 : f32 to vector<10x768xf32>
    %218 = arith.cmpf oge, %216, %217 : vector<10x768xf32>
    %cst_125 = arith.constant 1.000000e+00 : f32
    %cst_126 = arith.constant -1.000000e+00 : f32
    %219 = vector.broadcast %cst_125 : f32 to vector<10x768xf32>
    %220 = vector.broadcast %cst_126 : f32 to vector<10x768xf32>
    %221 = arith.select %218, %219, %220 : vector<10x768xi1>, vector<10x768xf32>
    %222 = math.absf %216 : vector<10x768xf32>
    %cst_127 = arith.constant 0.327591091 : f32
    %223 = vector.broadcast %cst_127 : f32 to vector<10x768xf32>
    %224 = arith.mulf %223, %222 : vector<10x768xf32>
    %cst_128 = arith.constant 1.000000e+00 : f32
    %225 = vector.broadcast %cst_128 : f32 to vector<10x768xf32>
    %226 = arith.addf %225, %224 : vector<10x768xf32>
    %cst_129 = arith.constant 1.000000e+00 : f32
    %227 = vector.broadcast %cst_129 : f32 to vector<10x768xf32>
    %228 = arith.divf %227, %226 : vector<10x768xf32>
    %cst_130 = arith.constant 1.06140542 : f32
    %229 = vector.broadcast %cst_130 : f32 to vector<10x768xf32>
    %230 = arith.mulf %229, %228 : vector<10x768xf32>
    %cst_131 = arith.constant -1.45315206 : f32
    %231 = vector.broadcast %cst_131 : f32 to vector<10x768xf32>
    %232 = arith.addf %230, %231 : vector<10x768xf32>
    %233 = arith.mulf %232, %228 : vector<10x768xf32>
    %cst_132 = arith.constant 1.42141378 : f32
    %234 = vector.broadcast %cst_132 : f32 to vector<10x768xf32>
    %235 = arith.addf %233, %234 : vector<10x768xf32>
    %236 = arith.mulf %235, %228 : vector<10x768xf32>
    %cst_133 = arith.constant -0.284496725 : f32
    %237 = vector.broadcast %cst_133 : f32 to vector<10x768xf32>
    %238 = arith.addf %236, %237 : vector<10x768xf32>
    %239 = arith.mulf %238, %228 : vector<10x768xf32>
    %cst_134 = arith.constant 0.254829586 : f32
    %240 = vector.broadcast %cst_134 : f32 to vector<10x768xf32>
    %241 = arith.addf %239, %240 : vector<10x768xf32>
    %242 = arith.mulf %241, %228 : vector<10x768xf32>
    %cst_135 = arith.constant 0.000000e+00 : f32
    %243 = vector.broadcast %cst_135 : f32 to vector<10x768xf32>
    %244 = arith.subf %243, %222 : vector<10x768xf32>
    %245 = arith.mulf %244, %222 : vector<10x768xf32>
    %246 = math.exp %245 : vector<10x768xf32>
    %247 = arith.mulf %242, %246 : vector<10x768xf32>
    %cst_136 = arith.constant 1.000000e+00 : f32
    %248 = vector.broadcast %cst_136 : f32 to vector<10x768xf32>
    %249 = arith.subf %248, %247 : vector<10x768xf32>
    %250 = arith.mulf %221, %249 : vector<10x768xf32>
    %cst_137 = arith.constant 1.000000e+00 : f32
    %251 = vector.broadcast %cst_137 : f32 to vector<10x768xf32>
    %252 = arith.addf %251, %250 : vector<10x768xf32>
    %253 = arith.mulf %214, %252 : vector<10x768xf32>
    %c0_138 = arith.constant 0 : index
    %c0_139 = arith.constant 0 : index
    %254 = vector.load %arg29[%c0_138, %c0_139] : memref<768x192xf32, #tpu.memory_space<vmem>>, vector<768x192xf32>
    %cst_140 = arith.constant dense<0.000000e+00> : vector<10x192xf32>
    %255 = tpu.matmul %253, %254, %cst_140 {dimension_numbers = #tpu.dot_dimension_numbers<[1], [0], [0], [1], [0, 0, 1, 1], [], []>} : vector<10x768xf32>, vector<768x192xf32>, vector<10x192xf32> -> vector<10x192xf32>
    %256 = arith.addf %183, %255 : vector<10x192xf32>
    %c0_141 = arith.constant 0 : index
    %c0_142 = arith.constant 0 : index
    %257 = vector.load %arg30[%c0_141, %c0_142] : memref<1x192xf32, #tpu.memory_space<vmem>>, vector<1x192xf32>
    %258 = vector.broadcast %257 : vector<1x192xf32> to vector<10x192xf32>
    %259 = arith.addf %256, %258 : vector<10x192xf32>
    %cst_143 = arith.constant dense<0.000000e+00> : vector<10xf32>
    %260 = vector.multi_reduction <add>, %259, %cst_143 [1] : vector<10x192xf32> to vector<10xf32>
    %261 = vector.shape_cast %260 : vector<10xf32> to vector<10x1xf32>
    %cst_144 = arith.constant 1.920000e+02 : f32
    %262 = vector.broadcast %cst_144 : f32 to vector<10x1xf32>
    %263 = arith.divf %261, %262 : vector<10x1xf32>
    %264 = vector.broadcast %263 : vector<10x1xf32> to vector<10x192xf32>
    %265 = arith.subf %259, %264 : vector<10x192xf32>
    %266 = arith.mulf %265, %265 : vector<10x192xf32>
    %cst_145 = arith.constant dense<0.000000e+00> : vector<10xf32>
    %267 = vector.multi_reduction <add>, %266, %cst_145 [1] : vector<10x192xf32> to vector<10xf32>
    %268 = vector.shape_cast %267 : vector<10xf32> to vector<10x1xf32>
    %cst_146 = arith.constant 1.920000e+02 : f32
    %269 = vector.broadcast %cst_146 : f32 to vector<10x1xf32>
    %270 = arith.divf %268, %269 : vector<10x1xf32>
    %271 = vector.broadcast %263 : vector<10x1xf32> to vector<10x192xf32>
    %272 = arith.subf %259, %271 : vector<10x192xf32>
    %cst_147 = arith.constant 9.99999974E-6 : f32
    %273 = vector.broadcast %cst_147 : f32 to vector<10x1xf32>
    %274 = arith.addf %270, %273 : vector<10x1xf32>
    %275 = math.rsqrt %274 : vector<10x1xf32>
    %276 = vector.broadcast %275 : vector<10x1xf32> to vector<10x192xf32>
    %277 = arith.mulf %272, %276 : vector<10x192xf32>
    %c0_148 = arith.constant 0 : index
    %c0_149 = arith.constant 0 : index
    %278 = vector.load %arg31[%c0_148, %c0_149] : memref<1x192xf32, #tpu.memory_space<vmem>>, vector<1x192xf32>
    %279 = vector.broadcast %278 : vector<1x192xf32> to vector<10x192xf32>
    %280 = arith.mulf %277, %279 : vector<10x192xf32>
    %c0_150 = arith.constant 0 : index
    %c0_151 = arith.constant 0 : index
    %281 = vector.load %arg32[%c0_150, %c0_151] : memref<1x192xf32, #tpu.memory_space<vmem>>, vector<1x192xf32>
    %282 = vector.broadcast %281 : vector<1x192xf32> to vector<10x192xf32>
    %283 = arith.addf %280, %282 : vector<10x192xf32>
    %c0_152 = arith.constant 0 : index
    %c0_153 = arith.constant 0 : index
    %284 = vector.load %arg33[%c0_152, %c0_153] : memref<192x576xf32, #tpu.memory_space<vmem>>, vector<192x576xf32>
    %cst_154 = arith.constant dense<0.000000e+00> : vector<10x576xf32>
    %285 = tpu.matmul %283, %284, %cst_154 {dimension_numbers = #tpu.dot_dimension_numbers<[1], [0], [0], [1], [0, 0, 1, 1], [], []>} : vector<10x192xf32>, vector<192x576xf32>, vector<10x576xf32> -> vector<10x576xf32>
    %286 = vector.extract_strided_slice %285 {offsets = [0, 0], sizes = [10, 192], strides = [1, 1]} : vector<10x576xf32> to vector<10x192xf32>
    %cst_155 = arith.constant 1.250000e-01 : f32
    %287 = vector.broadcast %cst_155 : f32 to vector<10x192xf32>
    %288 = arith.mulf %286, %287 : vector<10x192xf32>
    %289 = vector.extract_strided_slice %285 {offsets = [0, 192], sizes = [10, 192], strides = [1, 1]} : vector<10x576xf32> to vector<10x192xf32>
    %290 = vector.extract_strided_slice %285 {offsets = [0, 384], sizes = [10, 192], strides = [1, 1]} : vector<10x576xf32> to vector<10x192xf32>
    %291 = vector.extract_strided_slice %288 {offsets = [0, 0], sizes = [10, 64], strides = [1, 1]} : vector<10x192xf32> to vector<10x64xf32>
    %292 = vector.extract_strided_slice %289 {offsets = [0, 0], sizes = [10, 64], strides = [1, 1]} : vector<10x192xf32> to vector<10x64xf32>
    %cst_156 = arith.constant dense<0.000000e+00> : vector<10x10xf32>
    %293 = tpu.matmul %291, %292, %cst_156 {dimension_numbers = #tpu.dot_dimension_numbers<[1], [1], [0], [0], [0, 0, 1, 0], [], []>} : vector<10x64xf32>, vector<10x64xf32>, vector<10x10xf32> -> vector<10x10xf32>
    %294 = arith.addf %293, %97 : vector<10x10xf32>
    %cst_157 = arith.constant dense<0xFF800000> : vector<10xf32>
    %295 = vector.multi_reduction <maximumf>, %294, %cst_157 [1] : vector<10x10xf32> to vector<10xf32>
    %296 = vector.shape_cast %295 : vector<10xf32> to vector<10x1xf32>
    %297 = vector.broadcast %296 : vector<10x1xf32> to vector<10x10xf32>
    %298 = arith.subf %294, %297 : vector<10x10xf32>
    %299 = math.exp %298 : vector<10x10xf32>
    %cst_158 = arith.constant dense<0.000000e+00> : vector<10xf32>
    %300 = vector.multi_reduction <add>, %299, %cst_158 [1] : vector<10x10xf32> to vector<10xf32>
    %301 = vector.shape_cast %300 : vector<10xf32> to vector<10x1xf32>
    %302 = vector.broadcast %301 : vector<10x1xf32> to vector<10x10xf32>
    %303 = arith.divf %299, %302 : vector<10x10xf32>
    %304 = vector.extract_strided_slice %290 {offsets = [0, 0], sizes = [10, 64], strides = [1, 1]} : vector<10x192xf32> to vector<10x64xf32>
    %cst_159 = arith.constant dense<0.000000e+00> : vector<10x64xf32>
    %305 = tpu.matmul %303, %304, %cst_159 {dimension_numbers = #tpu.dot_dimension_numbers<[1], [0], [0], [1], [0, 0, 1, 1], [], []>} : vector<10x10xf32>, vector<10x64xf32>, vector<10x64xf32> -> vector<10x64xf32>
    %c0_160 = arith.constant 0 : index
    %c0_161 = arith.constant 0 : index
    %306 = vector.load %arg45[%c0_160, %c0_161] : memref<10x192xf32, #tpu.memory_space<vmem>>, vector<10x64xf32>
    tpu.vector_store %arg45[%c0_160, %c0_161], %305 {strides = array<i32>} : memref<10x192xf32, #tpu.memory_space<vmem>>, vector<10x64xf32>,
    %307 = vector.extract_strided_slice %288 {offsets = [0, 64], sizes = [10, 64], strides = [1, 1]} : vector<10x192xf32> to vector<10x64xf32>
    %308 = vector.extract_strided_slice %289 {offsets = [0, 64], sizes = [10, 64], strides = [1, 1]} : vector<10x192xf32> to vector<10x64xf32>
    %cst_162 = arith.constant dense<0.000000e+00> : vector<10x10xf32>
    %309 = tpu.matmul %307, %308, %cst_162 {dimension_numbers = #tpu.dot_dimension_numbers<[1], [1], [0], [0], [0, 0, 1, 0], [], []>} : vector<10x64xf32>, vector<10x64xf32>, vector<10x10xf32> -> vector<10x10xf32>
    %310 = arith.addf %309, %97 : vector<10x10xf32>
    %cst_163 = arith.constant dense<0xFF800000> : vector<10xf32>
    %311 = vector.multi_reduction <maximumf>, %310, %cst_163 [1] : vector<10x10xf32> to vector<10xf32>
    %312 = vector.shape_cast %311 : vector<10xf32> to vector<10x1xf32>
    %313 = vector.broadcast %312 : vector<10x1xf32> to vector<10x10xf32>
    %314 = arith.subf %310, %313 : vector<10x10xf32>
    %315 = math.exp %314 : vector<10x10xf32>
    %cst_164 = arith.constant dense<0.000000e+00> : vector<10xf32>
    %316 = vector.multi_reduction <add>, %315, %cst_164 [1] : vector<10x10xf32> to vector<10xf32>
    %317 = vector.shape_cast %316 : vector<10xf32> to vector<10x1xf32>
    %318 = vector.broadcast %317 : vector<10x1xf32> to vector<10x10xf32>
    %319 = arith.divf %315, %318 : vector<10x10xf32>
    %320 = vector.extract_strided_slice %290 {offsets = [0, 64], sizes = [10, 64], strides = [1, 1]} : vector<10x192xf32> to vector<10x64xf32>
    %cst_165 = arith.constant dense<0.000000e+00> : vector<10x64xf32>
    %321 = tpu.matmul %319, %320, %cst_165 {dimension_numbers = #tpu.dot_dimension_numbers<[1], [0], [0], [1], [0, 0, 1, 1], [], []>} : vector<10x10xf32>, vector<10x64xf32>, vector<10x64xf32> -> vector<10x64xf32>
    %c0_166 = arith.constant 0 : index
    %c64_167 = arith.constant 64 : index
    %322 = vector.load %arg45[%c0_166, %c64_167] : memref<10x192xf32, #tpu.memory_space<vmem>>, vector<10x64xf32>
    tpu.vector_store %arg45[%c0_166, %c64_167], %321 {strides = array<i32>} : memref<10x192xf32, #tpu.memory_space<vmem>>, vector<10x64xf32>,
    %323 = vector.extract_strided_slice %288 {offsets = [0, 128], sizes = [10, 64], strides = [1, 1]} : vector<10x192xf32> to vector<10x64xf32>
    %324 = vector.extract_strided_slice %289 {offsets = [0, 128], sizes = [10, 64], strides = [1, 1]} : vector<10x192xf32> to vector<10x64xf32>
    %cst_168 = arith.constant dense<0.000000e+00> : vector<10x10xf32>
    %325 = tpu.matmul %323, %324, %cst_168 {dimension_numbers = #tpu.dot_dimension_numbers<[1], [1], [0], [0], [0, 0, 1, 0], [], []>} : vector<10x64xf32>, vector<10x64xf32>, vector<10x10xf32> -> vector<10x10xf32>
    %326 = arith.addf %325, %97 : vector<10x10xf32>
    %cst_169 = arith.constant dense<0xFF800000> : vector<10xf32>
    %327 = vector.multi_reduction <maximumf>, %326, %cst_169 [1] : vector<10x10xf32> to vector<10xf32>
    %328 = vector.shape_cast %327 : vector<10xf32> to vector<10x1xf32>
    %329 = vector.broadcast %328 : vector<10x1xf32> to vector<10x10xf32>
    %330 = arith.subf %326, %329 : vector<10x10xf32>
    %331 = math.exp %330 : vector<10x10xf32>
    %cst_170 = arith.constant dense<0.000000e+00> : vector<10xf32>
    %332 = vector.multi_reduction <add>, %331, %cst_170 [1] : vector<10x10xf32> to vector<10xf32>
    %333 = vector.shape_cast %332 : vector<10xf32> to vector<10x1xf32>
    %334 = vector.broadcast %333 : vector<10x1xf32> to vector<10x10xf32>
    %335 = arith.divf %331, %334 : vector<10x10xf32>
    %336 = vector.extract_strided_slice %290 {offsets = [0, 128], sizes = [10, 64], strides = [1, 1]} : vector<10x192xf32> to vector<10x64xf32>
    %cst_171 = arith.constant dense<0.000000e+00> : vector<10x64xf32>
    %337 = tpu.matmul %335, %336, %cst_171 {dimension_numbers = #tpu.dot_dimension_numbers<[1], [0], [0], [1], [0, 0, 1, 1], [], []>} : vector<10x10xf32>, vector<10x64xf32>, vector<10x64xf32> -> vector<10x64xf32>
    %c0_172 = arith.constant 0 : index
    %c128_173 = arith.constant 128 : index
    %338 = vector.load %arg45[%c0_172, %c128_173] : memref<10x192xf32, #tpu.memory_space<vmem>>, vector<10x64xf32>
    tpu.vector_store %arg45[%c0_172, %c128_173], %337 {strides = array<i32>} : memref<10x192xf32, #tpu.memory_space<vmem>>, vector<10x64xf32>,
    %c0_174 = arith.constant 0 : index
    %c0_175 = arith.constant 0 : index
    %339 = vector.load %arg45[%c0_174, %c0_175] : memref<10x192xf32, #tpu.memory_space<vmem>>, vector<10x192xf32>
    %c0_176 = arith.constant 0 : index
    %c0_177 = arith.constant 0 : index
    %340 = vector.load %arg34[%c0_176, %c0_177] : memref<192x192xf32, #tpu.memory_space<vmem>>, vector<192x192xf32>
    %cst_178 = arith.constant dense<0.000000e+00> : vector<10x192xf32>
    %341 = tpu.matmul %339, %340, %cst_178 {dimension_numbers = #tpu.dot_dimension_numbers<[1], [0], [0], [1], [0, 0, 1, 1], [], []>} : vector<10x192xf32>, vector<192x192xf32>, vector<10x192xf32> -> vector<10x192xf32>
    %342 = arith.addf %259, %341 : vector<10x192xf32>
    %c0_179 = arith.constant 0 : index
    %c0_180 = arith.constant 0 : index
    %343 = vector.load %arg35[%c0_179, %c0_180] : memref<1x192xf32, #tpu.memory_space<vmem>>, vector<1x192xf32>
    %344 = vector.broadcast %343 : vector<1x192xf32> to vector<10x192xf32>
    %345 = arith.addf %342, %344 : vector<10x192xf32>
    %cst_181 = arith.constant dense<0.000000e+00> : vector<10xf32>
    %346 = vector.multi_reduction <add>, %345, %cst_181 [1] : vector<10x192xf32> to vector<10xf32>
    %347 = vector.shape_cast %346 : vector<10xf32> to vector<10x1xf32>
    %cst_182 = arith.constant 1.920000e+02 : f32
    %348 = vector.broadcast %cst_182 : f32 to vector<10x1xf32>
    %349 = arith.divf %347, %348 : vector<10x1xf32>
    %350 = vector.broadcast %349 : vector<10x1xf32> to vector<10x192xf32>
    %351 = arith.subf %345, %350 : vector<10x192xf32>
    %352 = arith.mulf %351, %351 : vector<10x192xf32>
    %cst_183 = arith.constant dense<0.000000e+00> : vector<10xf32>
    %353 = vector.multi_reduction <add>, %352, %cst_183 [1] : vector<10x192xf32> to vector<10xf32>
    %354 = vector.shape_cast %353 : vector<10xf32> to vector<10x1xf32>
    %cst_184 = arith.constant 1.920000e+02 : f32
    %355 = vector.broadcast %cst_184 : f32 to vector<10x1xf32>
    %356 = arith.divf %354, %355 : vector<10x1xf32>
    %357 = vector.broadcast %349 : vector<10x1xf32> to vector<10x192xf32>
    %358 = arith.subf %345, %357 : vector<10x192xf32>
    %cst_185 = arith.constant 9.99999974E-6 : f32
    %359 = vector.broadcast %cst_185 : f32 to vector<10x1xf32>
    %360 = arith.addf %356, %359 : vector<10x1xf32>
    %361 = math.rsqrt %360 : vector<10x1xf32>
    %362 = vector.broadcast %361 : vector<10x1xf32> to vector<10x192xf32>
    %363 = arith.mulf %358, %362 : vector<10x192xf32>
    %c0_186 = arith.constant 0 : index
    %c0_187 = arith.constant 0 : index
    %364 = vector.load %arg36[%c0_186, %c0_187] : memref<1x192xf32, #tpu.memory_space<vmem>>, vector<1x192xf32>
    %365 = vector.broadcast %364 : vector<1x192xf32> to vector<10x192xf32>
    %366 = arith.mulf %363, %365 : vector<10x192xf32>
    %c0_188 = arith.constant 0 : index
    %c0_189 = arith.constant 0 : index
    %367 = vector.load %arg37[%c0_188, %c0_189] : memref<1x192xf32, #tpu.memory_space<vmem>>, vector<1x192xf32>
    %368 = vector.broadcast %367 : vector<1x192xf32> to vector<10x192xf32>
    %369 = arith.addf %366, %368 : vector<10x192xf32>
    %c0_190 = arith.constant 0 : index
    %c0_191 = arith.constant 0 : index
    %370 = vector.load %arg38[%c0_190, %c0_191] : memref<192x768xf32, #tpu.memory_space<vmem>>, vector<192x768xf32>
    %cst_192 = arith.constant dense<0.000000e+00> : vector<10x768xf32>
    %371 = tpu.matmul %369, %370, %cst_192 {dimension_numbers = #tpu.dot_dimension_numbers<[1], [0], [0], [1], [0, 0, 1, 1], [], []>} : vector<10x192xf32>, vector<192x768xf32>, vector<10x768xf32> -> vector<10x768xf32>
    %c0_193 = arith.constant 0 : index
    %c0_194 = arith.constant 0 : index
    %372 = vector.load %arg39[%c0_193, %c0_194] : memref<1x768xf32, #tpu.memory_space<vmem>>, vector<1x768xf32>
    %373 = vector.broadcast %372 : vector<1x768xf32> to vector<10x768xf32>
    %374 = arith.addf %371, %373 : vector<10x768xf32>
    %cst_195 = arith.constant 5.000000e-01 : f32
    %375 = vector.broadcast %cst_195 : f32 to vector<10x768xf32>
    %376 = arith.mulf %375, %374 : vector<10x768xf32>
    %cst_196 = arith.constant 0.707106769 : f32
    %377 = vector.broadcast %cst_196 : f32 to vector<10x768xf32>
    %378 = arith.mulf %374, %377 : vector<10x768xf32>
    %cst_197 = arith.constant 0.000000e+00 : f32
    %379 = vector.broadcast %cst_197 : f32 to vector<10x768xf32>
    %380 = arith.cmpf oge, %378, %379 : vector<10x768xf32>
    %cst_198 = arith.constant 1.000000e+00 : f32
    %cst_199 = arith.constant -1.000000e+00 : f32
    %381 = vector.broadcast %cst_198 : f32 to vector<10x768xf32>
    %382 = vector.broadcast %cst_199 : f32 to vector<10x768xf32>
    %383 = arith.select %380, %381, %382 : vector<10x768xi1>, vector<10x768xf32>
    %384 = math.absf %378 : vector<10x768xf32>
    %cst_200 = arith.constant 0.327591091 : f32
    %385 = vector.broadcast %cst_200 : f32 to vector<10x768xf32>
    %386 = arith.mulf %385, %384 : vector<10x768xf32>
    %cst_201 = arith.constant 1.000000e+00 : f32
    %387 = vector.broadcast %cst_201 : f32 to vector<10x768xf32>
    %388 = arith.addf %387, %386 : vector<10x768xf32>
    %cst_202 = arith.constant 1.000000e+00 : f32
    %389 = vector.broadcast %cst_202 : f32 to vector<10x768xf32>
    %390 = arith.divf %389, %388 : vector<10x768xf32>
    %cst_203 = arith.constant 1.06140542 : f32
    %391 = vector.broadcast %cst_203 : f32 to vector<10x768xf32>
    %392 = arith.mulf %391, %390 : vector<10x768xf32>
    %cst_204 = arith.constant -1.45315206 : f32
    %393 = vector.broadcast %cst_204 : f32 to vector<10x768xf32>
    %394 = arith.addf %392, %393 : vector<10x768xf32>
    %395 = arith.mulf %394, %390 : vector<10x768xf32>
    %cst_205 = arith.constant 1.42141378 : f32
    %396 = vector.broadcast %cst_205 : f32 to vector<10x768xf32>
    %397 = arith.addf %395, %396 : vector<10x768xf32>
    %398 = arith.mulf %397, %390 : vector<10x768xf32>
    %cst_206 = arith.constant -0.284496725 : f32
    %399 = vector.broadcast %cst_206 : f32 to vector<10x768xf32>
    %400 = arith.addf %398, %399 : vector<10x768xf32>
    %401 = arith.mulf %400, %390 : vector<10x768xf32>
    %cst_207 = arith.constant 0.254829586 : f32
    %402 = vector.broadcast %cst_207 : f32 to vector<10x768xf32>
    %403 = arith.addf %401, %402 : vector<10x768xf32>
    %404 = arith.mulf %403, %390 : vector<10x768xf32>
    %cst_208 = arith.constant 0.000000e+00 : f32
    %405 = vector.broadcast %cst_208 : f32 to vector<10x768xf32>
    %406 = arith.subf %405, %384 : vector<10x768xf32>
    %407 = arith.mulf %406, %384 : vector<10x768xf32>
    %408 = math.exp %407 : vector<10x768xf32>
    %409 = arith.mulf %404, %408 : vector<10x768xf32>
    %cst_209 = arith.constant 1.000000e+00 : f32
    %410 = vector.broadcast %cst_209 : f32 to vector<10x768xf32>
    %411 = arith.subf %410, %409 : vector<10x768xf32>
    %412 = arith.mulf %383, %411 : vector<10x768xf32>
    %cst_210 = arith.constant 1.000000e+00 : f32
    %413 = vector.broadcast %cst_210 : f32 to vector<10x768xf32>
    %414 = arith.addf %413, %412 : vector<10x768xf32>
    %415 = arith.mulf %376, %414 : vector<10x768xf32>
    %c0_211 = arith.constant 0 : index
    %c0_212 = arith.constant 0 : index
    %416 = vector.load %arg40[%c0_211, %c0_212] : memref<768x192xf32, #tpu.memory_space<vmem>>, vector<768x192xf32>
    %cst_213 = arith.constant dense<0.000000e+00> : vector<10x192xf32>
    %417 = tpu.matmul %415, %416, %cst_213 {dimension_numbers = #tpu.dot_dimension_numbers<[1], [0], [0], [1], [0, 0, 1, 1], [], []>} : vector<10x768xf32>, vector<768x192xf32>, vector<10x192xf32> -> vector<10x192xf32>
    %418 = arith.addf %345, %417 : vector<10x192xf32>
    %c0_214 = arith.constant 0 : index
    %c0_215 = arith.constant 0 : index
    %419 = vector.load %arg41[%c0_214, %c0_215] : memref<1x192xf32, #tpu.memory_space<vmem>>, vector<1x192xf32>
    %420 = vector.broadcast %419 : vector<1x192xf32> to vector<10x192xf32>
    %421 = arith.addf %418, %420 : vector<10x192xf32>
    %c0_216 = arith.constant 0 : index
    %c0_217 = arith.constant 0 : index
    %422 = vector.load %arg19[%c0_216, %c0_217] : memref<2x10xf32, #tpu.memory_space<vmem>>, vector<2x10xf32>
    %cst_218 = arith.constant dense<0.000000e+00> : vector<2x192xf32>
    %423 = tpu.matmul %422, %421, %cst_218 {dimension_numbers = #tpu.dot_dimension_numbers<[1], [0], [0], [1], [0, 0, 1, 1], [], []>} : vector<2x10xf32>, vector<10x192xf32>, vector<2x192xf32> -> vector<2x192xf32>
    %cst_219 = arith.constant dense<0.000000e+00> : vector<2xf32>
    %424 = vector.multi_reduction <add>, %423, %cst_219 [1] : vector<2x192xf32> to vector<2xf32>
    %425 = vector.shape_cast %424 : vector<2xf32> to vector<2x1xf32>
    %cst_220 = arith.constant 1.920000e+02 : f32
    %426 = vector.broadcast %cst_220 : f32 to vector<2x1xf32>
    %427 = arith.divf %425, %426 : vector<2x1xf32>
    %428 = vector.broadcast %427 : vector<2x1xf32> to vector<2x192xf32>
    %429 = arith.subf %423, %428 : vector<2x192xf32>
    %430 = arith.mulf %429, %429 : vector<2x192xf32>
    %cst_221 = arith.constant dense<0.000000e+00> : vector<2xf32>
    %431 = vector.multi_reduction <add>, %430, %cst_221 [1] : vector<2x192xf32> to vector<2xf32>
    %432 = vector.shape_cast %431 : vector<2xf32> to vector<2x1xf32>
    %cst_222 = arith.constant 1.920000e+02 : f32
    %433 = vector.broadcast %cst_222 : f32 to vector<2x1xf32>
    %434 = arith.divf %432, %433 : vector<2x1xf32>
    %435 = vector.broadcast %427 : vector<2x1xf32> to vector<2x192xf32>
    %436 = arith.subf %423, %435 : vector<2x192xf32>
    %cst_223 = arith.constant 9.99999974E-6 : f32
    %437 = vector.broadcast %cst_223 : f32 to vector<2x1xf32>
    %438 = arith.addf %434, %437 : vector<2x1xf32>
    %439 = math.rsqrt %438 : vector<2x1xf32>
    %440 = vector.broadcast %439 : vector<2x1xf32> to vector<2x192xf32>
    %441 = arith.mulf %436, %440 : vector<2x192xf32>
    %c0_224 = arith.constant 0 : index
    %c0_225 = arith.constant 0 : index
    %442 = vector.load %arg42[%c0_224, %c0_225] : memref<1x192xf32, #tpu.memory_space<vmem>>, vector<1x192xf32>
    %443 = vector.broadcast %442 : vector<1x192xf32> to vector<2x192xf32>
    %444 = arith.mulf %441, %443 : vector<2x192xf32>
    %c0_226 = arith.constant 0 : index
    %c0_227 = arith.constant 0 : index
    %445 = vector.load %arg43[%c0_226, %c0_227] : memref<1x192xf32, #tpu.memory_space<vmem>>, vector<1x192xf32>
    %446 = vector.broadcast %445 : vector<1x192xf32> to vector<2x192xf32>
    %447 = arith.addf %444, %446 : vector<2x192xf32>
    %c0_228 = arith.constant 0 : index
    %c0_229 = arith.constant 0 : index
    %448 = vector.load %arg44[%c0_228, %c0_229] : memref<2x192xf32, #tpu.memory_space<vmem>>, vector<2x192xf32>
    tpu.vector_store %arg44[%c0_228, %c0_229], %447 {strides = array<i32>} : memref<2x192xf32, #tpu.memory_space<vmem>>, vector<2x192xf32>,
    return
  }
}

</mosaic_0001>

<bundles_post_ra>
// kernel: tile.9
= control target key start
LH: loop header
LB: loop body
LE: loop exit
PB: predicated region body
PF: predicated region fallthrough
CT: control target
= control target key end

     0   :  { %vm4_vm0 = vcmask 523264   ;;  %s70_s0 = inlined_call_operand.vmem [shape: f32[2,5,192], index: 0, kind: input, shape index: {}]   ;;  %s71_s1 = inlined_call_operand.vmem [shape: f32[10,192], index: 1, kind: output, shape index: {}]  }
   0x1   :  { %v22_v0 = vld [vmem:[%s70_s0 + $0x8] sm:$0x1f]   ;;  %v24_v1 = vld [vmem:[%s70_s0 + $0x18] sm:$0x1f]   ;;  %v14_v2 = vld [vmem:[%s70_s0] sm:$0x1f]  }
   0x2   :  { %23 = vst.msk [vmem:[%s71_s1 + $0x8] sm:$0x1f] %vm4_vm0, %v22_v0   ;;  %25 = vst.msk [vmem:[%s71_s1 + $0xd] sm:$0x7] %vm4_vm0, %v24_v1   ;;  %v27_v3 = vld [vmem:[%s70_s0 + $0x10] sm:$0x1f]  }
   0x3   :  { %26 = vst.msk [vmem:[%s71_s1 + $0x15] sm:$0x18] %vm4_vm0, %v24_v1   ;;  %15 = vst [vmem:[%s71_s1] sm:$0x1f] %v14_v2  }
   0x4   :  { %28 = vst [vmem:[%s71_s1 + $0x5] sm:$0x7] %v27_v3   ;;  %29 = vst [vmem:[%s71_s1 + $0xd] sm:$0x18] %v27_v3  }

// kernel: forward.1
= control target key start
LH: loop header
LB: loop body
LE: loop exit
PB: predicated region body
PF: predicated region fallthrough
CT: control target
= control target key end

     0   :  { %s9663_s6 = smov 1   ;;  %s9664_s10 = smov 2   ;;  %s12964_s0 = inlined_call_operand.smem [shape: u32[45], index: -1, kind: input, shape index: {}] }
   0x1   :  { %s9722_s5 = sld [smem:[%s12964_s0]]   ;;  %s9665_s14 = smov 3  }
   0x2   :  { %s9727_s9 = sld [smem:[%s12964_s0 + %s9663_s6]]   ;;  %s9666_s18 = smov 4  }
   0x3   :  { %s9732_s13 = sld [smem:[%s12964_s0 + %s9664_s10]]   ;;  %s9667_s22 = smov 5  }
   0x4   :  { %s9737_s17 = sld [smem:[%s12964_s0 + %s9665_s14]]   ;;  %s9668_s26 = smov 6  }
   0x5   :  { %s9742_s21 = sld [smem:[%s12964_s0 + %s9666_s18]]   ;;  %s9669_s30 = smov 7  }
   0x6   :  { %s9747_s25 = sld [smem:[%s12964_s0 + %s9667_s22]]   ;;  %s9670_s4 = smov 8  }
   0x7   :  { %s9752_s29 = sld [smem:[%s12964_s0 + %s9668_s26]]   ;;  %s9671_s10 = smov 9  }
   0x8   :  { %s9757_s3 = sld [smem:[%s12964_s0 + %s9669_s30]]   ;;  %s9672_s15 = smov 10  }
   0x9   :  { %s9762_s8 = sld [smem:[%s12964_s0 + %s9670_s4]]   ;;  %s9673_s20 = smov 11  }
   0xa   :  { %s9767_s14 = sld [smem:[%s12964_s0 + %s9671_s10]]   ;;  %s9674_s26 = smov 12  }
   0xb   :  { %s9772_s19 = sld [smem:[%s12964_s0 + %s9672_s15]]   ;;  %s9675_s1 = smov 13  }
   0xc   :  { %s9777_s24 = sld [smem:[%s12964_s0 + %s9673_s20]]   ;;  %s9676_s7 = smov 14  }
   0xd   :  { %s9782_s30 = sld [smem:[%s12964_s0 + %s9674_s26]]   ;;  %s9677_s15 = smov 15  }
   0xe   :  { %s9787_s6 = sld [smem:[%s12964_s0 + %s9675_s1]]   ;;  %s9678_s22 = smov 16  }
   0xf   :  { %s9792_s12 = sld [smem:[%s12964_s0 + %s9676_s7]]   ;;  %s9679_s28 = smov 17  }
  0x10   :  { %s9797_s20 = sld [smem:[%s12964_s0 + %s9677_s15]]   ;;  %s9680_s7 = smov 18  }
  0x11   :  { %s9802_s27 = sld [smem:[%s12964_s0 + %s9678_s22]]   ;;  %s9681_s15 = smov 19  }
  0x12   :  { %12985 = sst [smem:[#allocation6_spill]] %s9777_s24  ;;  %s9682_s22 = smov 20  }
  0x13   :  { %s9807_s4 = sld [smem:[%s12964_s0 + %s9679_s28]]   ;;  %s9683_s28 = smov 21  }
  0x14   :  { %12986 = sst [smem:[#allocation7_spill]] %s9787_s6 }
  0x15   :  { %s9812_s6 = sld [smem:[%s12964_s0 + %s9680_s7]]   ;;  %s9684_s7 = smov 22  }
  0x16   :  { %s9817_s24 = sld [smem:[%s12964_s0 + %s9681_s15]]   ;;  %s9685_s15 = smov 23  }
  0x17   :  { %12987 = sst [smem:[#allocation8_spill]] %s9802_s27 }
  0x18   :  { %s9822_s27 = sld [smem:[%s12964_s0 + %s9682_s22]]   ;;  %s9686_s22 = smov 24  }
  0x19   :  { %12988 = sst [smem:[#allocation9_spill]] %s9807_s4 }
  0x1a   :  { %s9827_s4 = sld [smem:[%s12964_s0 + %s9683_s28]]   ;;  %s9687_s28 = smov 25  }
  0x1b   :  { %12989 = sst [smem:[#allocation10_spill]] %s9812_s6 }
  0x1c   :  { %12990 = sst [smem:[#allocation11_spill]] %s9817_s24 }
  0x1d   :  { %s9832_s6 = sld [smem:[%s12964_s0 + %s9684_s7]]   ;;  %s9688_s7 = smov 26  }
  0x1e   :  { %12991 = sst [smem:[#allocation12_spill]] %s9822_s27 }
  0x1f   :  { %s9837_s24 = sld [smem:[%s12964_s0 + %s9685_s15]]   ;;  %s9689_s15 = smov 27  }
  0x20   :  { %12992 = sst [smem:[#allocation13_spill]] %s9827_s4 }
  0x21   :  { %s9842_s27 = sld [smem:[%s12964_s0 + %s9686_s22]]   ;;  %s9690_s22 = smov 28  }
  0x22   :  { %s9847_s4 = sld [smem:[%s12964_s0 + %s9687_s28]]   ;;  %s9691_s28 = smov 29  }
  0x23   :  { %12993 = sst [smem:[#allocation14_spill]] %s9832_s6 }
  0x24   :  { %s9852_s6 = sld [smem:[%s12964_s0 + %s9688_s7]]   ;;  %s9692_s7 = smov 30  }
  0x25   :  { %12994 = sst [smem:[#allocation15_spill]] %s9837_s24 }
  0x26   :  { %s9857_s24 = sld [smem:[%s12964_s0 + %s9689_s15]]   ;;  %s9693_s15 = smov 31  }
  0x27   :  { %12995 = sst [smem:[#allocation16_spill]] %s9842_s27 }
  0x28   :  { %12996 = sst [smem:[#allocation17_spill]] %s9847_s4 }
  0x29   :  { %s9862_s27 = sld [smem:[%s12964_s0 + %s9690_s22]]   ;;  %s9694_s22 = smov 32  }
  0x2a   :  { %12997 = sst [smem:[#allocation18_spill]] %s9852_s6 }
  0x2b   :  { %s9867_s4 = sld [smem:[%s12964_s0 + %s9691_s28]]   ;;  %s9695_s28 = smov 33  }
  0x2c   :  { %12998 = sst [smem:[#allocation19_spill]] %s9857_s24 }
  0x2d   :  { %s9872_s6 = sld [smem:[%s12964_s0 + %s9692_s7]]   ;;  %s9696_s7 = smov 34  }
  0x2e   :  { %s9877_s24 = sld [smem:[%s12964_s0 + %s9693_s15]]   ;;  %s9697_s15 = smov 35  }
  0x2f   :  { %12999 = sst [smem:[#allocation20_spill]] %s9862_s27 }
  0x30   :  { %s9882_s27 = sld [smem:[%s12964_s0 + %s9694_s22]]   ;;  %s9698_s22 = smov 36  }
  0x31   :  { %13000 = sst [smem:[#allocation21_spill]] %s9867_s4 }
  0x32   :  { %s9887_s4 = sld [smem:[%s12964_s0 + %s9695_s28]]   ;;  %s9699_s28 = smov 37  }
  0x33   :  { %13001 = sst [smem:[#allocation22_spill]] %s9872_s6 }
  0x34   :  { %13002 = sst [smem:[#allocation23_spill]] %s9877_s24 }
  0x35   :  { %s9892_s6 = sld [smem:[%s12964_s0 + %s9696_s7]]   ;;  %s9700_s7 = smov 38  }
  0x36   :  { %13003 = sst [smem:[#allocation24_spill]] %s9882_s27 }
  0x37   :  { %s9897_s24 = sld [smem:[%s12964_s0 + %s9697_s15]]   ;;  %s9701_s15 = smov 39  }
  0x38   :  { %13004 = sst [smem:[#allocation25_spill]] %s9887_s4 }
  0x39   :  { %s9902_s27 = sld [smem:[%s12964_s0 + %s9698_s22]]   ;;  %s9702_s22 = smov 40  }
  0x3a   :  { %s9907_s4 = sld [smem:[%s12964_s0 + %s9699_s28]]   ;;  %s9703_s28 = smov 41  }
  0x3b   :  { %13005 = sst [smem:[#allocation26_spill]] %s9892_s6 }
  0x3c   :  { %s9912_s6 = sld [smem:[%s12964_s0 + %s9700_s7]]   ;;  %s9704_s7 = smov 42  }
  0x3d   :  { %13006 = sst [smem:[#allocation27_spill]] %s9897_s24 }
  0x3e   :  { %s9917_s24 = sld [smem:[%s12964_s0 + %s9701_s15]]   ;;  %s9705_s15 = smov 43  }
  0x3f   :  { %13007 = sst [smem:[#allocation28_spill]] %s9902_s27 }
  0x40   :  { %13008 = sst [smem:[#allocation29_spill]] %s9907_s4 }
  0x41   :  { %s9922_s27 = sld [smem:[%s12964_s0 + %s9702_s22]]   ;;  %s9706_s22 = smov 44  }
  0x42   :  { %13009 = sst [smem:[#allocation30_spill]] %s9912_s6 }
  0x43   :  { %s9927_s4 = sld [smem:[%s12964_s0 + %s9703_s28]]  }
  0x44   :  { %13010 = sst [smem:[#allocation31_spill]] %s9917_s24 }
  0x45   :  { %s9932_s6 = sld [smem:[%s12964_s0 + %s9704_s7]]  }
  0x46   :  { %s9937_s24 = sld [smem:[%s12964_s0 + %s9705_s15]]  }
  0x47   :  { %13011 = sst [smem:[#allocation32_spill]] %s9922_s27 }
  0x48   :  { %s9942_s27 = sld [smem:[%s12964_s0 + %s9706_s22]]  }
  0x49   :  { %v190_v0 = vld [vmem:[%s9727_s9 + $0x8] sm:$0xff]  ;;  %v192_v1 = vld [vmem:[%s9727_s9 + $0x18] sm:$0xff]  ;;  %v189_v5 = vld [vmem:[%s9727_s9] sm:$0xff]  ;;  %v12976_v7 = vmov 0.0   ;;  %vm611_vm0 = vcmask 130048  }
  0x4a   :  { %v608_v2 = vld [vmem:[%s9742_s21 + $0x8] sm:$0xff]  ;;  %v7574_v3 = vpack.c.bf16 %v192_v1, %v190_v0  ;;  %v610_v4 = vld [vmem:[%s9742_s21 + $0x18] sm:$0xff]  ;;  %v191_v6 = vld [vmem:[%s9727_s9 + $0x10] sm:$0xff]  ;;  %679 = vmatprep.mubr.f32.mxu1 %v12976_v7 }
  0x4b   :  { %v7766_v8 = vpack.c.bf16 %v610_v4, %v608_v2  ;;  %v7576_v9 = vpack.c.bf16 %v191_v6, %v189_v5  ;;  %v607_v10 = vld [vmem:[%s9742_s21] sm:$0xff]  ;;  %v609_v11 = vld [vmem:[%s9742_s21 + $0x10] sm:$0xff]  ;;  %v194_v12 = vld [vmem:[%s9727_s9 + $0x28] sm:$0xff] }
  0x4c   :  { %7575 = vmatprep.subr.bf16.mxu0 %v7574_v3  ;;  %v7768_v13 = vpack.c.bf16 %v609_v11, %v607_v10  ;;  %v196_v14 = vld [vmem:[%s9727_s9 + $0x38] sm:$0xff]  ;;  %v193_v15 = vld [vmem:[%s9727_s9 + $0x20] sm:$0xff]  ;;  %v195_v17 = vld [vmem:[%s9727_s9 + $0x30] sm:$0xff] }
  0x4d   :  { %7767 = vmatprep.subr.bf16.mxu1 %v7766_v8  ;;  %7577 = vmatpush1.bf16.msra.mxu0 %v7576_v9  ;;  %v7578_v16 = vpack.c.bf16 %v196_v14, %v194_v12  ;;  %v198_v18 = vld [vmem:[%s9727_s9 + $0x48] sm:$0xff]  ;;  %v200_v19 = vld [vmem:[%s9727_s9 + $0x58] sm:$0xff]  ;;  %v606_v20 = vld [vmem:[%s9737_s17] sm:$0x3]  ;;  %v7580_v21 = vpack.c.bf16 %v195_v17, %v193_v15 }
  0x4e   :  { %7769 = vmatpush1.bf16.msra.mxu1 %v7768_v13  ;;  %v7582_v22 = vpack.c.bf16 %v200_v19, %v198_v18  ;;  %v197_v23 = vld [vmem:[%s9727_s9 + $0x40] sm:$0xff]  ;;  %v199_v24 = vld [vmem:[%s9727_s9 + $0x50] sm:$0xff]  ;;  %v202_v25 = vld [vmem:[%s9727_s9 + $0x68] sm:$0xff] }
  0x4f   :  { %7579 = vmatprep.subr.bf16.mxu0 %v7578_v16  ;;  %v204_v26 = vld [vmem:[%s9727_s9 + $0x78] sm:$0xff]  ;;  %v7584_v27 = vpack.c.bf16 %v199_v24, %v197_v23  ;;  %v201_v29 = vld [vmem:[%s9727_s9 + $0x60] sm:$0xff]  ;;  %v203_v30 = vld [vmem:[%s9727_s9 + $0x70] sm:$0xff] }
  0x50   :  { %v7586_v28 = vpack.c.bf16 %v204_v26, %v202_v25  ;;  %v206_v31 = vld [vmem:[%s9727_s9 + $0x88] sm:$0xff]  ;;  %v208_v32 = vld [vmem:[%s9727_s9 + $0x98] sm:$0xff]  ;;  %v7588_v33 = vpack.c.bf16 %v203_v30, %v201_v29  ;;  %v205_v35 = vld [vmem:[%s9727_s9 + $0x80] sm:$0xff] }
  0x51   :  { %7215 = vmatmul.mubr.msk.f32.vlgmr.msra.gmra.mrb[0].mxu1 %vm611_vm0, %v606_v20  ;;  %7581 = vmatpush1.bf16.msra.mxu0 %v7580_v21  ;;  %v7590_v34 = vpack.c.bf16 %v208_v32, %v206_v31  ;;  %v207_v36 = vld [vmem:[%s9727_s9 + $0x90] sm:$0xff]  ;;  %v210_v37 = vld [vmem:[%s9727_s9 + $0xa8] sm:$0xff]  ;;  %v212_v38 = vld [vmem:[%s9727_s9 + $0xb8] sm:$0xff] }
  0x52   :  { %7583 = vmatprep.subr.bf16.mxu0 %v7582_v22  ;;  %762 = vmatprep.mubr.f32.mxu1 %v12976_v7  ;;  %v7592_v39 = vpack.c.bf16 %v207_v36, %v205_v35  ;;  %v7594_v40 = vpack.c.bf16 %v212_v38, %v210_v37  ;;  %v209_v41 = vld [vmem:[%s9727_s9 + $0xa0] sm:$0xff]  ;;  %v211_v42 = vld [vmem:[%s9727_s9 + $0xb0] sm:$0xff]  ;;  %v214_v43 = vld [vmem:[%s9727_s9 + $0xc8] sm:$0xff] }
  0x53   :  { %v216_v44 = vld [vmem:[%s9727_s9 + $0xd8] sm:$0xff]  ;;  %v7596_v45 = vpack.c.bf16 %v211_v42, %v209_v41  ;;  %v213_v47 = vld [vmem:[%s9727_s9 + $0xc0] sm:$0xff]  ;;  %v215_v48 = vld [vmem:[%s9727_s9 + $0xd0] sm:$0xff] }
  0x54   :  { %v7598_v46 = vpack.c.bf16 %v216_v44, %v214_v43  ;;  %v218_v49 = vld [vmem:[%s9727_s9 + $0xe8] sm:$0xff]  ;;  %v220_v50 = vld [vmem:[%s9727_s9 + $0xf8] sm:$0xff]  ;;  %v7600_v52 = vpack.c.bf16 %v215_v48, %v213_v47  ;;  %v217_v54 = vld [vmem:[%s9727_s9 + $0xe0] sm:$0xff] }
  0x55   :  { %7585 = vmatpush1.bf16.msra.mxu0 %v7584_v27  ;;  %v184_v51 = vld [vmem:[%s9722_s5 + $0x8] sm:$0xff]  ;;  %v7602_v53 = vpack.c.bf16 %v220_v50, %v218_v49  ;;  %v219_v55 = vld [vmem:[%s9727_s9 + $0xf0] sm:$0xff]  ;;  %v224_v57 = vld [vmem:[%s9727_s9 + $0x118] sm:$0xff] }
  0x56   :  { %7587 = vmatprep.subr.bf16.mxu0 %v7586_v28  ;;  %457 = vmatprep.mubr.f32.mxu0 %v184_v51  ;;  %v222_v56 = vld [vmem:[%s9727_s9 + $0x108] sm:$0xff]  ;;  %v7604_v58 = vpack.c.bf16 %v219_v55, %v217_v54  ;;  %v221_v60 = vld [vmem:[%s9727_s9 + $0x100] sm:$0xff]  ;;  %v223_v61 = vld [vmem:[%s9727_s9 + $0x110] sm:$0xff] }
  0x57   :  { %v7606_v59 = vpack.c.bf16 %v224_v57, %v222_v56  ;;  %v226_v62 = vld [vmem:[%s9727_s9 + $0x128] sm:$0xff]  ;;  %v228_v63 = vld [vmem:[%s9727_s9 + $0x138] sm:$0xff]  ;;  %v7608_v0 = vpack.c.bf16 %v223_v61, %v221_v60  ;;  %v225_v2 = vld [vmem:[%s9727_s9 + $0x120] sm:$0xff] }
  0x58   :  { %v7610_v1 = vpack.c.bf16 %v228_v63, %v226_v62  ;;  %v227_v3 = vld [vmem:[%s9727_s9 + $0x130] sm:$0xff]  ;;  %v230_v4 = vld [vmem:[%s9727_s9 + $0x148] sm:$0xff]  ;;  %v232_v5 = vld [vmem:[%s9727_s9 + $0x158] sm:$0xff] }
  0x59   :  { %7589 = vmatpush1.bf16.msra.mxu0 %v7588_v33  ;;  %v7612_v6 = vpack.c.bf16 %v227_v3, %v225_v2  ;;  %v7614_v8 = vpack.c.bf16 %v232_v5, %v230_v4  ;;  %v229_v9 = vld [vmem:[%s9727_s9 + $0x140] sm:$0xff]  ;;  %v231_v10 = vld [vmem:[%s9727_s9 + $0x150] sm:$0xff]  ;;  %v234_v11 = vld [vmem:[%s9727_s9 + $0x168] sm:$0xff] }
  0x5a   :  { %7591 = vmatprep.subr.bf16.mxu0 %v7590_v34  ;;  %v236_v12 = vld [vmem:[%s9727_s9 + $0x178] sm:$0xff]  ;;  %v7616_v13 = vpack.c.bf16 %v231_v10, %v229_v9  ;;  %v233_v15 = vld [vmem:[%s9727_s9 + $0x160] sm:$0xff]  ;;  %v235_v16 = vld [vmem:[%s9727_s9 + $0x170] sm:$0xff] }
  0x5b   :  { %v7618_v14 = vpack.c.bf16 %v236_v12, %v234_v11  ;;  %v238_v17 = vld [vmem:[%s9727_s9 + $0x188] sm:$0xff]  ;;  %v240_v18 = vld [vmem:[%s9727_s9 + $0x198] sm:$0xff]  ;;  %v7620_v19 = vpack.c.bf16 %v235_v16, %v233_v15  ;;  %v237_v21 = vld [vmem:[%s9727_s9 + $0x180] sm:$0xff] }
  0x5c   :  { %v7622_v20 = vpack.c.bf16 %v240_v18, %v238_v17  ;;  %v239_v22 = vld [vmem:[%s9727_s9 + $0x190] sm:$0xff]  ;;  %v242_v23 = vld [vmem:[%s9727_s9 + $0x1a8] sm:$0xff]  ;;  %v244_v24 = vld [vmem:[%s9727_s9 + $0x1b8] sm:$0xff] }
  0x5d   :  { %7593 = vmatpush1.bf16.msra.mxu0 %v7592_v39  ;;  %v7624_v25 = vpack.c.bf16 %v239_v22, %v237_v21  ;;  %v7626_v26 = vpack.c.bf16 %v244_v24, %v242_v23  ;;  %v241_v27 = vld [vmem:[%s9727_s9 + $0x1a0] sm:$0xff]  ;;  %v243_v28 = vld [vmem:[%s9727_s9 + $0x1b0] sm:$0xff]  ;;  %v246_v29 = vld [vmem:[%s9727_s9 + $0x1c8] sm:$0xff] }
  0x5e   :  { %7595 = vmatprep.subr.bf16.mxu0 %v7594_v40  ;;  %v248_v30 = vld [vmem:[%s9727_s9 + $0x1d8] sm:$0xff]  ;;  %v7628_v31 = vpack.c.bf16 %v243_v28, %v241_v27  ;;  %v245_v33 = vld [vmem:[%s9727_s9 + $0x1c0] sm:$0xff]  ;;  %v247_v34 = vld [vmem:[%s9727_s9 + $0x1d0] sm:$0xff] }
  0x5f   :  { %v7630_v32 = vpack.c.bf16 %v248_v30, %v246_v29  ;;  %v250_v35 = vld [vmem:[%s9727_s9 + $0x1e8] sm:$0xff]  ;;  %v252_v36 = vld [vmem:[%s9727_s9 + $0x1f8] sm:$0xff]  ;;  %v7632_v37 = vpack.c.bf16 %v247_v34, %v245_v33  ;;  %v249_v39 = vld [vmem:[%s9727_s9 + $0x1e0] sm:$0xff] }
  0x60   :  { %v7634_v38 = vpack.c.bf16 %v252_v36, %v250_v35  ;;  %v251_v40 = vld [vmem:[%s9727_s9 + $0x1f0] sm:$0xff]  ;;  %v254_v41 = vld [vmem:[%s9727_s9 + $0x208] sm:$0xff]  ;;  %v256_v42 = vld [vmem:[%s9727_s9 + $0x218] sm:$0xff] }
  0x61   :  { %7597 = vmatpush1.bf16.msra.mxu0 %v7596_v45  ;;  %v7636_v43 = vpack.c.bf16 %v251_v40, %v249_v39  ;;  %v7638_v44 = vpack.c.bf16 %v256_v42, %v254_v41  ;;  %v253_v45 = vld [vmem:[%s9727_s9 + $0x200] sm:$0xff]  ;;  %v258_v47 = vld [vmem:[%s9727_s9 + $0x228] sm:$0xff]  ;;  %v260_v48 = vld [vmem:[%s9727_s9 + $0x238] sm:$0xff] }
  0x62   :  { %7599 = vmatprep.subr.bf16.mxu0 %v7598_v46  ;;  %v255_v46 = vld [vmem:[%s9727_s9 + $0x210] sm:$0xff]  ;;  %v183_v49 = vld [vmem:[%s9722_s5] sm:$0xff]  ;;  %v7642_v51 = vpack.c.bf16 %v260_v48, %v258_v47  ;;  %v186_v54 = vld [vmem:[%s9722_s5 + $0x18] sm:$0xff] }
  0x63   :  { %v7640_v50 = vpack.c.bf16 %v255_v46, %v253_v45  ;;  %v262_v55 = vld [vmem:[%s9727_s9 + $0x248] sm:$0xff]  ;;  %v264_v56 = vld [vmem:[%s9727_s9 + $0x258] sm:$0xff] }
  0x65   :  { %7601 = vmatpush1.bf16.msra.mxu0 %v7600_v52  ;;  %v257_v52 = vld [vmem:[%s9727_s9 + $0x220] sm:$0xff] }
  0x66   :  { %7603 = vmatprep.subr.bf16.mxu0 %v7602_v53  ;;  %v259_v53 = vld [vmem:[%s9727_s9 + $0x230] sm:$0xff] }
  0x69   :  { %7605 = vmatpush1.bf16.msra.mxu0 %v7604_v58 }
  0x6a   :  { %7607 = vmatprep.subr.bf16.mxu0 %v7606_v59 }
  0x6d   :  { %7609 = vmatpush1.bf16.msra.mxu0 %v7608_v0 }
  0x6e   :  { %7611 = vmatprep.subr.bf16.mxu0 %v7610_v1 }
  0x71   :  { %7613 = vmatpush1.bf16.msra.mxu0 %v7612_v6 }
  0x72   :  { %7615 = vmatprep.subr.bf16.mxu0 %v7614_v8 }
  0x75   :  { %7617 = vmatpush1.bf16.msra.mxu0 %v7616_v13 }
  0x76   :  { %7619 = vmatprep.subr.bf16.mxu0 %v7618_v14 }
  0x79   :  { %7621 = vmatpush1.bf16.msra.mxu0 %v7620_v19 }
  0x7a   :  { %7623 = vmatprep.subr.bf16.mxu0 %v7622_v20 }
  0x7d   :  { %7625 = vmatpush1.bf16.msra.mxu0 %v7624_v25 }
  0x7e   :  { %7627 = vmatprep.subr.bf16.mxu0 %v7626_v26 }
  0x81   :  { %7629 = vmatpush1.bf16.msra.mxu0 %v7628_v31 }
  0x82   :  { %7631 = vmatprep.subr.bf16.mxu0 %v7630_v32 }
  0x85   :  { %7633 = vmatpush1.bf16.msra.mxu0 %v7632_v37 }
  0x86   :  { %7635 = vmatprep.subr.bf16.mxu0 %v7634_v38 }
  0x89   :  { %7637 = vmatpush1.bf16.msra.mxu0 %v7636_v43 }
  0x8a   :  { %7639 = vmatprep.subr.bf16.mxu0 %v7638_v44 }
  0x8c   :  { %458 = vmatmul.mubr.f32.vlgmr.msra.gmra.mrb[0].mxu0 %v183_v49 }
  0x8d   :  { %94 = vsyncpa [#allocation4], 0  ;;  %7641 = vmatpush1.bf16.msra.mxu0 %v7640_v50  ;;  %v7644_v57 = vpack.c.bf16 %v259_v53, %v257_v52  ;;  %528 = vmatprep.mubr.f32.mxu0 %v186_v54  ;;  %v7646_v58 = vpack.c.bf16 %v264_v56, %v262_v55  ;;  %v261_v59 = vld [vmem:[%s9727_s9 + $0x240] sm:$0xff]  ;;  %v263_v60 = vld [vmem:[%s9727_s9 + $0x250] sm:$0xff]  ;;  %vm691_vm1 = vcmask 1041408   ;;  %vm687_vm2 = vcmask 15360  }
  0x8e   :  { %7643 = vmatprep.subr.bf16.mxu0 %v7642_v51  ;;  %v266_v61 = vld [vmem:[%s9727_s9 + $0x268] sm:$0xff]  ;;  %v268_v62 = vld [vmem:[%s9727_s9 + $0x278] sm:$0xff]  ;;  %v7648_v63 = vpack.c.bf16 %v263_v60, %v261_v59  ;;  %v265_v1 = vld [vmem:[%s9727_s9 + $0x260] sm:$0xff]  ;;  %vm829_vm3 = vcmask 523264   ;;  %vm1731_vm4 = vcmask 64512   ;;  %s13014_s0 = sld [smem:[#allocation6_spill]] }
  0x8f   :  { %v7650_v0 = vpack.c.bf16 %v268_v62, %v266_v61  ;;  %v267_v2 = vld [vmem:[%s9727_s9 + $0x270] sm:$0xff]  ;;  %v270_v3 = vld [vmem:[%s9727_s9 + $0x288] sm:$0xff]  ;;  %v272_v4 = vld [vmem:[%s9727_s9 + $0x298] sm:$0xff]  ;;  %s13018_s17 = sld [smem:[#allocation14_spill]]  ;;  %vm2133_vm5 = vcmask 517120   ;;  %s13019_s21 = sld [smem:[#allocation12_spill]] }
  0x90   :  { %v7652_v5 = vpack.c.bf16 %v267_v2, %v265_v1  ;;  %v7654_v6 = vpack.c.bf16 %v272_v4, %v270_v3  ;;  %v269_v8 = vld [vmem:[%s9727_s9 + $0x280] sm:$0xff]  ;;  %v271_v9 = vld [vmem:[%s9727_s9 + $0x290] sm:$0xff]  ;;  %v274_v10 = vld [vmem:[%s9727_s9 + $0x2a8] sm:$0xff]  ;;  %vm9710_vm7 = vmmov 1   ;;  %vm2654_vm9 = vcmask 74752   ;;  %s13033_s28 = sld [smem:[#allocation20_spill]] }
  0x91   :  { %7645 = vmatpush1.bf16.msra.mxu0 %v7644_v57  ;;  %v276_v11 = vld [vmem:[%s9727_s9 + $0x2b8] sm:$0xff]  ;;  %v7656_v12 = vpack.c.bf16 %v271_v9, %v269_v8  ;;  %v273_v14 = vld [vmem:[%s9727_s9 + $0x2a0] sm:$0xff]  ;;  %v275_v15 = vld [vmem:[%s9727_s9 + $0x2b0] sm:$0xff]  ;;  %vm2650_vm10 = vcmask 80896   ;;  %vm2970_vm11 = vcmask 1041920   ;;  %vm2968_vm12 = vcmask 1048064  }
  0x92   :  { %7647 = vmatprep.subr.bf16.mxu0 %v7646_v58  ;;  %v7658_v13 = vpack.c.bf16 %v276_v11, %v274_v10  ;;  %v278_v16 = vld [vmem:[%s9727_s9 + $0x2c8] sm:$0xff]  ;;  %v280_v17 = vld [vmem:[%s9727_s9 + $0x2d8] sm:$0xff]  ;;  %v7660_v18 = vpack.c.bf16 %v275_v15, %v273_v14  ;;  %v277_v20 = vld [vmem:[%s9727_s9 + $0x2c0] sm:$0xff]  ;;  %s13035_s1 = sld [smem:[#allocation22_spill]]  ;;  %s13036_s2 = sld [smem:[#allocation25_spill]] }
  0x93   :  { %v7662_v19 = vpack.c.bf16 %v280_v17, %v278_v16  ;;  %v279_v21 = vld [vmem:[%s9727_s9 + $0x2d0] sm:$0xff]  ;;  %v282_v22 = vld [vmem:[%s9727_s9 + $0x2e8] sm:$0xff]  ;;  %v284_v23 = vld [vmem:[%s9727_s9 + $0x2f8] sm:$0xff]  ;;  %s13037_s7 = sld [smem:[#allocation23_spill]]  ;;  %s13038_s10 = sld [smem:[#allocation24_spill]] }
  0x94   :  { %v7664_v24 = vpack.c.bf16 %v279_v21, %v277_v20  ;;  %v7666_v25 = vpack.c.bf16 %v284_v23, %v282_v22  ;;  %v281_v26 = vld [vmem:[%s9727_s9 + $0x2e0] sm:$0xff]  ;;  %v283_v27 = vld [vmem:[%s9727_s9 + $0x2f0] sm:$0xff]  ;;  %v286_v28 = vld [vmem:[%s9727_s9 + $0x308] sm:$0xff]  ;;  %s13039_s11 = sld [smem:[#allocation26_spill]]  ;;  %s13040_s15 = sld [smem:[#allocation27_spill]] }
  0x95   :  { %7649 = vmatpush1.bf16.msra.mxu0 %v7648_v63  ;;  %v288_v29 = vld [vmem:[%s9727_s9 + $0x318] sm:$0xff]  ;;  %v7668_v30 = vpack.c.bf16 %v283_v27, %v281_v26  ;;  %v285_v32 = vld [vmem:[%s9727_s9 + $0x300] sm:$0xff]  ;;  %v287_v33 = vld [vmem:[%s9727_s9 + $0x310] sm:$0xff]  ;;  %s13041_s16 = sld [smem:[#allocation30_spill]]  ;;  %s13042_s18 = sld [smem:[#allocation32_spill]] }
  0x96   :  { %7651 = vmatprep.subr.bf16.mxu0 %v7650_v0  ;;  %v7670_v31 = vpack.c.bf16 %v288_v29, %v286_v28  ;;  %v290_v34 = vld [vmem:[%s9727_s9 + $0x328] sm:$0xff]  ;;  %v292_v35 = vld [vmem:[%s9727_s9 + $0x338] sm:$0xff]  ;;  %v7672_v36 = vpack.c.bf16 %v287_v33, %v285_v32  ;;  %v289_v38 = vld [vmem:[%s9727_s9 + $0x320] sm:$0xff]  ;;  %s13043_s22 = sld [smem:[#allocation28_spill]]  ;;  %s13044_s23 = sld [smem:[#allocation29_spill]] }
  0x97   :  { %v7674_v37 = vpack.c.bf16 %v292_v35, %v290_v34  ;;  %v291_v39 = vld [vmem:[%s9727_s9 + $0x330] sm:$0xff]  ;;  %v294_v40 = vld [vmem:[%s9727_s9 + $0x348] sm:$0xff]  ;;  %v296_v41 = vld [vmem:[%s9727_s9 + $0x358] sm:$0xff]  ;;  %s13045_s26 = sld [smem:[#allocation31_spill]] }
  0x98   :  { %v7676_v42 = vpack.c.bf16 %v291_v39, %v289_v38  ;;  %v7678_v43 = vpack.c.bf16 %v296_v41, %v294_v40  ;;  %v293_v44 = vld [vmem:[%s9727_s9 + $0x340] sm:$0xff]  ;;  %v295_v45 = vld [vmem:[%s9727_s9 + $0x350] sm:$0xff]  ;;  %v298_v46 = vld [vmem:[%s9727_s9 + $0x368] sm:$0xff] }
  0x99   :  { %7653 = vmatpush1.bf16.msra.mxu0 %v7652_v5  ;;  %v300_v47 = vld [vmem:[%s9727_s9 + $0x378] sm:$0xff]  ;;  %v7680_v48 = vpack.c.bf16 %v295_v45, %v293_v44  ;;  %v297_v50 = vld [vmem:[%s9727_s9 + $0x360] sm:$0xff]  ;;  %v299_v51 = vld [vmem:[%s9727_s9 + $0x370] sm:$0xff] }
  0x9a   :  { %7655 = vmatprep.subr.bf16.mxu0 %v7654_v6  ;;  %v7682_v49 = vpack.c.bf16 %v300_v47, %v298_v46  ;;  %v302_v52 = vld [vmem:[%s9727_s9 + $0x388] sm:$0xff]  ;;  %v304_v53 = vld [vmem:[%s9727_s9 + $0x398] sm:$0xff]  ;;  %v7684_v54 = vpack.c.bf16 %v299_v51, %v297_v50  ;;  %v301_v56 = vld [vmem:[%s9727_s9 + $0x380] sm:$0xff] }
  0x9b   :  { %v7686_v55 = vpack.c.bf16 %v304_v53, %v302_v52  ;;  %v303_v57 = vld [vmem:[%s9727_s9 + $0x390] sm:$0xff]  ;;  %v306_v58 = vld [vmem:[%s9727_s9 + $0x3a8] sm:$0xff]  ;;  %v308_v59 = vld [vmem:[%s9727_s9 + $0x3b8] sm:$0xff] }
  0x9c   :  { %v7688_v60 = vpack.c.bf16 %v303_v57, %v301_v56  ;;  %v7690_v61 = vpack.c.bf16 %v308_v59, %v306_v58  ;;  %v305_v62 = vld [vmem:[%s9727_s9 + $0x3a0] sm:$0xff]  ;;  %v307_v63 = vld [vmem:[%s9727_s9 + $0x3b0] sm:$0xff]  ;;  %v310_v0 = vld [vmem:[%s9727_s9 + $0x3c8] sm:$0xff] }
  0x9d   :  { %7657 = vmatpush1.bf16.msra.mxu0 %v7656_v12  ;;  %v312_v1 = vld [vmem:[%s9727_s9 + $0x3d8] sm:$0xff]  ;;  %v7692_v2 = vpack.c.bf16 %v307_v63, %v305_v62  ;;  %v309_v4 = vld [vmem:[%s9727_s9 + $0x3c0] sm:$0xff]  ;;  %v311_v5 = vld [vmem:[%s9727_s9 + $0x3d0] sm:$0xff] }
  0x9e   :  { %7659 = vmatprep.subr.bf16.mxu0 %v7658_v13  ;;  %v7694_v3 = vpack.c.bf16 %v312_v1, %v310_v0  ;;  %v314_v6 = vld [vmem:[%s9727_s9 + $0x3e8] sm:$0xff]  ;;  %v316_v8 = vld [vmem:[%s9727_s9 + $0x3f8] sm:$0xff]  ;;  %v7696_v9 = vpack.c.bf16 %v311_v5, %v309_v4  ;;  %v313_v11 = vld [vmem:[%s9727_s9 + $0x3e0] sm:$0xff] }
  0x9f   :  { %v7698_v10 = vpack.c.bf16 %v316_v8, %v314_v6  ;;  %v315_v12 = vld [vmem:[%s9727_s9 + $0x3f0] sm:$0xff]  ;;  %v318_v13 = vld [vmem:[%s9727_s9 + $0x408] sm:$0xff]  ;;  %v320_v14 = vld [vmem:[%s9727_s9 + $0x418] sm:$0xff] }
  0xa0   :  { %v7700_v15 = vpack.c.bf16 %v315_v12, %v313_v11  ;;  %v7702_v16 = vpack.c.bf16 %v320_v14, %v318_v13  ;;  %v317_v17 = vld [vmem:[%s9727_s9 + $0x400] sm:$0xff]  ;;  %v324_v20 = vld [vmem:[%s9727_s9 + $0x438] sm:$0xff]  ;;  %v185_v21 = vld [vmem:[%s9722_s5 + $0x10] sm:$0xff] }
  0xa1   :  { %7661 = vmatpush1.bf16.msra.mxu0 %v7660_v18  ;;  %v319_v18 = vld [vmem:[%s9727_s9 + $0x410] sm:$0xff]  ;;  %v188_v26 = vld [vmem:[%s9722_s5 + $0x28] sm:$0xff]  ;;  %v328_v28 = vld [vmem:[%s9727_s9 + $0x458] sm:$0xff] }
  0xa2   :  { %7663 = vmatprep.subr.bf16.mxu0 %v7662_v19  ;;  %v322_v19 = vld [vmem:[%s9727_s9 + $0x428] sm:$0xff]  ;;  %v7704_v22 = vpack.c.bf16 %v319_v18, %v317_v17  ;;  %v327_v32 = vld [vmem:[%s9727_s9 + $0x450] sm:$0xff]  ;;  %v332_v34 = vld [vmem:[%s9727_s9 + $0x478] sm:$0xff] }
  0xa3   :  { %v7706_v23 = vpack.c.bf16 %v324_v20, %v322_v19  ;;  %v326_v27 = vld [vmem:[%s9727_s9 + $0x448] sm:$0xff]  ;;  %v331_v38 = vld [vmem:[%s9727_s9 + $0x470] sm:$0xff]  ;;  %v336_v40 = vld [vmem:[%s9727_s9 + $0x498] sm:$0xff] }
  0xa4   :  { %v330_v33 = vld [vmem:[%s9727_s9 + $0x468] sm:$0xff]  ;;  %v335_v44 = vld [vmem:[%s9727_s9 + $0x490] sm:$0xff]  ;;  %v340_v46 = vld [vmem:[%s9727_s9 + $0x4b8] sm:$0xff] }
  0xa5   :  { %7665 = vmatpush1.bf16.msra.mxu0 %v7664_v24  ;;  %v321_v24 = vld [vmem:[%s9727_s9 + $0x420] sm:$0xff]  ;;  %v334_v39 = vld [vmem:[%s9727_s9 + $0x488] sm:$0xff]  ;;  %v339_v50 = vld [vmem:[%s9727_s9 + $0x4b0] sm:$0xff] }
  0xa6   :  { %7667 = vmatprep.subr.bf16.mxu0 %v7666_v25  ;;  %v323_v25 = vld [vmem:[%s9727_s9 + $0x430] sm:$0xff]  ;;  %v338_v45 = vld [vmem:[%s9727_s9 + $0x4a8] sm:$0xff]  ;;  %v344_v52 = vld [vmem:[%s9727_s9 + $0x4d8] sm:$0xff] }
  0xa7   :  { %v7708_v29 = vpack.c.bf16 %v323_v25, %v321_v24  ;;  %v342_v51 = vld [vmem:[%s9727_s9 + $0x4c8] sm:$0xff]  ;;  %v343_v56 = vld [vmem:[%s9727_s9 + $0x4d0] sm:$0xff]  ;;  %v348_v58 = vld [vmem:[%s9727_s9 + $0x4f8] sm:$0xff] }
  0xa8   :  { %v346_v57 = vld [vmem:[%s9727_s9 + $0x4e8] sm:$0xff]  ;;  %v347_v62 = vld [vmem:[%s9727_s9 + $0x4f0] sm:$0xff]  ;;  %v352_v0 = vld [vmem:[%s9727_s9 + $0x518] sm:$0xff] }
  0xa9   :  { %7669 = vmatpush1.bf16.msra.mxu0 %v7668_v30  ;;  %v7710_v30 = vpack.c.bf16 %v328_v28, %v326_v27  ;;  %v350_v63 = vld [vmem:[%s9727_s9 + $0x508] sm:$0xff]  ;;  %v351_v4 = vld [vmem:[%s9727_s9 + $0x510] sm:$0xff]  ;;  %v356_v6 = vld [vmem:[%s9727_s9 + $0x538] sm:$0xff] }
  0xaa   :  { %7671 = vmatprep.subr.bf16.mxu0 %v7670_v31  ;;  %v325_v31 = vld [vmem:[%s9727_s9 + $0x440] sm:$0xff]  ;;  %v354_v5 = vld [vmem:[%s9727_s9 + $0x528] sm:$0xff]  ;;  %v355_v11 = vld [vmem:[%s9727_s9 + $0x530] sm:$0xff] }
  0xab   :  { %v7712_v35 = vpack.c.bf16 %v327_v32, %v325_v31  ;;  %v358_v12 = vld [vmem:[%s9727_s9 + $0x548] sm:$0xff]  ;;  %v360_v13 = vld [vmem:[%s9727_s9 + $0x558] sm:$0xff]  ;;  %v359_v17 = vld [vmem:[%s9727_s9 + $0x550] sm:$0xff] }
  0xac   :  { %v362_v18 = vld [vmem:[%s9727_s9 + $0x568] sm:$0xff]  ;;  %v364_v19 = vld [vmem:[%s9727_s9 + $0x578] sm:$0xff]  ;;  %v365_v28 = vld [vmem:[%s9727_s9 + $0x580] sm:$0xff] }
  0xad   :  { %7673 = vmatpush1.bf16.msra.mxu0 %v7672_v36  ;;  %v7714_v36 = vpack.c.bf16 %v332_v34, %v330_v33  ;;  %v366_v24 = vld [vmem:[%s9727_s9 + $0x588] sm:$0xff]  ;;  %v368_v25 = vld [vmem:[%s9727_s9 + $0x598] sm:$0xff]  ;;  %v369_v34 = vld [vmem:[%s9727_s9 + $0x5a0] sm:$0xff] }
  0xae   :  { %7675 = vmatprep.subr.bf16.mxu0 %v7674_v37  ;;  %v329_v37 = vld [vmem:[%s9727_s9 + $0x460] sm:$0xff]  ;;  %v7750_v27 = vpack.c.bf16 %v368_v25, %v366_v24  ;;  %v372_v31 = vld [vmem:[%s9727_s9 + $0x5b8] sm:$0xff]  ;;  %v1081_v7 = vld [vmem:[%s9772_s19 + $0x170] sm:$0xff] }
  0xaf   :  { %v7716_v41 = vpack.c.bf16 %v331_v38, %v329_v37  ;;  %v376_v37 = vld [vmem:[%s9727_s9 + $0x5d8] sm:$0xff]  ;;  %vm11043_vm6 = vmpackc.low %vm829_vm3, %vm829_vm3 }
  0xb0   :  { %vm11058_vm8 = vmpackc.low %vm691_vm1, %vm9710_vm7 }
  0xb1   :  { %7677 = vmatpush1.bf16.msra.mxu0 %v7676_v42  ;;  %v7718_v42 = vpack.c.bf16 %v336_v40, %v334_v39  ;;  %v373_v40 = vld [vmem:[%s9727_s9 + $0x5c0] sm:$0xff] }
  0xb2   :  { %7679 = vmatprep.subr.bf16.mxu0 %v7678_v43  ;;  %v333_v43 = vld [vmem:[%s9727_s9 + $0x480] sm:$0xff] }
  0xb3   :  { %v7720_v47 = vpack.c.bf16 %v335_v44, %v333_v43  ;;  %v380_v43 = vld [vmem:[%s9727_s9 + $0x5f8] sm:$0xff] }
  0xb5   :  { %7681 = vmatpush1.bf16.msra.mxu0 %v7680_v48  ;;  %v7722_v48 = vpack.c.bf16 %v340_v46, %v338_v45  ;;  %v377_v46 = vld [vmem:[%s9727_s9 + $0x5e0] sm:$0xff] }
  0xb6   :  { %7683 = vmatprep.subr.bf16.mxu0 %v7682_v49  ;;  %v337_v49 = vld [vmem:[%s9727_s9 + $0x4a0] sm:$0xff] }
  0xb7   :  { %v7724_v53 = vpack.c.bf16 %v339_v50, %v337_v49  ;;  %v907_v49 = vld [vmem:[%s9762_s8 + $0x18] sm:$0xff] }
  0xb9   :  { %7685 = vmatpush1.bf16.msra.mxu0 %v7684_v54  ;;  %v7726_v54 = vpack.c.bf16 %v344_v52, %v342_v51  ;;  %v904_v52 = vld [vmem:[%s9762_s8] sm:$0xff] }
  0xba   :  { %7687 = vmatprep.subr.bf16.mxu0 %v7686_v55  ;;  %v341_v55 = vld [vmem:[%s9727_s9 + $0x4c0] sm:$0xff] }
  0xbb   :  { %v7728_v59 = vpack.c.bf16 %v343_v56, %v341_v55  ;;  %v911_v55 = vld [vmem:[%s9762_s8 + $0x38] sm:$0xff]  ;;  %v187_v56 = vld [vmem:[%s9722_s5 + $0x20] sm:$0xff]  ;;  %s13015_s5 = sld [smem:[#allocation7_spill]] }
  0xbd   :  { %7689 = vmatpush1.bf16.msra.mxu0 %v7688_v60  ;;  %v7730_v60 = vpack.c.bf16 %v348_v58, %v346_v57 }
  0xbe   :  { %7691 = vmatprep.subr.bf16.mxu0 %v7690_v61  ;;  %v345_v61 = vld [vmem:[%s9727_s9 + $0x4e0] sm:$0xff] }
  0xbf   :  { %v7732_v1 = vpack.c.bf16 %v347_v62, %v345_v61  ;;  %v913_v61 = vld [vmem:[%s9762_s8 + $0x48] sm:$0xff]  ;;  %v915_v62 = vld [vmem:[%s9762_s8 + $0x58] sm:$0xff] }
  0xc1   :  { %7693 = vmatpush1.bf16.msra.mxu0 %v7692_v2  ;;  %v7734_v2 = vpack.c.bf16 %v352_v0, %v350_v63  ;;  %v10170_v0 = vpack.c.bf16 %v915_v62, %v913_v61  ;;  %v793_v62 = vld [vmem:[%s9752_s29 + $0xc0] sm:$0xff] }
  0xc2   :  { %7695 = vmatprep.subr.bf16.mxu0 %v7694_v3  ;;  %v349_v3 = vld [vmem:[%s9727_s9 + $0x500] sm:$0xff] }
  0xc3   :  { %v7736_v8 = vpack.c.bf16 %v351_v4, %v349_v3  ;;  %v917_v3 = vld [vmem:[%s9762_s8 + $0x68] sm:$0xff]  ;;  %v919_v4 = vld [vmem:[%s9762_s8 + $0x78] sm:$0xff] }
  0xc5   :  { %7697 = vmatpush1.bf16.msra.mxu0 %v7696_v9  ;;  %v7738_v9 = vpack.c.bf16 %v356_v6, %v354_v5  ;;  %v10180_v6 = vpack.c.bf16 %v919_v4, %v917_v3  ;;  %v800_v3 = vld [vmem:[%s9752_s29 + $0xf8] sm:$0xff] }
  0xc6   :  { %7699 = vmatprep.subr.bf16.mxu0 %v7698_v10  ;;  %v353_v10 = vld [vmem:[%s9727_s9 + $0x520] sm:$0xff] }
  0xc7   :  { %v7740_v14 = vpack.c.bf16 %v355_v11, %v353_v10  ;;  %v921_v10 = vld [vmem:[%s9762_s8 + $0x88] sm:$0xff]  ;;  %v923_v11 = vld [vmem:[%s9762_s8 + $0x98] sm:$0xff] }
  0xc9   :  { %7701 = vmatpush1.bf16.msra.mxu0 %v7700_v15  ;;  %v7742_v15 = vpack.c.bf16 %v360_v13, %v358_v12  ;;  %v10190_v13 = vpack.c.bf16 %v923_v11, %v921_v10  ;;  %v799_v10 = vld [vmem:[%s9752_s29 + $0xf0] sm:$0xff]  ;;  %v802_v11 = vld [vmem:[%s9752_s29 + $0x108] sm:$0xff] }
  0xca   :  { %7703 = vmatprep.subr.bf16.mxu0 %v7702_v16  ;;  %v357_v16 = vld [vmem:[%s9727_s9 + $0x540] sm:$0xff] }
  0xcb   :  { %v7744_v20 = vpack.c.bf16 %v359_v17, %v357_v16  ;;  %v770_v17 = vld [vmem:[%s9752_s29 + $0x8] sm:$0xff] }
  0xcc   :  { %529 = vmatmul.mubr.f32.vlgmr.msra.gmra.mrb[0].mxu0 %v185_v21  ;;  %v7746_v21 = vpack.c.bf16 %v364_v19, %v362_v18  ;;  %v772_v18 = vld [vmem:[%s9752_s29 + $0x18] sm:$0xff]  ;;  %v769_v19 = vld [vmem:[%s9752_s29] sm:$0xff] }
  0xcd   :  { %7705 = vmatpush1.bf16.msra.mxu0 %v7704_v22  ;;  %599 = vmatprep.mubr.f32.mxu0 %v188_v26  ;;  %v361_v22 = vld [vmem:[%s9727_s9 + $0x560] sm:$0xff]  ;;  %v10205_v24 = vpack.c.bf16 %v772_v18, %v770_v17 }
  0xce   :  { %7707 = vmatprep.subr.bf16.mxu0 %v7706_v23  ;;  %v363_v23 = vld [vmem:[%s9727_s9 + $0x570] sm:$0xff]  ;;  %v801_v18 = vld [vmem:[%s9752_s29 + $0x100] sm:$0xff] }
  0xcf   :  { %v7748_v26 = vpack.c.bf16 %v363_v23, %v361_v22  ;;  %v776_v22 = vld [vmem:[%s9752_s29 + $0x38] sm:$0xff] }
  0xd1   :  { %7709 = vmatpush1.bf16.msra.mxu0 %v7708_v29  ;;  %v367_v29 = vld [vmem:[%s9727_s9 + $0x590] sm:$0xff] }
  0xd2   :  { %7711 = vmatprep.subr.bf16.mxu0 %v7710_v30  ;;  %v370_v30 = vld [vmem:[%s9727_s9 + $0x5a8] sm:$0xff]  ;;  %v7752_v32 = vpack.c.bf16 %v367_v29, %v365_v28  ;;  %v773_v29 = vld [vmem:[%s9752_s29 + $0x20] sm:$0xff] }
  0xd3   :  { %v7754_v33 = vpack.c.bf16 %v372_v31, %v370_v30  ;;  %v775_v30 = vld [vmem:[%s9752_s29 + $0x30] sm:$0xff]  ;;  %v778_v31 = vld [vmem:[%s9752_s29 + $0x48] sm:$0xff] }
  0xd5   :  { %7713 = vmatpush1.bf16.msra.mxu0 %v7712_v35  ;;  %v371_v35 = vld [vmem:[%s9727_s9 + $0x5b0] sm:$0xff] }
  0xd6   :  { %7715 = vmatprep.subr.bf16.mxu0 %v7714_v36  ;;  %v374_v36 = vld [vmem:[%s9727_s9 + $0x5c8] sm:$0xff]  ;;  %v7756_v38 = vpack.c.bf16 %v371_v35, %v369_v34  ;;  %v777_v35 = vld [vmem:[%s9752_s29 + $0x40] sm:$0xff] }
  0xd7   :  { %v7758_v39 = vpack.c.bf16 %v376_v37, %v374_v36  ;;  %v779_v36 = vld [vmem:[%s9752_s29 + $0x50] sm:$0xff]  ;;  %v782_v37 = vld [vmem:[%s9752_s29 + $0x68] sm:$0xff] }
  0xd9   :  { %7717 = vmatpush1.bf16.msra.mxu0 %v7716_v41  ;;  %v375_v41 = vld [vmem:[%s9727_s9 + $0x5d0] sm:$0xff] }
  0xda   :  { %7719 = vmatprep.subr.bf16.mxu0 %v7718_v42  ;;  %v378_v42 = vld [vmem:[%s9727_s9 + $0x5e8] sm:$0xff]  ;;  %v7760_v44 = vpack.c.bf16 %v375_v41, %v373_v40  ;;  %v781_v41 = vld [vmem:[%s9752_s29 + $0x60] sm:$0xff] }
  0xdb   :  { %v7762_v45 = vpack.c.bf16 %v380_v43, %v378_v42  ;;  %v783_v42 = vld [vmem:[%s9752_s29 + $0x70] sm:$0xff]  ;;  %v786_v43 = vld [vmem:[%s9752_s29 + $0x88] sm:$0xff] }
  0xdd   :  { %7721 = vmatpush1.bf16.msra.mxu0 %v7720_v47  ;;  %v379_v47 = vld [vmem:[%s9727_s9 + $0x5f0] sm:$0xff]  ;;  %s13016_s9 = sld [smem:[#allocation8_spill]] }
  0xde   :  { %7723 = vmatprep.subr.bf16.mxu0 %v7722_v48  ;;  %v905_v48 = vld [vmem:[%s9762_s8 + $0x8] sm:$0xff]  ;;  %v7764_v50 = vpack.c.bf16 %v379_v47, %v377_v46  ;;  %v785_v47 = vld [vmem:[%s9752_s29 + $0x80] sm:$0xff] }
  0xdf   :  { %v10150_v51 = vpack.c.bf16 %v907_v49, %v905_v48  ;;  %v787_v48 = vld [vmem:[%s9752_s29 + $0x90] sm:$0xff]  ;;  %v790_v49 = vld [vmem:[%s9752_s29 + $0xa8] sm:$0xff] }
  0xe1   :  { %7725 = vmatpush1.bf16.msra.mxu0 %v7724_v53  ;;  %v906_v53 = vld [vmem:[%s9762_s8 + $0x10] sm:$0xff] }
  0xe2   :  { %7727 = vmatprep.subr.bf16.mxu0 %v7726_v54  ;;  %v909_v54 = vld [vmem:[%s9762_s8 + $0x28] sm:$0xff]  ;;  %v10157_v57 = vpack.c.bf16 %v906_v53, %v904_v52  ;;  %v10250_v52 = vpack.c.bf16 %v787_v48, %v785_v47 }
  0xe3   :  { %v10160_v58 = vpack.c.bf16 %v911_v55, %v909_v54  ;;  %v789_v54 = vld [vmem:[%s9752_s29 + $0xa0] sm:$0xff]  ;;  %v791_v55 = vld [vmem:[%s9752_s29 + $0xb0] sm:$0xff]  ;;  %v925_v48 = vld [vmem:[%s9762_s8 + $0xa8] sm:$0xff] }
  0xe5   :  { %7729 = vmatpush1.bf16.msra.mxu0 %v7728_v59  ;;  %v908_v59 = vld [vmem:[%s9762_s8 + $0x20] sm:$0xff] }
  0xe6   :  { %7731 = vmatprep.subr.bf16.mxu0 %v7730_v60  ;;  %v910_v60 = vld [vmem:[%s9762_s8 + $0x30] sm:$0xff] }
  0xe7   :  { %v10167_v63 = vpack.c.bf16 %v910_v60, %v908_v59  ;;  %v796_v59 = vld [vmem:[%s9752_s29 + $0xd8] sm:$0xff]  ;;  %v10260_v60 = vpack.c.bf16 %v791_v55, %v789_v54  ;;  %v924_v54 = vld [vmem:[%s9762_s8 + $0xa0] sm:$0xff]  ;;  %v926_v55 = vld [vmem:[%s9762_s8 + $0xb0] sm:$0xff] }
  0xe9   :  { %7733 = vmatpush1.bf16.msra.mxu0 %v7732_v1  ;;  %v912_v1 = vld [vmem:[%s9762_s8 + $0x40] sm:$0xff] }
  0xea   :  { %7735 = vmatprep.subr.bf16.mxu0 %v7734_v2  ;;  %v914_v2 = vld [vmem:[%s9762_s8 + $0x50] sm:$0xff] }
  0xeb   :  { %v10177_v5 = vpack.c.bf16 %v914_v2, %v912_v1  ;;  %v795_v1 = vld [vmem:[%s9752_s29 + $0xd0] sm:$0xff]  ;;  %v798_v2 = vld [vmem:[%s9752_s29 + $0xe8] sm:$0xff] }
  0xec   :  { %v10270_v4 = vpack.c.bf16 %v795_v1, %v793_v62  ;;  %v931_v62 = vld [vmem:[%s9762_s8 + $0xd8] sm:$0xff] }
  0xed   :  { %7737 = vmatpush1.bf16.msra.mxu0 %v7736_v8  ;;  %v916_v8 = vld [vmem:[%s9762_s8 + $0x60] sm:$0xff] }
  0xee   :  { %7739 = vmatprep.subr.bf16.mxu0 %v7738_v9  ;;  %v918_v9 = vld [vmem:[%s9762_s8 + $0x70] sm:$0xff] }
  0xef   :  { %v10187_v12 = vpack.c.bf16 %v918_v9, %v916_v8  ;;  %v10273_v8 = vpack.c.bf16 %v800_v3, %v798_v2  ;;  %v797_v9 = vld [vmem:[%s9752_s29 + $0xe0] sm:$0xff]  ;;  %v930_v3 = vld [vmem:[%s9762_s8 + $0xd0] sm:$0xff] }
  0xf0   :  { %v928_v2 = vld [vmem:[%s9762_s8 + $0xc0] sm:$0xff] }
  0xf1   :  { %7741 = vmatpush1.bf16.msra.mxu0 %v7740_v14  ;;  %v920_v14 = vld [vmem:[%s9762_s8 + $0x80] sm:$0xff] }
  0xf2   :  { %7743 = vmatprep.subr.bf16.mxu0 %v7742_v15  ;;  %v922_v15 = vld [vmem:[%s9762_s8 + $0x90] sm:$0xff] }
  0xf3   :  { %v10195_v16 = vpack.c.bf16 %v922_v15, %v920_v14  ;;  %v804_v14 = vld [vmem:[%s9752_s29 + $0x118] sm:$0xff]  ;;  %v10280_v15 = vpack.c.bf16 %v799_v10, %v797_v9  ;;  %v10339_v9 = vpack.c.bf16 %v930_v3, %v928_v2  ;;  %v933_v10 = vld [vmem:[%s9762_s8 + $0xe8] sm:$0xff] }
  0xf4   :  { %v10283_v17 = vpack.c.bf16 %v804_v14, %v802_v11  ;;  %v932_v14 = vld [vmem:[%s9762_s8 + $0xe0] sm:$0xff]  ;;  %v949_v2 = vld [vmem:[%s9762_s8 + $0x168] sm:$0xff]  ;;  %v951_v3 = vld [vmem:[%s9762_s8 + $0x178] sm:$0xff] }
  0xf5   :  { %7745 = vmatpush1.bf16.msra.mxu0 %v7744_v20  ;;  %v771_v20 = vld [vmem:[%s9752_s29 + $0x10] sm:$0xff] }
  0xf6   :  { %7747 = vmatprep.subr.bf16.mxu0 %v7746_v21  ;;  %v774_v21 = vld [vmem:[%s9752_s29 + $0x28] sm:$0xff] }
  0xf7   :  { %v10211_v28 = vpack.c.bf16 %v776_v22, %v774_v21  ;;  %v808_v21 = vld [vmem:[%s9752_s29 + $0x138] sm:$0xff] }
  0xf9   :  { %7749 = vmatpush1.bf16.msra.mxu0 %v7748_v26  ;;  %v686_v26 = vld [vmem:[%s9747_s25] sm:$0xff]  ;;  %s13020_s25 = sld [smem:[#allocation13_spill]] }
  0xfa   :  { %7751 = vmatprep.subr.bf16.mxu0 %v7750_v27  ;;  %v10208_v27 = vpack.c.bf16 %v771_v20, %v769_v19  ;;  %v803_v19 = vld [vmem:[%s9752_s29 + $0x110] sm:$0xff]  ;;  %v806_v20 = vld [vmem:[%s9752_s29 + $0x128] sm:$0xff] }
  0xfb   :  { %v10290_v22 = vpack.c.bf16 %v803_v19, %v801_v18  ;;  %v934_v18 = vld [vmem:[%s9762_s8 + $0xf0] sm:$0xff] }
  0xfc   :  { %v10349_v19 = vpack.c.bf16 %v934_v18, %v932_v14  ;;  %v950_v14 = vld [vmem:[%s9762_s8 + $0x170] sm:$0xff] }
  0xfd   :  { %7753 = vmatpush1.bf16.msra.mxu0 %v7752_v32  ;;  %v780_v32 = vld [vmem:[%s9752_s29 + $0x58] sm:$0xff] }
  0xfe   :  { %7755 = vmatprep.subr.bf16.mxu0 %v7754_v33  ;;  %v10220_v33 = vpack.c.bf16 %v775_v30, %v773_v29  ;;  %v10223_v34 = vpack.c.bf16 %v780_v32, %v778_v31  ;;  %v810_v29 = vld [vmem:[%s9752_s29 + $0x148] sm:$0xff]  ;;  %v812_v30 = vld [vmem:[%s9752_s29 + $0x158] sm:$0xff] }
  0xff   :  { %v10303_v32 = vpack.c.bf16 %v812_v30, %v810_v29  ;;  %v938_v29 = vld [vmem:[%s9762_s8 + $0x110] sm:$0xff] }
 0x101   :  { %7757 = vmatpush1.bf16.msra.mxu0 %v7756_v38  ;;  %v784_v38 = vld [vmem:[%s9752_s29 + $0x78] sm:$0xff] }
 0x102   :  { %7759 = vmatprep.subr.bf16.mxu0 %v7758_v39  ;;  %v10230_v39 = vpack.c.bf16 %v779_v36, %v777_v35  ;;  %v10233_v40 = vpack.c.bf16 %v784_v38, %v782_v37  ;;  %v809_v35 = vld [vmem:[%s9752_s29 + $0x140] sm:$0xff]  ;;  %v811_v36 = vld [vmem:[%s9752_s29 + $0x150] sm:$0xff]  ;;  %v814_v38 = vld [vmem:[%s9752_s29 + $0x168] sm:$0xff] }
 0x103   :  { %v10308_v37 = vpack.c.bf16 %v811_v36, %v809_v35  ;;  %v941_v35 = vld [vmem:[%s9762_s8 + $0x128] sm:$0xff]  ;;  %v943_v36 = vld [vmem:[%s9762_s8 + $0x138] sm:$0xff] }
 0x105   :  { %7761 = vmatpush1.bf16.msra.mxu0 %v7760_v44  ;;  %v788_v44 = vld [vmem:[%s9752_s29 + $0x98] sm:$0xff] }
 0x106   :  { %7763 = vmatprep.subr.bf16.mxu0 %v7762_v45  ;;  %v10240_v45 = vpack.c.bf16 %v783_v42, %v781_v41  ;;  %v10243_v46 = vpack.c.bf16 %v788_v44, %v786_v43  ;;  %v816_v41 = vld [vmem:[%s9752_s29 + $0x178] sm:$0xff]  ;;  %v813_v43 = vld [vmem:[%s9752_s29 + $0x160] sm:$0xff]  ;;  %v815_v44 = vld [vmem:[%s9752_s29 + $0x170] sm:$0xff] }
 0x107   :  { %v10314_v42 = vpack.c.bf16 %v816_v41, %v814_v38  ;;  %v10318_v47 = vpack.c.bf16 %v815_v44, %v813_v43  ;;  %v7854_v38 = vpack.c.bf16 %v943_v36, %v941_v35  ;;  %v940_v41 = vld [vmem:[%s9762_s8 + $0x120] sm:$0xff]  ;;  %v942_v43 = vld [vmem:[%s9762_s8 + $0x130] sm:$0xff] }
 0x108   :  { %v7856_v44 = vpack.c.bf16 %v942_v43, %v940_v41 }
 0x109   :  { %7765 = vmatpush1.bf16.msra.mxu0 %v7764_v50  ;;  %v792_v50 = vld [vmem:[%s9752_s29 + $0xb8] sm:$0xff] }
 0x10a   :  { %7963 = vmatprep.subr.bf16.mxu0 %v10150_v51  ;;  %v10253_v53 = vpack.c.bf16 %v792_v50, %v790_v49  ;;  %v927_v49 = vld [vmem:[%s9762_s8 + $0xb8] sm:$0xff] }
 0x10b   :  { %v10323_v50 = vpack.c.bf16 %v927_v49, %v925_v48  ;;  %v945_v48 = vld [vmem:[%s9762_s8 + $0x148] sm:$0xff]  ;;  %v947_v49 = vld [vmem:[%s9762_s8 + $0x158] sm:$0xff] }
 0x10c   :  { %600 = vmatmul.mubr.f32.vlgmr.msra.gmra.mrb[0].mxu0 %v187_v56  ;;  %v794_v56 = vld [vmem:[%s9752_s29 + $0xc8] sm:$0xff] }
 0x10d   :  { %7965 = vmatpush1.bf16.msra.mxu0 %v10157_v57  ;;  %v10263_v61 = vpack.c.bf16 %v796_v59, %v794_v56  ;;  %v10328_v56 = vpack.c.bf16 %v926_v55, %v924_v54  ;;  %v929_v59 = vld [vmem:[%s9762_s8 + $0xc8] sm:$0xff]  ;;  %v7858_v54 = vpack.c.bf16 %v947_v49, %v945_v48  ;;  %v944_v55 = vld [vmem:[%s9762_s8 + $0x140] sm:$0xff] }
 0x10e   :  { %7967 = vmatprep.subr.bf16.mxu0 %v10160_v58  ;;  %v10335_v1 = vpack.c.bf16 %v931_v62, %v929_v59  ;;  %v946_v59 = vld [vmem:[%s9762_s8 + $0x150] sm:$0xff] }
 0x10f   :  { %v7860_v62 = vpack.c.bf16 %v946_v59, %v944_v55  ;;  %v1050_v59 = vld [vmem:[%s9772_s19 + $0x78] sm:$0xff] }
 0x111   :  { %7969 = vmatpush1.bf16.msra.mxu0 %v10167_v63 }
 0x112   :  { %7971 = vmatprep.subr.bf16.mxu0 %v10170_v0 }
 0x115   :  { %7973 = vmatpush1.bf16.msra.mxu0 %v10177_v5 }
 0x116   :  { %7975 = vmatprep.subr.bf16.mxu0 %v10180_v6 }
 0x119   :  { %7977 = vmatpush1.bf16.msra.mxu0 %v10187_v12 }
 0x11a   :  { %7979 = vmatprep.subr.bf16.mxu0 %v10190_v13 }
 0x11d   :  { %7981 = vmatpush1.bf16.msra.mxu0 %v10195_v16 }
 0x11e   :  { %7983 = vmatprep.subr.bf16.mxu0 %v10323_v50 }
 0x121   :  { %7985 = vmatpush1.bf16.msra.mxu0 %v10328_v56 }
 0x122   :  { %7987 = vmatprep.subr.bf16.mxu0 %v10335_v1 }
 0x124   :  { %v681_v23 = vpop.f32.mrb[0].mxu1 }
 0x125   :  { %v683_v25 = vpop.f32.mrb[1].mxu1  ;;  %7989 = vmatpush1.bf16.msra.mxu0 %v10339_v9 }
 0x126   :  { %7216 = vmatprep.subr.msk.mxu1 %vm691_vm1, %v683_v25  ;;  %v805_v25 = vld [vmem:[%s9752_s29 + $0x120] sm:$0xff] }
 0x127   :  { %7217 = vmatpush1.msk.msra.mxu1 %vm691_vm1, %v681_v23  ;;  %v10293_v23 = vpack.c.bf16 %v808_v21, %v806_v20  ;;  %v937_v20 = vld [vmem:[%s9762_s8 + $0x108] sm:$0xff]  ;;  %v939_v21 = vld [vmem:[%s9762_s8 + $0x118] sm:$0xff] }
 0x128   :  { %7218 = vmatmul.mubr.msk.f32.vlgmr.msra.gmra.mrb[2].mxu1 %vm687_vm2, %v686_v26  ;;  %7771 = vmatprep.subr.bf16.mxu1 %v10205_v24  ;;  %v807_v26 = vld [vmem:[%s9752_s29 + $0x130] sm:$0xff]  ;;  %s9709_s29 = smov 64  }
 0x129   :  { %7773 = vmatpush1.bf16.msra.mxu1 %v10208_v27  ;;  %v10300_v31 = vpack.c.bf16 %v807_v26, %v805_v25  ;;  %v10355_v25 = vpack.c.bf16 %v939_v21, %v937_v20  ;;  %v936_v26 = vld [vmem:[%s9762_s8 + $0x100] sm:$0xff]  ;;  %v383_v20 = vlaneseq }
 0x12a   :  { %7775 = vmatprep.subr.bf16.mxu1 %v10211_v28  ;;  %v7852_v30 = vpack.c.bf16 %v938_v29, %v936_v26  ;;  %v381_v29 = vld [vmem:[%s9732_s13] sm:$0x3]  ;;  %s13017_s13 = sld [smem:[#allocation9_spill]] }
 0x12b   :  { %v10372_v21 = vshrl.u32 %v383_v20, 7 }
 0x12d   :  { %7777 = vmatpush1.bf16.msra.mxu1 %v10220_v33  ;;  %13012 = vst [vmem:[#allocation33_spill] sm:$0xff] %v10372_v21  ;;  %v10375_v26 = vsub.s32 1, %v10372_v21  ;;  %v10379_v35 = vsub.s32 0, %v10372_v21 }
 0x12e   :  { %7779 = vmatprep.subr.bf16.mxu1 %v10223_v34 }
 0x12f   :  { %v390_v36 = vrot.slane %v381_v29, %v10375_v26  ;;  %v386_v41 = vrot.slane %v381_v29, %v10379_v35  ;;  %v1051_v29 = vld [vmem:[%s9772_s19 + $0x80] sm:$0xff] }
 0x131   :  { %7781 = vmatpush1.bf16.msra.mxu1 %v10230_v39 }
 0x132   :  { %7783 = vmatprep.subr.bf16.mxu1 %v10233_v40 }
 0x135   :  { %7785 = vmatpush1.bf16.msra.mxu1 %v10240_v45 }
 0x136   :  { %7787 = vmatprep.subr.bf16.mxu1 %v10243_v46 }
 0x139   :  { %7789 = vmatpush1.bf16.msra.mxu1 %v10250_v52 }
 0x13a   :  { %7791 = vmatprep.subr.bf16.mxu1 %v10253_v53 }
 0x13d   :  { %7793 = vmatpush1.bf16.msra.mxu1 %v10260_v60 }
 0x13e   :  { %7795 = vmatprep.subr.bf16.mxu1 %v10263_v61 }
 0x141   :  { %7797 = vmatpush1.bf16.msra.mxu1 %v10270_v4 }
 0x142   :  { %7799 = vmatprep.subr.bf16.mxu1 %v10273_v8 }
 0x145   :  { %7801 = vmatpush1.bf16.msra.mxu1 %v10280_v15 }
 0x146   :  { %7803 = vmatprep.subr.bf16.mxu1 %v10283_v17 }
 0x149   :  { %7805 = vmatpush1.bf16.msra.mxu1 %v10290_v22 }
 0x14a   :  { %7807 = vmatprep.subr.bf16.mxu1 %v10293_v23 }
 0x14d   :  { %7809 = vmatpush1.bf16.msra.mxu1 %v10300_v31 }
 0x14e   :  { %7811 = vmatprep.subr.bf16.mxu1 %v10303_v32 }
 0x151   :  { %7813 = vmatpush1.bf16.msra.mxu1 %v10308_v37 }
 0x152   :  { %7815 = vmatprep.subr.bf16.mxu1 %v10314_v42 }
 0x155   :  { %7817 = vmatpush1.bf16.msra.mxu1 %v10318_v47 }
 0x156   :  { %7819 = vmatprep.subr.bf16.mxu1 %v10150_v51  ;;  %v935_v51 = vld [vmem:[%s9762_s8 + $0xf8] sm:$0xff] }
 0x157   :  { %v10345_v11 = vpack.c.bf16 %v935_v51, %v933_v10  ;;  %v7862_v10 = vpack.c.bf16 %v951_v3, %v949_v2  ;;  %v948_v51 = vld [vmem:[%s9762_s8 + $0x160] sm:$0xff]  ;;  %s13027_s8 = sld [smem:[#allocation15_spill]] }
 0x158   :  { %v7864_v18 = vpack.c.bf16 %v950_v14, %v948_v51  ;;  %v1047_v3 = vld [vmem:[%s9772_s19 + $0x60] sm:$0xff]  ;;  %v1052_v51 = vld [vmem:[%s9772_s19 + $0x88] sm:$0xff]  ;;  %v1054_v14 = vld [vmem:[%s9772_s19 + $0x98] sm:$0xff] }
 0x159   :  { %7991 = vmatprep.subr.bf16.mxu0 %v10345_v11  ;;  %v10454_v20 = vpack.c.bf16 %v1054_v14, %v1052_v51 }
 0x15a   :  { %7993 = vmatpush1.bf16.msra.mxu0 %v10349_v19 }
 0x15b   :  { %7995 = vmatprep.subr.bf16.mxu0 %v10355_v25 }
 0x15e   :  { %7997 = vmatpush1.bf16.msra.mxu0 %v7852_v30 }
 0x15f   :  { %7999 = vmatprep.subr.bf16.mxu0 %v7854_v38 }
 0x162   :  { %8001 = vmatpush1.bf16.msra.mxu0 %v7856_v44 }
 0x163   :  { %8003 = vmatprep.subr.bf16.mxu0 %v7858_v54 }
 0x166   :  { %8005 = vmatpush1.bf16.msra.mxu0 %v7860_v62 }
 0x167   :  { %8007 = vmatprep.subr.bf16.mxu0 %v7862_v10 }
 0x16a   :  { %8009 = vmatpush1.bf16.msra.mxu0 %v7864_v18 }
 0x1df   :  { %v601_v43 = vpop.f32.mrb[0].mxu0 }
 0x1e0   :  { %v603_v48 = vpop.f32.mrb[1].mxu0  ;;  %v10383_v55 = vadd.f32 %v601_v43, %v386_v41  ;;  %v1056_v41 = vld [vmem:[%s9772_s19 + $0xa8] sm:$0xff]  ;;  %v1058_v43 = vld [vmem:[%s9772_s19 + $0xb8] sm:$0xff] }
 0x1e1   :  { %v9361_v49 = vadd.f32 %v603_v48, %v390_v36  ;;  %v1053_v36 = vld [vmem:[%s9772_s19 + $0x90] sm:$0xff] }
 0x1e2   :  { %v10461_v48 = vpack.c.bf16 %v1053_v36, %v1051_v29  ;;  %v1067_v29 = vld [vmem:[%s9772_s19 + $0x100] sm:$0xff]  ;;  %v1069_v36 = vld [vmem:[%s9772_s19 + $0x110] sm:$0xff] }
 0x1e3   :  { %7219 = vmatprep.mubr.msk.f32.mxu1 %vm829_vm3, %v9361_v49 }
 0x1e4   :  { %898 = vmatmul.mubr.f32.vlgmr.msra.gmra.mrb[4].mxu1 %v10383_v55 }
 0x1e5   :  { %7821 = vmatpush1.bf16.msra.mxu1 %v10157_v57  ;;  %7220 = vmatprep.mubr.msk.f32.mxu1 %vm829_vm3, %v9361_v49 }
 0x1e6   :  { %7823 = vmatprep.subr.bf16.mxu1 %v10160_v58 }
 0x1e9   :  { %7825 = vmatpush1.bf16.msra.mxu1 %v10167_v63  ;;  %v1036_v63 = vld [vmem:[%s9772_s19 + $0x8] sm:$0xff] }
 0x1ea   :  { %7827 = vmatprep.subr.bf16.mxu1 %v10170_v0  ;;  %v1038_v0 = vld [vmem:[%s9772_s19 + $0x18] sm:$0xff] }
 0x1ed   :  { %7829 = vmatpush1.bf16.msra.mxu1 %v10177_v5  ;;  %v10413_v5 = vpack.c.bf16 %v1038_v0, %v1036_v63  ;;  %v1055_v63 = vld [vmem:[%s9772_s19 + $0xa0] sm:$0xff]  ;;  %v1057_v0 = vld [vmem:[%s9772_s19 + $0xb0] sm:$0xff] }
 0x1ee   :  { %7831 = vmatprep.subr.bf16.mxu1 %v10180_v6  ;;  %v1035_v6 = vld [vmem:[%s9772_s19] sm:$0xff] }
 0x1f1   :  { %7833 = vmatpush1.bf16.msra.mxu1 %v10187_v12  ;;  %v1037_v12 = vld [vmem:[%s9772_s19 + $0x10] sm:$0xff] }
 0x1f2   :  { %7835 = vmatprep.subr.bf16.mxu1 %v10190_v13  ;;  %v1040_v13 = vld [vmem:[%s9772_s19 + $0x28] sm:$0xff] }
 0x1f5   :  { %7837 = vmatpush1.bf16.msra.mxu1 %v10195_v16  ;;  %v1042_v16 = vld [vmem:[%s9772_s19 + $0x38] sm:$0xff] }
 0x1f6   :  { %7839 = vmatprep.subr.bf16.mxu1 %v10323_v50  ;;  %v10419_v50 = vpack.c.bf16 %v1037_v12, %v1035_v6  ;;  %v1060_v6 = vld [vmem:[%s9772_s19 + $0xc8] sm:$0xff]  ;;  %v1062_v12 = vld [vmem:[%s9772_s19 + $0xd8] sm:$0xff] }
 0x1f9   :  { %7841 = vmatpush1.bf16.msra.mxu1 %v10328_v56  ;;  %v10422_v56 = vpack.c.bf16 %v1042_v16, %v1040_v13  ;;  %v10471_v13 = vpack.c.bf16 %v1057_v0, %v1055_v63  ;;  %v10474_v16 = vpack.c.bf16 %v1062_v12, %v1060_v6  ;;  %v10501_v63 = vpack.c.bf16 %v1069_v36, %v1067_v29  ;;  %v1071_v6 = vld [vmem:[%s9772_s19 + $0x120] sm:$0xff]  ;;  %v1073_v12 = vld [vmem:[%s9772_s19 + $0x130] sm:$0xff] }
 0x1fa   :  { %7843 = vmatprep.subr.bf16.mxu1 %v10335_v1  ;;  %v1039_v1 = vld [vmem:[%s9772_s19 + $0x20] sm:$0xff] }
 0x1fb   :  { %v10400_v57 = vpop.f32.mrb[2].mxu1  ;;  %v1398_v36 = vld [vmem:[%s9792_s12 + $0x80] sm:$0xff] }
 0x1fc   :  { %v10402_v58 = vpop.f32.mrb[3].mxu1 }
 0x1fd   :  { %7845 = vmatpush1.bf16.msra.mxu1 %v10339_v9  ;;  %7223 = vmatprep.mubr.msk.f32.mxu0 %vm829_vm3, %v10402_v58  ;;  %v1041_v9 = vld [vmem:[%s9772_s19 + $0x30] sm:$0xff] }
 0x1fe   :  { %1305 = vmatmul.mubr.f32.vlgmr.msra.gmra.mrb[2].mxu0 %v10400_v57  ;;  %7847 = vmatprep.subr.bf16.mxu1 %v10345_v11  ;;  %v1044_v11 = vld [vmem:[%s9772_s19 + $0x48] sm:$0xff] }
 0x201   :  { %7849 = vmatpush1.bf16.msra.mxu1 %v10349_v19  ;;  %v1046_v19 = vld [vmem:[%s9772_s19 + $0x58] sm:$0xff] }
 0x202   :  { %7851 = vmatprep.subr.bf16.mxu1 %v10355_v25  ;;  %v10431_v25 = vpack.c.bf16 %v1041_v9, %v1039_v1  ;;  %v1059_v1 = vld [vmem:[%s9772_s19 + $0xc0] sm:$0xff]  ;;  %v1061_v9 = vld [vmem:[%s9772_s19 + $0xd0] sm:$0xff] }
 0x205   :  { %7853 = vmatpush1.bf16.msra.mxu1 %v7852_v30  ;;  %v10434_v30 = vpack.c.bf16 %v1046_v19, %v1044_v11  ;;  %v1064_v11 = vld [vmem:[%s9772_s19 + $0xe8] sm:$0xff]  ;;  %v1066_v19 = vld [vmem:[%s9772_s19 + $0xf8] sm:$0xff] }
 0x206   :  { %7855 = vmatprep.subr.bf16.mxu1 %v7854_v38  ;;  %v1043_v38 = vld [vmem:[%s9772_s19 + $0x40] sm:$0xff] }
 0x209   :  { %7857 = vmatpush1.bf16.msra.mxu1 %v7856_v44  ;;  %v1045_v44 = vld [vmem:[%s9772_s19 + $0x50] sm:$0xff] }
 0x20a   :  { %7859 = vmatprep.subr.bf16.mxu1 %v7858_v54  ;;  %v1048_v54 = vld [vmem:[%s9772_s19 + $0x68] sm:$0xff] }
 0x20b   :  { %v10444_v2 = vpack.c.bf16 %v1050_v59, %v1048_v54  ;;  %v1063_v54 = vld [vmem:[%s9772_s19 + $0xe0] sm:$0xff]  ;;  %v1065_v59 = vld [vmem:[%s9772_s19 + $0xf0] sm:$0xff] }
 0x20c   :  { %v10491_v51 = vpack.c.bf16 %v1065_v59, %v1063_v54  ;;  %v1075_v54 = vld [vmem:[%s9772_s19 + $0x140] sm:$0xff]  ;;  %v1077_v59 = vld [vmem:[%s9772_s19 + $0x150] sm:$0xff] }
 0x20d   :  { %7861 = vmatpush1.bf16.msra.mxu1 %v7860_v62  ;;  %v10441_v62 = vpack.c.bf16 %v1045_v44, %v1043_v38  ;;  %v10481_v38 = vpack.c.bf16 %v1061_v9, %v1059_v1  ;;  %v10484_v44 = vpack.c.bf16 %v1066_v19, %v1064_v11  ;;  %v1076_v1 = vld [vmem:[%s9772_s19 + $0x148] sm:$0xff]  ;;  %v1078_v9 = vld [vmem:[%s9772_s19 + $0x158] sm:$0xff]  ;;  %v10511_v11 = vpack.c.bf16 %v1073_v12, %v1071_v6  ;;  %v1079_v12 = vld [vmem:[%s9772_s19 + $0x160] sm:$0xff] }
 0x20e   :  { %7863 = vmatprep.subr.bf16.mxu1 %v7862_v10  ;;  %v1049_v10 = vld [vmem:[%s9772_s19 + $0x70] sm:$0xff]  ;;  %v10514_v19 = vpack.c.bf16 %v1078_v9, %v1076_v1  ;;  %v10521_v29 = vpack.c.bf16 %v1077_v59, %v1075_v54  ;;  %v1383_v1 = vld [vmem:[%s9792_s12 + $0x8] sm:$0xff]  ;;  %v10538_v54 = vpack.c.bf16 %v1081_v7, %v1079_v12  ;;  %v1385_v59 = vld [vmem:[%s9792_s12 + $0x18] sm:$0xff] }
 0x20f   :  { %v1400_v7 = vld [vmem:[%s9792_s12 + $0x90] sm:$0xff]  ;;  %v1406_v12 = vld [vmem:[%s9792_s12 + $0xc0] sm:$0xff] }
 0x211   :  { %7865 = vmatpush1.bf16.msra.mxu1 %v7864_v18  ;;  %v10451_v18 = vpack.c.bf16 %v1049_v10, %v1047_v3  ;;  %v1068_v3 = vld [vmem:[%s9772_s19 + $0x108] sm:$0xff]  ;;  %v1070_v10 = vld [vmem:[%s9772_s19 + $0x118] sm:$0xff] }
 0x212   :  { %7867 = vmatprep.subr.bf16.mxu1 %v10413_v5  ;;  %v10494_v14 = vpack.c.bf16 %v1070_v10, %v1068_v3  ;;  %v1080_v3 = vld [vmem:[%s9772_s19 + $0x168] sm:$0xff]  ;;  %v1082_v10 = vld [vmem:[%s9772_s19 + $0x178] sm:$0xff] }
 0x213   :  { %v10527_v6 = vpack.c.bf16 %v1082_v10, %v1080_v3  ;;  %v1387_v3 = vld [vmem:[%s9792_s12 + $0x28] sm:$0xff] }
 0x214   :  { %1029 = vmatmul.mubr.f32.vlgmr.msra.gmra.mrb[6].mxu1 %v10383_v55 }
 0x215   :  { %7869 = vmatpush1.bf16.msra.mxu1 %v10419_v50  ;;  %7221 = vmatprep.mubr.msk.f32.mxu1 %vm829_vm3, %v9361_v49  ;;  %v10464_v49 = vpack.c.bf16 %v1058_v43, %v1056_v41  ;;  %v1072_v41 = vld [vmem:[%s9772_s19 + $0x128] sm:$0xff]  ;;  %v1074_v43 = vld [vmem:[%s9772_s19 + $0x138] sm:$0xff]  ;;  %s13029_s19 = sld [smem:[#allocation19_spill]] }
 0x216   :  { %7871 = vmatprep.subr.bf16.mxu1 %v10422_v56  ;;  %v10504_v0 = vpack.c.bf16 %v1074_v43, %v1072_v41  ;;  %v1399_v41 = vld [vmem:[%s9792_s12 + $0x88] sm:$0xff]  ;;  %v1382_v43 = vld [vmem:[%s9792_s12] sm:$0xff] }
 0x217   :  { %v10531_v21 = vpack.c.bf16 %v1399_v41, %v1398_v36  ;;  %v10534_v9 = vpack.c.bf16 %v1383_v1, %v1382_v43  ;;  %v1388_v36 = vld [vmem:[%s9792_s12 + $0x30] sm:$0xff]  ;;  %v1389_v43 = vld [vmem:[%s9792_s12 + $0x38] sm:$0xff]  ;;  %v1407_v1 = vld [vmem:[%s9792_s12 + $0xc8] sm:$0xff] }
 0x219   :  { %7873 = vmatpush1.bf16.msra.mxu1 %v10431_v25  ;;  %8059 = vmatprep.subr.bf16.mxu0 %v10531_v21 }
 0x21a   :  { %7875 = vmatprep.subr.bf16.mxu1 %v10434_v30  ;;  %8061 = vmatpush3.bf16.msra.mxu0 %v10534_v9 }
 0x21d   :  { %7877 = vmatpush1.bf16.msra.mxu1 %v10441_v62 }
 0x21e   :  { %7879 = vmatprep.subr.bf16.mxu1 %v10444_v2 }
 0x221   :  { %7881 = vmatpush1.bf16.msra.mxu1 %v10451_v18 }
 0x222   :  { %7883 = vmatprep.subr.bf16.mxu1 %v10454_v20 }
 0x225   :  { %7885 = vmatpush1.bf16.msra.mxu1 %v10461_v48 }
 0x226   :  { %7887 = vmatprep.subr.bf16.mxu1 %v10464_v49 }
 0x229   :  { %7889 = vmatpush1.bf16.msra.mxu1 %v10471_v13 }
 0x22a   :  { %7891 = vmatprep.subr.bf16.mxu1 %v10474_v16 }
 0x22d   :  { %7893 = vmatpush1.bf16.msra.mxu1 %v10481_v38 }
 0x22e   :  { %7895 = vmatprep.subr.bf16.mxu1 %v10484_v44 }
 0x231   :  { %7897 = vmatpush1.bf16.msra.mxu1 %v10491_v51 }
 0x232   :  { %7899 = vmatprep.subr.bf16.mxu1 %v10494_v14 }
 0x235   :  { %7901 = vmatpush1.bf16.msra.mxu1 %v10501_v63 }
 0x236   :  { %7903 = vmatprep.subr.bf16.mxu1 %v10504_v0 }
 0x239   :  { %7905 = vmatpush1.bf16.msra.mxu1 %v10511_v11 }
 0x23a   :  { %7907 = vmatprep.subr.bf16.mxu1 %v10514_v19 }
 0x23d   :  { %7909 = vmatpush1.bf16.msra.mxu1 %v10521_v29 }
 0x23e   :  { %7911 = vmatprep.subr.bf16.mxu1 %v10527_v6 }
 0x241   :  { %7913 = vmatpush1.bf16.msra.mxu1 %v10538_v54 }
 0x242   :  { %7915 = vmatprep.subr.bf16.mxu1 %v10205_v24  ;;  %v1401_v24 = vld [vmem:[%s9792_s12 + $0x98] sm:$0xff] }
 0x244   :  { %1160 = vmatmul.mubr.f32.vlgmr.msra.gmra.mrb[8].mxu1 %v10383_v55  ;;  %v1384_v55 = vld [vmem:[%s9792_s12 + $0x10] sm:$0xff] }
 0x245   :  { %7917 = vmatpush1.bf16.msra.mxu1 %v10208_v27  ;;  %7222 = vmatprep.mubr.msk.f32.mxu1 %vm829_vm3, %v10402_v58  ;;  %v10555_v27 = vpack.c.bf16 %v1401_v24, %v1400_v7  ;;  %v10587_v7 = vpack.c.bf16 %v1407_v1, %v1406_v12  ;;  %v1390_v24 = vld [vmem:[%s9792_s12 + $0x40] sm:$0xff]  ;;  %v1413_v12 = vld [vmem:[%s9792_s12 + $0xf8] sm:$0xff] }
 0x246   :  { %7919 = vmatprep.subr.bf16.mxu1 %v10211_v28  ;;  %v10559_v28 = vpack.c.bf16 %v1385_v59, %v1384_v55  ;;  %v1391_v55 = vld [vmem:[%s9792_s12 + $0x48] sm:$0xff]  ;;  %v1409_v59 = vld [vmem:[%s9792_s12 + $0xd8] sm:$0xff] }
 0x247   :  { %8063 = vmatprep.subr.bf16.mxu0 %v10555_v27 }
 0x248   :  { %8065 = vmatpush3.bf16.msra.mxu0 %v10559_v28 }
 0x249   :  { %7921 = vmatpush1.bf16.msra.mxu1 %v10220_v33  ;;  %v1402_v33 = vld [vmem:[%s9792_s12 + $0xa0] sm:$0xff] }
 0x24a   :  { %7923 = vmatprep.subr.bf16.mxu1 %v10223_v34  ;;  %v1403_v34 = vld [vmem:[%s9792_s12 + $0xa8] sm:$0xff] }
 0x24d   :  { %7925 = vmatpush1.bf16.msra.mxu1 %v10230_v39  ;;  %v10567_v39 = vpack.c.bf16 %v1403_v34, %v1402_v33  ;;  %v10597_v33 = vpack.c.bf16 %v1391_v55, %v1390_v24  ;;  %v1396_v24 = vld [vmem:[%s9792_s12 + $0x70] sm:$0xff] }
 0x24e   :  { %7927 = vmatprep.subr.bf16.mxu1 %v10233_v40  ;;  %v1386_v40 = vld [vmem:[%s9792_s12 + $0x20] sm:$0xff] }
 0x24f   :  { %v10571_v10 = vpack.c.bf16 %v1387_v3, %v1386_v40  ;;  %8067 = vmatprep.subr.bf16.mxu0 %v10567_v39  ;;  %v1392_v40 = vld [vmem:[%s9792_s12 + $0x50] sm:$0xff]  ;;  %v1393_v3 = vld [vmem:[%s9792_s12 + $0x58] sm:$0xff] }
 0x251   :  { %7929 = vmatpush1.bf16.msra.mxu1 %v10240_v45  ;;  %v1404_v45 = vld [vmem:[%s9792_s12 + $0xb0] sm:$0xff]  ;;  %8069 = vmatpush3.bf16.msra.mxu0 %v10571_v10 }
 0x252   :  { %7931 = vmatprep.subr.bf16.mxu1 %v10243_v46  ;;  %v1405_v46 = vld [vmem:[%s9792_s12 + $0xb8] sm:$0xff] }
 0x253   :  { %v10580_v41 = vpack.c.bf16 %v1405_v46, %v1404_v45  ;;  %v1410_v45 = vld [vmem:[%s9792_s12 + $0xe0] sm:$0xff]  ;;  %v1411_v46 = vld [vmem:[%s9792_s12 + $0xe8] sm:$0xff] }
 0x255   :  { %7933 = vmatpush1.bf16.msra.mxu1 %v10250_v52  ;;  %v10585_v52 = vpack.c.bf16 %v1389_v43, %v1388_v36  ;;  %8071 = vmatprep.subr.bf16.mxu0 %v10580_v41  ;;  %v1394_v36 = vld [vmem:[%s9792_s12 + $0x60] sm:$0xff]  ;;  %v1395_v43 = vld [vmem:[%s9792_s12 + $0x68] sm:$0xff] }
 0x256   :  { %7935 = vmatprep.subr.bf16.mxu1 %v10253_v53  ;;  %v1408_v53 = vld [vmem:[%s9792_s12 + $0xd0] sm:$0xff] }
 0x257   :  { %8073 = vmatpush3.bf16.msra.mxu0 %v10585_v52  ;;  %v10600_v34 = vpack.c.bf16 %v1409_v59, %v1408_v53  ;;  %v1891_v59 = vld [vmem:[%s9782_s30 + $0x10] sm:$0xff] }
 0x258   :  { %8075 = vmatprep.subr.bf16.mxu0 %v10587_v7 }
 0x259   :  { %7937 = vmatpush1.bf16.msra.mxu1 %v10260_v60  ;;  %v10609_v60 = vpack.c.bf16 %v1393_v3, %v1392_v40 }
 0x25a   :  { %7939 = vmatprep.subr.bf16.mxu1 %v10263_v61  ;;  %v10612_v61 = vpack.c.bf16 %v1411_v46, %v1410_v45  ;;  %v1893_v45 = vld [vmem:[%s9782_s30 + $0x20] sm:$0xff]  ;;  %v1895_v46 = vld [vmem:[%s9782_s30 + $0x30] sm:$0xff] }
 0x25b   :  { %8077 = vmatpush3.bf16.msra.mxu0 %v10597_v33 }
 0x25c   :  { %8079 = vmatprep.subr.bf16.mxu0 %v10600_v34 }
 0x25d   :  { %7941 = vmatpush1.bf16.msra.mxu1 %v10270_v4  ;;  %v10619_v4 = vpack.c.bf16 %v1395_v43, %v1394_v36  ;;  %v8192_v36 = vpack.c.bf16 %v1895_v46, %v1893_v45 }
 0x25e   :  { %7943 = vmatprep.subr.bf16.mxu1 %v10273_v8  ;;  %v1412_v8 = vld [vmem:[%s9792_s12 + $0xf0] sm:$0xff] }
 0x25f   :  { %8081 = vmatpush3.bf16.msra.mxu0 %v10609_v60  ;;  %v10627_v1 = vpack.c.bf16 %v1413_v12, %v1412_v8  ;;  %v1899_v8 = vld [vmem:[%s9782_s30 + $0x50] sm:$0xff]  ;;  %v1902_v12 = vld [vmem:[%s9782_s30 + $0x68] sm:$0xff] }
 0x260   :  { %8083 = vmatprep.subr.bf16.mxu0 %v10612_v61 }
 0x261   :  { %7945 = vmatpush1.bf16.msra.mxu1 %v10280_v15  ;;  %v1397_v15 = vld [vmem:[%s9792_s12 + $0x78] sm:$0xff]  ;;  %s13031_s12 = sld [smem:[#allocation17_spill]] }
 0x262   :  { %7947 = vmatprep.subr.bf16.mxu1 %v10283_v17  ;;  %v10631_v55 = vpack.c.bf16 %v1397_v15, %v1396_v24 }
 0x263   :  { %8085 = vmatpush3.bf16.msra.mxu0 %v10619_v4 }
 0x264   :  { %8087 = vmatprep.subr.bf16.mxu0 %v10627_v1 }
 0x265   :  { %7949 = vmatpush1.bf16.msra.mxu1 %v10290_v22 }
 0x266   :  { %7951 = vmatprep.subr.bf16.mxu1 %v10293_v23  ;;  %v817_v23 = vld [vmem:[%s9757_s3] sm:$0x3]  ;;  %s13026_s3 = sld [smem:[#allocation10_spill]] }
 0x267   :  { %8089 = vmatpush3.bf16.msra.mxu0 %v10631_v55 }
 0x268   :  { %8091 = vmatprep.subr.bf16.mxu0 %v10531_v21 }
 0x269   :  { %7953 = vmatpush1.bf16.msra.mxu1 %v10300_v31  ;;  %v952_v31 = vld [vmem:[%s9767_s14] sm:$0x3]  ;;  %s13028_s14 = sld [smem:[#allocation16_spill]] }
 0x26a   :  { %7955 = vmatprep.subr.bf16.mxu1 %v10303_v32  ;;  %v822_v32 = vrot.slane %v817_v23, %v10379_v35 }
 0x26d   :  { %7957 = vmatpush1.bf16.msra.mxu1 %v10308_v37  ;;  %v957_v37 = vrot.slane %v952_v31, %v10379_v35 }
 0x26e   :  { %7959 = vmatprep.subr.bf16.mxu1 %v10314_v42 }
 0x271   :  { %7961 = vmatpush1.bf16.msra.mxu1 %v10318_v47 }
 0x272   :  { %8011 = vmatprep.subr.bf16.mxu1 %v10413_v5 }
 0x274   :  { %1234 = vmatmul.mubr.f32.vlgmr.msra.gmra.mrb[10].mxu1 %v10400_v57 }
 0x275   :  { %8013 = vmatpush1.bf16.msra.mxu1 %v10419_v50  ;;  %7224 = vmatprep.mubr.msk.f32.mxu1 %vm829_vm3, %v10402_v58  ;;  %v826_v50 = vrot.slane %v817_v23, %v10375_v26  ;;  %v1908_v23 = vld [vmem:[%s9782_s30 + $0x98] sm:$0xff] }
 0x276   :  { %8015 = vmatprep.subr.bf16.mxu1 %v10422_v56  ;;  %v961_v56 = vrot.slane %v952_v31, %v10375_v26 }
 0x279   :  { %8017 = vmatpush1.bf16.msra.mxu1 %v10431_v25 }
 0x27a   :  { %8019 = vmatprep.subr.bf16.mxu1 %v10434_v30 }
 0x27d   :  { %8021 = vmatpush1.bf16.msra.mxu1 %v10441_v62 }
 0x27e   :  { %8023 = vmatprep.subr.bf16.mxu1 %v10444_v2 }
 0x281   :  { %8025 = vmatpush1.bf16.msra.mxu1 %v10451_v18 }
 0x282   :  { %8027 = vmatprep.subr.bf16.mxu1 %v10454_v20 }
 0x285   :  { %8029 = vmatpush1.bf16.msra.mxu1 %v10461_v48 }
 0x286   :  { %8031 = vmatprep.subr.bf16.mxu1 %v10464_v49 }
 0x289   :  { %8033 = vmatpush1.bf16.msra.mxu1 %v10471_v13 }
 0x28a   :  { %8035 = vmatprep.subr.bf16.mxu1 %v10474_v16 }
 0x28d   :  { %8037 = vmatpush1.bf16.msra.mxu1 %v10481_v38 }
 0x28e   :  { %8039 = vmatprep.subr.bf16.mxu1 %v10484_v44 }
 0x291   :  { %8041 = vmatpush1.bf16.msra.mxu1 %v10491_v51 }
 0x292   :  { %8043 = vmatprep.subr.bf16.mxu1 %v10494_v14 }
 0x295   :  { %8045 = vmatpush1.bf16.msra.mxu1 %v10501_v63 }
 0x296   :  { %8047 = vmatprep.subr.bf16.mxu1 %v10504_v0 }
 0x299   :  { %8049 = vmatpush1.bf16.msra.mxu1 %v10511_v11 }
 0x29a   :  { %8051 = vmatprep.subr.bf16.mxu1 %v10514_v19 }
 0x29d   :  { %8053 = vmatpush1.bf16.msra.mxu1 %v10521_v29  ;;  %v13013_v29 = vmov 0.0  }
 0x29e   :  { %8055 = vmatprep.subr.bf16.mxu1 %v10527_v6 }
 0x2a1   :  { %8057 = vmatpush1.bf16.msra.mxu1 %v10538_v54  ;;  %v1415_v54 = vld [vmem:[%s9797_s20 + $0x8] sm:$0xff] }
 0x2a2   :  { %8155 = vmatprep.subr.bf16.mxu1 %v10531_v21 }
 0x2a4   :  { %1376 = vmatmul.mubr.f32.vlgmr.msra.gmra.mrb[12].mxu1 %v10400_v57 }
 0x2a5   :  { %8157 = vmatpush3.bf16.msra.mxu1 %v10534_v9 }
 0x2a6   :  { %8159 = vmatprep.subr.bf16.mxu1 %v10555_v27 }
 0x2a9   :  { %8161 = vmatpush3.bf16.msra.mxu1 %v10559_v28 }
 0x2aa   :  { %8163 = vmatprep.subr.bf16.mxu1 %v10567_v39 }
 0x2ad   :  { %8165 = vmatpush3.bf16.msra.mxu1 %v10571_v10 }
 0x2ae   :  { %8167 = vmatprep.subr.bf16.mxu1 %v10580_v41 }
 0x2b1   :  { %8169 = vmatpush3.bf16.msra.mxu1 %v10585_v52 }
 0x2b2   :  { %8171 = vmatprep.subr.bf16.mxu1 %v10587_v7 }
 0x2b5   :  { %8173 = vmatpush3.bf16.msra.mxu1 %v10597_v33 }
 0x2b6   :  { %8175 = vmatprep.subr.bf16.mxu1 %v10600_v34 }
 0x2b7   :  { %v899_v17 = vpop.f32.mrb[4].mxu1 }
 0x2b8   :  { %v901_v22 = vpop.f32.mrb[5].mxu1  ;;  %v900_v47 = vadd.f32 %v899_v17, %v822_v32  ;;  %v1903_v17 = vld [vmem:[%s9782_s30 + $0x70] sm:$0xff] }
 0x2b9   :  { %8177 = vmatpush3.bf16.msra.mxu1 %v10609_v60  ;;  %v902_v2 = vadd.f32 %v901_v22, %v826_v50  ;;  %v1906_v22 = vld [vmem:[%s9782_s30 + $0x88] sm:$0xff] }
 0x2ba   :  { %8179 = vmatprep.subr.bf16.mxu1 %v10612_v61 }
 0x2bd   :  { %8181 = vmatpush3.bf16.msra.mxu1 %v10619_v4 }
 0x2be   :  { %8183 = vmatprep.subr.bf16.mxu1 %v10627_v1 }
 0x2c1   :  { %8185 = vmatpush3.bf16.msra.mxu1 %v10631_v55 }
 0x2c2   :  { %1735 = vmatprep.subr.mxu1 %v1415_v54 }
 0x2d1   :  { %v1306_v42 = vpop.f32.mrb[2].mxu0 }
 0x2d2   :  { %v1307_v57 = vadd.f32 %v1306_v42, %v957_v37  ;;  %v1308_v58 = vpop.f32.mrb[3].mxu0  ;;  %v1907_v42 = vld [vmem:[%s9782_s30 + $0x90] sm:$0xff] }
 0x2d3   :  { %v1309_v18 = vadd.f32 %v1308_v58, %v961_v56 }
 0x2d4   :  { %v1489_v5 = vmul.f32 %v1307_v57, %v900_v47 }
 0x2d5   :  { %v1490_v13 = vmul.f32 %v1309_v18, %v902_v2 }
 0x2e7   :  { %v1030_v25 = vpop.f32.mrb[6].mxu1 }
 0x2e8   :  { %v1031_v30 = vadd.f32 %v1030_v25, %v957_v37  ;;  %v1032_v62 = vpop.f32.mrb[7].mxu1  ;;  %v1905_v37 = vld [vmem:[%s9782_s30 + $0x80] sm:$0xff]  ;;  %v1914_v25 = vld [vmem:[%s9782_s30 + $0xc8] sm:$0xff] }
 0x2e9   :  { %v1033_v20 = vadd.f32 %v1032_v62, %v961_v56  ;;  %v8204_v58 = vpack.c.bf16 %v1907_v42, %v1905_v37  ;;  %v1911_v56 = vld [vmem:[%s9782_s30 + $0xb0] sm:$0xff]  ;;  %v1938_v37 = vld [vmem:[%s9782_s30 + $0x188] sm:$0xff]  ;;  %v1940_v42 = vld [vmem:[%s9782_s30 + $0x198] sm:$0xff] }
 0x2ea   :  { %v1416_v49 = vmul.f32 %v1031_v30, %v900_v47  ;;  %v1910_v47 = vld [vmem:[%s9782_s30 + $0xa8] sm:$0xff] }
 0x2eb   :  { %v1417_v48 = vmul.f32 %v1033_v20, %v902_v2 }
 0x2ed   :  { %1482 = vmatprep.mubr.f32.mxu0 %v1417_v48 }
 0x2ee   :  { %1483 = vmatmul.mubr.f32.vlgmr.msra.gmra.mrb[4].mxu0 %v1416_v49  ;;  %v1913_v49 = vld [vmem:[%s9782_s30 + $0xc0] sm:$0xff] }
 0x2ef   :  { %8093 = vmatpush3.bf16.msra.mxu0 %v10534_v9  ;;  %1555 = vmatprep.mubr.f32.mxu0 %v1490_v13  ;;  %v1915_v13 = vld [vmem:[%s9782_s30 + $0xd0] sm:$0xff] }
 0x2f0   :  { %8095 = vmatprep.subr.bf16.mxu0 %v10555_v27 }
 0x2f3   :  { %8097 = vmatpush3.bf16.msra.mxu0 %v10559_v28 }
 0x2f4   :  { %8099 = vmatprep.subr.bf16.mxu0 %v10567_v39 }
 0x2f7   :  { %8101 = vmatpush3.bf16.msra.mxu0 %v10571_v10 }
 0x2f8   :  { %8103 = vmatprep.subr.bf16.mxu0 %v10580_v41 }
 0x2fb   :  { %8105 = vmatpush3.bf16.msra.mxu0 %v10585_v52 }
 0x2fc   :  { %8107 = vmatprep.subr.bf16.mxu0 %v10587_v7 }
 0x2ff   :  { %8109 = vmatpush3.bf16.msra.mxu0 %v10597_v33 }
 0x300   :  { %8111 = vmatprep.subr.bf16.mxu0 %v10600_v34 }
 0x303   :  { %8113 = vmatpush3.bf16.msra.mxu0 %v10609_v60 }
 0x304   :  { %8115 = vmatprep.subr.bf16.mxu0 %v10612_v61 }
 0x307   :  { %8117 = vmatpush3.bf16.msra.mxu0 %v10619_v4 }
 0x308   :  { %8119 = vmatprep.subr.bf16.mxu0 %v10627_v1 }
 0x30b   :  { %8121 = vmatpush3.bf16.msra.mxu0 %v10631_v55 }
 0x30c   :  { %8123 = vmatprep.subr.bf16.mxu0 %v10531_v21 }
 0x30e   :  { %1556 = vmatmul.mubr.f32.vlgmr.msra.gmra.mrb[6].mxu0 %v1489_v5 }
 0x30f   :  { %8125 = vmatpush3.bf16.msra.mxu0 %v10534_v9 }
 0x310   :  { %8127 = vmatprep.subr.bf16.mxu0 %v10555_v27  ;;  %v10733_v27 = vld [vmem:[%s9797_s20] sm:$0xff]  ;;  %s13032_s20 = sld [smem:[#allocation18_spill]] }
 0x313   :  { %8129 = vmatpush3.bf16.msra.mxu0 %v10559_v28 }
 0x314   :  { %8131 = vmatprep.subr.bf16.mxu0 %v10567_v39 }
 0x317   :  { %v10711_v16 = vpop.f32.mrb[8].mxu1  ;;  %8133 = vmatpush3.bf16.msra.mxu0 %v10571_v10 }
 0x318   :  { %v10714_v38 = vpop.f32.mrb[9].mxu1  ;;  %8135 = vmatprep.subr.bf16.mxu0 %v10580_v41  ;;  %v1890_v41 = vld [vmem:[%s9782_s30 + $0x8] sm:$0xff] }
 0x31b   :  { %8137 = vmatpush3.bf16.msra.mxu0 %v10585_v52  ;;  %v1892_v52 = vld [vmem:[%s9782_s30 + $0x18] sm:$0xff] }
 0x31c   :  { %8139 = vmatprep.subr.bf16.mxu0 %v10587_v7  ;;  %v1889_v7 = vld [vmem:[%s9782_s30] sm:$0xff]  ;;  %v8186_v53 = vpack.c.bf16 %v1892_v52, %v1890_v41 }
 0x31d   :  { %v8188_v40 = vpack.c.bf16 %v1891_v59, %v1889_v7 }
 0x31f   :  { %8141 = vmatpush3.bf16.msra.mxu0 %v10597_v33  ;;  %v1894_v33 = vld [vmem:[%s9782_s30 + $0x28] sm:$0xff] }
 0x320   :  { %8143 = vmatprep.subr.bf16.mxu0 %v10600_v34  ;;  %v1896_v34 = vld [vmem:[%s9782_s30 + $0x38] sm:$0xff] }
 0x321   :  { %v8190_v3 = vpack.c.bf16 %v1896_v34, %v1894_v33  ;;  %v1921_v33 = vld [vmem:[%s9782_s30 + $0x100] sm:$0xff]  ;;  %v1923_v34 = vld [vmem:[%s9782_s30 + $0x110] sm:$0xff] }
 0x322   :  { %v8220_v45 = vpack.c.bf16 %v1923_v34, %v1921_v33  ;;  %v1941_v34 = vld [vmem:[%s9782_s30 + $0x1a0] sm:$0xff] }
 0x323   :  { %8145 = vmatpush3.bf16.msra.mxu0 %v10609_v60  ;;  %v1898_v60 = vld [vmem:[%s9782_s30 + $0x48] sm:$0xff] }
 0x324   :  { %8147 = vmatprep.subr.bf16.mxu0 %v10612_v61  ;;  %v1900_v61 = vld [vmem:[%s9782_s30 + $0x58] sm:$0xff] }
 0x325   :  { %v8194_v43 = vpack.c.bf16 %v1900_v61, %v1898_v60  ;;  %v1925_v60 = vld [vmem:[%s9782_s30 + $0x120] sm:$0xff]  ;;  %v1927_v61 = vld [vmem:[%s9782_s30 + $0x130] sm:$0xff] }
 0x327   :  { %8149 = vmatpush3.bf16.msra.mxu0 %v10619_v4  ;;  %v1897_v4 = vld [vmem:[%s9782_s30 + $0x40] sm:$0xff] }
 0x328   :  { %8151 = vmatprep.subr.bf16.mxu0 %v10627_v1  ;;  %v1904_v1 = vld [vmem:[%s9782_s30 + $0x78] sm:$0xff]  ;;  %v8196_v24 = vpack.c.bf16 %v1899_v8, %v1897_v4  ;;  %v8224_v4 = vpack.c.bf16 %v1927_v61, %v1925_v60  ;;  %v1945_v61 = vld [vmem:[%s9782_s30 + $0x1c0] sm:$0xff] }
 0x329   :  { %v8198_v15 = vpack.c.bf16 %v1904_v1, %v1902_v12  ;;  %v1929_v12 = vld [vmem:[%s9782_s30 + $0x140] sm:$0xff]  ;;  %v1931_v1 = vld [vmem:[%s9782_s30 + $0x150] sm:$0xff] }
 0x32b   :  { %8153 = vmatpush3.bf16.msra.mxu0 %v10631_v55  ;;  %v1901_v55 = vld [vmem:[%s9782_s30 + $0x60] sm:$0xff] }
 0x32c   :  { %8187 = vmatprep.subr.bf16.mxu0 %v8186_v53  ;;  %v8200_v31 = vpack.c.bf16 %v1903_v17, %v1901_v55  ;;  %v8228_v55 = vpack.c.bf16 %v1931_v1, %v1929_v12  ;;  %v1949_v12 = vld [vmem:[%s9782_s30 + $0x1e0] sm:$0xff]  ;;  %v1951_v1 = vld [vmem:[%s9782_s30 + $0x1f0] sm:$0xff] }
 0x347   :  { %v1235_v21 = vpop.f32.mrb[10].mxu1 }
 0x348   :  { %v1236_v44 = vadd.f32 %v1235_v21, %v822_v32  ;;  %v1237_v51 = vpop.f32.mrb[11].mxu1  ;;  %v8202_v32 = vpack.c.bf16 %v1908_v23, %v1906_v22  ;;  %v1918_v21 = vld [vmem:[%s9782_s30 + $0xe8] sm:$0xff]  ;;  %v1933_v23 = vld [vmem:[%s9782_s30 + $0x160] sm:$0xff] }
 0x349   :  { %v1238_v14 = vadd.f32 %v1237_v51, %v826_v50  ;;  %v1909_v50 = vld [vmem:[%s9782_s30 + $0xa0] sm:$0xff] }
 0x34a   :  { %v1635_v63 = vmul.f32 %v1307_v57, %v1236_v44  ;;  %v1562_v19 = vmul.f32 %v1236_v44, %v1031_v30  ;;  %v1912_v57 = vld [vmem:[%s9782_s30 + $0xb8] sm:$0xff] }
 0x34b   :  { %v1563_v0 = vmul.f32 %v1238_v14, %v1033_v20  ;;  %v1636_v11 = vmul.f32 %v1309_v18, %v1238_v14  ;;  %v8206_v5 = vpack.c.bf16 %v1912_v57, %v1910_v47  ;;  %v1916_v30 = vld [vmem:[%s9782_s30 + $0xd8] sm:$0xff]  ;;  %v8208_v18 = vpack.c.bf16 %v1911_v56, %v1909_v50  ;;  %v1939_v50 = vld [vmem:[%s9782_s30 + $0x190] sm:$0xff]  ;;  %v1942_v56 = vld [vmem:[%s9782_s30 + $0x1a8] sm:$0xff] }
 0x34c   :  { %v8210_v48 = vpack.c.bf16 %v1916_v30, %v1914_v25  ;;  %v1920_v44 = vld [vmem:[%s9782_s30 + $0xf8] sm:$0xff] }
 0x34d   :  { %1628 = vmatprep.mubr.f32.mxu0 %v1563_v0  ;;  %1701 = vmatprep.mubr.f32.mxu1 %v1636_v11  ;;  %v8214_v11 = vpack.c.bf16 %v1920_v44, %v1918_v21  ;;  %v1944_v25 = vld [vmem:[%s9782_s30 + $0x1b8] sm:$0xff] }
 0x34e   :  { %1629 = vmatmul.mubr.f32.vlgmr.msra.gmra.mrb[8].mxu0 %v1562_v19  ;;  %1702 = vmatmul.mubr.f32.vlgmr.msra.gmra.mrb[14].mxu1 %v1635_v63  ;;  %v8212_v63 = vpack.c.bf16 %v1915_v13, %v1913_v49  ;;  %v1917_v19 = vld [vmem:[%s9782_s30 + $0xe0] sm:$0xff] }
 0x34f   :  { %1799 = vmatprep.mubr.f32.mxu1 %v13013_v29  ;;  %1736 = vmatpush1.msra.mxu1 %v10733_v27 }
 0x350   :  { %1812 = vmatprep.subr.mxu1 %v1415_v54  ;;  %8189 = vmatpush1.bf16.msra.mxu0 %v8188_v40  ;;  %v1919_v54 = vld [vmem:[%s9782_s30 + $0xf0] sm:$0xff]  ;;  %v1926_v40 = vld [vmem:[%s9782_s30 + $0x128] sm:$0xff] }
 0x351   :  { %8191 = vmatprep.subr.bf16.mxu0 %v8190_v3  ;;  %v8216_v7 = vpack.c.bf16 %v1919_v54, %v1917_v19  ;;  %v1928_v3 = vld [vmem:[%s9782_s30 + $0x138] sm:$0xff] }
 0x352   :  { %v8222_v46 = vpack.c.bf16 %v1928_v3, %v1926_v40  ;;  %v1943_v40 = vld [vmem:[%s9782_s30 + $0x1b0] sm:$0xff] }
 0x353   :  { %v8240_v3 = vpack.c.bf16 %v1943_v40, %v1941_v34  ;;  %v2200_v34 = vld [vmem:[%s13018_s17] sm:$0xff] }
 0x354   :  { %8193 = vmatpush1.bf16.msra.mxu0 %v8192_v36  ;;  %v1930_v36 = vld [vmem:[%s9782_s30 + $0x148] sm:$0xff] }
 0x355   :  { %8195 = vmatprep.subr.bf16.mxu0 %v8194_v43  ;;  %v1932_v43 = vld [vmem:[%s9782_s30 + $0x158] sm:$0xff] }
 0x356   :  { %v8226_v8 = vpack.c.bf16 %v1932_v43, %v1930_v36  ;;  %v1950_v43 = vld [vmem:[%s9782_s30 + $0x1e8] sm:$0xff] }
 0x358   :  { %8197 = vmatpush1.bf16.msra.mxu0 %v8196_v24  ;;  %v1934_v24 = vld [vmem:[%s9782_s30 + $0x168] sm:$0xff] }
 0x359   :  { %8199 = vmatprep.subr.bf16.mxu0 %v8198_v15  ;;  %v1936_v15 = vld [vmem:[%s9782_s30 + $0x178] sm:$0xff] }
 0x35a   :  { %v8230_v22 = vpack.c.bf16 %v1936_v15, %v1934_v24  ;;  %v8248_v24 = vpack.c.bf16 %v1951_v1, %v1949_v12  ;;  %v1083_v15 = vld [vmem:[%s13014_s0] sm:$0x3]  ;;  %v2215_v12 = vld [vmem:[%s13018_s17 + $0x78] sm:$0xff]  ;;  %v2214_v1 = vld [vmem:[%s13018_s17 + $0x70] sm:$0xff]  ;;  %s13049_s0 = sld [smem:[#allocation11_spill]] }
 0x35c   :  { %8201 = vmatpush1.bf16.msra.mxu0 %v8200_v31  ;;  %v1935_v31 = vld [vmem:[%s9782_s30 + $0x170] sm:$0xff] }
 0x35d   :  { %8203 = vmatprep.subr.bf16.mxu0 %v8202_v32  ;;  %v8232_v57 = vpack.c.bf16 %v1935_v31, %v1933_v23 }
 0x360   :  { %8205 = vmatpush1.bf16.msra.mxu0 %v8204_v58  ;;  %v8234_v58 = vpack.c.bf16 %v1940_v42, %v1938_v37 }
 0x361   :  { %8207 = vmatprep.subr.bf16.mxu0 %v8206_v5  ;;  %v1937_v5 = vld [vmem:[%s9782_s30 + $0x180] sm:$0xff] }
 0x362   :  { %v8236_v30 = vpack.c.bf16 %v1939_v50, %v1937_v5 }
 0x364   :  { %8209 = vmatpush1.bf16.msra.mxu0 %v8208_v18 }
 0x365   :  { %8211 = vmatprep.subr.bf16.mxu0 %v8210_v48 }
 0x368   :  { %8213 = vmatpush1.bf16.msra.mxu0 %v8212_v63 }
 0x369   :  { %8215 = vmatprep.subr.bf16.mxu0 %v8214_v11 }
 0x36c   :  { %8217 = vmatpush1.bf16.msra.mxu0 %v8216_v7 }
 0x377   :  { %v10727_v6 = vpop.f32.mrb[12].mxu1 }
 0x378   :  { %v10729_v9 = vpop.f32.mrb[13].mxu1 }
 0x3c1   :  { %v7334_v28 = vpop.f32.mrb[4].mxu0 }
 0x3c2   :  { %v7335_v39 = vpop.f32.mrb[5].mxu0 }
 0x3c3   :  { %v7336_v10 = vadd.f32 %v7335_v39, %v7334_v28  ;;  %v1922_v28 = vld [vmem:[%s9782_s30 + $0x108] sm:$0xff]  ;;  %v1924_v39 = vld [vmem:[%s9782_s30 + $0x118] sm:$0xff] }
 0x3c4   :  { %v8218_v59 = vpack.c.bf16 %v1924_v39, %v1922_v28 }
 0x3c5   :  { %v1488_v51 = vmul.f32 0.17677669, %v7336_v10 }
 0x3c6   :  { %8219 = vmatprep.subr.bf16.mxu0 %v8218_v59 }
 0x3c7   :  { %8221 = vmatpush1.bf16.msra.mxu0 %v8220_v45  ;;  %v1946_v45 = vld [vmem:[%s9782_s30 + $0x1c8] sm:$0xff] }
 0x3c8   :  { %8223 = vmatprep.subr.bf16.mxu0 %v8222_v46  ;;  %v1948_v46 = vld [vmem:[%s9782_s30 + $0x1d8] sm:$0xff] }
 0x3c9   :  { %v8242_v60 = vpack.c.bf16 %v1948_v46, %v1946_v45  ;;  %v9708_v45 = vmov 0.0|0.0   ;;  %v2204_v46 = vld [vmem:[%s13018_s17 + $0x20] sm:$0xff] }
 0x3cb   :  { %8225 = vmatpush1.bf16.msra.mxu0 %v8224_v4  ;;  %v1952_v4 = vld [vmem:[%s9782_s30 + $0x1f8] sm:$0xff] }
 0x3cc   :  { %8227 = vmatprep.subr.bf16.mxu0 %v8226_v8  ;;  %v8246_v8 = vpack.c.bf16 %v1952_v4, %v1950_v43  ;;  %v2216_v43 = vld [vmem:[%s13018_s17 + $0x80] sm:$0xff]  ;;  %v2210_v4 = vld [vmem:[%s13018_s17 + $0x50] sm:$0xff] }
 0x3cf   :  { %8229 = vmatpush1.bf16.msra.mxu0 %v8228_v55  ;;  %v1088_v55 = vrot.slane %v1083_v15, %v10379_v35 }
 0x3d0   :  { %8231 = vmatprep.subr.bf16.mxu0 %v8230_v22 }
 0x3d1   :  { %v1162_v22 = vadd.f32 %v10711_v16, %v1088_v55  ;;  %v1953_v16 = vld [vmem:[%s13015_s5] sm:$0x3] }
 0x3d3   :  { %8233 = vmatpush1.bf16.msra.mxu0 %v8232_v57 }
 0x3d4   :  { %8235 = vmatprep.subr.bf16.mxu0 %v8234_v58 }
 0x3d7   :  { %8237 = vmatpush1.bf16.msra.mxu0 %v8236_v30 }
 0x3e1   :  { %v7369_v62 = vpop.f32.mrb[6].mxu0 }
 0x3e2   :  { %v7370_v2 = vpop.f32.mrb[7].mxu0 }
 0x3e3   :  { %v7371_v20 = vadd.f32 %v7370_v2, %v7369_v62  ;;  %v8238_v62 = vpack.c.bf16 %v1944_v25, %v1942_v56 }
 0x3e5   :  { %v1561_v14 = vmul.f32 0.17677669, %v7371_v20  ;;  %8239 = vmatprep.subr.bf16.mxu0 %v8238_v62 }
 0x3e6   :  { %8241 = vmatpush1.bf16.msra.mxu0 %v8240_v3  ;;  %v2205_v3 = vld [vmem:[%s13018_s17 + $0x28] sm:$0xff] }
 0x3e7   :  { %v1708_v0 = vmax.f32 %v1488_v51, %v1561_v14  ;;  %8243 = vmatprep.subr.bf16.mxu0 %v8242_v60  ;;  %v2209_v60 = vld [vmem:[%s13018_s17 + $0x48] sm:$0xff] }
 0x3e9   :  { %v1709_v41 = vsub.f32 %v1488_v51, %v1708_v0  ;;  %v1712_v52 = vsub.f32 %v1561_v14, %v1708_v0 }
 0x3eb   :  { %v1710_v10 = vmul.f32 1.442695, %v1709_v41  ;;  %v1713_v53 = vmul.f32 1.442695, %v1712_v52 }
 0x3ed   :  { %9463 = vpow2.f32 %v1710_v10 }
 0x3ee   :  { %9465 = vpow2.f32 %v1713_v53 }
 0x3f7   :  { %v9464_v17 = vpop.eup %9463 }
 0x3f8   :  { %v9466_v32 = vpop.eup %9465 }
 0x3f9   :  { %v1715_v47 = vadd.f32 %v9466_v32, %v9464_v17 }
 0x3fb   :  { %9467 = vrcp.f32 %v1715_v47  ;;  %v1378_v47 = vadd.f32 %v10727_v6, %v1088_v55 }
 0x405   :  { %v9468_v2 = vpop.eup %9467 }
 0x406   :  { %v1728_v18 = vmul.f32 %v9468_v2, %v9464_v17  ;;  %v1806_v20 = vmul.f32 %v9468_v2, %v9466_v32  ;;  %v1092_v17 = vrot.slane %v1083_v15, %v10375_v26  ;;  %v8256_v15 = vpack.c.bf16 %v2215_v12, %v2210_v4 }
 0x408   :  { %v1164_v23 = vadd.f32 %v10714_v38, %v1092_v17  ;;  %v1380_v57 = vadd.f32 %v10729_v9, %v1092_v17  ;;  %v1954_v38 = vmul.f32 2.0, %v1953_v16  ;;  %v2221_v17 = vld [vmem:[%s13018_s17 + $0xa8] sm:$0xff]  ;;  %v2239_v16 = vld [vmem:[%s13018_s17 + $0x138] sm:$0xff] }
 0x40a   :  { %v1963_v62 = vrot.slane %v1954_v38, %v10375_v26  ;;  %v1959_v6 = vrot.slane %v1954_v38, %v10379_v35  ;;  %v2241_v38 = vld [vmem:[%s13018_s17 + $0x148] sm:$0xff] }
 0x421   :  { %v7404_v48 = vpop.f32.mrb[8].mxu0  ;;  %v7439_v49 = vpop.f32.mrb[14].mxu1 }
 0x422   :  { %v7405_v13 = vpop.f32.mrb[9].mxu0  ;;  %v7440_v21 = vpop.f32.mrb[15].mxu1 }
 0x423   :  { %v7406_v44 = vadd.f32 %v7405_v13, %v7404_v48  ;;  %v7441_v51 = vadd.f32 %v7440_v21, %v7439_v49  ;;  %v2037_v48 = vld [vmem:[%s13016_s9] sm:$0xff]  ;;  %v2038_v49 = vld [vmem:[%s13016_s9 + $0x8] sm:$0x3] }
 0x424   :  { %v2040_v13 = vld [vmem:[%s13017_s13 + $0x8] sm:$0xff]  ;;  %v2039_v21 = vld [vmem:[%s13017_s13] sm:$0xff] }
 0x425   :  { %v1634_v14 = vmul.f32 0.17677669, %v7406_v44  ;;  %v1707_v63 = vmul.f32 0.17677669, %v7441_v51 }
 0x427   :  { %v1718_v0 = vmax.f32 %v1634_v14, %v1707_v63 }
 0x429   :  { %v1719_v11 = vsub.f32 %v1634_v14, %v1718_v0  ;;  %v1722_v19 = vsub.f32 %v1707_v63, %v1718_v0  ;;  %v2041_v63 = vld [vmem:[%s13017_s13 + $0x10] sm:$0x3] }
 0x42b   :  { %v1720_v54 = vmul.f32 1.442695, %v1719_v11  ;;  %v1723_v28 = vmul.f32 1.442695, %v1722_v19  ;;  %v2042_v11 = vld [vmem:[%s13017_s13 + $0x18] sm:$0x3] }
 0x42d   :  { %9469 = vpow2.f32 %v1720_v54 }
 0x42e   :  { %9471 = vpow2.f32 %v1723_v28 }
 0x437   :  { %v9470_v39 = vpop.eup %9469 }
 0x438   :  { %v9472_v41 = vpop.eup %9471 }
 0x439   :  { %v1725_v52 = vadd.f32 %v9472_v41, %v9470_v39 }
 0x43b   :  { %9473 = vrcp.f32 %v1725_v52 }
 0x445   :  { %v9474_v7 = vpop.eup %9473 }
 0x446   :  { %v1729_v10 = vmul.f32 %v9474_v7, %v9470_v39  ;;  %v1807_v53 = vmul.f32 %v9474_v7, %v9472_v41 }
 0x448   :  { %v1730_v59 = vadd.f32 %v1729_v10, %v1728_v18  ;;  %v1808_v33 = vadd.f32 %v1807_v53, %v1806_v20 }
 0x44a   :  { %7225 = vmatmul.mubr.msk.f32.vlgmr.msra.gmra.mrb[16].mxu1 %vm1731_vm4, %v1730_v59  ;;  %v2201_v59 = vld [vmem:[%s13018_s17 + $0x8] sm:$0xff] }
 0x44b   :  { %1813 = vmatpush1.msra.mxu1 %v10733_v27  ;;  %1876 = vmatprep.mubr.f32.mxu1 %v13013_v29  ;;  %v1947_v27 = vld [vmem:[%s9782_s30 + $0x1d0] sm:$0xff]  ;;  %s13030_s30 = sld [smem:[#allocation21_spill]] }
 0x44c   :  { %v8244_v36 = vpack.c.bf16 %v1947_v27, %v1945_v61  ;;  %v8252_v61 = vpack.c.bf16 %v2205_v3, %v2200_v34  ;;  %v8347_v27 = vpack.c.bf16 %v2209_v60, %v2204_v46  ;;  %v2265_v34 = vld [vmem:[%s13018_s17 + $0x208] sm:$0xff] }
 0x44d   :  { %v2269_v3 = vld [vmem:[%s13018_s17 + $0x228] sm:$0xff] }
 0x44e   :  { %7226 = vmatmul.mubr.msk.f32.vlgmr.msra.gmra.mrb[18].mxu1 %vm1731_vm4, %v1808_v33  ;;  %8245 = vmatpush1.bf16.msra.mxu0 %v8244_v36  ;;  %v2206_v33 = vld [vmem:[%s13018_s17 + $0x30] sm:$0xff]  ;;  %v2211_v36 = vld [vmem:[%s13018_s17 + $0x58] sm:$0xff] }
 0x44f   :  { %2113 = vmatprep.mubr.f32.mxu1 %v13013_v29  ;;  %8247 = vmatprep.subr.bf16.mxu0 %v8246_v8  ;;  %v8250_v40 = vpack.c.bf16 %v2206_v33, %v2201_v59  ;;  %v8254_v8 = vpack.c.bf16 %v2216_v43, %v2211_v36  ;;  %v2260_v59 = vld [vmem:[%s13018_s17 + $0x1e0] sm:$0xff] }
 0x450   :  { %v8276_v46 = vpack.c.bf16 %v2265_v34, %v2260_v59  ;;  %v2309_v34 = vld [vmem:[%s13018_s17 + $0x368] sm:$0xff] }
 0x452   :  { %8249 = vmatpush1.bf16.msra.mxu0 %v8248_v24  ;;  %v2219_v24 = vld [vmem:[%s13018_s17 + $0x98] sm:$0xff] }
 0x453   :  { %8346 = vmatprep.subr.bf16.mxu0 %v9708_v45  ;;  %v8350_v55 = vpack.c.bf16 %v2219_v24, %v2214_v1 }
 0x51d   :  { %v1801_v31 = vpop.f32.mrb[16].mxu1 }
 0x51e   :  { %v1883_v32 = vmul.f32 %v1801_v31, %v1162_v22  ;;  %v1803_v37 = vpop.f32.mrb[17].mxu1  ;;  %v2226_v22 = vld [vmem:[%s13018_s17 + $0xd0] sm:$0xff] }
 0x51f   :  { %v1884_v42 = vmul.f32 %v1803_v37, %v1164_v23  ;;  %v2220_v23 = vld [vmem:[%s13018_s17 + $0xa0] sm:$0xff]  ;;  %v8258_v31 = vpack.c.bf16 %v2226_v22, %v2221_v17 }
 0x520   :  { %v2224_v37 = vld [vmem:[%s13018_s17 + $0xc0] sm:$0xff] }
 0x521   :  { %v1878_v58 = vpop.f32.mrb[18].mxu1 }
 0x522   :  { %v1885_v5 = vmul.f32 %v1878_v58, %v1378_v47  ;;  %v1880_v50 = vpop.f32.mrb[19].mxu1  ;;  %v2231_v47 = vld [vmem:[%s13018_s17 + $0xf8] sm:$0xff] }
 0x523   :  { %v1886_v56 = vmul.f32 %v1880_v50, %v1380_v57  ;;  %v2236_v57 = vld [vmem:[%s13018_s17 + $0x120] sm:$0xff]  ;;  %v2230_v50 = vld [vmem:[%s13018_s17 + $0xf0] sm:$0xff] }
 0x524   :  { %v1887_v25 = vadd.f32 %v1885_v5, %v1883_v32  ;;  %v2225_v32 = vld [vmem:[%s13018_s17 + $0xc8] sm:$0xff] }
 0x525   :  { %v1888_v30 = vadd.f32 %v1886_v56, %v1884_v42  ;;  %v2229_v42 = vld [vmem:[%s13018_s17 + $0xe8] sm:$0xff]  ;;  %v8260_v58 = vpack.c.bf16 %v2225_v32, %v2220_v23  ;;  %v8262_v56 = vpack.c.bf16 %v2236_v57, %v2231_v47  ;;  %v2276_v47 = vld [vmem:[%s13018_s17 + $0x260] sm:$0xff] }
 0x526   :  { %v8353_v5 = vpack.c.bf16 %v2229_v42, %v2224_v37  ;;  %v2271_v42 = vld [vmem:[%s13018_s17 + $0x238] sm:$0xff] }
 0x527   :  { %2030 = vmatprep.mubr.f32.mxu0 %v1888_v30  ;;  %v2234_v30 = vld [vmem:[%s13018_s17 + $0x110] sm:$0xff]  ;;  %v8278_v57 = vpack.c.bf16 %v2276_v47, %v2271_v42 }
 0x528   :  { %2031 = vmatmul.mubr.f32.vlgmr.msra.gmra.mrb[10].mxu0 %v1887_v25  ;;  %v2235_v25 = vld [vmem:[%s13018_s17 + $0x118] sm:$0xff] }
 0x529   :  { %8348 = vmatpush1.bf16.msra.mxu0 %v8347_v27 }
 0x52a   :  { %8349 = vmatprep.subr.bf16.mxu0 %v9708_v45 }
 0x52d   :  { %8351 = vmatpush1.bf16.msra.mxu0 %v8350_v55 }
 0x52e   :  { %8352 = vmatprep.subr.bf16.mxu0 %v9708_v45 }
 0x531   :  { %8354 = vmatpush1.bf16.msra.mxu0 %v8353_v5  ;;  %v2275_v5 = vld [vmem:[%s13018_s17 + $0x258] sm:$0xff] }
 0x532   :  { %8355 = vmatprep.subr.bf16.mxu0 %v9708_v45 }
 0x5fb   :  { %v2032_v2 = vpop.f32.mrb[10].mxu0 }
 0x5fc   :  { %v2034_v9 = vpop.f32.mrb[11].mxu0  ;;  %v2033_v20 = vadd.f32 %v2032_v2, %v1959_v6  ;;  %v8264_v6 = vpack.c.bf16 %v2235_v25, %v2230_v50  ;;  %v8356_v2 = vpack.c.bf16 %v2239_v16, %v2234_v30  ;;  %v2279_v25 = vld [vmem:[%s13018_s17 + $0x278] sm:$0xff]  ;;  %v2281_v16 = vld [vmem:[%s13018_s17 + $0x288] sm:$0xff] }
 0x5fd   :  { %v2035_v18 = vadd.f32 %v2034_v9, %v1963_v62  ;;  %v2246_v62 = vld [vmem:[%s13018_s17 + $0x170] sm:$0xff]  ;;  %v2240_v9 = vld [vmem:[%s13018_s17 + $0x140] sm:$0xff] }
 0x5fe   :  { %8357 = vmatpush1.bf16.msra.mxu0 %v8356_v2  ;;  %v2285_v2 = vld [vmem:[%s13018_s17 + $0x2a8] sm:$0xff] }
 0x5ff   :  { %2049 = vmatprep.subr.mxu1 %v2035_v18  ;;  %v8266_v18 = vpack.c.bf16 %v2246_v62, %v2241_v38  ;;  %8358 = vmatprep.subr.bf16.mxu0 %v9708_v45  ;;  %v2286_v38 = vld [vmem:[%s13018_s17 + $0x2b0] sm:$0xff] }
 0x600   :  { %2050 = vmatpush1.msra.mxu1 %v2033_v20  ;;  %v2245_v20 = vld [vmem:[%s13018_s17 + $0x168] sm:$0xff]  ;;  %v8282_v62 = vpack.c.bf16 %v2286_v38, %v2281_v16 }
 0x601   :  { %7227 = vmatmul.mubr.msk.f32.vlgmr.msra.gmra.mrb[20].mxu1 %vm1731_vm4, %v2037_v48  ;;  %8251 = vmatprep.subr.bf16.mxu1 %v8250_v40  ;;  %v2244_v48 = vld [vmem:[%s13018_s17 + $0x160] sm:$0xff] }
 0x602   :  { %2119 = vmatprep.mubr.f32.mxu1 %v13013_v29  ;;  %8253 = vmatpush1.bf16.msra.mxu1 %v8252_v61  ;;  %v2264_v40 = vld [vmem:[%s13018_s17 + $0x200] sm:$0xff] }
 0x603   :  { %8255 = vmatprep.subr.bf16.mxu1 %v8254_v8  ;;  %v8365_v60 = vpack.c.bf16 %v2269_v3, %v2264_v40  ;;  %v2311_v3 = vld [vmem:[%s13018_s17 + $0x378] sm:$0xff] }
 0x605   :  { %7228 = vmatmul.mubr.msk.f32.gmra.mrb[22].mxu1 %vm1731_vm4, %v2038_v49  ;;  %v2249_v49 = vld [vmem:[%s13018_s17 + $0x188] sm:$0xff] }
 0x606   :  { %8257 = vmatpush1.bf16.msra.mxu1 %v8256_v15 }
 0x607   :  { %8259 = vmatprep.subr.bf16.mxu1 %v8258_v31 }
 0x60a   :  { %8261 = vmatpush1.bf16.msra.mxu1 %v8260_v58  ;;  %v2270_v58 = vld [vmem:[%s13018_s17 + $0x230] sm:$0xff] }
 0x60b   :  { %8263 = vmatprep.subr.bf16.mxu1 %v8262_v56  ;;  %v8280_v50 = vpack.c.bf16 %v2275_v5, %v2270_v58  ;;  %v2274_v56 = vld [vmem:[%s13018_s17 + $0x250] sm:$0xff]  ;;  %v2184_v58 = vld [vmem:[%s13020_s25] sm:$0x3] }
 0x60c   :  { %v8368_v30 = vpack.c.bf16 %v2279_v25, %v2274_v56  ;;  %v2189_v16 = vrot.slane %v2184_v58, %v10379_v35  ;;  %v2193_v38 = vrot.slane %v2184_v58, %v10375_v26  ;;  %v2267_v58 = vld [vmem:[%s13018_s17 + $0x218] sm:$0xff] }
 0x60e   :  { %8265 = vmatpush1.bf16.msra.mxu1 %v8264_v6  ;;  %v2280_v6 = vld [vmem:[%s13018_s17 + $0x280] sm:$0xff] }
 0x60f   :  { %8267 = vmatprep.subr.bf16.mxu1 %v8266_v18  ;;  %v2284_v18 = vld [vmem:[%s13018_s17 + $0x2a0] sm:$0xff] }
 0x6d4   :  { %v2115_v44 = vpop.f32.mrb[20].mxu1 }
 0x6d5   :  { %v2117_v51 = vpop.f32.mrb[21].mxu1  ;;  %v10825_v0 = vadd.f32 %v2115_v44, %v2039_v21  ;;  %v2256_v21 = vld [vmem:[%s13018_s17 + $0x1c0] sm:$0xff]  ;;  %v8268_v44 = vpack.c.bf16 %v2245_v20, %v2240_v9  ;;  %v8284_v9 = vpack.c.bf16 %v2285_v2, %v2280_v6  ;;  %v2289_v20 = vld [vmem:[%s13018_s17 + $0x2c8] sm:$0xff]  ;;  %v2207_v6 = vld [vmem:[%s13018_s17 + $0x38] sm:$0xff] }
 0x6d6   :  { %v10822_v14 = vadd.f32 %v2117_v51, %v2040_v13  ;;  %v2251_v13 = vld [vmem:[%s13018_s17 + $0x198] sm:$0xff]  ;;  %v8359_v51 = vpack.c.bf16 %v2249_v49, %v2244_v48  ;;  %v8371_v48 = vpack.c.bf16 %v2289_v20, %v2284_v18  ;;  %v2213_v18 = vld [vmem:[%s13018_s17 + $0x68] sm:$0xff]  ;;  %v2218_v20 = vld [vmem:[%s13018_s17 + $0x90] sm:$0xff] }
 0x6d7   :  { %8269 = vmatpush1.bf16.msra.mxu1 %v8268_v44  ;;  %v2291_v49 = vld [vmem:[%s13018_s17 + $0x2d8] sm:$0xff]  ;;  %v2290_v44 = vld [vmem:[%s13018_s17 + $0x2d0] sm:$0xff] }
 0x6d8   :  { %v2121_v19 = vpop.f32.mrb[22].mxu1  ;;  %v2128_v54 = vsel %vm829_vm3, %v10822_v14, 0.0  ;;  %8360 = vmatpush1.bf16.msra.mxu0 %v8359_v51  ;;  %v2295_v51 = vld [vmem:[%s13018_s17 + $0x2f8] sm:$0xff] }
 0x6d9   :  { %v10830_v28 = vadd.f32 %v2121_v19, %v2041_v63  ;;  %v2123_v39 = vpop.f32.mrb[23].mxu1  ;;  %v2129_v41 = vadd.f32 %v2128_v54, %v10825_v0  ;;  %v2250_v63 = vld [vmem:[%s13018_s17 + $0x190] sm:$0xff]  ;;  %v2255_v19 = vld [vmem:[%s13018_s17 + $0x1b8] sm:$0xff]  ;;  %8361 = vmatprep.subr.bf16.mxu0 %v9708_v45 }
 0x6da   :  { %v10833_v52 = vadd.f32 %v2123_v39, %v2042_v11  ;;  %v8270_v11 = vpack.c.bf16 %v2256_v21, %v2251_v13  ;;  %v2254_v54 = vld [vmem:[%s13018_s17 + $0x1b0] sm:$0xff]  ;;  %v2259_v39 = vld [vmem:[%s13018_s17 + $0x1d8] sm:$0xff]  ;;  %v2296_v13 = vld [vmem:[%s13018_s17 + $0x300] sm:$0xff] }
 0x6db   :  { %2130 = vadd.xlane.f32.xlu0 %v2129_v41  ;;  %v2132_v7 = vsel %vm691_vm1, %v10830_v28, 0.0  ;;  %v2261_v41 = vld [vmem:[%s13018_s17 + $0x1e8] sm:$0xff]  ;;  %v8286_v21 = vpack.c.bf16 %v2296_v13, %v2291_v49 }
 0x6dc   :  { %v2134_v10 = vsel %vm2133_vm5, %v10833_v52, 0.0  ;;  %8271 = vmatprep.subr.bf16.mxu1 %v8270_v11  ;;  %v2294_v11 = vld [vmem:[%s13018_s17 + $0x2f0] sm:$0xff] }
 0x6dd   :  { %v2135_v53 = vadd.f32 %v2134_v10, %v2132_v7  ;;  %v2266_v7 = vld [vmem:[%s13018_s17 + $0x210] sm:$0xff]  ;;  %v8272_v10 = vpack.c.bf16 %v2255_v19, %v2250_v63  ;;  %v8288_v63 = vpack.c.bf16 %v2295_v51, %v2290_v44  ;;  %v2299_v19 = vld [vmem:[%s13018_s17 + $0x318] sm:$0xff]  ;;  %v8302_v44 = vpack.c.bf16 %v2218_v20, %v2213_v18  ;;  %v2212_v51 = vld [vmem:[%s13018_s17 + $0x60] sm:$0xff] }
 0x6de   :  { %v8274_v33 = vpack.c.bf16 %v2266_v7, %v2261_v41  ;;  %v2306_v41 = vld [vmem:[%s13018_s17 + $0x350] sm:$0xff]  ;;  %v2287_v18 = vld [vmem:[%s13018_s17 + $0x2b8] sm:$0xff]  ;;  %v2293_v20 = vld [vmem:[%s13018_s17 + $0x2e8] sm:$0xff] }
 0x6df   :  { %2136 = vadd.xlane.f32.xlu0 %v2135_v53  ;;  %v8362_v53 = vpack.c.bf16 %v2259_v39, %v2254_v54  ;;  %8273 = vmatpush1.bf16.msra.mxu1 %v8272_v10  ;;  %v8374_v54 = vpack.c.bf16 %v2299_v19, %v2294_v11  ;;  %v2301_v39 = vld [vmem:[%s13018_s17 + $0x328] sm:$0xff]  ;;  %v2300_v10 = vld [vmem:[%s13018_s17 + $0x320] sm:$0xff] }
 0x6e0   :  { %8275 = vmatprep.subr.bf16.mxu1 %v8274_v33  ;;  %v8290_v7 = vpack.c.bf16 %v2306_v41, %v2301_v39  ;;  %v2304_v33 = vld [vmem:[%s13018_s17 + $0x340] sm:$0xff] }
 0x6e1   :  { %8363 = vmatpush1.bf16.msra.mxu0 %v8362_v53  ;;  %v2305_v53 = vld [vmem:[%s13018_s17 + $0x348] sm:$0xff]  ;;  %v8377_v40 = vpack.c.bf16 %v2309_v34, %v2304_v33  ;;  %v2228_v39 = vld [vmem:[%s13018_s17 + $0xe0] sm:$0xff]  ;;  %v2238_v33 = vld [vmem:[%s13018_s17 + $0x130] sm:$0xff] }
 0x6e2   :  { %8364 = vmatprep.subr.bf16.mxu0 %v9708_v45  ;;  %v8292_v59 = vpack.c.bf16 %v2305_v53, %v2300_v10  ;;  %v2222_v10 = vld [vmem:[%s13018_s17 + $0xb0] sm:$0xff]  ;;  %v2227_v53 = vld [vmem:[%s13018_s17 + $0xd8] sm:$0xff] }
 0x6e3   :  { %8277 = vmatpush1.bf16.msra.mxu1 %v8276_v46  ;;  %v2316_v46 = vld [vmem:[%s13018_s17 + $0x3a0] sm:$0xff]  ;;  %v8308_v34 = vpack.c.bf16 %v2227_v53, %v2222_v10 }
 0x6e4   :  { %8279 = vmatprep.subr.bf16.mxu1 %v8278_v57  ;;  %v2168_v57 = vld [vmem:[%s13019_s21] sm:$0x3] }
 0x6e5   :  { %8366 = vmatpush1.bf16.msra.mxu0 %v8365_v60  ;;  %v2310_v60 = vld [vmem:[%s13018_s17 + $0x370] sm:$0xff]  ;;  %v2173_v5 = vrot.slane %v2168_v57, %v10379_v35  ;;  %v2312_v53 = vld [vmem:[%s13018_s17 + $0x380] sm:$0xff] }
 0x6e6   :  { %8367 = vmatprep.subr.bf16.mxu0 %v9708_v45 }
 0x6e7   :  { %8281 = vmatpush1.bf16.msra.mxu1 %v8280_v50  ;;  %v2177_v50 = vrot.slane %v2168_v57, %v10375_v26  ;;  %v2262_v57 = vld [vmem:[%s13018_s17 + $0x1f0] sm:$0xff] }
 0x6e8   :  { %8283 = vmatprep.subr.bf16.mxu1 %v8282_v62  ;;  %v2202_v62 = vld [vmem:[%s13018_s17 + $0x10] sm:$0xff] }
 0x6e9   :  { %8369 = vmatpush1.bf16.msra.mxu0 %v8368_v30  ;;  %v8300_v49 = vpack.c.bf16 %v2207_v6, %v2202_v62  ;;  %v2288_v62 = vld [vmem:[%s13018_s17 + $0x2c0] sm:$0xff] }
 0x6ea   :  { %8370 = vmatprep.subr.bf16.mxu0 %v9708_v45 }
 0x6eb   :  { %8285 = vmatpush1.bf16.msra.mxu1 %v8284_v9 }
 0x6ec   :  { %8287 = vmatprep.subr.bf16.mxu1 %v8286_v21 }
 0x6ed   :  { %8372 = vmatpush1.bf16.msra.mxu0 %v8371_v48 }
 0x6ee   :  { %8373 = vmatprep.subr.bf16.mxu0 %v9708_v45 }
 0x6ef   :  { %8289 = vmatpush1.bf16.msra.mxu1 %v8288_v63  ;;  %v2217_v63 = vld [vmem:[%s13018_s17 + $0x88] sm:$0xff] }
 0x6f0   :  { %8291 = vmatprep.subr.bf16.mxu1 %v8290_v7  ;;  %v8304_v41 = vpack.c.bf16 %v2217_v63, %v2212_v51  ;;  %v2308_v51 = vld [vmem:[%s13018_s17 + $0x360] sm:$0xff] }
 0x6f1   :  { %8375 = vmatpush1.bf16.msra.mxu0 %v8374_v54  ;;  %v2223_v54 = vld [vmem:[%s13018_s17 + $0xb8] sm:$0xff] }
 0x6f2   :  { %8376 = vmatprep.subr.bf16.mxu0 %v9708_v45  ;;  %v8306_v7 = vpack.c.bf16 %v2228_v39, %v2223_v54  ;;  %v2307_v54 = vld [vmem:[%s13018_s17 + $0x358] sm:$0xff]  ;;  %v2313_v39 = vld [vmem:[%s13018_s17 + $0x388] sm:$0xff] }
 0x6f3   :  { %8293 = vmatpush1.bf16.msra.mxu1 %v8292_v59  ;;  %v2233_v59 = vld [vmem:[%s13018_s17 + $0x108] sm:$0xff] }
 0x6f5   :  { %8378 = vmatpush1.bf16.msra.mxu0 %v8377_v40  ;;  %v8310_v40 = vpack.c.bf16 %v2238_v33, %v2233_v59  ;;  %v2317_v59 = vld [vmem:[%s13018_s17 + $0x3a8] sm:$0xff] }
 0x6f6   :  { %8379 = vmatprep.subr.bf16.mxu0 %v9708_v45  ;;  %v8344_v33 = vpack.c.bf16 %v2317_v59, %v2312_v53 }
 0x768   :  { %v2131_v61 = vpop.xlane.xlu0 %2130 }
 0x769   :  { %v2139_v27 = vmul.f32 0.0052083335, %v2131_v61  ;;  %v8294_v61 = vpack.c.bf16 %v2316_v46, %v2311_v3  ;;  %v2232_v3 = vld [vmem:[%s13018_s17 + $0x100] sm:$0xff]  ;;  %v2237_v46 = vld [vmem:[%s13018_s17 + $0x128] sm:$0xff] }
 0x76b   :  { %v10890_v36 = vsub.f32 %v10825_v0, %v2139_v27  ;;  %v10893_v43 = vsub.f32 %v10822_v14, %v2139_v27  ;;  %v2315_v27 = vld [vmem:[%s13018_s17 + $0x398] sm:$0xff]  ;;  %8295 = vmatprep.subr.bf16.mxu1 %v8294_v61  ;;  %v2248_v61 = vld [vmem:[%s13018_s17 + $0x180] sm:$0xff] }
 0x76c   :  { %v2137_v4 = vpop.xlane.xlu0 %2136 }
 0x76d   :  { %v2140_v8 = vmul.f32 0.0052083335, %v2137_v4  ;;  %v2145_v12 = vmul.f32 %v10890_v36, %v10890_v36  ;;  %v2146_v1 = vmul.f32 %v10893_v43, %v10893_v43  ;;  %v2314_v4 = vld [vmem:[%s13018_s17 + $0x390] sm:$0xff] }
 0x76f   :  { %v10900_v24 = vsub.f32 %v10830_v28, %v2140_v8  ;;  %v10903_v15 = vsub.f32 %v10833_v52, %v2140_v8  ;;  %v2149_v55 = vsel %vm829_vm3, %v2146_v1, 0.0  ;;  %v2319_v8 = vld [vmem:[%s13018_s17 + $0x3b8] sm:$0xff] }
 0x770   :  { %v2150_v17 = vadd.f32 %v2149_v55, %v2145_v12  ;;  %v8296_v12 = vpack.c.bf16 %v2315_v27, %v2310_v60  ;;  %v8380_v1 = vpack.c.bf16 %v2319_v8, %v2314_v4  ;;  %v2203_v55 = vld [vmem:[%s13018_s17 + $0x18] sm:$0xff]  ;;  %v8312_v27 = vpack.c.bf16 %v2237_v46, %v2232_v3  ;;  %v2242_v8 = vld [vmem:[%s13018_s17 + $0x150] sm:$0xff] }
 0x771   :  { %v2147_v22 = vmul.f32 %v10900_v24, %v10900_v24  ;;  %v2148_v23 = vmul.f32 %v10903_v15, %v10903_v15  ;;  %v2243_v60 = vld [vmem:[%s13018_s17 + $0x158] sm:$0xff] }
 0x772   :  { %2151 = vadd.xlane.f32.xlu1 %v2150_v17  ;;  %8297 = vmatpush1.bf16.msra.mxu1 %v8296_v12  ;;  %v2208_v17 = vld [vmem:[%s13018_s17 + $0x40] sm:$0xff]  ;;  %v8314_v4 = vpack.c.bf16 %v2248_v61, %v2243_v60  ;;  %v2247_v12 = vld [vmem:[%s13018_s17 + $0x178] sm:$0xff] }
 0x773   :  { %v2153_v31 = vsel %vm691_vm1, %v2147_v22, 0.0  ;;  %v2154_v32 = vsel %vm2133_vm5, %v2148_v23, 0.0  ;;  %8381 = vmatpush1.bf16.msra.mxu0 %v8380_v1  ;;  %v8298_v22 = vpack.c.bf16 %v2208_v17, %v2203_v55  ;;  %v2253_v1 = vld [vmem:[%s13018_s17 + $0x1a8] sm:$0xff]  ;;  %v2258_v55 = vld [vmem:[%s13018_s17 + $0x1d0] sm:$0xff]  ;;  %v8316_v17 = vpack.c.bf16 %v2247_v12, %v2242_v8 }
 0x774   :  { %v2155_v37 = vadd.f32 %v2154_v32, %v2153_v31 }
 0x775   :  { %8299 = vmatprep.subr.bf16.mxu1 %v8298_v22  ;;  %v8318_v22 = vpack.c.bf16 %v2258_v55, %v2253_v1 }
 0x776   :  { %2156 = vadd.xlane.f32.xlu1 %v2155_v37 }
 0x7ff   :  { %v2152_v23 = vpop.xlane.xlu1 %2151 }
 0x800   :  { %v2158_v31 = vmul.f32 0.0052083335, %v2152_v23  ;;  %v2252_v23 = vld [vmem:[%s13018_s17 + $0x1a0] sm:$0xff] }
 0x802   :  { %v2160_v32 = vadd.f32 1e-05, %v2158_v31  ;;  %v2257_v31 = vld [vmem:[%s13018_s17 + $0x1c8] sm:$0xff] }
 0x803   :  { %v2157_v37 = vpop.xlane.xlu1 %2156 }
 0x804   :  { %9475 = vrsqrt.f32 %v2160_v32  ;;  %v2159_v42 = vmul.f32 0.0052083335, %v2157_v37  ;;  %v2263_v32 = vld [vmem:[%s13018_s17 + $0x1f8] sm:$0xff]  ;;  %v2268_v37 = vld [vmem:[%s13018_s17 + $0x220] sm:$0xff] }
 0x806   :  { %v2161_v47 = vadd.f32 1e-05, %v2159_v42  ;;  %v8320_v42 = vpack.c.bf16 %v2257_v31, %v2252_v23 }
 0x808   :  { %9477 = vrsqrt.f32 %v2161_v47  ;;  %v8322_v47 = vpack.c.bf16 %v2268_v37, %v2263_v32 }
 0x80e   :  { %v9476_v56 = vpop.eup %9475 }
 0x80f   :  { %v2164_v25 = vmul.f32 %v9476_v56, %v10890_v36  ;;  %v2165_v30 = vmul.f32 %v9476_v56, %v10893_v43  ;;  %v8324_v56 = vpack.c.bf16 %v2267_v58, %v2262_v57 }
 0x811   :  { %v2181_v2 = vmul.f32 %v2177_v50, %v2165_v30  ;;  %v2180_v9 = vmul.f32 %v2173_v5, %v2164_v25  ;;  %v2272_v30 = vld [vmem:[%s13018_s17 + $0x240] sm:$0xff] }
 0x812   :  { %v9478_v48 = vpop.eup %9477 }
 0x813   :  { %v2197_v13 = vadd.f32 %v2193_v38, %v2181_v2  ;;  %v10960_v36 = vadd.f32 %v2189_v16, %v2180_v9  ;;  %v2167_v43 = vmul.f32 %v9478_v48, %v10903_v15  ;;  %v2166_v21 = vmul.f32 %v9478_v48, %v10900_v24  ;;  %v2282_v9 = vld [vmem:[%s13018_s17 + $0x290] sm:$0xff] }
 0x814   :  { %v2298_v48 = vld [vmem:[%s13018_s17 + $0x310] sm:$0xff] }
 0x815   :  { %7229 = vmatprep.mubr.msk.f32.mxu1 %vm829_vm3, %v2197_v13  ;;  %7233 = vmatprep.mubr.msk.f32.mxu0 %vm829_vm3, %v2197_v13  ;;  %v2183_v11 = vmul.f32 %v2177_v50, %v2167_v43  ;;  %v2182_v19 = vmul.f32 %v2173_v5, %v2166_v21  ;;  %v2273_v5 = vld [vmem:[%s13018_s17 + $0x248] sm:$0xff]  ;;  %v2278_v50 = vld [vmem:[%s13018_s17 + $0x270] sm:$0xff]  ;;  %v2292_v43 = vld [vmem:[%s13018_s17 + $0x2e0] sm:$0xff] }
 0x816   :  { %2391 = vmatmul.mubr.f32.vlgmr.msra.gmra.mrb[24].mxu1 %v10960_v36  ;;  %2545 = vmatmul.mubr.f32.vlgmr.msra.gmra.mrb[12].mxu0 %v10960_v36  ;;  %v8326_v25 = vpack.c.bf16 %v2278_v50, %v2273_v5  ;;  %v2297_v21 = vld [vmem:[%s13018_s17 + $0x308] sm:$0xff] }
 0x817   :  { %8301 = vmatpush1.bf16.msra.mxu1 %v8300_v49  ;;  %v10972_v24 = vadd.f32 %v2193_v38, %v2183_v11  ;;  %v10974_v15 = vadd.f32 %v2189_v16, %v2182_v19  ;;  %v2277_v16 = vld [vmem:[%s13018_s17 + $0x268] sm:$0xff]  ;;  %v2283_v38 = vld [vmem:[%s13018_s17 + $0x298] sm:$0xff]  ;;  %v8332_v49 = vpack.c.bf16 %v2287_v18, %v2282_v9  ;;  %v8336_v63 = vpack.c.bf16 %v2297_v21, %v2292_v43  ;;  %v2302_v19 = vld [vmem:[%s13018_s17 + $0x330] sm:$0xff] }
 0x818   :  { %8303 = vmatprep.subr.bf16.mxu1 %v8302_v44  ;;  %v8328_v6 = vpack.c.bf16 %v2277_v16, %v2272_v30  ;;  %v8330_v2 = vpack.c.bf16 %v2288_v62, %v2283_v38  ;;  %v2303_v44 = vld [vmem:[%s13018_s17 + $0x338] sm:$0xff]  ;;  %v11082_v16 = vld [vmem:[%s13026_s3 + $0x8] sm:$0x3]  ;;  %v11085_v38 = vld [vmem:[%s13026_s3] sm:$0xff] }
 0x819   :  { %7230 = vmatprep.mubr.msk.f32.mxu1 %vm829_vm3, %v10972_v24  ;;  %7234 = vmatprep.mubr.msk.f32.mxu0 %vm829_vm3, %v10972_v24  ;;  %v8338_v11 = vpack.c.bf16 %v2308_v51, %v2303_v44 }
 0x81a   :  { %2397 = vmatmul.mubr.f32.gmra.mrb[26].mxu1 %v10974_v15  ;;  %2550 = vmatmul.mubr.f32.gmra.mrb[14].mxu0 %v10974_v15 }
 0x81b   :  { %8305 = vmatpush1.bf16.msra.mxu1 %v8304_v41  ;;  %7231 = vmatprep.mubr.msk.f32.mxu1 %vm829_vm3, %v2197_v13  ;;  %v8334_v13 = vpack.c.bf16 %v2298_v48, %v2293_v20  ;;  %v2318_v41 = vld [vmem:[%s13018_s17 + $0x3b0] sm:$0xff] }
 0x81c   :  { %8307 = vmatprep.subr.bf16.mxu1 %v8306_v7  ;;  %v8340_v7 = vpack.c.bf16 %v2307_v54, %v2302_v19  ;;  %v8342_v10 = vpack.c.bf16 %v2318_v41, %v2313_v39 }
 0x81f   :  { %8309 = vmatpush1.bf16.msra.mxu1 %v8308_v34 }
 0x820   :  { %8311 = vmatprep.subr.bf16.mxu1 %v8310_v40 }
 0x823   :  { %8313 = vmatpush1.bf16.msra.mxu1 %v8312_v27 }
 0x824   :  { %8315 = vmatprep.subr.bf16.mxu1 %v8314_v4 }
 0x827   :  { %8317 = vmatpush1.bf16.msra.mxu1 %v8316_v17 }
 0x828   :  { %8319 = vmatprep.subr.bf16.mxu1 %v8318_v22 }
 0x82b   :  { %8321 = vmatpush1.bf16.msra.mxu1 %v8320_v42  ;;  %v13023_v42 = vmov 0 }
 0x82c   :  { %8323 = vmatprep.subr.bf16.mxu1 %v8322_v47  ;;  %v13024_v42 = vsel %vm11058_vm8, 4294967295, %v13023_v42 }
 0x82d   :  { %13025 = vst [vmem:[#allocation34_spill] sm:$0xff] %v13024_v42 }
 0x82f   :  { %8325 = vmatpush1.bf16.msra.mxu1 %v8324_v56 }
 0x830   :  { %8327 = vmatprep.subr.bf16.mxu1 %v8326_v25 }
 0x833   :  { %8329 = vmatpush1.bf16.msra.mxu1 %v8328_v6 }
 0x834   :  { %8331 = vmatprep.subr.bf16.mxu1 %v8330_v2 }
 0x837   :  { %8333 = vmatpush1.bf16.msra.mxu1 %v8332_v49 }
 0x838   :  { %8335 = vmatprep.subr.bf16.mxu1 %v8334_v13 }
 0x83b   :  { %8337 = vmatpush1.bf16.msra.mxu1 %v8336_v63 }
 0x83c   :  { %8339 = vmatprep.subr.bf16.mxu1 %v8338_v11 }
 0x83f   :  { %8341 = vmatpush1.bf16.msra.mxu1 %v8340_v7 }
 0x840   :  { %8343 = vmatprep.subr.bf16.mxu1 %v8342_v10 }
 0x843   :  { %8345 = vmatpush1.bf16.msra.mxu1 %v8344_v33 }
 0x846   :  { %2468 = vmatmul.mubr.f32.vlgmr.msra.gmra.mrb[28].mxu1 %v10960_v36 }
 0x847   :  { %7232 = vmatprep.mubr.msk.f32.mxu1 %vm829_vm3, %v10972_v24 }
 0x84a   :  { %2474 = vmatmul.mubr.f32.gmra.mrb[30].mxu1 %v10974_v15 }
 0x8e9   :  { %v2392_v34 = vpop.f32.mrb[24].mxu1  ;;  %v2546_v40 = vpop.f32.mrb[12].mxu0 }
 0x8ea   :  { %v2555_v3 = vmul.f32 0.125, %v2392_v34  ;;  %v11025_v46 = vpop.f32.mrb[25].mxu1  ;;  %v2548_v60 = vpop.f32.mrb[13].mxu0 }
 0x8ec   :  { %2760 = vrot.lane.b32.xlu1 %v2555_v3, %s9709_s29  ;;  %7494 = vmatprep.mubr.msk.f32.mxu1 %vm829_vm3, %v2555_v3 }
 0x8ed   :  { %v2398_v61 = vpop.f32.mrb[26].mxu1  ;;  %v2551_v27 = vpop.f32.mrb[14].mxu0 }
 0x8ee   :  { %v2557_v4 = vmul.f32 0.125, %v2398_v61  ;;  %v8412_v36 = vpack.c.bf16 %v2551_v27, %v2546_v40  ;;  %v11029_v8 = vpop.f32.mrb[27].mxu1  ;;  %v2553_v24 = vpop.f32.mrb[15].mxu0 }
 0x8ef   :  { %v9433_v15 = vpack.i.bf16 %v11029_v8, %v11025_v46 }
 0x8f0   :  { %2762 = vrot.lane.b32.xlu1 %v2557_v4, %s9709_s29 }
 0x8f1   :  { %9434 = vrot.lane.b32.xlu0 %v9433_v15, %s9709_s29 }
 0x919   :  { %v11035_v12 = vpop.f32.mrb[28].mxu1 }
 0x91a   :  { %v11037_v1 = vpop.f32.mrb[29].mxu1 }
 0x91d   :  { %v11039_v55 = vpop.f32.mrb[30].mxu1 }
 0x91e   :  { %v9443_v22 = vpack.i.bf16 %v11039_v55, %v11035_v12  ;;  %v8394_v23 = vpack.c.bf16 %v11039_v55, %v11035_v12  ;;  %v11051_v31 = vpop.f32.mrb[31].mxu1 }
 0x91f   :  { %v9438_v32 = vpack.i.bf16 %v11051_v31, %v11037_v1  ;;  %v8388_v37 = vpack.c.bf16 %v11051_v31, %v11037_v1 }
 0x920   :  { %8396 = vmatprep.subr.msk.bf16.mxu0 %vm11043_vm6, %v8394_v23 }
 0x921   :  { %8399 = vmatpush3.bf16.xpose.msk.msra.mxu0 %vm11043_vm6, %v8394_v23 }
 0x922   :  { %8414 = vmatprep.subr.msk.bf16.mxu0 %vm11058_vm8, %v8412_v36 }
 0x95e   :  { %v2761_v47 = vpop.permute.xlu1 %2760 }
 0x95f   :  { %7508 = vmatprep.mubr.msk.f32.mxu0 %vm829_vm3, %v2761_v47 }
 0x962   :  { %v2763_v57 = vpop.permute.xlu1 %2762 }
 0x963   :  { %v9435_v58 = vpop.permute.xlu0 %9434  ;;  %7509 = vmatmul.mubr.msk.f32.vlgmr.msra.gmra.mrb[16].mxu0 %vm829_vm3, %v2763_v57 }
 0x964   :  { %v9437_v5 = vunpack.i.h.bf16 %v9435_v58  ;;  %v9436_v50 = vunpack.i.l.bf16 %v9435_v58  ;;  %8417 = vmatpush3.bf16.msk.msra.mxu0 %vm11058_vm8, %v8412_v36 }
 0x966   :  { %v8382_v56 = vpack.c.bf16 %v9437_v5, %v9436_v50 }
 0x968   :  { %8384 = vmatprep.subr.msk.bf16.mxu1 %vm11043_vm6, %v8382_v56 }
 0x969   :  { %8387 = vmatpush3.bf16.xpose.msk.msra.mxu1 %vm11043_vm6, %v8382_v56 }
 0x96a   :  { %8390 = vmatprep.subr.msk.bf16.mxu1 %vm11058_vm8, %v8388_v37 }
 0x970   :  { %7495 = vmatmul.mubr.msk.f32.vlgmr.msra.gmra.mrb[32].mxu1 %vm829_vm3, %v2557_v4 }
 0x971   :  { %8393 = vmatpush3.bf16.msk.msra.mxu1 %vm11058_vm8, %v8388_v37 }
 0xa36   :  { %v7510_v25 = vpop.f32.mrb[16].mxu0 }
 0xa37   :  { %v2840_v30 = vpop.f32.mrb[17].mxu0  ;;  %v2846_v49 = vadd.f32 %v7510_v25, %v11082_v16 }
 0xa38   :  { %v2841_v18 = vadd.f32 %v2840_v30, %v11085_v38 }
 0xa39   :  { %v2852_v43 = vsel %vm2654_vm9, %v2846_v49, -inf }
 0xa3a   :  { %v2849_v13 = vsel %vm2650_vm10, %v2841_v18, -inf }
 0xa43   :  { %v7496_v62 = vpop.f32.mrb[32].mxu1 }
 0xa44   :  { %v2647_v6 = vadd.f32 %v7496_v62, %v11082_v16  ;;  %v2641_v2 = vpop.f32.mrb[33].mxu1  ;;  %v2556_v62 = vmul.f32 0.125, %v11025_v46 }
 0xa45   :  { %v2642_v9 = vadd.f32 %v2641_v2, %v11085_v38 }
 0xa46   :  { %v2655_v20 = vsel %vm2654_vm9, %v2647_v6, -inf }
 0xa47   :  { %2656 = vmax.xlane.f32.xlu0 %v2655_v20  ;;  %v2651_v48 = vsel %vm2650_vm10, %v2642_v9, -inf }
 0xa48   :  { %2652 = vmax.xlane.f32.xlu1 %v2651_v48 }
 0xa4b   :  { %2850 = vmax.xlane.f32.xlu0 %v2849_v13 }
 0xa4f   :  { %2853 = vmax.xlane.f32.xlu0 %v2852_v43 }
 0xad4   :  { %v2657_v21 = vpop.xlane.xlu0 %2656 }
 0xad5   :  { %v2659_v44 = vsub.f32 %v2647_v6, %v2657_v21  ;;  %v2653_v51 = vpop.xlane.xlu1 %2652  ;;  %v2558_v6 = vmul.f32 0.125, %v11029_v8 }
 0xad6   :  { %v2658_v11 = vsub.f32 %v2642_v9, %v2653_v51 }
 0xad7   :  { %v2662_v63 = vmul.f32 1.442695, %v2659_v44 }
 0xad8   :  { %v2851_v19 = vpop.xlane.xlu0 %2850  ;;  %v2660_v39 = vmul.f32 1.442695, %v2658_v11 }
 0xad9   :  { %9479 = vpow2.f32 %v2662_v63  ;;  %v2855_v54 = vsub.f32 %v2841_v18, %v2851_v19 }
 0xadb   :  { %v2857_v41 = vmul.f32 1.442695, %v2855_v54 }
 0xadc   :  { %v2854_v7 = vpop.xlane.xlu0 %2853 }
 0xadd   :  { %9481 = vpow2.f32 %v2857_v41  ;;  %v2856_v10 = vsub.f32 %v2846_v49, %v2854_v7  ;;  %v3174_v41 = vld [vmem:[%s13027_s8 + $0x8] sm:$0xff]  ;;  %v3176_v7 = vld [vmem:[%s13027_s8 + $0x18] sm:$0xff] }
 0xade   :  { %9483 = vpow2.f32 %v2660_v39 }
 0xadf   :  { %v2859_v53 = vmul.f32 1.442695, %v2856_v10  ;;  %v8418_v10 = vpack.c.bf16 %v3176_v7, %v3174_v41  ;;  %v3203_v41 = vld [vmem:[%s13027_s8 + $0xf0] sm:$0xff]  ;;  %v3206_v7 = vld [vmem:[%s13027_s8 + $0x108] sm:$0xff] }
 0xae1   :  { %9485 = vpow2.f32 %v2859_v53  ;;  %8419 = vmatprep.subr.bf16.mxu0 %v8418_v10  ;;  %v3208_v10 = vld [vmem:[%s13027_s8 + $0x118] sm:$0xff] }
 0xae3   :  { %v9480_v59 = vpop.eup %9479 }
 0xae4   :  { %v2667_v33 = vsel %vm2654_vm9, %v9480_v59, 0.0 }
 0xae5   :  { %2668 = vadd.xlane.f32.xlu0 %v2667_v33 }
 0xae7   :  { %v9482_v34 = vpop.eup %9481 }
 0xae8   :  { %v2861_v40 = vsel %vm2650_vm10, %v9482_v34, 0.0  ;;  %v9484_v3 = vpop.eup %9483 }
 0xae9   :  { %2862 = vadd.xlane.f32.xlu1 %v2861_v40  ;;  %v2664_v27 = vsel %vm2650_vm10, %v9484_v3, 0.0  ;;  %v3173_v40 = vld [vmem:[%s13027_s8] sm:$0xff] }
 0xaeb   :  { %v9486_v60 = vpop.eup %9485 }
 0xaec   :  { %v2864_v61 = vsel %vm2654_vm9, %v9486_v60, 0.0 }
 0xaed   :  { %2865 = vadd.xlane.f32.xlu0 %v2864_v61  ;;  %2665 = vadd.xlane.f32.xlu1 %v2664_v27  ;;  %v3178_v61 = vld [vmem:[%s13027_s8 + $0x28] sm:$0xff]  ;;  %v3180_v27 = vld [vmem:[%s13027_s8 + $0x38] sm:$0xff] }
 0xafe   :  { %9439 = vrot.lane.b32.xlu1 %v9438_v32, %s9709_s29 }
 0xb03   :  { %9444 = vrot.lane.b32.xlu0 %v9443_v22, %s9709_s29 }
 0xb72   :  { %v2669_v36 = vpop.xlane.xlu0 %2668 }
 0xb73   :  { %9487 = vrcp.f32 %v2669_v36 }
 0xb76   :  { %v2863_v4 = vpop.xlane.xlu1 %2862 }
 0xb77   :  { %9489 = vrcp.f32 %v2863_v4 }
 0xb7a   :  { %v2666_v24 = vpop.xlane.xlu1 %2665  ;;  %v2866_v15 = vpop.xlane.xlu0 %2865 }
 0xb7b   :  { %9491 = vrcp.f32 %v2666_v24 }
 0xb7c   :  { %9493 = vrcp.f32 %v2866_v15 }
 0xb7d   :  { %v9488_v1 = vpop.eup %9487 }
 0xb7e   :  { %v9440_v23 = vpop.permute.xlu1 %9439  ;;  %v9445_v58 = vpop.permute.xlu0 %9444  ;;  %v2673_v5 = vmul.f32 %v9488_v1, %v9480_v59 }
 0xb7f   :  { %v9442_v37 = vunpack.i.h.bf16 %v9440_v23  ;;  %v9441_v47 = vunpack.i.l.bf16 %v9440_v23  ;;  %v9447_v55 = vunpack.i.h.bf16 %v9445_v58  ;;  %v9446_v22 = vunpack.i.l.bf16 %v9445_v58  ;;  %v3184_v58 = vld [vmem:[%s13027_s8 + $0x58] sm:$0xff] }
 0xb80   :  { %v8422_v23 = vpack.c.bf16 %v3180_v27, %v3178_v61  ;;  %v3209_v27 = vld [vmem:[%s13027_s8 + $0x120] sm:$0xff] }
 0xb81   :  { %v8400_v57 = vpack.c.bf16 %v9442_v37, %v9441_v47  ;;  %v9490_v31 = vpop.eup %9489  ;;  %v8406_v25 = vpack.c.bf16 %v9447_v55, %v9446_v22  ;;  %v3177_v37 = vld [vmem:[%s13027_s8 + $0x20] sm:$0xff]  ;;  %v3179_v47 = vld [vmem:[%s13027_s8 + $0x30] sm:$0xff]  ;;  %v3186_v22 = vld [vmem:[%s13027_s8 + $0x68] sm:$0xff] }
 0xb82   :  { %v2868_v56 = vmul.f32 %v9490_v31, %v9482_v34  ;;  %v8424_v1 = vpack.c.bf16 %v3179_v47, %v3177_v37  ;;  %v3183_v55 = vld [vmem:[%s13027_s8 + $0x50] sm:$0xff]  ;;  %v3213_v37 = vld [vmem:[%s13027_s8 + $0x140] sm:$0xff] }
 0xb83   :  { %8402 = vmatprep.subr.msk.bf16.mxu1 %vm11058_vm8, %v8400_v57  ;;  %v3215_v47 = vld [vmem:[%s13027_s8 + $0x150] sm:$0xff] }
 0xb85   :  { %v9492_v12 = vpop.eup %9491 }
 0xb86   :  { %v2671_v32 = vmul.f32 %v9492_v12, %v9484_v3  ;;  %v9494_v50 = vpop.eup %9493  ;;  %v3175_v3 = vld [vmem:[%s13027_s8 + $0x10] sm:$0xff]  ;;  %v3181_v12 = vld [vmem:[%s13027_s8 + $0x40] sm:$0xff] }
 0xb87   :  { %v2870_v30 = vmul.f32 %v9494_v50, %v9486_v60  ;;  %v8420_v24 = vpack.c.bf16 %v3175_v3, %v3173_v40  ;;  %v3210_v40 = vld [vmem:[%s13027_s8 + $0x128] sm:$0xff]  ;;  %v3212_v3 = vld [vmem:[%s13027_s8 + $0x138] sm:$0xff] }
 0xb88   :  { %7501 = vmatprep.mubr.msk.f32.mxu1 %vm2650_vm10, %v2671_v32  ;;  %v3188_v32 = vld [vmem:[%s13027_s8 + $0x78] sm:$0xff]  ;;  %v8454_v61 = vpack.c.bf16 %v3212_v3, %v3210_v40  ;;  %v3406_v3 = vld [vmem:[%s13029_s19 + $0x60] sm:$0xff] }
 0xb89   :  { %7502 = vmatmul.mubr.msk.f32.vlgmr.msra.gmra.mrb[34].mxu1 %vm2650_vm10, %v2673_v5  ;;  %v8428_v5 = vpack.c.bf16 %v3183_v55, %v3181_v12  ;;  %v8430_v50 = vpack.c.bf16 %v3188_v32, %v3186_v22  ;;  %v3219_v55 = vld [vmem:[%s13027_s8 + $0x170] sm:$0xff]  ;;  %v3413_v40 = vld [vmem:[%s13029_s19 + $0x98] sm:$0xff] }
 0xb8a   :  { %8405 = vmatpush3.bf16.msk.msra.mxu1 %vm11058_vm8, %v8400_v57  ;;  %7515 = vmatprep.mubr.msk.f32.mxu1 %vm2650_vm10, %v2868_v56  ;;  %v3182_v57 = vld [vmem:[%s13027_s8 + $0x48] sm:$0xff]  ;;  %v3185_v56 = vld [vmem:[%s13027_s8 + $0x60] sm:$0xff] }
 0xb8b   :  { %8408 = vmatprep.subr.msk.bf16.mxu1 %vm11043_vm6, %v8406_v25  ;;  %v8426_v31 = vpack.c.bf16 %v3184_v58, %v3182_v57  ;;  %v8460_v57 = vpack.c.bf16 %v3215_v47, %v3213_v37  ;;  %v3218_v58 = vld [vmem:[%s13027_s8 + $0x168] sm:$0xff]  ;;  %v3425_v47 = vld [vmem:[%s13029_s19 + $0xf8] sm:$0xff] }
 0xb8c   :  { %v3419_v37 = vld [vmem:[%s13029_s19 + $0xc8] sm:$0xff] }
 0xb8d   :  { %7516 = vmatmul.mubr.msk.f32.vlgmr.msra.gmra.mrb[36].mxu1 %vm2650_vm10, %v2870_v30  ;;  %v3190_v30 = vld [vmem:[%s13027_s8 + $0x88] sm:$0xff] }
 0xb8e   :  { %7522 = vmatprep.mubr.msk.f32.mxu1 %vm829_vm3, %v2556_v62  ;;  %v3192_v62 = vld [vmem:[%s13027_s8 + $0x98] sm:$0xff] }
 0xb93   :  { %8411 = vmatpush3.bf16.xpose.msk.msra.mxu1 %vm11043_vm6, %v8406_v25  ;;  %v3187_v25 = vld [vmem:[%s13027_s8 + $0x70] sm:$0xff] }
 0xb9a   :  { %7523 = vmatmul.mubr.msk.f32.vlgmr.msra.gmra.mrb[38].mxu1 %vm829_vm3, %v2558_v6  ;;  %v8432_v6 = vpack.c.bf16 %v3187_v25, %v3185_v56 }
 0xc5c   :  { %v7503_v2 = vpop.f32.mrb[34].mxu1 }
 0xc5d   :  { %2759 = vst.msk [vmem:[#allocation2 + $0x10] sm:$0x3] %vm2133_vm5, %v7503_v2  ;;  %v2749_v9 = vpop.f32.mrb[35].mxu1  ;;  %v8434_v2 = vpack.c.bf16 %v3192_v62, %v3190_v30  ;;  %v3308_v62 = vld [vmem:[%s13028_s14] sm:$0x3] }
 0xc5e   :  { %2758 = vst.msk [vmem:[#allocation2] sm:$0xff] %vm829_vm3, %v2749_v9  ;;  %v3189_v9 = vld [vmem:[%s13027_s8 + $0x80] sm:$0xff] }
 0xc60   :  { %v7517_v18 = vpop.f32.mrb[36].mxu1 }
 0xc61   :  { %v2951_v20 = vpop.f32.mrb[37].mxu1 }
 0xc6d   :  { %v7524_v46 = vpop.f32.mrb[38].mxu1 }
 0xc6e   :  { %v3058_v48 = vadd.f32 %v7524_v46, %v11082_v16  ;;  %v3052_v49 = vpop.f32.mrb[39].mxu1  ;;  %v3196_v46 = vld [vmem:[%s13027_s8 + $0xb8] sm:$0xff] }
 0xc6f   :  { %v3053_v13 = vadd.f32 %v3052_v49, %v11085_v38 }
 0xc70   :  { %v3064_v43 = vsel %vm2654_vm9, %v3058_v48, -inf }
 0xc71   :  { %3065 = vmax.xlane.f32.xlu0 %v3064_v43  ;;  %v3061_v8 = vsel %vm2650_vm10, %v3053_v13, -inf  ;;  %v3195_v43 = vld [vmem:[%s13027_s8 + $0xb0] sm:$0xff] }
 0xc72   :  { %3062 = vmax.xlane.f32.xlu1 %v3061_v8  ;;  %v3198_v8 = vld [vmem:[%s13027_s8 + $0xc8] sm:$0xff] }
 0xcfe   :  { %v3066_v21 = vpop.xlane.xlu0 %3065 }
 0xcff   :  { %v3068_v44 = vsub.f32 %v3058_v48, %v3066_v21  ;;  %v3063_v51 = vpop.xlane.xlu1 %3062  ;;  %v3200_v21 = vld [vmem:[%s13027_s8 + $0xd8] sm:$0xff] }
 0xd00   :  { %v3067_v63 = vsub.f32 %v3053_v13, %v3063_v51  ;;  %v3193_v13 = vld [vmem:[%s13027_s8 + $0xa0] sm:$0xff]  ;;  %v8442_v51 = vpack.c.bf16 %v3200_v21, %v3198_v8 }
 0xd01   :  { %v3071_v11 = vmul.f32 1.442695, %v3068_v44  ;;  %v8440_v44 = vpack.c.bf16 %v3195_v43, %v3193_v13 }
 0xd02   :  { %v3069_v19 = vmul.f32 1.442695, %v3067_v63  ;;  %v3197_v63 = vld [vmem:[%s13027_s8 + $0xc0] sm:$0xff] }
 0xd03   :  { %9495 = vpow2.f32 %v3071_v11  ;;  %v3199_v11 = vld [vmem:[%s13027_s8 + $0xd0] sm:$0xff] }
 0xd04   :  { %9497 = vpow2.f32 %v3069_v19  ;;  %v3202_v19 = vld [vmem:[%s13027_s8 + $0xe8] sm:$0xff] }
 0xd0d   :  { %v9496_v16 = vpop.eup %9495 }
 0xd0e   :  { %v9498_v54 = vpop.eup %9497  ;;  %v3076_v38 = vsel %vm2654_vm9, %v9496_v16, 0.0 }
 0xd0f   :  { %3077 = vadd.xlane.f32.xlu0 %v3076_v38  ;;  %v3073_v39 = vsel %vm2650_vm10, %v9498_v54, 0.0 }
 0xd10   :  { %3074 = vadd.xlane.f32.xlu1 %v3073_v39  ;;  %v3201_v39 = vld [vmem:[%s13027_s8 + $0xe0] sm:$0xff] }
 0xd21   :  { %2962 = vrot.lane.b32.xlu1 %v2951_v20, %s9709_s29  ;;  %v3194_v20 = vld [vmem:[%s13027_s8 + $0xa8] sm:$0xff] }
 0xd22   :  { %v8438_v49 = vpack.c.bf16 %v3196_v46, %v3194_v20 }
 0xd25   :  { %2964 = vrot.lane.b32.xlu0 %v7517_v18, %s9709_s29  ;;  %v3191_v18 = vld [vmem:[%s13027_s8 + $0x90] sm:$0xff] }
 0xd26   :  { %v8436_v48 = vpack.c.bf16 %v3191_v18, %v3189_v9  ;;  %v3313_v18 = vrot.slane %v3308_v62, %v10379_v35 }
 0xd9c   :  { %v3078_v53 = vpop.xlane.xlu0 %3077 }
 0xd9d   :  { %9499 = vrcp.f32 %v3078_v53  ;;  %v3075_v59 = vpop.xlane.xlu1 %3074  ;;  %v8448_v53 = vpack.c.bf16 %v3203_v41, %v3201_v39  ;;  %v3397_v39 = vld [vmem:[%s13029_s19 + $0x18] sm:$0xff]  ;;  %v3403_v41 = vld [vmem:[%s13029_s19 + $0x48] sm:$0xff] }
 0xd9e   :  { %9501 = vrcp.f32 %v3075_v59  ;;  %v8450_v59 = vpack.c.bf16 %v3208_v10, %v3206_v7  ;;  %v8514_v10 = vpack.c.bf16 %v3403_v41, %v3397_v39  ;;  %v3461_v39 = vld [vmem:[%s13029_s19 + $0x218] sm:$0xff] }
 0xd9f   :  { %v3457_v41 = vld [vmem:[%s13029_s19 + $0x1f8] sm:$0xff] }
 0xda0   :  { %v2965_v33 = vpop.permute.xlu0 %2964 }
 0xda1   :  { %2971 = vst.msk [vmem:[#allocation2 + $0x10] sm:$0x3] %vm2970_vm11, %v2965_v33  ;;  %v2963_v34 = vpop.permute.xlu1 %2962  ;;  %v3205_v33 = vld [vmem:[%s13027_s8 + $0x100] sm:$0xff] }
 0xda2   :  { %2969 = vst.msk [vmem:[#allocation2] sm:$0xff] %vm2968_vm12, %v2963_v34  ;;  %v3207_v34 = vld [vmem:[%s13027_s8 + $0x110] sm:$0xff] }
 0xda7   :  { %v9500_v60 = vpop.eup %9499 }
 0xda8   :  { %v9502_v4 = vpop.eup %9501  ;;  %v3082_v15 = vmul.f32 %v9500_v60, %v9496_v16  ;;  %v3204_v16 = vld [vmem:[%s13027_s8 + $0xf8] sm:$0xff]  ;;  %v8452_v60 = vpack.c.bf16 %v3207_v34, %v3205_v33  ;;  %v3171_v30 = vld [vmem:[#allocation2 + $0x10] sm:$0x3]  ;;  %v3407_v33 = vld [vmem:[%s13029_s19 + $0x68] sm:$0xff] }
 0xda9   :  { %v3080_v36 = vmul.f32 %v9502_v4, %v9498_v54  ;;  %v8444_v54 = vpack.c.bf16 %v3199_v11, %v3197_v63  ;;  %v8446_v38 = vpack.c.bf16 %v3204_v16, %v3202_v19  ;;  %v3211_v4 = vld [vmem:[%s13027_s8 + $0x130] sm:$0xff]  ;;  %v3169_v56 = vld [vmem:[#allocation2] sm:$0xff]  ;;  %v3395_v11 = vld [vmem:[%s13029_s19 + $0x8] sm:$0xff] }
 0xdaa   :  { %v3401_v19 = vld [vmem:[%s13029_s19 + $0x38] sm:$0xff]  ;;  %v3394_v16 = vld [vmem:[%s13029_s19] sm:$0xff] }
 0xdab   :  { %7529 = vmatprep.mubr.msk.f32.mxu0 %vm2650_vm10, %v3080_v36  ;;  %v8456_v36 = vpack.c.bf16 %v3211_v4, %v3209_v27  ;;  %v3409_v4 = vld [vmem:[%s13029_s19 + $0x78] sm:$0xff] }
 0xdac   :  { %7530 = vmatmul.mubr.msk.f32.vlgmr.msra.gmra.mrb[18].mxu0 %vm2650_vm10, %v3082_v15  ;;  %v3216_v15 = vld [vmem:[%s13027_s8 + $0x158] sm:$0xff] }
 0xdad   :  { %8421 = vmatpush1.bf16.msra.mxu0 %v8420_v24  ;;  %v3214_v24 = vld [vmem:[%s13027_s8 + $0x148] sm:$0xff] }
 0xdae   :  { %8423 = vmatprep.subr.bf16.mxu0 %v8422_v23  ;;  %v8458_v23 = vpack.c.bf16 %v3216_v15, %v3214_v24  ;;  %v3408_v24 = vld [vmem:[%s13029_s19 + $0x70] sm:$0xff] }
 0xdb1   :  { %8425 = vmatpush1.bf16.msra.mxu0 %v8424_v1  ;;  %v3220_v1 = vld [vmem:[%s13027_s8 + $0x178] sm:$0xff] }
 0xdb2   :  { %8427 = vmatprep.subr.bf16.mxu0 %v8426_v31  ;;  %v3217_v31 = vld [vmem:[%s13027_s8 + $0x160] sm:$0xff]  ;;  %v8462_v12 = vpack.c.bf16 %v3220_v1, %v3218_v58  ;;  %v8474_v58 = vpack.c.bf16 %v3425_v47, %v3419_v37  ;;  %v3472_v47 = vld [vmem:[%s13029_s19 + $0x270] sm:$0xff] }
 0xdb3   :  { %v8464_v22 = vpack.c.bf16 %v3219_v55, %v3217_v31  ;;  %v3418_v1 = vld [vmem:[%s13029_s19 + $0xc0] sm:$0xff]  ;;  %v3424_v31 = vld [vmem:[%s13029_s19 + $0xf0] sm:$0xff]  ;;  %v3427_v55 = vld [vmem:[%s13029_s19 + $0x108] sm:$0xff] }
 0xdb4   :  { %v3466_v37 = vld [vmem:[%s13029_s19 + $0x240] sm:$0xff] }
 0xdb5   :  { %8429 = vmatpush1.bf16.msra.mxu0 %v8428_v5 }
 0xdb6   :  { %8431 = vmatprep.subr.bf16.mxu0 %v8430_v50 }
 0xdb9   :  { %8433 = vmatpush1.bf16.msra.mxu0 %v8432_v6 }
 0xdba   :  { %8435 = vmatprep.subr.bf16.mxu0 %v8434_v2  ;;  %v3317_v2 = vrot.slane %v3308_v62, %v10375_v26 }
 0xdbd   :  { %8437 = vmatpush1.bf16.msra.mxu0 %v8436_v48 }
 0xdbe   :  { %8439 = vmatprep.subr.bf16.mxu0 %v8438_v49 }
 0xdc1   :  { %8441 = vmatpush1.bf16.msra.mxu0 %v8440_v44 }
 0xdc2   :  { %8443 = vmatprep.subr.bf16.mxu0 %v8442_v51 }
 0xdc5   :  { %8445 = vmatpush1.bf16.msra.mxu0 %v8444_v54  ;;  %v8466_v54 = vpack.c.bf16 %v3401_v19, %v3395_v11  ;;  %v3448_v11 = vld [vmem:[%s13029_s19 + $0x1b0] sm:$0xff] }
 0xdc6   :  { %8447 = vmatprep.subr.bf16.mxu0 %v8446_v38  ;;  %v3400_v38 = vld [vmem:[%s13029_s19 + $0x30] sm:$0xff] }
 0xdc7   :  { %v8468_v7 = vpack.c.bf16 %v3400_v38, %v3394_v16  ;;  %8467 = vmatprep.subr.bf16.mxu1 %v8466_v54  ;;  %v3444_v19 = vld [vmem:[%s13029_s19 + $0x190] sm:$0xff]  ;;  %v3450_v54 = vld [vmem:[%s13029_s19 + $0x1c0] sm:$0xff]  ;;  %v3455_v38 = vld [vmem:[%s13029_s19 + $0x1e8] sm:$0xff] }
 0xdc9   :  { %8449 = vmatpush1.bf16.msra.mxu0 %v8448_v53  ;;  %v3396_v53 = vld [vmem:[%s13029_s19 + $0x10] sm:$0xff]  ;;  %8469 = vmatpush1.bf16.msra.mxu1 %v8468_v7  ;;  %v3463_v7 = vld [vmem:[%s13029_s19 + $0x228] sm:$0xff] }
 0xdca   :  { %8451 = vmatprep.subr.bf16.mxu0 %v8450_v59  ;;  %v3402_v59 = vld [vmem:[%s13029_s19 + $0x40] sm:$0xff] }
 0xdcb   :  { %v8516_v34 = vpack.c.bf16 %v3402_v59, %v3396_v53  ;;  %v8532_v53 = vpack.c.bf16 %v3450_v54, %v3444_v19  ;;  %v8486_v59 = vpack.c.bf16 %v3461_v39, %v3455_v38  ;;  %v3480_v19 = vld [vmem:[%s13029_s19 + $0x2b0] sm:$0xff]  ;;  %v3491_v39 = vld [vmem:[%s13029_s19 + $0x308] sm:$0xff] }
 0xdcd   :  { %8453 = vmatpush1.bf16.msra.mxu0 %v8452_v60  ;;  %v3412_v60 = vld [vmem:[%s13029_s19 + $0x90] sm:$0xff] }
 0xdce   :  { %8455 = vmatprep.subr.bf16.mxu0 %v8454_v61  ;;  %v8470_v61 = vpack.c.bf16 %v3413_v40, %v3407_v33  ;;  %v8472_v27 = vpack.c.bf16 %v3412_v60, %v3406_v3  ;;  %v3454_v33 = vld [vmem:[%s13029_s19 + $0x1e0] sm:$0xff]  ;;  %v3456_v40 = vld [vmem:[%s13029_s19 + $0x1f0] sm:$0xff]  ;;  %v8534_v3 = vpack.c.bf16 %v3463_v7, %v3457_v41  ;;  %v3497_v41 = vld [vmem:[%s13029_s19 + $0x338] sm:$0xff] }
 0xdcf   :  { %v3462_v60 = vld [vmem:[%s13029_s19 + $0x220] sm:$0xff]  ;;  %v8498_v7 = vpack.c.bf16 %v3497_v41, %v3491_v39  ;;  %v4132_v41 = vld [vmem:[%s13030_s30 + $0x8] sm:$0xff] }
 0xdd0   :  { %8471 = vmatprep.subr.bf16.mxu1 %v8470_v61  ;;  %v3467_v61 = vld [vmem:[%s13029_s19 + $0x248] sm:$0xff] }
 0xdd1   :  { %8457 = vmatpush1.bf16.msra.mxu0 %v8456_v36  ;;  %v3415_v36 = vld [vmem:[%s13029_s19 + $0xa8] sm:$0xff]  ;;  %8473 = vmatpush1.bf16.msra.mxu1 %v8472_v27  ;;  %v3473_v27 = vld [vmem:[%s13029_s19 + $0x278] sm:$0xff] }
 0xdd2   :  { %8459 = vmatprep.subr.bf16.mxu0 %v8458_v23  ;;  %v8518_v15 = vpack.c.bf16 %v3415_v36, %v3409_v4  ;;  %v3414_v23 = vld [vmem:[%s13029_s19 + $0xa0] sm:$0xff]  ;;  %8475 = vmatprep.subr.bf16.mxu1 %v8474_v58  ;;  %v3469_v4 = vld [vmem:[%s13029_s19 + $0x258] sm:$0xff]  ;;  %v3475_v36 = vld [vmem:[%s13029_s19 + $0x288] sm:$0xff] }
 0xdd3   :  { %v3468_v58 = vld [vmem:[%s13029_s19 + $0x250] sm:$0xff] }
 0xdd5   :  { %8461 = vmatpush1.bf16.msra.mxu0 %v8460_v57  ;;  %v8520_v57 = vpack.c.bf16 %v3414_v23, %v3408_v24  ;;  %v8490_v23 = vpack.c.bf16 %v3473_v27, %v3467_v61  ;;  %v3503_v27 = vld [vmem:[%s13029_s19 + $0x368] sm:$0xff] }
 0xdd6   :  { %8463 = vmatprep.subr.bf16.mxu0 %v8462_v12  ;;  %v3421_v12 = vld [vmem:[%s13029_s19 + $0xd8] sm:$0xff] }
 0xdd9   :  { %8465 = vmatpush1.bf16.msra.mxu0 %v8464_v22  ;;  %v3420_v22 = vld [vmem:[%s13029_s19 + $0xd0] sm:$0xff] }
 0xdda   :  { %8515 = vmatprep.subr.bf16.mxu0 %v8514_v10 }
 0xe7f   :  { %v7531_v32 = vpop.f32.mrb[18].mxu0 }
 0xe80   :  { %3168 = vst.msk [vmem:[#allocation2 + $0x18] sm:$0x3] %vm2133_vm5, %v7531_v32  ;;  %v3158_v5 = vpop.f32.mrb[19].mxu0  ;;  %v3426_v32 = vld [vmem:[%s13029_s19 + $0x100] sm:$0xff] }
 0xe81   :  { %3167 = vst.msk [vmem:[#allocation2 + $0x8] sm:$0xff] %vm829_vm3, %v3158_v5  ;;  %v8476_v5 = vpack.c.bf16 %v3424_v31, %v3418_v1  ;;  %v8524_v62 = vpack.c.bf16 %v3426_v32, %v3420_v22  ;;  %v3474_v1 = vld [vmem:[%s13029_s19 + $0x280] sm:$0xff]  ;;  %v8492_v31 = vpack.c.bf16 %v3472_v47, %v3466_v37  ;;  %v3511_v47 = vld [vmem:[%s13029_s19 + $0x3a8] sm:$0xff] }
 0xe83   :  { %8477 = vmatpush1.bf16.msra.mxu1 %v8476_v5 }
 0xe87   :  { %v3172_v25 = vld [vmem:[#allocation2 + $0x18] sm:$0x3] }
 0xe88   :  { %v3170_v50 = vld [vmem:[#allocation2 + $0x8] sm:$0xff] }
 0xe89   :  { %7256 = vmatprep.mubr.msk.f32.mxu0 %vm829_vm3, %v3170_v50  ;;  %v8522_v50 = vpack.c.bf16 %v3427_v55, %v3421_v12  ;;  %v8540_v12 = vpack.c.bf16 %v3474_v1, %v3468_v58  ;;  %v3510_v58 = vld [vmem:[%s13029_s19 + $0x3a0] sm:$0xff] }
 0xe8a   :  { %3292 = vmatmul.mubr.f32.vlgmr.msra.gmra.mrb[20].mxu0 %v3169_v56  ;;  %v3431_v56 = vld [vmem:[%s13029_s19 + $0x128] sm:$0xff] }
 0xe8b   :  { %7257 = vmatprep.mubr.msk.f32.mxu0 %vm829_vm3, %v3172_v25  ;;  %8517 = vmatpush1.bf16.msra.mxu0 %v8516_v34  ;;  %v3437_v25 = vld [vmem:[%s13029_s19 + $0x158] sm:$0xff]  ;;  %v3460_v34 = vld [vmem:[%s13029_s19 + $0x210] sm:$0xff] }
 0xe8c   :  { %8519 = vmatprep.subr.bf16.mxu0 %v8518_v15  ;;  %v8488_v24 = vpack.c.bf16 %v3460_v34, %v3454_v33  ;;  %v8536_v15 = vpack.c.bf16 %v3462_v60, %v3456_v40  ;;  %v3499_v34 = vld [vmem:[%s13029_s19 + $0x348] sm:$0xff]  ;;  %v3492_v40 = vld [vmem:[%s13029_s19 + $0x310] sm:$0xff] }
 0xe8e   :  { %3298 = vmatmul.mubr.f32.gmra.mrb[22].mxu0 %v3171_v30  ;;  %v3430_v30 = vld [vmem:[%s13029_s19 + $0x120] sm:$0xff] }
 0xe8f   :  { %8521 = vmatpush1.bf16.msra.mxu0 %v8520_v57  ;;  %v8538_v57 = vpack.c.bf16 %v3475_v36, %v3469_v4  ;;  %v3509_v4 = vld [vmem:[%s13029_s19 + $0x398] sm:$0xff] }
 0xe90   :  { %8523 = vmatprep.subr.bf16.mxu0 %v8522_v50  ;;  %v8502_v36 = vpack.c.bf16 %v3509_v4, %v3503_v27 }
 0xe93   :  { %8525 = vmatpush1.bf16.msra.mxu0 %v8524_v62 }
 0xf5d   :  { %v3293_v6 = vpop.f32.mrb[20].mxu0 }
 0xf5e   :  { %v3304_v9 = vadd.f32 %v3293_v6, %v10825_v0  ;;  %v3295_v20 = vpop.f32.mrb[21].mxu0  ;;  %v8478_v6 = vpack.c.bf16 %v3437_v25, %v3431_v56 }
 0xf5f   :  { %v3305_v46 = vadd.f32 %v3295_v20, %v10822_v14 }
 0xf60   :  { %v11196_v13 = vadd.f32 %v3313_v18, %v3304_v9  ;;  %v3433_v9 = vld [vmem:[%s13029_s19 + $0x138] sm:$0xff]  ;;  %8479 = vmatprep.subr.bf16.mxu1 %v8478_v6 }
 0xf61   :  { %v11194_v48 = vadd.f32 %v3317_v2, %v3305_v46  ;;  %v3299_v49 = vpop.f32.mrb[22].mxu0  ;;  %v3432_v46 = vld [vmem:[%s13029_s19 + $0x130] sm:$0xff] }
 0xf62   :  { %v3306_v43 = vadd.f32 %v3299_v49, %v10830_v28  ;;  %v3301_v8 = vpop.f32.mrb[23].mxu0  ;;  %v3438_v49 = vld [vmem:[%s13029_s19 + $0x160] sm:$0xff] }
 0xf63   :  { %v3307_v0 = vadd.f32 %v3301_v8, %v10833_v52  ;;  %v3324_v21 = vsel %vm829_vm3, %v11194_v48, 0.0  ;;  %v3449_v8 = vld [vmem:[%s13029_s19 + $0x1b8] sm:$0xff] }
 0xf64   :  { %v11202_v14 = vadd.f32 %v3313_v18, %v3306_v43  ;;  %v3325_v44 = vadd.f32 %v3324_v21, %v11196_v13  ;;  %v3439_v18 = vld [vmem:[%s13029_s19 + $0x168] sm:$0xff]  ;;  %v3445_v21 = vld [vmem:[%s13029_s19 + $0x198] sm:$0xff] }
 0xf65   :  { %v11205_v51 = vadd.f32 %v3317_v2, %v3307_v0  ;;  %v3436_v2 = vld [vmem:[%s13029_s19 + $0x150] sm:$0xff]  ;;  %v8526_v20 = vpack.c.bf16 %v3439_v18, %v3433_v9  ;;  %v3443_v43 = vld [vmem:[%s13029_s19 + $0x188] sm:$0xff] }
 0xf66   :  { %3326 = vadd.xlane.f32.xlu1 %v3325_v44  ;;  %v3328_v28 = vsel %vm691_vm1, %v11202_v14, 0.0  ;;  %v8480_v0 = vpack.c.bf16 %v3436_v2, %v3430_v30  ;;  %v3451_v44 = vld [vmem:[%s13029_s19 + $0x1c8] sm:$0xff] }
 0xf67   :  { %v3329_v52 = vsel %vm2133_vm5, %v11205_v51, 0.0  ;;  %8527 = vmatprep.subr.bf16.mxu0 %v8526_v20  ;;  %v8530_v16 = vpack.c.bf16 %v3451_v44, %v3445_v21  ;;  %v3478_v44 = vld [vmem:[%s13029_s19 + $0x2a0] sm:$0xff] }
 0xf68   :  { %v3330_v63 = vadd.f32 %v3329_v52, %v3328_v28  ;;  %v8528_v28 = vpack.c.bf16 %v3438_v49, %v3432_v46  ;;  %v8482_v52 = vpack.c.bf16 %v3449_v8, %v3443_v43  ;;  %8481 = vmatpush1.bf16.msra.mxu1 %v8480_v0  ;;  %v3479_v8 = vld [vmem:[%s13029_s19 + $0x2a8] sm:$0xff]  ;;  %v3485_v0 = vld [vmem:[%s13029_s19 + $0x2d8] sm:$0xff] }
 0xf69   :  { %v8494_v21 = vpack.c.bf16 %v3485_v0, %v3479_v8  ;;  %v3526_v8 = vld [vmem:[%s13029_s19 + $0x420] sm:$0xff]  ;;  %v3532_v0 = vld [vmem:[%s13029_s19 + $0x450] sm:$0xff] }
 0xf6a   :  { %3331 = vadd.xlane.f32.xlu0 %v3330_v63  ;;  %v3442_v63 = vld [vmem:[%s13029_s19 + $0x180] sm:$0xff]  ;;  %8529 = vmatpush1.bf16.msra.mxu0 %v8528_v28  ;;  %v3484_v28 = vld [vmem:[%s13029_s19 + $0x2d0] sm:$0xff] }
 0xf6b   :  { %v8484_v10 = vpack.c.bf16 %v3448_v11, %v3442_v63  ;;  %8483 = vmatprep.subr.bf16.mxu1 %v8482_v52  ;;  %8531 = vmatprep.subr.bf16.mxu0 %v8530_v16  ;;  %v3481_v52 = vld [vmem:[%s13029_s19 + $0x2b8] sm:$0xff]  ;;  %v8496_v63 = vpack.c.bf16 %v3484_v28, %v3478_v44  ;;  %v3487_v11 = vld [vmem:[%s13029_s19 + $0x2e8] sm:$0xff]  ;;  %v3486_v16 = vld [vmem:[%s13029_s19 + $0x2e0] sm:$0xff] }
 0xf6c   :  { %v8542_v54 = vpack.c.bf16 %v3487_v11, %v3481_v52  ;;  %v8544_v38 = vpack.c.bf16 %v3486_v16, %v3480_v19  ;;  %v3529_v44 = vld [vmem:[%s13029_s19 + $0x438] sm:$0xff]  ;;  %v3535_v28 = vld [vmem:[%s13029_s19 + $0x468] sm:$0xff]  ;;  %v3528_v52 = vld [vmem:[%s13029_s19 + $0x430] sm:$0xff] }
 0xf6d   :  { %8485 = vmatpush1.bf16.msra.mxu1 %v8484_v10  ;;  %v3490_v10 = vld [vmem:[%s13029_s19 + $0x300] sm:$0xff]  ;;  %v8558_v11 = vpack.c.bf16 %v3535_v28, %v3529_v44  ;;  %v3429_v44 = vld [vmem:[%s13029_s19 + $0x118] sm:$0xff]  ;;  %v4137_v28 = vld [vmem:[%s13030_s30 + $0x30] sm:$0xff] }
 0xf6e   :  { %8533 = vmatpush1.bf16.msra.mxu0 %v8532_v53  ;;  %8487 = vmatprep.subr.bf16.mxu1 %v8486_v59  ;;  %v3496_v53 = vld [vmem:[%s13029_s19 + $0x330] sm:$0xff]  ;;  %v3493_v59 = vld [vmem:[%s13029_s19 + $0x318] sm:$0xff]  ;;  %v3534_v19 = vld [vmem:[%s13029_s19 + $0x460] sm:$0xff] }
 0xf6f   :  { %8535 = vmatprep.subr.bf16.mxu0 %v8534_v3  ;;  %v8500_v33 = vpack.c.bf16 %v3496_v53, %v3490_v10  ;;  %v3498_v3 = vld [vmem:[%s13029_s19 + $0x340] sm:$0xff]  ;;  %v8546_v60 = vpack.c.bf16 %v3499_v34, %v3493_v59  ;;  %v8560_v16 = vpack.c.bf16 %v3534_v19, %v3528_v52  ;;  %v4142_v52 = vld [vmem:[%s13030_s30 + $0x58] sm:$0xff] }
 0xf70   :  { %v8548_v61 = vpack.c.bf16 %v3498_v3, %v3492_v40 }
 0xf71   :  { %8489 = vmatpush1.bf16.msra.mxu1 %v8488_v24  ;;  %v3502_v24 = vld [vmem:[%s13029_s19 + $0x360] sm:$0xff] }
 0xf72   :  { %8537 = vmatpush1.bf16.msra.mxu0 %v8536_v15  ;;  %8491 = vmatprep.subr.bf16.mxu1 %v8490_v23  ;;  %v3508_v15 = vld [vmem:[%s13029_s19 + $0x390] sm:$0xff]  ;;  %v3505_v23 = vld [vmem:[%s13029_s19 + $0x378] sm:$0xff] }
 0xf73   :  { %8539 = vmatprep.subr.bf16.mxu0 %v8538_v57  ;;  %v8504_v37 = vpack.c.bf16 %v3508_v15, %v3502_v24  ;;  %v3504_v57 = vld [vmem:[%s13029_s19 + $0x370] sm:$0xff]  ;;  %v8550_v1 = vpack.c.bf16 %v3511_v47, %v3505_v23  ;;  %v3398_v24 = vld [vmem:[%s13029_s19 + $0x20] sm:$0xff] }
 0xf75   :  { %8493 = vmatpush1.bf16.msra.mxu1 %v8492_v31  ;;  %v8552_v31 = vpack.c.bf16 %v3510_v58, %v3504_v57  ;;  %v3404_v57 = vld [vmem:[%s13029_s19 + $0x50] sm:$0xff]  ;;  %v4131_v58 = vld [vmem:[%s13030_s30] sm:$0xff] }
 0xf76   :  { %8541 = vmatpush1.bf16.msra.mxu0 %v8540_v12  ;;  %8495 = vmatprep.subr.bf16.mxu1 %v8494_v21  ;;  %v3515_v12 = vld [vmem:[%s13029_s19 + $0x3c8] sm:$0xff] }
 0xf77   :  { %8543 = vmatprep.subr.bf16.mxu0 %v8542_v54  ;;  %v3399_v54 = vld [vmem:[%s13029_s19 + $0x28] sm:$0xff] }
 0xf79   :  { %8497 = vmatpush1.bf16.msra.mxu1 %v8496_v63  ;;  %v8512_v63 = vpack.c.bf16 %v3532_v0, %v3526_v8 }
 0xf7a   :  { %8545 = vmatpush1.bf16.msra.mxu0 %v8544_v38  ;;  %8499 = vmatprep.subr.bf16.mxu1 %v8498_v7  ;;  %v3405_v38 = vld [vmem:[%s13029_s19 + $0x58] sm:$0xff] }
 0xf7b   :  { %8547 = vmatprep.subr.bf16.mxu0 %v8546_v60  ;;  %v8562_v39 = vpack.c.bf16 %v3405_v38, %v3399_v54  ;;  %v4134_v7 = vld [vmem:[%s13030_s30 + $0x18] sm:$0xff]  ;;  %v3362_v60 = vld [vmem:[%s13031_s12] sm:$0x3]  ;;  %v3428_v38 = vld [vmem:[%s13029_s19 + $0x110] sm:$0xff] }
 0xf7c   :  { %v8610_v10 = vpack.c.bf16 %v4134_v7, %v4132_v41  ;;  %v3371_v27 = vrot.slane %v3362_v60, %v10375_v26  ;;  %v3367_v4 = vrot.slane %v3362_v60, %v10379_v35  ;;  %v3422_v54 = vld [vmem:[%s13029_s19 + $0xe0] sm:$0xff]  ;;  %v3441_v7 = vld [vmem:[%s13029_s19 + $0x178] sm:$0xff] }
 0xf7d   :  { %8501 = vmatpush1.bf16.msra.mxu1 %v8500_v33  ;;  %v3434_v60 = vld [vmem:[%s13029_s19 + $0x140] sm:$0xff] }
 0xf7e   :  { %8549 = vmatpush1.bf16.msra.mxu0 %v8548_v61  ;;  %8503 = vmatprep.subr.bf16.mxu1 %v8502_v36  ;;  %v3378_v61 = vld [vmem:[%s13032_s20] sm:$0x3] }
 0xf7f   :  { %8551 = vmatprep.subr.bf16.mxu0 %v8550_v1  ;;  %v3387_v23 = vrot.slane %v3378_v61, %v10375_v26  ;;  %v3383_v47 = vrot.slane %v3378_v61, %v10379_v35  ;;  %v4133_v1 = vld [vmem:[%s13030_s30 + $0x10] sm:$0xff] }
 0xf80   :  { %v3440_v61 = vld [vmem:[%s13029_s19 + $0x170] sm:$0xff] }
 0xf81   :  { %8505 = vmatpush1.bf16.msra.mxu1 %v8504_v37 }
 0xf82   :  { %8553 = vmatpush1.bf16.msra.mxu0 %v8552_v31  ;;  %v3411_v31 = vld [vmem:[%s13029_s19 + $0x88] sm:$0xff] }
 0xff3   :  { %v3327_v55 = vpop.xlane.xlu1 %3326 }
 0xff4   :  { %v3333_v22 = vmul.f32 0.0052083335, %v3327_v55  ;;  %v3521_v55 = vld [vmem:[%s13029_s19 + $0x3f8] sm:$0xff] }
 0xff6   :  { %v11268_v32 = vsub.f32 %v11196_v13, %v3333_v22  ;;  %v11271_v5 = vsub.f32 %v11194_v48, %v3333_v22  ;;  %v3514_v22 = vld [vmem:[%s13029_s19 + $0x3c0] sm:$0xff] }
 0xff7   :  { %v3332_v50 = vpop.xlane.xlu0 %3331 }
 0xff8   :  { %v3334_v56 = vmul.f32 0.0052083335, %v3332_v50  ;;  %v3339_v25 = vmul.f32 %v11268_v32, %v11268_v32  ;;  %v3340_v30 = vmul.f32 %v11271_v5, %v11271_v5  ;;  %v8506_v50 = vpack.c.bf16 %v3521_v55, %v3515_v12 }
 0xffa   :  { %v11278_v62 = vsub.f32 %v11202_v14, %v3334_v56  ;;  %v11281_v6 = vsub.f32 %v11205_v51, %v3334_v56  ;;  %v3343_v2 = vsel %vm829_vm3, %v3340_v30, 0.0  ;;  %v3520_v56 = vld [vmem:[%s13029_s19 + $0x3f0] sm:$0xff]  ;;  %v3523_v30 = vld [vmem:[%s13029_s19 + $0x408] sm:$0xff]  ;;  %8507 = vmatprep.subr.bf16.mxu1 %v8506_v50 }
 0xffb   :  { %v3344_v9 = vadd.f32 %v3343_v2, %v3339_v25  ;;  %v3517_v25 = vld [vmem:[%s13029_s19 + $0x3d8] sm:$0xff]  ;;  %v8508_v2 = vpack.c.bf16 %v3520_v56, %v3514_v22  ;;  %v4136_v50 = vld [vmem:[%s13030_s30 + $0x28] sm:$0xff] }
 0xffc   :  { %v3341_v18 = vmul.f32 %v11278_v62, %v11278_v62  ;;  %v3342_v20 = vmul.f32 %v11281_v6, %v11281_v6  ;;  %v3417_v22 = vld [vmem:[%s13029_s19 + $0xb8] sm:$0xff] }
 0xffd   :  { %3345 = vadd.xlane.f32.xlu1 %v3344_v9  ;;  %v8554_v9 = vpack.c.bf16 %v3523_v30, %v3517_v25  ;;  %8509 = vmatpush1.bf16.msra.mxu1 %v8508_v2  ;;  %v4138_v56 = vld [vmem:[%s13030_s30 + $0x38] sm:$0xff]  ;;  %v8612_v30 = vpack.c.bf16 %v4133_v1, %v4131_v58 }
 0xffe   :  { %v3347_v46 = vsel %vm691_vm1, %v3341_v18, 0.0  ;;  %v3348_v49 = vsel %vm2133_vm5, %v3342_v20, 0.0  ;;  %v3516_v18 = vld [vmem:[%s13029_s19 + $0x3d0] sm:$0xff]  ;;  %v3522_v20 = vld [vmem:[%s13029_s19 + $0x400] sm:$0xff]  ;;  %v8614_v8 = vpack.c.bf16 %v4138_v56, %v4136_v50  ;;  %v3465_v58 = vld [vmem:[%s13029_s19 + $0x238] sm:$0xff] }
 0xfff   :  { %v3349_v43 = vadd.f32 %v3348_v49, %v3347_v46  ;;  %v3527_v46 = vld [vmem:[%s13029_s19 + $0x428] sm:$0xff]  ;;  %v8556_v49 = vpack.c.bf16 %v3522_v20, %v3516_v18  ;;  %8555 = vmatprep.subr.bf16.mxu0 %v8554_v9  ;;  %v8566_v20 = vpack.c.bf16 %v3417_v22, %v3411_v31  ;;  %v3477_v50 = vld [vmem:[%s13029_s19 + $0x298] sm:$0xff] }
0x1000   :  { %v3471_v22 = vld [vmem:[%s13029_s19 + $0x268] sm:$0xff] }
0x1001   :  { %3350 = vadd.xlane.f32.xlu0 %v3349_v43  ;;  %v3533_v43 = vld [vmem:[%s13029_s19 + $0x458] sm:$0xff]  ;;  %8557 = vmatpush1.bf16.msra.mxu0 %v8556_v49  ;;  %v3416_v49 = vld [vmem:[%s13029_s19 + $0xb0] sm:$0xff] }
0x1002   :  { %v8510_v21 = vpack.c.bf16 %v3533_v43, %v3527_v46  ;;  %8559 = vmatprep.subr.bf16.mxu0 %v8558_v11  ;;  %v3410_v46 = vld [vmem:[%s13029_s19 + $0x80] sm:$0xff]  ;;  %v3423_v43 = vld [vmem:[%s13029_s19 + $0xe8] sm:$0xff] }
0x1003   :  { %v8568_v19 = vpack.c.bf16 %v3416_v49, %v3410_v46  ;;  %v3482_v46 = vld [vmem:[%s13029_s19 + $0x2c0] sm:$0xff]  ;;  %v3488_v49 = vld [vmem:[%s13029_s19 + $0x2f0] sm:$0xff] }
0x1004   :  { %8511 = vmatprep.subr.bf16.mxu1 %v8510_v21 }
0x1005   :  { %8513 = vmatpush1.bf16.msra.mxu1 %v8512_v63  ;;  %8561 = vmatpush1.bf16.msra.mxu0 %v8560_v16  ;;  %v8570_v16 = vpack.c.bf16 %v3429_v44, %v3423_v43  ;;  %v3495_v43 = vld [vmem:[%s13029_s19 + $0x328] sm:$0xff]  ;;  %v3494_v44 = vld [vmem:[%s13029_s19 + $0x320] sm:$0xff] }
0x1006   :  { %8563 = vmatprep.subr.bf16.mxu1 %v8562_v39  ;;  %8611 = vmatprep.subr.bf16.mxu0 %v8610_v10  ;;  %v3435_v39 = vld [vmem:[%s13029_s19 + $0x148] sm:$0xff] }
0x108a   :  { %v3346_v53 = vpop.xlane.xlu1 %3345 }
0x108b   :  { %v3352_v59 = vmul.f32 0.0052083335, %v3346_v53  ;;  %v4139_v53 = vld [vmem:[%s13030_s30 + $0x40] sm:$0xff] }
0x108d   :  { %v3354_v33 = vadd.f32 1e-05, %v3352_v59  ;;  %v4141_v59 = vld [vmem:[%s13030_s30 + $0x50] sm:$0xff] }
0x108e   :  { %v3351_v34 = vpop.xlane.xlu0 %3350 }
0x108f   :  { %9503 = vrsqrt.f32 %v3354_v33  ;;  %v3353_v40 = vmul.f32 0.0052083335, %v3351_v34  ;;  %v4144_v33 = vld [vmem:[%s13030_s30 + $0x68] sm:$0xff]  ;;  %v4146_v34 = vld [vmem:[%s13030_s30 + $0x78] sm:$0xff] }
0x1091   :  { %v3355_v3 = vadd.f32 1e-05, %v3353_v40  ;;  %v8572_v40 = vpack.c.bf16 %v3428_v38, %v3422_v54  ;;  %v3512_v54 = vld [vmem:[%s13029_s19 + $0x3b0] sm:$0xff]  ;;  %v3519_v38 = vld [vmem:[%s13029_s19 + $0x3e8] sm:$0xff] }
0x1093   :  { %9505 = vrsqrt.f32 %v3355_v3  ;;  %v8574_v3 = vpack.c.bf16 %v3441_v7, %v3435_v39  ;;  %v3525_v39 = vld [vmem:[%s13029_s19 + $0x418] sm:$0xff] }
0x1094   :  { %v8602_v7 = vpack.c.bf16 %v3525_v39, %v3519_v38  ;;  %v4171_v39 = vld [vmem:[%s13030_s30 + $0x140] sm:$0xff] }
0x1099   :  { %v9504_v36 = vpop.eup %9503 }
0x109a   :  { %v3359_v15 = vmul.f32 %v9504_v36, %v11271_v5  ;;  %v3358_v37 = vmul.f32 %v9504_v36, %v11268_v32  ;;  %v8564_v5 = vpack.c.bf16 %v3404_v57, %v3398_v24  ;;  %v3453_v36 = vld [vmem:[%s13029_s19 + $0x1d8] sm:$0xff]  ;;  %v8622_v24 = vpack.c.bf16 %v4146_v34, %v4144_v33  ;;  %v3459_v57 = vld [vmem:[%s13029_s19 + $0x208] sm:$0xff] }
0x109b   :  { %v8582_v31 = vpack.c.bf16 %v3465_v58, %v3459_v57  ;;  %v3537_v33 = vld [vmem:[%s13029_s19 + $0x478] sm:$0xff]  ;;  %v4151_v58 = vld [vmem:[%s13030_s30 + $0xa0] sm:$0xff] }
0x109c   :  { %v3375_v12 = vmul.f32 %v3371_v27, %v3359_v15  ;;  %v3374_v55 = vmul.f32 %v3367_v4, %v3358_v37  ;;  %v8576_v15 = vpack.c.bf16 %v3440_v61, %v3434_v60  ;;  %v3446_v37 = vld [vmem:[%s13029_s19 + $0x1a0] sm:$0xff]  ;;  %v3536_v60 = vld [vmem:[%s13029_s19 + $0x470] sm:$0xff] }
0x109d   :  { %v9506_v25 = vpop.eup %9505 }
0x109e   :  { %v3391_v32 = vadd.f32 %v3387_v23, %v3375_v12  ;;  %v11350_v2 = vadd.f32 %v3383_v47, %v3374_v55  ;;  %v3361_v9 = vmul.f32 %v9506_v25, %v11281_v6  ;;  %v3360_v18 = vmul.f32 %v9506_v25, %v11278_v62  ;;  %v4135_v6 = vld [vmem:[%s13030_s30 + $0x20] sm:$0xff]  ;;  %v4140_v62 = vld [vmem:[%s13030_s30 + $0x48] sm:$0xff]  ;;  %v3464_v55 = vld [vmem:[%s13029_s19 + $0x230] sm:$0xff] }
0x109f   :  { %v8616_v41 = vpack.c.bf16 %v4137_v28, %v4135_v6  ;;  %v8618_v10 = vpack.c.bf16 %v4142_v52, %v4140_v62  ;;  %v3458_v12 = vld [vmem:[%s13029_s19 + $0x200] sm:$0xff]  ;;  %v8586_v25 = vpack.c.bf16 %v3477_v50, %v3471_v22  ;;  %v3500_v6 = vld [vmem:[%s13029_s19 + $0x350] sm:$0xff]  ;;  %v3507_v28 = vld [vmem:[%s13029_s19 + $0x388] sm:$0xff] }
0x10a0   :  { %7258 = vmatprep.mubr.msk.f32.mxu1 %vm829_vm3, %v3391_v32  ;;  %7260 = vmatprep.mubr.msk.f32.mxu0 %vm829_vm3, %v3391_v32  ;;  %v3377_v0 = vmul.f32 %v3371_v27, %v3361_v9  ;;  %v3376_v21 = vmul.f32 %v3367_v4, %v3360_v18  ;;  %v8620_v27 = vpack.c.bf16 %v4141_v59, %v4139_v53  ;;  %v3447_v4 = vld [vmem:[%s13029_s19 + $0x1a8] sm:$0xff]  ;;  %v3489_v9 = vld [vmem:[%s13029_s19 + $0x2f8] sm:$0xff]  ;;  %v3524_v53 = vld [vmem:[%s13029_s19 + $0x410] sm:$0xff] }
0x10a1   :  { %3641 = vmatmul.mubr.f32.vlgmr.msra.gmra.mrb[40].mxu1 %v11350_v2  ;;  %3718 = vmatmul.mubr.f32.vlgmr.msra.gmra.mrb[24].mxu0 %v11350_v2  ;;  %v8584_v56 = vpack.c.bf16 %v3464_v55, %v3458_v12  ;;  %v3513_v62 = vld [vmem:[%s13029_s19 + $0x3b8] sm:$0xff]  ;;  %v8596_v52 = vpack.c.bf16 %v3500_v6, %v3494_v44  ;;  %v3531_v59 = vld [vmem:[%s13029_s19 + $0x448] sm:$0xff]  ;;  %v4155_v50 = vld [vmem:[%s13030_s30 + $0xc0] sm:$0xff] }
0x10a2   :  { %8565 = vmatpush1.bf16.msra.mxu1 %v8564_v5  ;;  %v11366_v63 = vadd.f32 %v3387_v23, %v3377_v0  ;;  %v11368_v11 = vadd.f32 %v3383_v47, %v3376_v21  ;;  %8613 = vmatpush1.bf16.msra.mxu0 %v8612_v30  ;;  %v8578_v23 = vpack.c.bf16 %v3453_v36, %v3447_v4  ;;  %v3452_v47 = vld [vmem:[%s13029_s19 + $0x1d0] sm:$0xff]  ;;  %v3470_v5 = vld [vmem:[%s13029_s19 + $0x260] sm:$0xff]  ;;  %v4156_v12 = vld [vmem:[%s13030_s30 + $0xc8] sm:$0xff] }
0x10a3   :  { %8567 = vmatprep.subr.bf16.mxu1 %v8566_v20  ;;  %8615 = vmatprep.subr.bf16.mxu0 %v8614_v8  ;;  %v8580_v1 = vpack.c.bf16 %v3452_v47, %v3446_v37  ;;  %v3476_v30 = vld [vmem:[%s13029_s19 + $0x290] sm:$0xff]  ;;  %v3501_v8 = vld [vmem:[%s13029_s19 + $0x358] sm:$0xff]  ;;  %v8592_v0 = vpack.c.bf16 %v3488_v49, %v3482_v46  ;;  %v4164_v46 = vld [vmem:[%s13030_s30 + $0x108] sm:$0xff] }
0x10a4   :  { %7259 = vmatprep.mubr.msk.f32.mxu1 %vm829_vm3, %v11366_v63  ;;  %7261 = vmatprep.mubr.msk.f32.mxu0 %vm829_vm3, %v11366_v63  ;;  %v8588_v18 = vpack.c.bf16 %v3476_v30, %v3470_v5  ;;  %v8594_v21 = vpack.c.bf16 %v3501_v8, %v3495_v43  ;;  %v4145_v4 = vld [vmem:[%s13030_s30 + $0x70] sm:$0xff]  ;;  %v4158_v55 = vld [vmem:[%s13030_s30 + $0xd8] sm:$0xff]  ;;  %v4160_v5 = vld [vmem:[%s13030_s30 + $0xe8] sm:$0xff] }
0x10a5   :  { %3647 = vmatmul.mubr.f32.gmra.mrb[42].mxu1 %v11368_v11  ;;  %3724 = vmatmul.mubr.f32.gmra.mrb[26].mxu0 %v11368_v11  ;;  %v4149_v37 = vld [vmem:[%s13030_s30 + $0x90] sm:$0xff]  ;;  %v8634_v22 = vpack.c.bf16 %v4158_v55, %v4156_v12  ;;  %v4162_v30 = vld [vmem:[%s13030_s30 + $0xf8] sm:$0xff]  ;;  %v4163_v8 = vld [vmem:[%s13030_s30 + $0x100] sm:$0xff] }
0x10a6   :  { %8569 = vmatpush1.bf16.msra.mxu1 %v8568_v19  ;;  %7262 = vmatprep.mubr.msk.f32.mxu1 %vm829_vm3, %v3391_v32  ;;  %v3483_v32 = vld [vmem:[%s13029_s19 + $0x2c8] sm:$0xff]  ;;  %v8598_v19 = vpack.c.bf16 %v3513_v62, %v3507_v28  ;;  %v4166_v49 = vld [vmem:[%s13030_s30 + $0x118] sm:$0xff]  ;;  %v4167_v62 = vld [vmem:[%s13030_s30 + $0x120] sm:$0xff] }
0x10a7   :  { %8571 = vmatprep.subr.bf16.mxu1 %v8570_v16  ;;  %8617 = vmatpush1.bf16.msra.mxu0 %v8616_v41  ;;  %v8590_v20 = vpack.c.bf16 %v3489_v9, %v3483_v32  ;;  %v3506_v16 = vld [vmem:[%s13029_s19 + $0x380] sm:$0xff]  ;;  %v8638_v32 = vpack.c.bf16 %v4162_v30, %v4160_v5  ;;  %v8642_v43 = vpack.c.bf16 %v4166_v49, %v4164_v46  ;;  %v4168_v44 = vld [vmem:[%s13030_s30 + $0x128] sm:$0xff]  ;;  %v4170_v6 = vld [vmem:[%s13030_s30 + $0x138] sm:$0xff] }
0x10a8   :  { %8619 = vmatprep.subr.bf16.mxu0 %v8618_v10  ;;  %v8600_v41 = vpack.c.bf16 %v3512_v54, %v3506_v16  ;;  %v3518_v10 = vld [vmem:[%s13029_s19 + $0x3e0] sm:$0xff]  ;;  %v8646_v28 = vpack.c.bf16 %v4170_v6, %v4168_v44  ;;  %v4172_v16 = vld [vmem:[%s13030_s30 + $0x148] sm:$0xff]  ;;  %v4174_v54 = vld [vmem:[%s13030_s30 + $0x158] sm:$0xff] }
0x10a9   :  { %v8604_v34 = vpack.c.bf16 %v3524_v53, %v3518_v10  ;;  %v4159_v9 = vld [vmem:[%s13030_s30 + $0xe0] sm:$0xff]  ;;  %v8650_v38 = vpack.c.bf16 %v4174_v54, %v4172_v16  ;;  %v4176_v10 = vld [vmem:[%s13030_s30 + $0x168] sm:$0xff]  ;;  %v4178_v53 = vld [vmem:[%s13030_s30 + $0x178] sm:$0xff] }
0x10aa   :  { %8573 = vmatpush1.bf16.msra.mxu1 %v8572_v40  ;;  %v8606_v40 = vpack.c.bf16 %v3537_v33, %v3531_v59  ;;  %v8654_v59 = vpack.c.bf16 %v4178_v53, %v4176_v10  ;;  %v4175_v33 = vld [vmem:[%s13030_s30 + $0x160] sm:$0xff]  ;;  %v4192_v12 = vld [vmem:[%s13030_s30 + $0x1e8] sm:$0xff]  ;;  %v4194_v55 = vld [vmem:[%s13030_s30 + $0x1f8] sm:$0xff] }
0x10ab   :  { %8575 = vmatprep.subr.bf16.mxu1 %v8574_v3  ;;  %8621 = vmatpush1.bf16.msra.mxu0 %v8620_v27  ;;  %v3530_v3 = vld [vmem:[%s13029_s19 + $0x440] sm:$0xff]  ;;  %v4196_v5 = vld [vmem:[%s13030_s30 + $0x208] sm:$0xff]  ;;  %v4198_v30 = vld [vmem:[%s13030_s30 + $0x218] sm:$0xff] }
0x10ac   :  { %8623 = vmatprep.subr.bf16.mxu0 %v8622_v24  ;;  %v8608_v61 = vpack.c.bf16 %v3536_v60, %v3530_v3  ;;  %v4143_v27 = vld [vmem:[%s13030_s30 + $0x60] sm:$0xff]  ;;  %v4148_v24 = vld [vmem:[%s13030_s30 + $0x88] sm:$0xff]  ;;  %v4182_v60 = vld [vmem:[%s13030_s30 + $0x198] sm:$0xff] }
0x10ad   :  { %v8624_v36 = vpack.c.bf16 %v4145_v4, %v4143_v27  ;;  %v4180_v3 = vld [vmem:[%s13030_s30 + $0x188] sm:$0xff]  ;;  %v4179_v27 = vld [vmem:[%s13030_s30 + $0x180] sm:$0xff]  ;;  %v4181_v4 = vld [vmem:[%s13030_s30 + $0x190] sm:$0xff] }
0x10ae   :  { %8577 = vmatpush1.bf16.msra.mxu1 %v8576_v15  ;;  %v4150_v15 = vld [vmem:[%s13030_s30 + $0x98] sm:$0xff] }
0x10af   :  { %8579 = vmatprep.subr.bf16.mxu1 %v8578_v23  ;;  %8625 = vmatpush1.bf16.msra.mxu0 %v8624_v36  ;;  %v8626_v23 = vpack.c.bf16 %v4150_v15, %v4148_v24  ;;  %v4184_v36 = vld [vmem:[%s13030_s30 + $0x1a8] sm:$0xff]  ;;  %v8660_v24 = vpack.c.bf16 %v4181_v4, %v4179_v27  ;;  %v4186_v15 = vld [vmem:[%s13030_s30 + $0x1b8] sm:$0xff] }
0x10b1   :  { %8627 = vmatprep.subr.bf16.mxu0 %v8626_v23  ;;  %v4183_v23 = vld [vmem:[%s13030_s30 + $0x1a0] sm:$0xff] }
0x10b2   :  { %8581 = vmatpush1.bf16.msra.mxu1 %v8580_v1  ;;  %v4153_v1 = vld [vmem:[%s13030_s30 + $0xb0] sm:$0xff] }
0x10b3   :  { %8583 = vmatprep.subr.bf16.mxu1 %v8582_v31  ;;  %v8632_v31 = vpack.c.bf16 %v4153_v1, %v4151_v58  ;;  %v4187_v58 = vld [vmem:[%s13030_s30 + $0x1c0] sm:$0xff]  ;;  %v4189_v1 = vld [vmem:[%s13030_s30 + $0x1d0] sm:$0xff] }
0x10b6   :  { %8585 = vmatpush1.bf16.msra.mxu1 %v8584_v56  ;;  %v4157_v56 = vld [vmem:[%s13030_s30 + $0xd0] sm:$0xff] }
0x10b7   :  { %8587 = vmatprep.subr.bf16.mxu1 %v8586_v25  ;;  %v8636_v25 = vpack.c.bf16 %v4157_v56, %v4155_v50  ;;  %v4191_v50 = vld [vmem:[%s13030_s30 + $0x1e0] sm:$0xff]  ;;  %v4193_v56 = vld [vmem:[%s13030_s30 + $0x1f0] sm:$0xff] }
0x10ba   :  { %8589 = vmatpush1.bf16.msra.mxu1 %v8588_v18  ;;  %v4161_v18 = vld [vmem:[%s13030_s30 + $0xf0] sm:$0xff] }
0x10bb   :  { %8591 = vmatprep.subr.bf16.mxu1 %v8590_v20  ;;  %v8640_v20 = vpack.c.bf16 %v4161_v18, %v4159_v9  ;;  %v11476_v9 = vld [vmem:[%s13033_s28] sm:$0x3f] }
0x10bc   :  { %v13034_v18 = vld [vmem:[#allocation33_spill] sm:$0xff]  ;;  %v3543_v46 = vrot.slane %v11476_v9, %v10379_v35  ;;  %v3547_v49 = vrot.slane %v11476_v9, %v10375_v26 }
0x10be   :  { %8593 = vmatpush1.bf16.msra.mxu1 %v8592_v0  ;;  %v4165_v0 = vld [vmem:[%s13030_s30 + $0x110] sm:$0xff] }
0x10bf   :  { %8595 = vmatprep.subr.bf16.mxu1 %v8594_v21  ;;  %v8644_v21 = vpack.c.bf16 %v4165_v0, %v4163_v8 }
0x10c2   :  { %8597 = vmatpush1.bf16.msra.mxu1 %v8596_v52  ;;  %v4169_v52 = vld [vmem:[%s13030_s30 + $0x130] sm:$0xff] }
0x10c3   :  { %8599 = vmatprep.subr.bf16.mxu1 %v8598_v19  ;;  %v8648_v19 = vpack.c.bf16 %v4169_v52, %v4167_v62 }
0x10c6   :  { %8601 = vmatpush1.bf16.msra.mxu1 %v8600_v41  ;;  %v4173_v41 = vld [vmem:[%s13030_s30 + $0x150] sm:$0xff] }
0x10c7   :  { %8603 = vmatprep.subr.bf16.mxu1 %v8602_v7  ;;  %v8652_v7 = vpack.c.bf16 %v4173_v41, %v4171_v39 }
0x10ca   :  { %8605 = vmatpush1.bf16.msra.mxu1 %v8604_v34  ;;  %v4177_v34 = vld [vmem:[%s13030_s30 + $0x170] sm:$0xff] }
0x10cb   :  { %8607 = vmatprep.subr.bf16.mxu1 %v8606_v40  ;;  %v8656_v40 = vpack.c.bf16 %v4177_v34, %v4175_v33 }
0x10ce   :  { %8609 = vmatpush1.bf16.msra.mxu1 %v8608_v61  ;;  %v8658_v61 = vpack.c.bf16 %v4182_v60, %v4180_v3 }
0x10d1   :  { %3795 = vmatmul.mubr.f32.vlgmr.msra.gmra.mrb[44].mxu1 %v11350_v2  ;;  %v4147_v2 = vld [vmem:[%s13030_s30 + $0x80] sm:$0xff] }
0x10d2   :  { %7263 = vmatprep.mubr.msk.f32.mxu1 %vm829_vm3, %v11366_v63  ;;  %v8628_v47 = vpack.c.bf16 %v4149_v37, %v4147_v2  ;;  %v4152_v63 = vld [vmem:[%s13030_s30 + $0xa8] sm:$0xff]  ;;  %v4185_v2 = vld [vmem:[%s13030_s30 + $0x1b0] sm:$0xff]  ;;  %v8662_v37 = vpack.c.bf16 %v4186_v15, %v4184_v36 }
0x10d4   :  { %8629 = vmatpush1.bf16.msra.mxu0 %v8628_v47  ;;  %v4188_v47 = vld [vmem:[%s13030_s30 + $0x1c8] sm:$0xff] }
0x10d5   :  { %3801 = vmatmul.mubr.f32.gmra.mrb[46].mxu1 %v11368_v11  ;;  %v4154_v11 = vld [vmem:[%s13030_s30 + $0xb8] sm:$0xff] }
0x10d6   :  { %v8630_v57 = vpack.c.bf16 %v4154_v11, %v4152_v63  ;;  %v4190_v63 = vld [vmem:[%s13030_s30 + $0x1d8] sm:$0xff]  ;;  %v8664_v11 = vpack.c.bf16 %v4185_v2, %v4183_v23 }
0x10d8   :  { %8631 = vmatprep.subr.bf16.mxu0 %v8630_v57  ;;  %v8666_v57 = vpack.c.bf16 %v4190_v63, %v4188_v47 }
0x10d9   :  { %8633 = vmatpush1.bf16.msra.mxu0 %v8632_v31  ;;  %v8668_v31 = vpack.c.bf16 %v4189_v1, %v4187_v58 }
0x10da   :  { %8635 = vmatprep.subr.bf16.mxu0 %v8634_v22  ;;  %v8670_v22 = vpack.c.bf16 %v4194_v55, %v4192_v12 }
0x10dd   :  { %8637 = vmatpush1.bf16.msra.mxu0 %v8636_v25  ;;  %v8672_v25 = vpack.c.bf16 %v4193_v56, %v4191_v50 }
0x10de   :  { %8639 = vmatprep.subr.bf16.mxu0 %v8638_v32  ;;  %v8674_v32 = vpack.c.bf16 %v4198_v30, %v4196_v5 }
0x10e1   :  { %8641 = vmatpush1.bf16.msra.mxu0 %v8640_v20  ;;  %v3554_v20 = vsub.s32 3, %v13034_v18 }
0x10e2   :  { %8643 = vmatprep.subr.bf16.mxu0 %v8642_v43 }
0x10e3   :  { %v11486_v43 = vrot.slane %v11476_v9, %v3554_v20 }
0x10e5   :  { %8645 = vmatpush1.bf16.msra.mxu0 %v8644_v21 }
0x10e6   :  { %8647 = vmatprep.subr.bf16.mxu0 %v8646_v28 }
0x10e9   :  { %8649 = vmatpush1.bf16.msra.mxu0 %v8648_v19 }
0x10ea   :  { %8651 = vmatprep.subr.bf16.mxu0 %v8650_v38 }
0x10ed   :  { %8653 = vmatpush1.bf16.msra.mxu0 %v8652_v7 }
0x10ee   :  { %8655 = vmatprep.subr.bf16.mxu0 %v8654_v59 }
0x10f1   :  { %8657 = vmatpush1.bf16.msra.mxu0 %v8656_v40 }
0x10f2   :  { %8659 = vmatprep.subr.bf16.mxu0 %v8658_v61 }
0x10f5   :  { %8661 = vmatpush1.bf16.msra.mxu0 %v8660_v24 }
0x10f6   :  { %8663 = vmatprep.subr.bf16.mxu0 %v8662_v37  ;;  %v3550_v37 = vsub.s32 2, %v13034_v18 }
0x10f8   :  { %v3551_v12 = vrot.slane %v11476_v9, %v3550_v37 }
0x10f9   :  { %8665 = vmatpush1.bf16.msra.mxu0 %v8664_v11 }
0x10fa   :  { %8667 = vmatprep.subr.bf16.mxu0 %v8666_v57 }
0x10fd   :  { %8669 = vmatpush1.bf16.msra.mxu0 %v8668_v31 }
0x10fe   :  { %8671 = vmatprep.subr.bf16.mxu0 %v8670_v22 }
0x1101   :  { %8673 = vmatpush1.bf16.msra.mxu0 %v8672_v25 }
0x1102   :  { %8675 = vmatprep.subr.bf16.mxu0 %v8674_v32 }
0x1174   :  { %v3642_v8 = vpop.f32.mrb[40].mxu1  ;;  %v3719_v0 = vpop.f32.mrb[24].mxu0 }
0x1175   :  { %v11488_v21 = vadd.f32 %v3642_v8, %v3543_v46  ;;  %v3644_v44 = vpop.f32.mrb[41].mxu1  ;;  %v3721_v6 = vpop.f32.mrb[25].mxu0 }
0x1176   :  { %v11490_v28 = vadd.f32 %v3644_v44, %v3547_v49  ;;  %v11493_v62 = vadd.f32 %v3721_v6, %v11486_v43 }
0x1177   :  { %v11496_v52 = vmul.f32 0.70710677, %v11488_v21 }
0x1178   :  { %v11499_v19 = vmul.f32 0.70710677, %v11490_v28  ;;  %v11504_v38 = vmul.f32 0.70710677, %v11493_v62  ;;  %v3648_v39 = vpop.f32.mrb[42].mxu1  ;;  %v11506_v10 = vpop.f32.mrb[26].mxu0 }
0x1179   :  { %v3855_v16 = vand.u32 2147483647, %v11496_v52  ;;  %v3650_v59 = vpop.f32.mrb[43].mxu1  ;;  %v3727_v33 = vpop.f32.mrb[27].mxu0  ;;  %v11509_v3 = vadd.f32 %v3648_v39, %v3543_v46  ;;  %v11530_v46 = vadd.f32 %v3719_v0, %v3551_v12  ;;  %vm3831_vm13 = vcmp.ge.f32.partialorder %v11496_v52, 0.0 }
0x117a   :  { %v3856_v54 = vand.u32 2147483647, %v11499_v19  ;;  %v3858_v34 = vand.u32 2147483647, %v11504_v38  ;;  %v11514_v4 = vadd.f32 %v3650_v59, %v3547_v49  ;;  %v11539_v0 = vadd.f32 %v3727_v33, %v11486_v43 }
0x117b   :  { %v3867_v41 = vmul.f32 0.3275911, %v3855_v16  ;;  %v11512_v61 = vmul.f32 0.70710677, %v11509_v3  ;;  %v4023_v24 = vsub.f32 0.0, %v3855_v16  ;;  %v11549_v43 = vadd.f32 %v11506_v10, %v3551_v12 }
0x117c   :  { %v3868_v7 = vmul.f32 0.3275911, %v3856_v54  ;;  %v3870_v60 = vmul.f32 0.3275911, %v3858_v34  ;;  %v11518_v23 = vmul.f32 0.70710677, %v11514_v4 }
0x117d   :  { %v3879_v53 = vadd.f32 1.0, %v3867_v41  ;;  %v3861_v36 = vand.u32 2147483647, %v11512_v61  ;;  %v4035_v11 = vmul.f32 %v4023_v24, %v3855_v16  ;;  %v4024_v57 = vsub.f32 0.0, %v3856_v54 }
0x117e   :  { %v3880_v40 = vadd.f32 1.0, %v3868_v7  ;;  %v3882_v27 = vadd.f32 1.0, %v3870_v60  ;;  %v11522_v47 = vand.u32 2147483647, %v11518_v23  ;;  %v4026_v16 = vsub.f32 0.0, %v3858_v34 }
0x117f   :  { %9507 = vrcp.f32 %v3879_v53  ;;  %v3873_v15 = vmul.f32 0.3275911, %v3861_v36  ;;  %v4047_v50 = vmul.f32 1.442695, %v4035_v11  ;;  %v4036_v56 = vmul.f32 %v4024_v57, %v3856_v54 }
0x1180   :  { %9509 = vrcp.f32 %v3880_v40  ;;  %v3874_v1 = vmul.f32 0.3275911, %v11522_v47  ;;  %v4029_v7 = vsub.f32 0.0, %v3861_v36  ;;  %v11536_v59 = vmul.f32 0.70710677, %v11530_v46 }
0x1181   :  { %9511 = vrcp.f32 %v3882_v27  ;;  %v3885_v2 = vadd.f32 1.0, %v3873_v15  ;;  %v4049_v8 = vmul.f32 1.442695, %v4036_v56  ;;  %v4038_v15 = vmul.f32 %v4026_v16, %v3858_v34 }
0x1182   :  { %v3886_v55 = vadd.f32 1.0, %v3874_v1  ;;  %v4041_v57 = vmul.f32 %v4029_v7, %v3861_v36  ;;  %v4030_v34 = vsub.f32 0.0, %v11522_v47  ;;  %v11555_v56 = vmul.f32 0.70710677, %v11539_v0 }
0x1183   :  { %9513 = vrcp.f32 %v3885_v2  ;;  %v3562_v2 = vsub.s32 5, %v13034_v18  ;;  %vm3832_vm14 = vcmp.ge.f32.partialorder %v11499_v19, 0.0  ;;  %vm3837_vm15 = vcmp.ge.f32.partialorder %v11512_v61, 0.0 }
0x1184   :  { %9515 = vrcp.f32 %v3886_v55  ;;  %v11546_v55 = vand.u32 2147483647, %v11536_v59  ;;  %v4059_v10 = vmul.f32 1.442695, %v4041_v57  ;;  %vm3834_vm0 = vcmp.ge.f32.partialorder %v11504_v38, 0.0  ;;  %v4214_v38 = vld [vmem:[%s13030_s30 + $0x298] sm:$0xff] }
0x1185   :  { %9517 = vpow2.f32 %v4047_v50  ;;  %vm3838_vm2 = vcmp.ge.f32.partialorder %v11518_v23, 0.0  ;;  %vm3833_vm4 = vcmp.ge.f32.partialorder %v11536_v59, 0.0  ;;  %vm3840_vm7 = vcmp.ge.f32.partialorder %v11555_v56, 0.0 }
0x1186   :  { %9519 = vpow2.f32 %v4049_v8 }
0x1187   :  { %9521 = vpow2.f32 %v4059_v10  ;;  %v4197_v10 = vld [vmem:[%s13030_s30 + $0x210] sm:$0xff] }
0x1189   :  { %v9508_v63 = vpop.eup %9507 }
0x118a   :  { %v3915_v58 = vmul.f32 1.0614054, %v9508_v63  ;;  %v9510_v22 = vpop.eup %9509 }
0x118b   :  { %v3916_v5 = vmul.f32 1.0614054, %v9510_v22  ;;  %v11528_v30 = vpop.eup %9511 }
0x118c   :  { %v3927_v31 = vadd.f32 -1.4531521, %v3915_v58  ;;  %v3918_v44 = vmul.f32 1.0614054, %v11528_v30 }
0x118d   :  { %v3928_v49 = vadd.f32 -1.4531521, %v3916_v5  ;;  %v11533_v41 = vpop.eup %9513 }
0x118e   :  { %v3939_v25 = vmul.f32 %v9508_v63, %v3927_v31  ;;  %v3930_v54 = vadd.f32 -1.4531521, %v3918_v44  ;;  %v3921_v60 = vmul.f32 1.0614054, %v11533_v41  ;;  %v11551_v50 = vpop.eup %9515 }
0x118f   :  { %v3940_v39 = vmul.f32 %v9510_v22, %v3928_v49  ;;  %v3922_v8 = vmul.f32 1.0614054, %v11551_v50  ;;  %v9518_v44 = vpop.eup %9517 }
0x1190   :  { %v3951_v32 = vadd.f32 1.4214138, %v3939_v25  ;;  %v3942_v27 = vmul.f32 %v11528_v30, %v3930_v54  ;;  %v3933_v58 = vadd.f32 -1.4531521, %v3921_v60  ;;  %v11568_v60 = vand.u32 2147483647, %v11555_v56  ;;  %v9520_v57 = vpop.eup %9519 }
0x1191   :  { %v3952_v40 = vadd.f32 1.4214138, %v3940_v39  ;;  %v11561_v39 = vmul.f32 0.70710677, %v11549_v43  ;;  %v3934_v54 = vadd.f32 -1.4531521, %v3922_v8 }
0x1192   :  { %v3963_v6 = vmul.f32 %v9508_v63, %v3951_v32  ;;  %v3954_v1 = vadd.f32 1.4214138, %v3942_v27  ;;  %v3945_v25 = vmul.f32 %v11533_v41, %v3933_v58  ;;  %v4053_v32 = vmul.f32 1.442695, %v4038_v15 }
0x1193   :  { %v3964_v11 = vmul.f32 %v9510_v22, %v3952_v40  ;;  %v3869_v58 = vmul.f32 0.3275911, %v11546_v55 }
0x1194   :  { %v3975_v53 = vadd.f32 -0.28449672, %v3963_v6  ;;  %v3966_v36 = vmul.f32 %v11528_v30, %v3954_v1  ;;  %v3957_v12 = vadd.f32 1.4214138, %v3945_v25  ;;  %9523 = vpow2.f32 %v4053_v32 }
0x1195   :  { %v3976_v33 = vadd.f32 -0.28449672, %v3964_v11  ;;  %v3946_v11 = vmul.f32 %v11551_v50, %v3934_v54  ;;  %v11576_v1 = vand.u32 2147483647, %v11561_v39 }
0x1196   :  { %v3987_v24 = vmul.f32 %v9508_v63, %v3975_v53  ;;  %v3978_v6 = vadd.f32 -0.28449672, %v3966_v36  ;;  %v12980_v53 = vmov -1.0   ;;  %v3969_v27 = vmul.f32 %v11533_v41, %v3957_v12 }
0x1197   :  { %v3988_v49 = vmul.f32 %v9510_v22, %v3976_v33  ;;  %v3843_v40 = vsel %vm3831_vm13, 1.0, %v12980_v53  ;;  %v3958_v33 = vadd.f32 1.4214138, %v3946_v11  ;;  %v3844_v8 = vsel %vm3832_vm14, 1.0, %v12980_v53 }
0x1198   :  { %v3999_v31 = vadd.f32 0.2548296, %v3987_v24  ;;  %v3981_v52 = vadd.f32 -0.28449672, %v3969_v27  ;;  %v4200_v27 = vld [vmem:[%s13030_s30 + $0x228] sm:$0xff]  ;;  %v3850_v23 = vsel %vm3838_vm2, 1.0, %v12980_v53 }
0x1199   :  { %v4000_v7 = vadd.f32 0.2548296, %v3988_v49  ;;  %v3970_v32 = vmul.f32 %v11551_v50, %v3958_v33  ;;  %vm3839_vm13 = vcmp.ge.f32.partialorder %v11561_v39, 0.0  ;;  %v3852_v56 = vsel %vm3840_vm7, 1.0, %v12980_v53 }
0x119a   :  { %v4011_v5 = vmul.f32 %v9508_v63, %v3999_v31  ;;  %v4042_v63 = vmul.f32 %v4030_v34, %v11522_v47  ;;  %v3990_v47 = vmul.f32 %v11528_v30, %v3978_v6  ;;  %v3993_v36 = vmul.f32 %v11533_v41, %v3981_v52 }
0x119b   :  { %v4012_v15 = vmul.f32 %v9510_v22, %v4000_v7  ;;  %v3876_v22 = vmul.f32 0.3275911, %v11568_v60  ;;  %v3808_v7 = vmul.f32 0.5, %v11490_v28 }
0x119c   :  { %v4071_v16 = vmul.f32 %v9518_v44, %v4011_v5  ;;  %v4061_v25 = vmul.f32 1.442695, %v4042_v63  ;;  %v11583_v5 = vrot.slane %v11476_v9, %v3562_v2  ;;  %v4195_v44 = vld [vmem:[%s13030_s30 + $0x200] sm:$0xff]  ;;  %v4005_v12 = vadd.f32 0.2548296, %v3993_v36 }
0x119d   :  { %v4072_v31 = vmul.f32 %v9520_v57, %v4012_v15  ;;  %v4002_v6 = vadd.f32 0.2548296, %v3990_v47  ;;  %v3982_v63 = vadd.f32 -0.28449672, %v3970_v32  ;;  %v3875_v15 = vmul.f32 0.3275911, %v11576_v1  ;;  %v9522_v32 = vpop.eup %9521 }
0x119e   :  { %v4083_v24 = vsub.f32 1.0, %v4071_v16  ;;  %v3881_v16 = vadd.f32 1.0, %v3869_v58  ;;  %9525 = vpow2.f32 %v4061_v25  ;;  %v3888_v11 = vadd.f32 1.0, %v3876_v22  ;;  %v4202_v57 = vld [vmem:[%s13030_s30 + $0x238] sm:$0xff] }
0x119f   :  { %v4084_v49 = vsub.f32 1.0, %v4072_v31  ;;  %v3994_v58 = vmul.f32 %v11551_v50, %v3982_v63  ;;  %v4017_v28 = vmul.f32 %v11533_v41, %v4005_v12  ;;  %v3807_v47 = vmul.f32 0.5, %v11488_v21  ;;  %v4199_v21 = vld [vmem:[%s13030_s30 + $0x220] sm:$0xff]  ;;  %v4201_v12 = vld [vmem:[%s13030_s30 + $0x230] sm:$0xff] }
0x11a0   :  { %v4095_v34 = vmul.f32 %v4083_v24, %v3843_v40  ;;  %v4014_v33 = vmul.f32 %v11528_v30, %v4002_v6  ;;  %v8676_v36 = vpack.c.bf16 %v4197_v10, %v4195_v44  ;;  %9527 = vrcp.f32 %v3881_v16  ;;  %v9524_v30 = vpop.eup %9523  ;;  %v4204_v10 = vld [vmem:[%s13030_s30 + $0x248] sm:$0xff] }
0x11a1   :  { %v4096_v40 = vmul.f32 %v4084_v49, %v3844_v8  ;;  %v8678_v49 = vpack.c.bf16 %v4202_v57, %v4200_v27  ;;  %v4006_v41 = vadd.f32 0.2548296, %v3994_v58  ;;  %9529 = vrcp.f32 %v3888_v11  ;;  %v4205_v57 = vld [vmem:[%s13030_s30 + $0x250] sm:$0xff] }
0x11a2   :  { %v4107_v24 = vadd.f32 1.0, %v4095_v34  ;;  %v4077_v44 = vmul.f32 %v9522_v32, %v4017_v28  ;;  %v4074_v16 = vmul.f32 %v9524_v30, %v4014_v33  ;;  %v4208_v28 = vld [vmem:[%s13030_s30 + $0x268] sm:$0xff]  ;;  %v4207_v32 = vld [vmem:[%s13030_s30 + $0x260] sm:$0xff] }
0x11a3   :  { %v4108_v31 = vadd.f32 1.0, %v4096_v40  ;;  %v3887_v40 = vadd.f32 1.0, %v3875_v15  ;;  %v4018_v15 = vmul.f32 %v11551_v50, %v4006_v41 }
0x11a4   :  { %v11592_v54 = vpop.f32.mrb[44].mxu1  ;;  %v4119_v8 = vmul.f32 %v4107_v24, %v3807_v47  ;;  %v8680_v24 = vpack.c.bf16 %v4201_v12, %v4199_v21  ;;  %v4089_v58 = vsub.f32 1.0, %v4077_v44  ;;  %v4210_v47 = vld [vmem:[%s13030_s30 + $0x278] sm:$0xff]  ;;  %v4212_v21 = vld [vmem:[%s13030_s30 + $0x288] sm:$0xff] }
0x11a5   :  { %v3798_v19 = vpop.f32.mrb[45].mxu1  ;;  %v4120_v22 = vmul.f32 %v4108_v31, %v3808_v7  ;;  %v4206_v7 = vld [vmem:[%s13030_s30 + $0x258] sm:$0xff]  ;;  %9531 = vrcp.f32 %v3887_v40  ;;  %v3846_v40 = vsel %vm3834_vm0, 1.0, %v12980_v53 }
0x11a6   :  { %v11598_v52 = vadd.f32 %v3798_v19, %v11583_v5  ;;  %v8682_v11 = vpack.c.bf16 %v4206_v7, %v4204_v10  ;;  %v4203_v19 = vld [vmem:[%s13030_s30 + $0x240] sm:$0xff] }
0x11a7   :  { %4387 = vmatprep.mubr.f32.mxu0 %v4120_v22  ;;  %v4086_v22 = vsub.f32 1.0, %v4074_v16  ;;  %v8684_v50 = vpack.c.bf16 %v4205_v57, %v4203_v19  ;;  %v4213_v19 = vld [vmem:[%s13030_s30 + $0x290] sm:$0xff]  ;;  %v4216_v57 = vld [vmem:[%s13030_s30 + $0x2a8] sm:$0xff] }
0x11a8   :  { %v11605_v34 = vmul.f32 0.70710677, %v11598_v52  ;;  %v11607_v25 = vpop.f32.mrb[46].mxu1  ;;  %4388 = vmatmul.mubr.f32.vlgmr.msra.gmra.mrb[28].mxu0 %v4119_v8  ;;  %v9526_v33 = vpop.eup %9525  ;;  %v4209_v8 = vld [vmem:[%s13030_s30 + $0x270] sm:$0xff] }
0x11a9   :  { %v11609_v63 = vpop.f32.mrb[47].mxu1  ;;  %8677 = vmatpush1.bf16.msra.mxu0 %v8676_v36  ;;  %v3849_v36 = vsel %vm3837_vm15, 1.0, %v12980_v53  ;;  %v4078_v61 = vmul.f32 %v9526_v33, %v4018_v15  ;;  %v4098_v44 = vmul.f32 %v4086_v22, %v3846_v40  ;;  %v8688_v7 = vpack.c.bf16 %v4209_v8, %v4207_v32  ;;  %v4218_v33 = vld [vmem:[%s13030_s30 + $0x2b8] sm:$0xff] }
0x11aa   :  { %v11614_v6 = vand.u32 2147483647, %v11605_v34  ;;  %8679 = vmatprep.subr.bf16.mxu0 %v8678_v49  ;;  %v8686_v49 = vpack.c.bf16 %v4210_v47, %v4208_v28  ;;  %v4101_v41 = vmul.f32 %v4089_v58, %v3849_v36  ;;  %v11633_v12 = vpop.eup %9527  ;;  %v3814_v58 = vmul.f32 0.5, %v11514_v4 }
0x11ab   :  { %v4090_v30 = vsub.f32 1.0, %v4078_v61  ;;  %v11635_v10 = vpop.eup %9529  ;;  %v4110_v47 = vadd.f32 1.0, %v4098_v44  ;;  %v3810_v36 = vmul.f32 0.5, %v11493_v62  ;;  %v8694_v40 = vpack.c.bf16 %v4218_v33, %v4216_v57  ;;  %v4222_v62 = vld [vmem:[%s13030_s30 + $0x2d8] sm:$0xff] }
0x11ac   :  { %v3872_v27 = vmul.f32 0.3275911, %v11614_v6  ;;  %v4113_v15 = vadd.f32 1.0, %v4101_v41  ;;  %v3924_v22 = vmul.f32 1.0614054, %v11635_v10  ;;  %v4215_v41 = vld [vmem:[%s13030_s30 + $0x2a0] sm:$0xff] }
0x11ad   :  { %8681 = vmatpush1.bf16.msra.mxu0 %v8680_v24  ;;  %v4102_v16 = vmul.f32 %v4090_v30, %v3850_v23  ;;  %v3917_v24 = vmul.f32 1.0614054, %v11633_v12  ;;  %v4220_v30 = vld [vmem:[%s13030_s30 + $0x2c8] sm:$0xff]  ;;  %v4226_v57 = vld [vmem:[%s13030_s30 + $0x2f8] sm:$0xff]  ;;  %vm3836_vm14 = vcmp.ge.f32.partialorder %v11605_v34, 0.0 }
0x11ae   :  { %v3884_v31 = vadd.f32 1.0, %v3872_v27  ;;  %8683 = vmatprep.subr.bf16.mxu0 %v8682_v11  ;;  %v8690_v27 = vpack.c.bf16 %v4214_v38, %v4212_v21  ;;  %v4211_v11 = vld [vmem:[%s13030_s30 + $0x280] sm:$0xff]  ;;  %v4217_v21 = vld [vmem:[%s13030_s30 + $0x2b0] sm:$0xff]  ;;  %v3936_v44 = vadd.f32 -1.4531521, %v3924_v22 }
0x11af   :  { %v4114_v28 = vadd.f32 1.0, %v4102_v16  ;;  %v3929_v8 = vadd.f32 -1.4531521, %v3917_v24  ;;  %v4219_v24 = vld [vmem:[%s13030_s30 + $0x2c0] sm:$0xff] }
0x11b0   :  { %9533 = vrcp.f32 %v3884_v31  ;;  %v11642_v31 = vpop.eup %9531 }
0x11b1   :  { %8685 = vmatpush1.bf16.msra.mxu0 %v8684_v50  ;;  %v3813_v50 = vmul.f32 0.5, %v11509_v3  ;;  %v4126_v61 = vmul.f32 %v4114_v28, %v3814_v58  ;;  %v3923_v38 = vmul.f32 1.0614054, %v11642_v31  ;;  %v4122_v3 = vmul.f32 %v4110_v47, %v3810_v36  ;;  %v4225_v36 = vld [vmem:[%s13030_s30 + $0x2f0] sm:$0xff] }
0x11b2   :  { %8687 = vmatprep.subr.bf16.mxu0 %v8686_v49  ;;  %v8692_v49 = vpack.c.bf16 %v4213_v19, %v4211_v11  ;;  %v3941_v16 = vmul.f32 %v11633_v12, %v3929_v8  ;;  %v4224_v19 = vld [vmem:[%s13030_s30 + $0x2e8] sm:$0xff]  ;;  %v3948_v58 = vmul.f32 %v11635_v10, %v3936_v44  ;;  %v4229_v44 = vld [vmem:[%s13030_s30 + $0x310] sm:$0xff] }
0x11b3   :  { %v4125_v4 = vmul.f32 %v4113_v15, %v3813_v50  ;;  %4393 = vmatprep.mubr.f32.mxu0 %v4126_v61  ;;  %v4221_v15 = vld [vmem:[%s13030_s30 + $0x2d0] sm:$0xff]  ;;  %v3935_v11 = vadd.f32 -1.4531521, %v3923_v38  ;;  %v8702_v22 = vpack.c.bf16 %v4226_v57, %v4224_v19  ;;  %v4223_v50 = vld [vmem:[%s13030_s30 + $0x2e0] sm:$0xff]  ;;  %v4228_v8 = vld [vmem:[%s13030_s30 + $0x308] sm:$0xff]  ;;  %v4028_v57 = vsub.f32 0.0, %v11614_v6 }
0x11b4   :  { %v8700_v47 = vpack.c.bf16 %v4221_v15, %v4219_v24  ;;  %v3953_v33 = vadd.f32 1.4214138, %v3941_v16  ;;  %v8704_v38 = vpack.c.bf16 %v4225_v36, %v4223_v50  ;;  %v4031_v16 = vsub.f32 0.0, %v11576_v1  ;;  %v4234_v24 = vld [vmem:[%s13030_s30 + $0x338] sm:$0xff] }
0x11b5   :  { %8689 = vmatpush1.bf16.msra.mxu0 %v8688_v7  ;;  %v8696_v7 = vpack.c.bf16 %v4217_v21, %v4215_v41  ;;  %v3947_v61 = vmul.f32 %v11642_v31, %v3935_v11  ;;  %v4032_v21 = vsub.f32 0.0, %v11568_v60 }
0x11b6   :  { %8691 = vmatprep.subr.bf16.mxu0 %v8690_v27  ;;  %4394 = vmatmul.mubr.f32.gmra.mrb[30].mxu0 %v4125_v4  ;;  %v8698_v27 = vpack.c.bf16 %v4222_v62, %v4220_v30  ;;  %v4230_v4 = vld [vmem:[%s13030_s30 + $0x318] sm:$0xff]  ;;  %v4227_v62 = vld [vmem:[%s13030_s30 + $0x300] sm:$0xff]  ;;  %v4043_v36 = vmul.f32 %v4031_v16, %v11576_v1  ;;  %v4237_v1 = vld [vmem:[%s13030_s30 + $0x350] sm:$0xff] }
0x11b7   :  { %4464 = vmatprep.mubr.f32.mxu0 %v4122_v3  ;;  %v3965_v3 = vmul.f32 %v11633_v12, %v3953_v33  ;;  %v8706_v30 = vpack.c.bf16 %v4230_v4, %v4228_v8  ;;  %v4044_v19 = vmul.f32 %v4032_v21, %v11568_v60  ;;  %v4231_v33 = vld [vmem:[%s13030_s30 + $0x320] sm:$0xff] }
0x11b9   :  { %8693 = vmatpush1.bf16.msra.mxu0 %v8692_v49  ;;  %v4025_v49 = vsub.f32 0.0, %v11546_v55  ;;  %v4065_v4 = vmul.f32 1.442695, %v4044_v19 }
0x11ba   :  { %v11649_v32 = vpop.eup %9533  ;;  %8695 = vmatprep.subr.bf16.mxu0 %v8694_v40  ;;  %v3960_v40 = vadd.f32 1.4214138, %v3948_v58  ;;  %v8708_v58 = vpack.c.bf16 %v4229_v44, %v4227_v62  ;;  %v4063_v44 = vmul.f32 1.442695, %v4043_v36 }
0x11bb   :  { %v3920_v23 = vmul.f32 1.0614054, %v11649_v32 }
0x11bc   :  { %v3972_v15 = vmul.f32 %v11635_v10, %v3960_v40  ;;  %v4040_v40 = vmul.f32 %v4028_v57, %v11614_v6  ;;  %v4239_v57 = vld [vmem:[%s13030_s30 + $0x360] sm:$0xff] }
0x11bd   :  { %v3932_v28 = vadd.f32 -1.4531521, %v3920_v23  ;;  %8697 = vmatpush1.bf16.msra.mxu0 %v8696_v7  ;;  %v3959_v23 = vadd.f32 1.4214138, %v3947_v61  ;;  %v4037_v7 = vmul.f32 %v4025_v49, %v11546_v55  ;;  %v4233_v55 = vld [vmem:[%s13030_s30 + $0x330] sm:$0xff]  ;;  %v4236_v61 = vld [vmem:[%s13030_s30 + $0x348] sm:$0xff] }
0x11be   :  { %8699 = vmatprep.subr.bf16.mxu0 %v8698_v27  ;;  %v4232_v27 = vld [vmem:[%s13030_s30 + $0x328] sm:$0xff]  ;;  %v4238_v49 = vld [vmem:[%s13030_s30 + $0x358] sm:$0xff]  ;;  %v3984_v60 = vadd.f32 -0.28449672, %v3972_v15  ;;  %v8712_v21 = vpack.c.bf16 %v4233_v55, %v4231_v33 }
0x11bf   :  { %v3944_v41 = vmul.f32 %v11649_v32, %v3932_v28  ;;  %v3977_v28 = vadd.f32 -0.28449672, %v3965_v3  ;;  %v4051_v50 = vmul.f32 1.442695, %v4037_v7  ;;  %v8714_v3 = vpack.c.bf16 %v4238_v49, %v4236_v61  ;;  %v4242_v7 = vld [vmem:[%s13030_s30 + $0x378] sm:$0xff] }
0x11c0   :  { %v3996_v6 = vmul.f32 %v11635_v10, %v3984_v60  ;;  %v4246_v33 = vld [vmem:[%s13030_s30 + $0x398] sm:$0xff]  ;;  %v11711_v61 = vadd.f32 %v11609_v63, %v11583_v5  ;;  %v4243_v60 = vld [vmem:[%s13030_s30 + $0x380] sm:$0xff] }
0x11c1   :  { %8701 = vmatpush1.bf16.msra.mxu0 %v8700_v47  ;;  %v3956_v11 = vadd.f32 1.4214138, %v3944_v41  ;;  %v8710_v47 = vpack.c.bf16 %v4234_v24, %v4232_v27  ;;  %v3558_v41 = vsub.s32 4, %v13034_v18  ;;  %9535 = vpow2.f32 %v4051_v50 }
0x11c2   :  { %8703 = vmatprep.subr.bf16.mxu0 %v8702_v22  ;;  %v3971_v22 = vmul.f32 %v11642_v31, %v3959_v23  ;;  %v4240_v23 = vld [vmem:[%s13030_s30 + $0x368] sm:$0xff]  ;;  %9537 = vpow2.f32 %v4065_v4  ;;  %v4057_v27 = vmul.f32 1.442695, %v4040_v40  ;;  %v4008_v55 = vadd.f32 0.2548296, %v3996_v6  ;;  %v4254_v6 = vld [vmem:[%s13030_s30 + $0x3d8] sm:$0xff] }
0x11c3   :  { %v3968_v8 = vmul.f32 %v11649_v32, %v3956_v11  ;;  %v3559_v24 = vrot.slane %v11476_v9, %v3558_v41  ;;  %v8718_v19 = vpack.c.bf16 %v4242_v7, %v4240_v23  ;;  %9539 = vpow2.f32 %v4063_v44  ;;  %v4248_v40 = vld [vmem:[%s13030_s30 + $0x3a8] sm:$0xff]  ;;  %v4249_v23 = vld [vmem:[%s13030_s30 + $0x3b0] sm:$0xff] }
0x11c4   :  { %v3983_v62 = vadd.f32 -0.28449672, %v3971_v22  ;;  %9541 = vpow2.f32 %v4057_v27  ;;  %v11726_v44 = vmul.f32 0.70710677, %v11711_v61  ;;  %v4252_v7 = vld [vmem:[%s13030_s30 + $0x3c8] sm:$0xff] }
0x11c5   :  { %8705 = vmatpush1.bf16.msra.mxu0 %v8704_v38  ;;  %v3989_v38 = vmul.f32 %v11633_v12, %v3977_v28  ;;  %v3980_v16 = vadd.f32 -0.28449672, %v3968_v8  ;;  %v11706_v9 = vadd.f32 %v11592_v54, %v3559_v24  ;;  %v4245_v8 = vld [vmem:[%s13030_s30 + $0x390] sm:$0xff]  ;;  %v4020_v54 = vmul.f32 %v11635_v10, %v4008_v55 }
0x11c6   :  { %8707 = vmatprep.subr.bf16.mxu0 %v8706_v30  ;;  %v4235_v30 = vld [vmem:[%s13030_s30 + $0x340] sm:$0xff]  ;;  %v3995_v28 = vmul.f32 %v11642_v31, %v3983_v62  ;;  %v11722_v5 = vadd.f32 %v11607_v25, %v3559_v24  ;;  %v8724_v63 = vpack.c.bf16 %v4245_v8, %v4243_v60  ;;  %v11745_v55 = vand.u32 2147483647, %v11726_v44 }
0x11c7   :  { %v8716_v15 = vpack.c.bf16 %v4237_v1, %v4235_v30  ;;  %v4001_v11 = vadd.f32 0.2548296, %v3989_v38  ;;  %v3992_v22 = vmul.f32 %v11649_v32, %v3980_v16  ;;  %v4247_v30 = vld [vmem:[%s13030_s30 + $0x3a0] sm:$0xff]  ;;  %vm3842_vm0 = vcmp.ge.f32.partialorder %v11726_v44, 0.0 }
0x11c8   :  { %v4007_v4 = vadd.f32 0.2548296, %v3995_v28  ;;  %v4251_v24 = vld [vmem:[%s13030_s30 + $0x3c0] sm:$0xff]  ;;  %v8730_v28 = vpack.c.bf16 %v4254_v6, %v4252_v7 }
0x11c9   :  { %8709 = vmatpush1.bf16.msra.mxu0 %v8708_v58  ;;  %v4241_v58 = vld [vmem:[%s13030_s30 + $0x370] sm:$0xff]  ;;  %v4013_v36 = vmul.f32 %v11633_v12, %v4001_v11  ;;  %v4004_v38 = vadd.f32 0.2548296, %v3992_v22  ;;  %v11719_v12 = vmul.f32 0.70710677, %v11706_v9  ;;  %v4255_v8 = vld [vmem:[%s13030_s30 + $0x3e0] sm:$0xff] }
0x11ca   :  { %8711 = vmatprep.subr.bf16.mxu0 %v8710_v47  ;;  %v4244_v47 = vld [vmem:[%s13030_s30 + $0x388] sm:$0xff]  ;;  %v8720_v50 = vpack.c.bf16 %v4241_v58, %v4239_v57  ;;  %v4019_v16 = vmul.f32 %v11642_v31, %v4007_v4  ;;  %v11739_v57 = vmul.f32 0.70710677, %v11722_v5  ;;  %v8728_v58 = vpack.c.bf16 %v4249_v23, %v4247_v30  ;;  %v4257_v4 = vld [vmem:[%s13030_s30 + $0x3f0] sm:$0xff] }
0x11cb   :  { %v8722_v49 = vpack.c.bf16 %v4246_v33, %v4244_v47  ;;  %v4016_v27 = vmul.f32 %v11649_v32, %v4004_v38  ;;  %v4256_v47 = vld [vmem:[%s13030_s30 + $0x3e8] sm:$0xff]  ;;  %v4258_v33 = vld [vmem:[%s13030_s30 + $0x3f8] sm:$0xff]  ;;  %v3878_v38 = vmul.f32 0.3275911, %v11745_v55  ;;  %vm3835_vm15 = vcmp.ge.f32.partialorder %v11719_v12, 0.0 }
0x11cc   :  { %v8734_v60 = vpack.c.bf16 %v4258_v33, %v4256_v47  ;;  %v3809_v33 = vmul.f32 0.5, %v11530_v46  ;;  %v4268_v46 = vld [vmem:[%s13030_s30 + $0x448] sm:$0xff]  ;;  %vm3841_vm2 = vcmp.ge.f32.partialorder %v11739_v57, 0.0 }
0x11cd   :  { %8713 = vmatpush1.bf16.msra.mxu0 %v8712_v21  ;;  %v4250_v21 = vld [vmem:[%s13030_s30 + $0x3b8] sm:$0xff]  ;;  %v3853_v44 = vsel %vm3841_vm2, 1.0, %v12980_v53 }
0x11ce   :  { %8715 = vmatprep.subr.bf16.mxu0 %v8714_v3  ;;  %v9536_v3 = vpop.eup %9535  ;;  %v8726_v10 = vpack.c.bf16 %v4250_v21, %v4248_v40  ;;  %v3845_v40 = vsel %vm3833_vm4, 1.0, %v12980_v53  ;;  %v11754_v21 = vand.u32 2147483647, %v11739_v57 }
0x11cf   :  { %v9538_v1 = vpop.eup %9537  ;;  %v4073_v62 = vmul.f32 %v9536_v3, %v4013_v36  ;;  %v4260_v3 = vld [vmem:[%s13030_s30 + $0x408] sm:$0xff] }
0x11d0   :  { %v4080_v25 = vmul.f32 %v9538_v1, %v4020_v54  ;;  %v9540_v11 = vpop.eup %9539  ;;  %v3877_v7 = vmul.f32 0.3275911, %v11754_v21 }
0x11d1   :  { %8717 = vmatpush1.bf16.msra.mxu0 %v8716_v15  ;;  %v4253_v15 = vld [vmem:[%s13030_s30 + $0x3d0] sm:$0xff]  ;;  %v9542_v31 = vpop.eup %9541  ;;  %v4085_v32 = vsub.f32 1.0, %v4073_v62  ;;  %v4079_v22 = vmul.f32 %v9540_v11, %v4019_v16  ;;  %v8736_v62 = vpack.c.bf16 %v4257_v4, %v4255_v8 }
0x11d2   :  { %8719 = vmatprep.subr.bf16.mxu0 %v8718_v19  ;;  %v11736_v19 = vand.u32 2147483647, %v11719_v12  ;;  %v4076_v36 = vmul.f32 %v9542_v31, %v4016_v27  ;;  %v3890_v27 = vadd.f32 1.0, %v3878_v38  ;;  %v3816_v31 = vmul.f32 0.5, %v11539_v0  ;;  %v4265_v8 = vld [vmem:[%s13030_s30 + $0x430] sm:$0xff] }
0x11d3   :  { %v4097_v54 = vmul.f32 %v4085_v32, %v3845_v40  ;;  %v4091_v30 = vsub.f32 1.0, %v4079_v22  ;;  %v3889_v32 = vadd.f32 1.0, %v3877_v7  ;;  %v3815_v0 = vmul.f32 0.5, %v11549_v43 }
0x11d4   :  { %v3871_v59 = vmul.f32 0.3275911, %v11736_v19  ;;  %v4088_v1 = vsub.f32 1.0, %v4076_v36 }
0x11d5   :  { %8721 = vmatpush1.bf16.msra.mxu0 %v8720_v50  ;;  %v4092_v50 = vsub.f32 1.0, %v4080_v25  ;;  %v4109_v16 = vadd.f32 1.0, %v4097_v54  ;;  %v3848_v25 = vsel %vm3836_vm14, 1.0, %v12980_v53  ;;  %v3812_v54 = vmul.f32 0.5, %v11598_v52 }
0x11d6   :  { %8723 = vmatprep.subr.bf16.mxu0 %v8722_v49  ;;  %v8732_v49 = vpack.c.bf16 %v4253_v15, %v4251_v24  ;;  %v3883_v23 = vadd.f32 1.0, %v3871_v59  ;;  %v4259_v24 = vld [vmem:[%s13030_s30 + $0x400] sm:$0xff]  ;;  %v4261_v15 = vld [vmem:[%s13030_s30 + $0x410] sm:$0xff]  ;;  %v4100_v47 = vmul.f32 %v4088_v1, %v3848_v25  ;;  %v4270_v59 = vld [vmem:[%s13030_s30 + $0x458] sm:$0xff] }
0x11d7   :  { %v4104_v39 = vmul.f32 %v4092_v50, %v3852_v56  ;;  %v8740_v22 = vpack.c.bf16 %v4261_v15, %v4259_v24  ;;  %v4121_v50 = vmul.f32 %v4109_v16, %v3809_v33  ;;  %v4272_v1 = vld [vmem:[%s13030_s30 + $0x468] sm:$0xff]  ;;  %v4278_v16 = vld [vmem:[%s13030_s30 + $0x498] sm:$0xff] }
0x11d8   :  { %9543 = vrcp.f32 %v3883_v23  ;;  %v4112_v40 = vadd.f32 1.0, %v4100_v47  ;;  %v4273_v23 = vld [vmem:[%s13030_s30 + $0x470] sm:$0xff]  ;;  %v4282_v47 = vld [vmem:[%s13030_s30 + $0x4b8] sm:$0xff] }
0x11d9   :  { %8725 = vmatpush1.bf16.msra.mxu0 %v8724_v63  ;;  %v4262_v63 = vld [vmem:[%s13030_s30 + $0x418] sm:$0xff]  ;;  %v4116_v11 = vadd.f32 1.0, %v4104_v39  ;;  %9545 = vrcp.f32 %v3890_v27 }
0x11da   :  { %8727 = vmatprep.subr.bf16.mxu0 %v8726_v10  ;;  %v3851_v10 = vsel %vm3839_vm13, 1.0, %v12980_v53  ;;  %v8738_v6 = vpack.c.bf16 %v4262_v63, %v4260_v3  ;;  %9547 = vrcp.f32 %v3889_v32  ;;  %v8746_v3 = vpack.c.bf16 %v4270_v59, %v4268_v46  ;;  %v4267_v63 = vld [vmem:[%s13030_s30 + $0x440] sm:$0xff] }
0x11db   :  { %v4103_v34 = vmul.f32 %v4091_v30, %v3851_v10  ;;  %v4128_v4 = vmul.f32 %v4116_v11, %v3816_v31  ;;  %v4269_v30 = vld [vmem:[%s13030_s30 + $0x450] sm:$0xff]  ;;  %v4124_v39 = vmul.f32 %v4112_v40, %v3812_v54  ;;  %v4271_v10 = vld [vmem:[%s13030_s30 + $0x460] sm:$0xff] }
0x11dc   :  { %v8748_v43 = vpack.c.bf16 %v4269_v30, %v4267_v63  ;;  %v8752_v27 = vpack.c.bf16 %v4273_v23, %v4271_v10  ;;  %v4277_v11 = vld [vmem:[%s13030_s30 + $0x490] sm:$0xff]  ;;  %v4027_v10 = vsub.f32 0.0, %v11736_v19  ;;  %v4292_v23 = vld [vmem:[%s13030_s30 + $0x508] sm:$0xff] }
0x11dd   :  { %8729 = vmatpush1.bf16.msra.mxu0 %v8728_v58  ;;  %v4264_v58 = vld [vmem:[%s13030_s30 + $0x428] sm:$0xff]  ;;  %v4115_v36 = vadd.f32 1.0, %v4103_v34  ;;  %v4275_v34 = vld [vmem:[%s13030_s30 + $0x480] sm:$0xff]  ;;  %v4285_v54 = vld [vmem:[%s13030_s30 + $0x4d0] sm:$0xff] }
0x11de   :  { %8731 = vmatprep.subr.bf16.mxu0 %v8730_v28  ;;  %v4266_v28 = vld [vmem:[%s13030_s30 + $0x438] sm:$0xff]  ;;  %v8756_v31 = vpack.c.bf16 %v4277_v11, %v4275_v34  ;;  %v4291_v11 = vld [vmem:[%s13030_s30 + $0x500] sm:$0xff] }
0x11df   :  { %v4127_v38 = vmul.f32 %v4115_v36, %v3815_v0  ;;  %v4281_v36 = vld [vmem:[%s13030_s30 + $0x4b0] sm:$0xff]  ;;  %v4283_v0 = vld [vmem:[%s13030_s30 + $0x4c0] sm:$0xff] }
0x11e0   :  { %v8764_v30 = vpack.c.bf16 %v4285_v54, %v4283_v0  ;;  %v4300_v0 = vld [vmem:[%s13030_s30 + $0x548] sm:$0xff]  ;;  %v4302_v54 = vld [vmem:[%s13030_s30 + $0x558] sm:$0xff] }
0x11e1   :  { %8733 = vmatpush1.bf16.msra.mxu0 %v8732_v49  ;;  %v8742_v49 = vpack.c.bf16 %v4266_v28, %v4264_v58  ;;  %v4280_v28 = vld [vmem:[%s13030_s30 + $0x4a8] sm:$0xff] }
0x11e2   :  { %8735 = vmatprep.subr.bf16.mxu0 %v8734_v60  ;;  %v4263_v60 = vld [vmem:[%s13030_s30 + $0x420] sm:$0xff]  ;;  %v11782_v7 = vpop.eup %9543 }
0x11e3   :  { %v8744_v56 = vpack.c.bf16 %v4265_v8, %v4263_v60  ;;  %v11786_v25 = vpop.eup %9545  ;;  %v3919_v24 = vmul.f32 1.0614054, %v11782_v7  ;;  %v4284_v60 = vld [vmem:[%s13030_s30 + $0x4c8] sm:$0xff]  ;;  %v4286_v8 = vld [vmem:[%s13030_s30 + $0x4d8] sm:$0xff] }
0x11e4   :  { %v11791_v58 = vpop.eup %9547  ;;  %v3926_v33 = vmul.f32 1.0614054, %v11786_v25  ;;  %v8762_v59 = vpack.c.bf16 %v4286_v8, %v4284_v60 }
0x11e5   :  { %8737 = vmatpush1.bf16.msra.mxu0 %v8736_v62  ;;  %v4274_v62 = vld [vmem:[%s13030_s30 + $0x478] sm:$0xff]  ;;  %v3931_v32 = vadd.f32 -1.4531521, %v3919_v24 }
0x11e6   :  { %8739 = vmatprep.subr.bf16.mxu0 %v8738_v6  ;;  %v8750_v52 = vpack.c.bf16 %v4274_v62, %v4272_v1  ;;  %v4276_v6 = vld [vmem:[%s13030_s30 + $0x488] sm:$0xff]  ;;  %v4287_v62 = vld [vmem:[%s13030_s30 + $0x4e0] sm:$0xff] }
0x11e7   :  { %v8754_v15 = vpack.c.bf16 %v4278_v16, %v4276_v6  ;;  %v3943_v46 = vmul.f32 %v11782_v7, %v3931_v32  ;;  %v4294_v6 = vld [vmem:[%s13030_s30 + $0x518] sm:$0xff]  ;;  %v4296_v32 = vld [vmem:[%s13030_s30 + $0x528] sm:$0xff] }
0x11e8   :  { %4465 = vmatmul.mubr.f32.vlgmr.msra.gmra.mrb[28].mxu0 %v4121_v50  ;;  %v4279_v50 = vld [vmem:[%s13030_s30 + $0x4a0] sm:$0xff]  ;;  %v8770_v34 = vpack.c.bf16 %v4294_v6, %v4292_v23 }
0x11e9   :  { %4470 = vmatprep.mubr.f32.mxu0 %v4128_v4  ;;  %8741 = vmatpush1.bf16.msra.mxu0 %v8740_v22  ;;  %v8758_v22 = vpack.c.bf16 %v4282_v47, %v4280_v28  ;;  %v3938_v4 = vadd.f32 -1.4531521, %v3926_v33  ;;  %v8760_v40 = vpack.c.bf16 %v4281_v36, %v4279_v50  ;;  %v4293_v28 = vld [vmem:[%s13030_s30 + $0x510] sm:$0xff]  ;;  %v4039_v33 = vmul.f32 %v4027_v10, %v11736_v19 }
0x11ea   :  { %8743 = vmatprep.subr.bf16.mxu0 %v8742_v49  ;;  %v3925_v49 = vmul.f32 1.0614054, %v11791_v58 }
0x11eb   :  { %v3950_v63 = vmul.f32 %v11786_v25, %v3938_v4  ;;  %v4295_v4 = vld [vmem:[%s13030_s30 + $0x520] sm:$0xff] }
0x11ec   :  { %4471 = vmatmul.mubr.f32.gmra.mrb[30].mxu0 %v4127_v38  ;;  %v4288_v38 = vld [vmem:[%s13030_s30 + $0x4e8] sm:$0xff] }
0x11ed   :  { %8745 = vmatpush1.bf16.msra.mxu0 %v8744_v56  ;;  %4541 = vmatprep.mubr.f32.mxu0 %v4124_v39  ;;  %v3937_v56 = vadd.f32 -1.4531521, %v3925_v49  ;;  %v3955_v39 = vadd.f32 1.4214138, %v3943_v46  ;;  %v3962_v16 = vadd.f32 1.4214138, %v3950_v63  ;;  %v8772_v49 = vpack.c.bf16 %v4293_v28, %v4291_v11 }
0x11ee   :  { %8747 = vmatprep.subr.bf16.mxu0 %v8746_v3  ;;  %v4290_v3 = vld [vmem:[%s13030_s30 + $0x4f8] sm:$0xff]  ;;  %v4055_v46 = vmul.f32 1.442695, %v4039_v33  ;;  %v8778_v63 = vpack.c.bf16 %v4302_v54, %v4300_v0  ;;  %v4316_v0 = vld [vmem:[%s13030_s30 + $0x5c8] sm:$0xff] }
0x11ef   :  { %v8766_v1 = vpack.c.bf16 %v4290_v3, %v4288_v38  ;;  %v3974_v50 = vmul.f32 %v11786_v25, %v3962_v16  ;;  %v4303_v16 = vld [vmem:[%s13030_s30 + $0x560] sm:$0xff]  ;;  %v4318_v54 = vld [vmem:[%s13030_s30 + $0x5d8] sm:$0xff] }
0x11f0   :  { %9549 = vpow2.f32 %v4055_v46  ;;  %v4313_v46 = vld [vmem:[%s13030_s30 + $0x5b0] sm:$0xff] }
0x11f1   :  { %8749 = vmatpush1.bf16.msra.mxu0 %v8748_v43  ;;  %v4289_v43 = vld [vmem:[%s13030_s30 + $0x4f0] sm:$0xff] }
0x11f2   :  { %8751 = vmatprep.subr.bf16.mxu0 %v8750_v52  ;;  %v3949_v52 = vmul.f32 %v11791_v58, %v3937_v56  ;;  %v8768_v24 = vpack.c.bf16 %v4289_v43, %v4287_v62  ;;  %v3986_v56 = vadd.f32 -0.28449672, %v3974_v50  ;;  %v4304_v62 = vld [vmem:[%s13030_s30 + $0x568] sm:$0xff]  ;;  %v4306_v43 = vld [vmem:[%s13030_s30 + $0x578] sm:$0xff] }
0x11f3   :  { %v8782_v6 = vpack.c.bf16 %v4306_v43, %v4304_v62  ;;  %v4312_v50 = vld [vmem:[%s13030_s30 + $0x5a8] sm:$0xff]  ;;  %v3847_v62 = vsel %vm3835_vm15, 1.0, %v12980_v53 }
0x11f4   :  { %v3961_v47 = vadd.f32 1.4214138, %v3949_v52  ;;  %v3998_v52 = vmul.f32 %v11786_v25, %v3986_v56 }
0x11f5   :  { %8753 = vmatpush1.bf16.msra.mxu0 %v8752_v27  ;;  %v4034_v27 = vsub.f32 0.0, %v11745_v55 }
0x11f6   :  { %8755 = vmatprep.subr.bf16.mxu0 %v8754_v15  ;;  %v3967_v15 = vmul.f32 %v11782_v7, %v3955_v39  ;;  %v3973_v19 = vmul.f32 %v11791_v58, %v3961_v47  ;;  %v4301_v39 = vld [vmem:[%s13030_s30 + $0x550] sm:$0xff]  ;;  %v4010_v11 = vadd.f32 0.2548296, %v3998_v52  ;;  %v3854_v52 = vsel %vm3842_vm0, 1.0, %v12980_v53 }
0x11f7   :  { %v4046_v36 = vmul.f32 %v4034_v27, %v11745_v55  ;;  %v4305_v27 = vld [vmem:[%s13030_s30 + $0x570] sm:$0xff] }
0x11f8   :  { %v3979_v60 = vadd.f32 -0.28449672, %v3967_v15  ;;  %v4308_v15 = vld [vmem:[%s13030_s30 + $0x588] sm:$0xff]  ;;  %v8784_v28 = vpack.c.bf16 %v4305_v27, %v4303_v16 }
0x11f9   :  { %8757 = vmatpush1.bf16.msra.mxu0 %v8756_v31  ;;  %v4033_v31 = vsub.f32 0.0, %v11754_v21  ;;  %v4069_v55 = vmul.f32 1.442695, %v4046_v36  ;;  %v4314_v36 = vld [vmem:[%s13030_s30 + $0x5b8] sm:$0xff] }
0x11fa   :  { %8759 = vmatprep.subr.bf16.mxu0 %v8758_v22  ;;  %v4298_v22 = vld [vmem:[%s13030_s30 + $0x538] sm:$0xff]  ;;  %v3991_v3 = vmul.f32 %v11782_v7, %v3979_v60  ;;  %v9550_v60 = vpop.eup %9549 }
0x11fb   :  { %v8774_v8 = vpack.c.bf16 %v4298_v22, %v4296_v32  ;;  %9551 = vpow2.f32 %v4069_v55  ;;  %v4309_v32 = vld [vmem:[%s13030_s30 + $0x590] sm:$0xff] }
0x11fc   :  { %v4003_v23 = vadd.f32 0.2548296, %v3991_v3  ;;  %v8794_v3 = vpack.c.bf16 %v4318_v54, %v4316_v0 }
0x11fd   :  { %8761 = vmatpush1.bf16.msra.mxu0 %v8760_v40  ;;  %v4297_v40 = vld [vmem:[%s13030_s30 + $0x530] sm:$0xff] }
0x11fe   :  { %8763 = vmatprep.subr.bf16.mxu0 %v8762_v59  ;;  %v4045_v59 = vmul.f32 %v4033_v31, %v11754_v21  ;;  %v8776_v38 = vpack.c.bf16 %v4297_v40, %v4295_v4  ;;  %v4015_v47 = vmul.f32 %v11782_v7, %v4003_v23  ;;  %v4307_v31 = vld [vmem:[%s13030_s30 + $0x580] sm:$0xff]  ;;  %v8790_v7 = vpack.c.bf16 %v4314_v36, %v4312_v50 }
0x11ff   :  { %v4319_v23 = vld [vmem:[%s13030_s30 + $0x5e0] sm:$0xff] }
0x1200   :  { %v4067_v21 = vmul.f32 1.442695, %v4045_v59  ;;  %v4075_v40 = vmul.f32 %v9550_v60, %v4015_v47  ;;  %v4558_v50 = vld [vmem:[%s13035_s1] sm:$0x3] }
0x1201   :  { %8765 = vmatpush1.bf16.msra.mxu0 %v8764_v30  ;;  %v4299_v30 = vld [vmem:[%s13030_s30 + $0x540] sm:$0xff] }
0x1202   :  { %8767 = vmatprep.subr.bf16.mxu0 %v8766_v1  ;;  %v3985_v1 = vadd.f32 -0.28449672, %v3973_v19  ;;  %v8780_v10 = vpack.c.bf16 %v4301_v39, %v4299_v30  ;;  %9553 = vpow2.f32 %v4067_v21  ;;  %v4311_v19 = vld [vmem:[%s13030_s30 + $0x5a0] sm:$0xff]  ;;  %v4317_v30 = vld [vmem:[%s13030_s30 + $0x5d0] sm:$0xff] }
0x1205   :  { %8769 = vmatpush1.bf16.msra.mxu0 %v8768_v24  ;;  %v3997_v24 = vmul.f32 %v11791_v58, %v3985_v1  ;;  %v9552_v4 = vpop.eup %9551  ;;  %v4322_v1 = vld [vmem:[%s13030_s30 + $0x5f8] sm:$0xff] }
0x1206   :  { %8771 = vmatprep.subr.bf16.mxu0 %v8770_v34  ;;  %v4310_v34 = vld [vmem:[%s13030_s30 + $0x598] sm:$0xff] }
0x1207   :  { %v8786_v33 = vpack.c.bf16 %v4310_v34, %v4308_v15  ;;  %v4009_v22 = vadd.f32 0.2548296, %v3997_v24 }
0x1209   :  { %8773 = vmatpush1.bf16.msra.mxu0 %v8772_v49  ;;  %v4022_v49 = vmul.f32 %v11786_v25, %v4010_v11  ;;  %v4021_v59 = vmul.f32 %v11791_v58, %v4009_v22  ;;  %v8792_v25 = vpack.c.bf16 %v4313_v46, %v4311_v19  ;;  %v4320_v58 = vld [vmem:[%s13030_s30 + $0x5e8] sm:$0xff]  ;;  %v3811_v11 = vmul.f32 0.5, %v11706_v9 }
0x120a   :  { %8775 = vmatprep.subr.bf16.mxu0 %v8774_v8  ;;  %v8788_v8 = vpack.c.bf16 %v4309_v32, %v4307_v31  ;;  %v3817_v32 = vmul.f32 0.5, %v11722_v5  ;;  %v4563_v9 = vrot.slane %v4558_v50, %v10379_v35 }
0x120b   :  { %v4082_v56 = vmul.f32 %v9552_v4, %v4022_v49  ;;  %v4567_v49 = vrot.slane %v4558_v50, %v10375_v26 }
0x120c   :  { %v9554_v55 = vpop.eup %9553 }
0x120d   :  { %8777 = vmatpush1.bf16.msra.mxu0 %v8776_v38  ;;  %v4087_v38 = vsub.f32 1.0, %v4075_v40  ;;  %v4081_v39 = vmul.f32 %v9554_v55, %v4021_v59  ;;  %v4094_v21 = vsub.f32 1.0, %v4082_v56  ;;  %v4645_v56 = vld [vmem:[%s13036_s2 + $0x8] sm:$0xff]  ;;  %v4650_v55 = vld [vmem:[%s13036_s2 + $0x30] sm:$0xff] }
0x120e   :  { %8779 = vmatprep.subr.bf16.mxu0 %v8778_v63  ;;  %v4315_v63 = vld [vmem:[%s13030_s30 + $0x5c0] sm:$0xff] }
0x120f   :  { %v8796_v43 = vpack.c.bf16 %v4317_v30, %v4315_v63  ;;  %v4099_v12 = vmul.f32 %v4087_v38, %v3847_v62  ;;  %v4093_v16 = vsub.f32 1.0, %v4081_v39  ;;  %v4106_v27 = vmul.f32 %v4094_v21, %v3854_v52  ;;  %v4655_v63 = vld [vmem:[%s13036_s2 + $0x58] sm:$0xff]  ;;  %v4660_v30 = vld [vmem:[%s13036_s2 + $0x80] sm:$0xff]  ;;  %v4665_v62 = vld [vmem:[%s13036_s2 + $0xa8] sm:$0xff] }
0x1210   :  { %v8802_v38 = vpack.c.bf16 %v4650_v55, %v4645_v56  ;;  %v4659_v21 = vld [vmem:[%s13036_s2 + $0x78] sm:$0xff] }
0x1211   :  { %8781 = vmatpush1.bf16.msra.mxu0 %v8780_v10  ;;  %v8798_v10 = vpack.c.bf16 %v4322_v1, %v4320_v58  ;;  %v4111_v15 = vadd.f32 1.0, %v4099_v12  ;;  %v4105_v34 = vmul.f32 %v4093_v16, %v3853_v44  ;;  %v4118_v57 = vadd.f32 1.0, %v4106_v27  ;;  %v4654_v1 = vld [vmem:[%s13036_s2 + $0x50] sm:$0xff]  ;;  %v4680_v16 = vld [vmem:[%s13036_s2 + $0x120] sm:$0xff] }
0x1212   :  { %8783 = vmatprep.subr.bf16.mxu0 %v8782_v6  ;;  %v4321_v6 = vld [vmem:[%s13030_s30 + $0x5f0] sm:$0xff]  ;;  %v8806_v58 = vpack.c.bf16 %v4660_v30, %v4655_v63  ;;  %8803 = vmatprep.subr.bf16.mxu1 %v8802_v38  ;;  %v8808_v12 = vpack.c.bf16 %v4659_v21, %v4654_v1 }
0x1213   :  { %v8800_v24 = vpack.c.bf16 %v4321_v6, %v4319_v23  ;;  %v4123_v47 = vmul.f32 %v4111_v15, %v3811_v11  ;;  %v4669_v23 = vld [vmem:[%s13036_s2 + $0xc8] sm:$0xff]  ;;  %v4675_v6 = vld [vmem:[%s13036_s2 + $0xf8] sm:$0xff] }
0x1214   :  { %v8814_v44 = vpack.c.bf16 %v4680_v16, %v4675_v6  ;;  %v4679_v15 = vld [vmem:[%s13036_s2 + $0x118] sm:$0xff]  ;;  %v4730_v6 = vld [vmem:[%s13036_s2 + $0x2b0] sm:$0xff] }
0x1215   :  { %8785 = vmatpush1.bf16.msra.mxu0 %v8784_v28  ;;  %v3818_v28 = vmul.f32 0.5, %v11711_v61 }
0x1216   :  { %8787 = vmatprep.subr.bf16.mxu0 %v8786_v33  ;;  %v4117_v33 = vadd.f32 1.0, %v4105_v34  ;;  %v4685_v34 = vld [vmem:[%s13036_s2 + $0x148] sm:$0xff] }
0x1217   :  { %v4130_v31 = vmul.f32 %v4118_v57, %v3818_v28  ;;  %v4690_v57 = vld [vmem:[%s13036_s2 + $0x170] sm:$0xff] }
0x1218   :  { %v4129_v22 = vmul.f32 %v4117_v33, %v3817_v32  ;;  %v8818_v28 = vpack.c.bf16 %v4690_v57, %v4685_v34  ;;  %v4689_v33 = vld [vmem:[%s13036_s2 + $0x168] sm:$0xff]  ;;  %v4700_v32 = vld [vmem:[%s13036_s2 + $0x1c0] sm:$0xff] }
0x1219   :  { %8789 = vmatpush1.bf16.msra.mxu0 %v8788_v8  ;;  %v4740_v34 = vld [vmem:[%s13036_s2 + $0x300] sm:$0xff] }
0x121a   :  { %8791 = vmatprep.subr.bf16.mxu0 %v8790_v7 }
0x121d   :  { %8793 = vmatpush1.bf16.msra.mxu0 %v8792_v25  ;;  %v4644_v25 = vld [vmem:[%s13036_s2] sm:$0xff] }
0x121e   :  { %8795 = vmatprep.subr.bf16.mxu0 %v8794_v3  ;;  %v4649_v3 = vld [vmem:[%s13036_s2 + $0x28] sm:$0xff] }
0x121f   :  { %v8804_v39 = vpack.c.bf16 %v4649_v3, %v4644_v25 }
0x1221   :  { %8797 = vmatpush1.bf16.msra.mxu0 %v8796_v43  ;;  %v4670_v43 = vld [vmem:[%s13036_s2 + $0xd0] sm:$0xff]  ;;  %8805 = vmatpush1.bf16.msra.mxu1 %v8804_v39 }
0x1222   :  { %8799 = vmatprep.subr.bf16.mxu0 %v8798_v10  ;;  %8807 = vmatprep.subr.bf16.mxu1 %v8806_v58  ;;  %v8810_v52 = vpack.c.bf16 %v4670_v43, %v4665_v62  ;;  %v4664_v10 = vld [vmem:[%s13036_s2 + $0xa0] sm:$0xff]  ;;  %v4715_v62 = vld [vmem:[%s13036_s2 + $0x238] sm:$0xff] }
0x1223   :  { %v8812_v27 = vpack.c.bf16 %v4669_v23, %v4664_v10  ;;  %v4720_v43 = vld [vmem:[%s13036_s2 + $0x260] sm:$0xff]  ;;  %v4719_v10 = vld [vmem:[%s13036_s2 + $0x258] sm:$0xff]  ;;  %v4725_v23 = vld [vmem:[%s13036_s2 + $0x288] sm:$0xff] }
0x1225   :  { %8801 = vmatpush1.bf16.msra.mxu0 %v8800_v24  ;;  %8809 = vmatpush1.bf16.msra.mxu1 %v8808_v12  ;;  %v4674_v24 = vld [vmem:[%s13036_s2 + $0xf0] sm:$0xff] }
0x1226   :  { %8811 = vmatprep.subr.bf16.mxu1 %v8810_v52  ;;  %v8816_v11 = vpack.c.bf16 %v4679_v15, %v4674_v24  ;;  %v4714_v12 = vld [vmem:[%s13036_s2 + $0x230] sm:$0xff]  ;;  %v8830_v52 = vpack.c.bf16 %v4720_v43, %v4715_v62  ;;  %v4729_v24 = vld [vmem:[%s13036_s2 + $0x2a8] sm:$0xff]  ;;  %v4735_v15 = vld [vmem:[%s13036_s2 + $0x2d8] sm:$0xff] }
0x1227   :  { %v8832_v16 = vpack.c.bf16 %v4719_v10, %v4714_v12  ;;  %v4646_v10 = vld [vmem:[%s13036_s2 + $0x10] sm:$0xff] }
0x1228   :  { %4542 = vmatmul.mubr.f32.vlgmr.msra.gmra.mrb[28].mxu0 %v4123_v47  ;;  %v4684_v47 = vld [vmem:[%s13036_s2 + $0x140] sm:$0xff] }
0x1229   :  { %4547 = vmatprep.mubr.f32.mxu0 %v4130_v31  ;;  %8813 = vmatpush1.bf16.msra.mxu1 %v8812_v27  ;;  %v4695_v31 = vld [vmem:[%s13036_s2 + $0x198] sm:$0xff]  ;;  %v8834_v27 = vpack.c.bf16 %v4730_v6, %v4725_v23 }
0x122a   :  { %8815 = vmatprep.subr.bf16.mxu1 %v8814_v44  ;;  %v8822_v50 = vpack.c.bf16 %v4700_v32, %v4695_v31  ;;  %v4724_v44 = vld [vmem:[%s13036_s2 + $0x280] sm:$0xff]  ;;  %v4750_v31 = vld [vmem:[%s13036_s2 + $0x350] sm:$0xff]  ;;  %v4651_v23 = vld [vmem:[%s13036_s2 + $0x38] sm:$0xff] }
0x122b   :  { %v8836_v57 = vpack.c.bf16 %v4729_v24, %v4724_v44  ;;  %v4662_v44 = vld [vmem:[%s13036_s2 + $0x90] sm:$0xff] }
0x122c   :  { %4548 = vmatmul.mubr.f32.gmra.mrb[30].mxu0 %v4129_v22  ;;  %v8820_v22 = vpack.c.bf16 %v4689_v33, %v4684_v47  ;;  %v4739_v47 = vld [vmem:[%s13036_s2 + $0x2f8] sm:$0xff]  ;;  %v4745_v33 = vld [vmem:[%s13036_s2 + $0x328] sm:$0xff] }
0x122d   :  { %8817 = vmatpush1.bf16.msra.mxu1 %v8816_v11  ;;  %v8838_v11 = vpack.c.bf16 %v4740_v34, %v4735_v15  ;;  %v8852_v15 = vpack.c.bf16 %v4651_v23, %v4646_v10  ;;  %v4711_v10 = vld [vmem:[%s13036_s2 + $0x218] sm:$0xff]  ;;  %v4717_v23 = vld [vmem:[%s13036_s2 + $0x248] sm:$0xff] }
0x122e   :  { %8819 = vmatprep.subr.bf16.mxu1 %v8818_v28  ;;  %v4734_v28 = vld [vmem:[%s13036_s2 + $0x2d0] sm:$0xff] }
0x122f   :  { %v8840_v32 = vpack.c.bf16 %v4739_v47, %v4734_v28  ;;  %v4656_v28 = vld [vmem:[%s13036_s2 + $0x60] sm:$0xff]  ;;  %v4661_v47 = vld [vmem:[%s13036_s2 + $0x88] sm:$0xff] }
0x1231   :  { %8821 = vmatpush1.bf16.msra.mxu1 %v8820_v22  ;;  %v8842_v22 = vpack.c.bf16 %v4750_v31, %v4745_v33 }
0x1232   :  { %8823 = vmatprep.subr.bf16.mxu1 %v8822_v50  ;;  %v4744_v50 = vld [vmem:[%s13036_s2 + $0x320] sm:$0xff] }
0x12fb   :  { %v4543_v36 = vpop.f32.mrb[28].mxu0 }
0x12fc   :  { %v4554_v60 = vadd.f32 %v4543_v36, %v11196_v13  ;;  %v4545_v8 = vpop.f32.mrb[29].mxu0  ;;  %v4694_v36 = vld [vmem:[%s13036_s2 + $0x190] sm:$0xff] }
0x12fd   :  { %v4555_v61 = vadd.f32 %v4545_v8, %v11194_v48 }
0x12fe   :  { %v11873_v40 = vadd.f32 %v4563_v9, %v4554_v60  ;;  %v4705_v60 = vld [vmem:[%s13036_s2 + $0x1e8] sm:$0xff] }
0x12ff   :  { %v11871_v4 = vadd.f32 %v4567_v49, %v4555_v61  ;;  %v4549_v5 = vpop.f32.mrb[30].mxu0 }
0x1300   :  { %v4556_v7 = vadd.f32 %v4549_v5, %v11202_v14  ;;  %v4551_v19 = vpop.f32.mrb[31].mxu0  ;;  %v4704_v5 = vld [vmem:[%s13036_s2 + $0x1e0] sm:$0xff] }
0x1301   :  { %v4557_v13 = vadd.f32 %v4551_v19, %v11205_v51  ;;  %v4574_v46 = vsel %vm829_vm3, %v11871_v4, 0.0 }
0x1302   :  { %v11879_v48 = vadd.f32 %v4563_v9, %v4556_v7  ;;  %v4575_v59 = vadd.f32 %v4574_v46, %v11873_v40  ;;  %v4710_v9 = vld [vmem:[%s13036_s2 + $0x210] sm:$0xff]  ;;  %v4709_v7 = vld [vmem:[%s13036_s2 + $0x208] sm:$0xff] }
0x1303   :  { %v11882_v0 = vadd.f32 %v4567_v49, %v4557_v13  ;;  %v4699_v49 = vld [vmem:[%s13036_s2 + $0x1b8] sm:$0xff]  ;;  %v8826_v61 = vpack.c.bf16 %v4710_v9, %v4705_v60  ;;  %v8828_v19 = vpack.c.bf16 %v4709_v7, %v4704_v5  ;;  %v4760_v60 = vld [vmem:[%s13036_s2 + $0x3a0] sm:$0xff] }
0x1304   :  { %4576 = vadd.xlane.f32.xlu1 %v4575_v59  ;;  %v4578_v14 = vsel %vm691_vm1, %v11879_v48, 0.0  ;;  %v8824_v8 = vpack.c.bf16 %v4699_v49, %v4694_v36  ;;  %v4749_v36 = vld [vmem:[%s13036_s2 + $0x348] sm:$0xff]  ;;  %v4755_v49 = vld [vmem:[%s13036_s2 + $0x378] sm:$0xff] }
0x1305   :  { %v4579_v51 = vsel %vm2133_vm5, %v11882_v0, 0.0  ;;  %v8844_v9 = vpack.c.bf16 %v4749_v36, %v4744_v50  ;;  %v4759_v5 = vld [vmem:[%s13036_s2 + $0x398] sm:$0xff]  ;;  %v8856_v50 = vpack.c.bf16 %v4661_v47, %v4656_v28  ;;  %v4726_v28 = vld [vmem:[%s13036_s2 + $0x290] sm:$0xff] }
0x1306   :  { %v4580_v54 = vadd.f32 %v4579_v51, %v4578_v14  ;;  %8825 = vmatpush1.bf16.msra.mxu1 %v8824_v8  ;;  %v8846_v8 = vpack.c.bf16 %v4760_v60, %v4755_v49  ;;  %v4647_v7 = vld [vmem:[%s13036_s2 + $0x18] sm:$0xff]  ;;  %v4666_v49 = vld [vmem:[%s13036_s2 + $0xb0] sm:$0xff] }
0x1307   :  { %8827 = vmatprep.subr.bf16.mxu1 %v8826_v61  ;;  %v4754_v61 = vld [vmem:[%s13036_s2 + $0x370] sm:$0xff]  ;;  %v4671_v60 = vld [vmem:[%s13036_s2 + $0xd8] sm:$0xff] }
0x1308   :  { %4581 = vadd.xlane.f32.xlu0 %v4580_v54  ;;  %v4731_v47 = vld [vmem:[%s13036_s2 + $0x2b8] sm:$0xff] }
0x130a   :  { %8829 = vmatpush1.bf16.msra.mxu1 %v8828_v19  ;;  %v4652_v19 = vld [vmem:[%s13036_s2 + $0x40] sm:$0xff] }
0x130b   :  { %8831 = vmatprep.subr.bf16.mxu1 %v8830_v52 }
0x130e   :  { %8833 = vmatpush1.bf16.msra.mxu1 %v8832_v16 }
0x130f   :  { %8835 = vmatprep.subr.bf16.mxu1 %v8834_v27  ;;  %v4657_v27 = vld [vmem:[%s13036_s2 + $0x68] sm:$0xff] }
0x1312   :  { %8837 = vmatpush1.bf16.msra.mxu1 %v8836_v57 }
0x1313   :  { %8839 = vmatprep.subr.bf16.mxu1 %v8838_v11  ;;  %v8854_v11 = vpack.c.bf16 %v4662_v44, %v4657_v27  ;;  %v4716_v44 = vld [vmem:[%s13036_s2 + $0x240] sm:$0xff] }
0x1316   :  { %8841 = vmatpush1.bf16.msra.mxu1 %v8840_v32  ;;  %v4667_v32 = vld [vmem:[%s13036_s2 + $0xb8] sm:$0xff] }
0x1317   :  { %8843 = vmatprep.subr.bf16.mxu1 %v8842_v22  ;;  %v4672_v22 = vld [vmem:[%s13036_s2 + $0xe0] sm:$0xff] }
0x1318   :  { %v8858_v36 = vpack.c.bf16 %v4672_v22, %v4667_v32  ;;  %v8884_v32 = vpack.c.bf16 %v4731_v47, %v4726_v28  ;;  %v4728_v28 = vld [vmem:[%s13036_s2 + $0x2a0] sm:$0xff]  ;;  %v4733_v47 = vld [vmem:[%s13036_s2 + $0x2c8] sm:$0xff] }
0x131a   :  { %8845 = vmatpush1.bf16.msra.mxu1 %v8844_v9  ;;  %v4677_v9 = vld [vmem:[%s13036_s2 + $0x108] sm:$0xff] }
0x131b   :  { %8847 = vmatprep.subr.bf16.mxu1 %v8846_v8  ;;  %v4682_v8 = vld [vmem:[%s13036_s2 + $0x130] sm:$0xff] }
0x1391   :  { %v4577_v13 = vpop.xlane.xlu1 %4576 }
0x1392   :  { %v4583_v46 = vmul.f32 0.0052083335, %v4577_v13  ;;  %v8848_v13 = vpack.c.bf16 %v4759_v5, %v4754_v61  ;;  %v8860_v61 = vpack.c.bf16 %v4671_v60, %v4666_v49  ;;  %v8862_v5 = vpack.c.bf16 %v4682_v8, %v4677_v9  ;;  %v4747_v49 = vld [vmem:[%s13036_s2 + $0x338] sm:$0xff]  ;;  %v4752_v60 = vld [vmem:[%s13036_s2 + $0x360] sm:$0xff] }
0x1393   :  { %v8890_v8 = vpack.c.bf16 %v4752_v60, %v4747_v49  ;;  %v4758_v60 = vld [vmem:[%s13036_s2 + $0x390] sm:$0xff] }
0x1394   :  { %v11917_v59 = vsub.f32 %v11873_v40, %v4583_v46  ;;  %v11920_v14 = vsub.f32 %v11871_v4, %v4583_v46  ;;  %v8850_v46 = vpack.c.bf16 %v4652_v19, %v4647_v7  ;;  %8849 = vmatpush1.bf16.msra.mxu1 %v8848_v13  ;;  %v4676_v7 = vld [vmem:[%s13036_s2 + $0x100] sm:$0xff]  ;;  %v4681_v19 = vld [vmem:[%s13036_s2 + $0x128] sm:$0xff]  ;;  %v4687_v13 = vld [vmem:[%s13036_s2 + $0x158] sm:$0xff] }
0x1395   :  { %v4582_v51 = vpop.xlane.xlu0 %4581 }
0x1396   :  { %v4584_v54 = vmul.f32 0.0052083335, %v4582_v51  ;;  %v4589_v56 = vmul.f32 %v11917_v59, %v11917_v59  ;;  %v4590_v55 = vmul.f32 %v11920_v14, %v11920_v14  ;;  %8851 = vmatprep.subr.bf16.mxu1 %v8850_v46  ;;  %v4692_v46 = vld [vmem:[%s13036_s2 + $0x180] sm:$0xff] }
0x1398   :  { %v11927_v25 = vsub.f32 %v11879_v48, %v4584_v54  ;;  %v11930_v38 = vsub.f32 %v11882_v0, %v4584_v54  ;;  %v4593_v3 = vsel %vm829_vm3, %v4590_v55, 0.0 }
0x1399   :  { %v4594_v63 = vadd.f32 %v4593_v3, %v4589_v56 }
0x139a   :  { %v4591_v30 = vmul.f32 %v11927_v25, %v11927_v25  ;;  %v4592_v39 = vmul.f32 %v11930_v38, %v11930_v38 }
0x139b   :  { %4595 = vadd.xlane.f32.xlu1 %v4594_v63 }
0x139c   :  { %v4597_v58 = vsel %vm691_vm1, %v4591_v30, 0.0  ;;  %v4598_v1 = vsel %vm2133_vm5, %v4592_v39, 0.0  ;;  %v4612_v30 = vld [vmem:[%s13037_s7] sm:$0x3] }
0x139d   :  { %v4599_v21 = vadd.f32 %v4598_v1, %v4597_v58  ;;  %v4628_v39 = vld [vmem:[%s13038_s10] sm:$0x3]  ;;  %v4617_v58 = vrot.slane %v4612_v30, %v10379_v35  ;;  %v4621_v1 = vrot.slane %v4612_v30, %v10375_v26 }
0x139e   :  { %v4633_v12 = vrot.slane %v4628_v39, %v10379_v35  ;;  %v4637_v52 = vrot.slane %v4628_v39, %v10375_v26 }
0x139f   :  { %4600 = vadd.xlane.f32.xlu0 %v4599_v21 }
0x1428   :  { %v4596_v51 = vpop.xlane.xlu1 %4595 }
0x1429   :  { %v4602_v54 = vmul.f32 0.0052083335, %v4596_v51  ;;  %v8864_v51 = vpack.c.bf16 %v4681_v19, %v4676_v7  ;;  %v4757_v7 = vld [vmem:[%s13036_s2 + $0x388] sm:$0xff]  ;;  %v4762_v19 = vld [vmem:[%s13036_s2 + $0x3b0] sm:$0xff] }
0x142b   :  { %v4604_v56 = vadd.f32 1e-05, %v4602_v54  ;;  %v8866_v54 = vpack.c.bf16 %v4692_v46, %v4687_v13  ;;  %v8894_v46 = vpack.c.bf16 %v4762_v19, %v4757_v7 }
0x142c   :  { %v4601_v55 = vpop.xlane.xlu0 %4600 }
0x142d   :  { %9555 = vrsqrt.f32 %v4604_v56  ;;  %v4603_v3 = vmul.f32 0.0052083335, %v4601_v55  ;;  %v4686_v56 = vld [vmem:[%s13036_s2 + $0x150] sm:$0xff]  ;;  %v4691_v55 = vld [vmem:[%s13036_s2 + $0x178] sm:$0xff] }
0x142e   :  { %v8868_v30 = vpack.c.bf16 %v4691_v55, %v4686_v56  ;;  %v4648_v55 = vld [vmem:[%s13036_s2 + $0x20] sm:$0xff] }
0x142f   :  { %v4605_v63 = vadd.f32 1e-05, %v4603_v3  ;;  %v4697_v3 = vld [vmem:[%s13036_s2 + $0x1a8] sm:$0xff] }
0x1431   :  { %9557 = vrsqrt.f32 %v4605_v63  ;;  %v4702_v63 = vld [vmem:[%s13036_s2 + $0x1d0] sm:$0xff] }
0x1432   :  { %v8870_v39 = vpack.c.bf16 %v4702_v63, %v4697_v3  ;;  %v4653_v3 = vld [vmem:[%s13036_s2 + $0x48] sm:$0xff] }
0x1433   :  { %v8899_v63 = vpack.c.bf16 %v4653_v3, %v4648_v55 }
0x1437   :  { %v9556_v21 = vpop.eup %9555 }
0x1438   :  { %v4608_v62 = vmul.f32 %v9556_v21, %v11917_v59  ;;  %v4609_v43 = vmul.f32 %v9556_v21, %v11920_v14  ;;  %v4707_v21 = vld [vmem:[%s13036_s2 + $0x1f8] sm:$0xff] }
0x143a   :  { %v4625_v6 = vmul.f32 %v4621_v1, %v4609_v43  ;;  %v4624_v16 = vmul.f32 %v4617_v58, %v4608_v62  ;;  %v4712_v62 = vld [vmem:[%s13036_s2 + $0x220] sm:$0xff] }
0x143b   :  { %v9558_v24 = vpop.eup %9557 }
0x143c   :  { %v11973_v34 = vadd.f32 %v4637_v52, %v4625_v6  ;;  %v11975_v59 = vadd.f32 %v4633_v12, %v4624_v16  ;;  %v4611_v14 = vmul.f32 %v9558_v24, %v11930_v38  ;;  %v4610_v57 = vmul.f32 %v9558_v24, %v11927_v25  ;;  %v4722_v6 = vld [vmem:[%s13036_s2 + $0x270] sm:$0xff]  ;;  %v4721_v24 = vld [vmem:[%s13036_s2 + $0x268] sm:$0xff] }
0x143d   :  { %v8878_v27 = vpack.c.bf16 %v4722_v6, %v4717_v23  ;;  %v4693_v23 = vld [vmem:[%s13036_s2 + $0x188] sm:$0xff] }
0x143e   :  { %7264 = vmatprep.mubr.msk.f32.mxu1 %vm829_vm3, %v11973_v34  ;;  %v4627_v33 = vmul.f32 %v4621_v1, %v4611_v14  ;;  %v4626_v31 = vmul.f32 %v4617_v58, %v4610_v57  ;;  %v4696_v58 = vld [vmem:[%s13036_s2 + $0x1a0] sm:$0xff]  ;;  %v4701_v1 = vld [vmem:[%s13036_s2 + $0x1c8] sm:$0xff]  ;;  %v8880_v57 = vpack.c.bf16 %v4721_v24, %v4716_v44 }
0x143f   :  { %4835 = vmatmul.mubr.f32.vlgmr.msra.gmra.mrb[48].mxu1 %v11975_v59  ;;  %v8872_v43 = vpack.c.bf16 %v4701_v1, %v4696_v58  ;;  %v4732_v14 = vld [vmem:[%s13036_s2 + $0x2c0] sm:$0xff]  ;;  %v4713_v24 = vld [vmem:[%s13036_s2 + $0x228] sm:$0xff] }
0x1440   :  { %8853 = vmatpush1.bf16.msra.mxu1 %v8852_v15  ;;  %v11986_v38 = vadd.f32 %v4637_v52, %v4627_v33  ;;  %v11988_v25 = vadd.f32 %v4633_v12, %v4626_v31  ;;  %v8874_v12 = vpack.c.bf16 %v4712_v62, %v4707_v21  ;;  %v4706_v52 = vld [vmem:[%s13036_s2 + $0x1f0] sm:$0xff]  ;;  %v4727_v15 = vld [vmem:[%s13036_s2 + $0x298] sm:$0xff]  ;;  %v4737_v33 = vld [vmem:[%s13036_s2 + $0x2e8] sm:$0xff] }
0x1441   :  { %8855 = vmatprep.subr.bf16.mxu1 %v8854_v11  ;;  %v8876_v16 = vpack.c.bf16 %v4711_v10, %v4706_v52  ;;  %v8882_v11 = vpack.c.bf16 %v4732_v14, %v4727_v15  ;;  %v4742_v31 = vld [vmem:[%s13036_s2 + $0x310] sm:$0xff]  ;;  %v4668_v1 = vld [vmem:[%s13036_s2 + $0xc0] sm:$0xff]  ;;  %v4673_v21 = vld [vmem:[%s13036_s2 + $0xe8] sm:$0xff] }
0x1442   :  { %7265 = vmatprep.mubr.msk.f32.mxu1 %vm829_vm3, %v11986_v38  ;;  %v8886_v22 = vpack.c.bf16 %v4742_v31, %v4737_v33  ;;  %v8905_v62 = vpack.c.bf16 %v4673_v21, %v4668_v1  ;;  %v4688_v10 = vld [vmem:[%s13036_s2 + $0x160] sm:$0xff]  ;;  %v4718_v14 = vld [vmem:[%s13036_s2 + $0x250] sm:$0xff]  ;;  %v8923_v33 = vpack.c.bf16 %v4733_v47, %v4728_v28 }
0x1443   :  { %4841 = vmatmul.mubr.f32.gmra.mrb[50].mxu1 %v11988_v25  ;;  %v8911_v6 = vpack.c.bf16 %v4693_v23, %v4688_v10  ;;  %v4708_v44 = vld [vmem:[%s13036_s2 + $0x200] sm:$0xff]  ;;  %v4738_v31 = vld [vmem:[%s13036_s2 + $0x2f0] sm:$0xff] }
0x1444   :  { %8857 = vmatpush1.bf16.msra.mxu1 %v8856_v50  ;;  %7266 = vmatprep.mubr.msk.f32.mxu1 %vm829_vm3, %v11973_v34  ;;  %v4736_v50 = vld [vmem:[%s13036_s2 + $0x2e0] sm:$0xff]  ;;  %v8917_v15 = vpack.c.bf16 %v4713_v24, %v4708_v44 }
0x1445   :  { %8859 = vmatprep.subr.bf16.mxu1 %v8858_v36  ;;  %v4741_v36 = vld [vmem:[%s13036_s2 + $0x308] sm:$0xff]  ;;  %v12118_v23 = vld [vmem:[%s13026_s3] sm:$0xff] }
0x1446   :  { %v8888_v9 = vpack.c.bf16 %v4741_v36, %v4736_v50  ;;  %v4748_v50 = vld [vmem:[%s13036_s2 + $0x340] sm:$0xff]  ;;  %v4753_v36 = vld [vmem:[%s13036_s2 + $0x368] sm:$0xff] }
0x1447   :  { %v8929_v49 = vpack.c.bf16 %v4753_v36, %v4748_v50 }
0x1448   :  { %8861 = vmatpush1.bf16.msra.mxu1 %v8860_v61  ;;  %v4746_v61 = vld [vmem:[%s13036_s2 + $0x330] sm:$0xff] }
0x1449   :  { %8863 = vmatprep.subr.bf16.mxu1 %v8862_v5  ;;  %v4751_v5 = vld [vmem:[%s13036_s2 + $0x358] sm:$0xff] }
0x144a   :  { %v8892_v13 = vpack.c.bf16 %v4751_v5, %v4746_v61 }
0x144c   :  { %8865 = vmatpush1.bf16.msra.mxu1 %v8864_v51  ;;  %v4756_v51 = vld [vmem:[%s13036_s2 + $0x380] sm:$0xff] }
0x144d   :  { %8867 = vmatprep.subr.bf16.mxu1 %v8866_v54  ;;  %v4761_v54 = vld [vmem:[%s13036_s2 + $0x3a8] sm:$0xff] }
0x144e   :  { %v8896_v56 = vpack.c.bf16 %v4761_v54, %v4756_v51 }
0x1450   :  { %8869 = vmatpush1.bf16.msra.mxu1 %v8868_v30  ;;  %v4658_v30 = vld [vmem:[%s13036_s2 + $0x70] sm:$0xff] }
0x1451   :  { %8871 = vmatprep.subr.bf16.mxu1 %v8870_v39  ;;  %v4663_v39 = vld [vmem:[%s13036_s2 + $0x98] sm:$0xff] }
0x1452   :  { %v8902_v58 = vpack.c.bf16 %v4663_v39, %v4658_v30 }
0x1454   :  { %8873 = vmatpush1.bf16.msra.mxu1 %v8872_v43  ;;  %v4678_v43 = vld [vmem:[%s13036_s2 + $0x110] sm:$0xff] }
0x1455   :  { %8875 = vmatprep.subr.bf16.mxu1 %v8874_v12  ;;  %v4683_v12 = vld [vmem:[%s13036_s2 + $0x138] sm:$0xff] }
0x1456   :  { %v8908_v52 = vpack.c.bf16 %v4683_v12, %v4678_v43 }
0x1458   :  { %8877 = vmatpush1.bf16.msra.mxu1 %v8876_v16  ;;  %v4703_v16 = vld [vmem:[%s13036_s2 + $0x1d8] sm:$0xff] }
0x1459   :  { %8879 = vmatprep.subr.bf16.mxu1 %v8878_v27 }
0x145c   :  { %8881 = vmatpush1.bf16.msra.mxu1 %v8880_v57  ;;  %v4723_v57 = vld [vmem:[%s13036_s2 + $0x278] sm:$0xff] }
0x145d   :  { %8883 = vmatprep.subr.bf16.mxu1 %v8882_v11  ;;  %v8920_v11 = vpack.c.bf16 %v4723_v57, %v4718_v14 }
0x1460   :  { %8885 = vmatpush1.bf16.msra.mxu1 %v8884_v32  ;;  %v4743_v32 = vld [vmem:[%s13036_s2 + $0x318] sm:$0xff] }
0x1461   :  { %8887 = vmatprep.subr.bf16.mxu1 %v8886_v22  ;;  %v8926_v22 = vpack.c.bf16 %v4743_v32, %v4738_v31 }
0x1464   :  { %8889 = vmatpush1.bf16.msra.mxu1 %v8888_v9  ;;  %v4763_v9 = vld [vmem:[%s13036_s2 + $0x3b8] sm:$0xff] }
0x1465   :  { %8891 = vmatprep.subr.bf16.mxu1 %v8890_v8  ;;  %v8932_v8 = vpack.c.bf16 %v4763_v9, %v4758_v60 }
0x1468   :  { %8893 = vmatpush1.bf16.msra.mxu1 %v8892_v13 }
0x1469   :  { %8895 = vmatprep.subr.bf16.mxu1 %v8894_v46 }
0x146c   :  { %8897 = vmatpush1.bf16.msra.mxu1 %v8896_v56 }
0x146d   :  { %8898 = vmatprep.subr.bf16.mxu1 %v9708_v45 }
0x146f   :  { %4912 = vmatmul.mubr.f32.vlgmr.msra.gmra.mrb[52].mxu1 %v11975_v59 }
0x1470   :  { %7267 = vmatprep.mubr.msk.f32.mxu1 %vm829_vm3, %v11986_v38  ;;  %8900 = vmatpush1.bf16.msra.mxu1 %v8899_v63 }
0x1471   :  { %8901 = vmatprep.subr.bf16.mxu1 %v9708_v45 }
0x1473   :  { %4918 = vmatmul.mubr.f32.gmra.mrb[54].mxu1 %v11988_v25 }
0x1474   :  { %8903 = vmatpush1.bf16.msra.mxu1 %v8902_v58  ;;  %7268 = vmatprep.mubr.msk.f32.mxu1 %vm829_vm3, %v11973_v34  ;;  %v4698_v34 = vld [vmem:[%s13036_s2 + $0x1b0] sm:$0xff] }
0x1475   :  { %8904 = vmatprep.subr.bf16.mxu1 %v9708_v45  ;;  %v8914_v27 = vpack.c.bf16 %v4703_v16, %v4698_v34  ;;  %v12122_v34 = vld [vmem:[%s13026_s3 + $0x8] sm:$0x3] }
0x1478   :  { %8906 = vmatpush1.bf16.msra.mxu1 %v8905_v62 }
0x1479   :  { %8907 = vmatprep.subr.bf16.mxu1 %v9708_v45 }
0x147c   :  { %8909 = vmatpush1.bf16.msra.mxu1 %v8908_v52 }
0x147d   :  { %8910 = vmatprep.subr.bf16.mxu1 %v9708_v45 }
0x1480   :  { %8912 = vmatpush1.bf16.msra.mxu1 %v8911_v6 }
0x1481   :  { %8913 = vmatprep.subr.bf16.mxu1 %v9708_v45 }
0x1484   :  { %8915 = vmatpush1.bf16.msra.mxu1 %v8914_v27 }
0x1485   :  { %8916 = vmatprep.subr.bf16.mxu1 %v9708_v45 }
0x1488   :  { %8918 = vmatpush1.bf16.msra.mxu1 %v8917_v15 }
0x1489   :  { %8919 = vmatprep.subr.bf16.mxu1 %v9708_v45 }
0x148c   :  { %8921 = vmatpush1.bf16.msra.mxu1 %v8920_v11 }
0x148d   :  { %8922 = vmatprep.subr.bf16.mxu1 %v9708_v45 }
0x1490   :  { %8924 = vmatpush1.bf16.msra.mxu1 %v8923_v33 }
0x1491   :  { %8925 = vmatprep.subr.bf16.mxu1 %v9708_v45 }
0x1494   :  { %8927 = vmatpush1.bf16.msra.mxu1 %v8926_v22 }
0x1495   :  { %8928 = vmatprep.subr.bf16.mxu1 %v9708_v45 }
0x1498   :  { %8930 = vmatpush1.bf16.msra.mxu1 %v8929_v49 }
0x1499   :  { %8931 = vmatprep.subr.bf16.mxu1 %v9708_v45 }
0x149c   :  { %8933 = vmatpush1.bf16.msra.mxu1 %v8932_v8 }
0x149f   :  { %4989 = vmatmul.mubr.f32.vlgmr.msra.gmra.mrb[56].mxu1 %v11975_v59 }
0x14a0   :  { %7269 = vmatprep.mubr.msk.f32.mxu1 %vm829_vm3, %v11986_v38 }
0x14a3   :  { %4994 = vmatmul.mubr.f32.gmra.mrb[58].mxu1 %v11988_v25 }
0x1512   :  { %v4836_v61 = vpop.f32.mrb[48].mxu1 }
0x1513   :  { %v4999_v5 = vmul.f32 0.125, %v4836_v61  ;;  %v12079_v7 = vpop.f32.mrb[49].mxu1 }
0x1515   :  { %7536 = vmatprep.mubr.msk.f32.mxu1 %vm829_vm3, %v4999_v5 }
0x1516   :  { %v4842_v19 = vpop.f32.mrb[50].mxu1 }
0x1517   :  { %v12082_v13 = vpop.f32.mrb[51].mxu1  ;;  %v5001_v12 = vmul.f32 0.125, %v4842_v19 }
0x1518   :  { %v9448_v45 = vpack.i.bf16 %v12082_v13, %v12079_v7 }
0x151a   :  { %9449 = vrot.lane.b32.xlu1 %v9448_v45, %s9709_s29 }
0x151e   :  { %5202 = vrot.lane.b32.xlu1 %v4999_v5, %s9709_s29 }
0x1542   :  { %v12088_v59 = vpop.f32.mrb[52].mxu1 }
0x1543   :  { %v12090_v38 = vpop.f32.mrb[53].mxu1 }
0x1546   :  { %v12092_v25 = vpop.f32.mrb[54].mxu1 }
0x1547   :  { %v9458_v46 = vpack.i.bf16 %v12092_v25, %v12088_v59  ;;  %v8946_v51 = vpack.c.bf16 %v12092_v25, %v12088_v59  ;;  %v12098_v54 = vpop.f32.mrb[55].mxu1 }
0x1548   :  { %v9453_v56 = vpack.i.bf16 %v12098_v54, %v12090_v38  ;;  %v8940_v55 = vpack.c.bf16 %v12098_v54, %v12090_v38 }
0x1572   :  { %v4990_v3 = vpop.f32.mrb[56].mxu1 }
0x1573   :  { %v4992_v63 = vpop.f32.mrb[57].mxu1 }
0x1576   :  { %v4995_v30 = vpop.f32.mrb[58].mxu1 }
0x1577   :  { %v12104_v39 = vpack.c.bf16 %v4995_v30, %v4990_v3  ;;  %v4997_v58 = vpop.f32.mrb[59].mxu1 }
0x158c   :  { %v9450_v1 = vpop.permute.xlu1 %9449 }
0x158d   :  { %v9452_v21 = vunpack.i.h.bf16 %v9450_v1  ;;  %v9451_v62 = vunpack.i.l.bf16 %v9450_v1 }
0x158f   :  { %v8934_v43 = vpack.c.bf16 %v9452_v21, %v9451_v62 }
0x1590   :  { %v5203_v8 = vpop.permute.xlu1 %5202 }
0x1591   :  { %8936 = vmatprep.subr.msk.bf16.mxu1 %vm11043_vm6, %v8934_v43 }
0x1592   :  { %8939 = vmatpush3.bf16.xpose.msk.msra.mxu1 %vm11043_vm6, %v8934_v43 }
0x1593   :  { %8942 = vmatprep.subr.msk.bf16.mxu1 %vm11058_vm8, %v8940_v55 }
0x1599   :  { %7537 = vmatmul.mubr.msk.f32.vlgmr.msra.gmra.mrb[60].mxu1 %vm829_vm3, %v5001_v12 }
0x159a   :  { %8945 = vmatpush3.bf16.msk.msra.mxu1 %vm11058_vm8, %v8940_v55 }
0x159b   :  { %8948 = vmatprep.subr.msk.bf16.mxu1 %vm11043_vm6, %v8946_v51 }
0x166c   :  { %v7538_v52 = vpop.f32.mrb[60].mxu1 }
0x166d   :  { %v5085_v10 = vpop.f32.mrb[61].mxu1  ;;  %v5091_v16 = vadd.f32 %v12122_v34, %v7538_v52 }
0x166e   :  { %v5086_v6 = vadd.f32 %v12118_v23, %v5085_v10 }
0x166f   :  { %v5097_v44 = vsel %vm2654_vm9, %v5091_v16, -inf }
0x1670   :  { %v5094_v27 = vsel %vm2650_vm10, %v5086_v6, -inf }
0x1671   :  { %5095 = vmax.xlane.f32.xlu0 %v5094_v27 }
0x1675   :  { %5098 = vmax.xlane.f32.xlu0 %v5097_v44 }
0x16fe   :  { %v5096_v24 = vpop.xlane.xlu0 %5095 }
0x16ff   :  { %v5100_v15 = vsub.f32 %v5086_v6, %v5096_v24 }
0x1701   :  { %v5102_v14 = vmul.f32 1.442695, %v5100_v15 }
0x1702   :  { %v5099_v57 = vpop.xlane.xlu0 %5098 }
0x1703   :  { %9559 = vpow2.f32 %v5102_v14  ;;  %v5101_v11 = vsub.f32 %v5091_v16, %v5099_v57 }
0x1705   :  { %v5104_v28 = vmul.f32 1.442695, %v5101_v11 }
0x1707   :  { %9561 = vpow2.f32 %v5104_v28 }
0x170d   :  { %v9560_v47 = vpop.eup %9559 }
0x170e   :  { %v5106_v33 = vsel %vm2650_vm10, %v9560_v47, 0.0 }
0x170f   :  { %5107 = vadd.xlane.f32.xlu0 %v5106_v33  ;;  %v5002_v33 = vmul.f32 0.125, %v12082_v13 }
0x1711   :  { %v9562_v31 = vpop.eup %9561 }
0x1712   :  { %v5109_v32 = vsel %vm2654_vm9, %v9562_v31, 0.0 }
0x1713   :  { %5110 = vadd.xlane.f32.xlu0 %v5109_v32 }
0x1729   :  { %5204 = vrot.lane.b32.xlu0 %v5001_v12, %s9709_s29 }
0x179c   :  { %v5108_v22 = vpop.xlane.xlu0 %5107 }
0x179d   :  { %9563 = vrcp.f32 %v5108_v22 }
0x17a0   :  { %v5111_v50 = vpop.xlane.xlu0 %5110 }
0x17a1   :  { %9565 = vrcp.f32 %v5111_v50 }
0x17a4   :  { %v5205_v61 = vpop.permute.xlu0 %5204 }
0x17a7   :  { %v9564_v36 = vpop.eup %9563 }
0x17a8   :  { %v5113_v49 = vmul.f32 %v9564_v36, %v9560_v47  ;;  %v5000_v47 = vmul.f32 0.125, %v12079_v7 }
0x17aa   :  { %7543 = vmatprep.mubr.msk.f32.mxu1 %vm2650_vm10, %v5113_v49 }
0x17ab   :  { %v9566_v60 = vpop.eup %9565 }
0x17ac   :  { %v5115_v9 = vmul.f32 %v9566_v60, %v9562_v31 }
0x17ae   :  { %7544 = vmatmul.mubr.msk.f32.vlgmr.msra.gmra.mrb[62].mxu1 %vm2650_vm10, %v5115_v9 }
0x17af   :  { %8951 = vmatpush3.bf16.xpose.msk.msra.mxu1 %vm11043_vm6, %v8946_v51  ;;  %7550 = vmatprep.mubr.msk.f32.mxu1 %vm829_vm3, %v5203_v8 }
0x17b6   :  { %7551 = vmatmul.mubr.msk.f32.vlgmr.msra.gmra.mrb[64].mxu1 %vm829_vm3, %v5205_v61 }
0x1881   :  { %v7545_v5 = vpop.f32.mrb[62].mxu1 }
0x1882   :  { %5201 = vst.msk [vmem:[#allocation2 + $0x10] sm:$0x3] %vm2133_vm5, %v7545_v5  ;;  %v5191_v19 = vpop.f32.mrb[63].mxu1 }
0x1883   :  { %5200 = vst.msk [vmem:[#allocation2] sm:$0xff] %vm829_vm3, %v5191_v19 }
0x1889   :  { %v7552_v45 = vpop.f32.mrb[64].mxu1 }
0x188a   :  { %v5288_v55 = vadd.f32 %v12122_v34, %v7552_v45  ;;  %v5282_v3 = vpop.f32.mrb[65].mxu1 }
0x188b   :  { %v5283_v63 = vadd.f32 %v12118_v23, %v5282_v3  ;;  %v5616_v3 = vld [vmem:[%s13039_s11 + $0x18] sm:$0xff] }
0x188c   :  { %v5294_v30 = vsel %vm2654_vm9, %v5288_v55, -inf }
0x188d   :  { %5295 = vmax.xlane.f32.xlu0 %v5294_v30  ;;  %v5291_v51 = vsel %vm2650_vm10, %v5283_v63, -inf }
0x188e   :  { %5292 = vmax.xlane.f32.xlu1 %v5291_v51 }
0x18a3   :  { %9459 = vrot.lane.b32.xlu0 %v9458_v46, %s9709_s29 }
0x191a   :  { %v5296_v58 = vpop.xlane.xlu0 %5295 }
0x191b   :  { %v5298_v1 = vsub.f32 %v5288_v55, %v5296_v58  ;;  %v5293_v21 = vpop.xlane.xlu1 %5292  ;;  %v5614_v55 = vld [vmem:[%s13039_s11 + $0x8] sm:$0xff] }
0x191c   :  { %v5297_v62 = vsub.f32 %v5283_v63, %v5293_v21  ;;  %v8970_v63 = vpack.c.bf16 %v5616_v3, %v5614_v55 }
0x191d   :  { %v5301_v43 = vmul.f32 1.442695, %v5298_v1 }
0x191e   :  { %v5299_v12 = vmul.f32 1.442695, %v5297_v62  ;;  %v9460_v46 = vpop.permute.xlu0 %9459  ;;  %v5613_v62 = vld [vmem:[%s13039_s11] sm:$0xff] }
0x191f   :  { %9567 = vpow2.f32 %v5301_v43  ;;  %v9462_v44 = vunpack.i.h.bf16 %v9460_v46  ;;  %v9461_v24 = vunpack.i.l.bf16 %v9460_v46  ;;  %v5615_v43 = vld [vmem:[%s13039_s11 + $0x10] sm:$0xff] }
0x1920   :  { %9569 = vpow2.f32 %v5299_v12  ;;  %v5618_v12 = vld [vmem:[%s13039_s11 + $0x28] sm:$0xff]  ;;  %v5619_v46 = vld [vmem:[%s13039_s11 + $0x30] sm:$0xff] }
0x1921   :  { %v8958_v11 = vpack.c.bf16 %v9462_v44, %v9461_v24  ;;  %v5624_v44 = vld [vmem:[%s13039_s11 + $0x58] sm:$0xff] }
0x1929   :  { %v9568_v52 = vpop.eup %9567 }
0x192a   :  { %v5306_v10 = vsel %vm2654_vm9, %v9568_v52, 0.0  ;;  %v9570_v6 = vpop.eup %9569 }
0x192b   :  { %5307 = vadd.xlane.f32.xlu1 %v5306_v10  ;;  %v5303_v16 = vsel %vm2650_vm10, %v9570_v6, 0.0 }
0x192f   :  { %5304 = vadd.xlane.f32.xlu1 %v5303_v16 }
0x1940   :  { %9454 = vrot.lane.b32.xlu1 %v9453_v56, %s9709_s29 }
0x19b8   :  { %v5308_v59 = vpop.xlane.xlu1 %5307 }
0x19b9   :  { %9571 = vrcp.f32 %v5308_v59 }
0x19bc   :  { %v5305_v25 = vpop.xlane.xlu1 %5304 }
0x19bd   :  { %9573 = vrcp.f32 %v5305_v25  ;;  %v5617_v25 = vld [vmem:[%s13039_s11 + $0x20] sm:$0xff] }
0x19be   :  { %v8976_v24 = vpack.c.bf16 %v5619_v46, %v5617_v25  ;;  %v5654_v46 = vld [vmem:[%s13039_s11 + $0x148] sm:$0xff] }
0x19c0   :  { %v9455_v27 = vpop.permute.xlu1 %9454 }
0x19c1   :  { %v9457_v15 = vunpack.i.h.bf16 %v9455_v27  ;;  %v9456_v14 = vunpack.i.l.bf16 %v9455_v27  ;;  %v5622_v27 = vld [vmem:[%s13039_s11 + $0x48] sm:$0xff] }
0x19c3   :  { %v8952_v57 = vpack.c.bf16 %v9457_v15, %v9456_v14  ;;  %v9572_v28 = vpop.eup %9571  ;;  %v8978_v15 = vpack.c.bf16 %v5624_v44, %v5622_v27  ;;  %v5621_v14 = vld [vmem:[%s13039_s11 + $0x40] sm:$0xff]  ;;  %v5656_v27 = vld [vmem:[%s13039_s11 + $0x158] sm:$0xff] }
0x19c4   :  { %v5312_v56 = vmul.f32 %v9572_v28, %v9568_v52  ;;  %v5620_v52 = vld [vmem:[%s13039_s11 + $0x38] sm:$0xff]  ;;  %v5653_v44 = vld [vmem:[%s13039_s11 + $0x140] sm:$0xff] }
0x19c5   :  { %8954 = vmatprep.subr.msk.bf16.mxu1 %vm11058_vm8, %v8952_v57  ;;  %v8974_v59 = vpack.c.bf16 %v5620_v52, %v5618_v12  ;;  %v5628_v28 = vld [vmem:[%s13039_s11 + $0x78] sm:$0xff]  ;;  %v5650_v12 = vld [vmem:[%s13039_s11 + $0x128] sm:$0xff] }
0x19c6   :  { %8957 = vmatpush3.bf16.msk.msra.mxu1 %vm11058_vm8, %v8952_v57  ;;  %v5623_v57 = vld [vmem:[%s13039_s11 + $0x50] sm:$0xff]  ;;  %v5652_v52 = vld [vmem:[%s13039_s11 + $0x138] sm:$0xff] }
0x19c7   :  { %v9574_v38 = vpop.eup %9573  ;;  %8960 = vmatprep.subr.msk.bf16.mxu1 %vm11043_vm6, %v8958_v11 }
0x19c8   :  { %v5310_v54 = vmul.f32 %v9574_v38, %v9570_v6  ;;  %v8972_v6 = vpack.c.bf16 %v5615_v43, %v5613_v62  ;;  %v8980_v38 = vpack.c.bf16 %v5623_v57, %v5621_v14  ;;  %v5645_v62 = vld [vmem:[%s13039_s11 + $0x100] sm:$0xff]  ;;  %v5647_v43 = vld [vmem:[%s13039_s11 + $0x110] sm:$0xff]  ;;  %v5658_v14 = vld [vmem:[%s13039_s11 + $0x168] sm:$0xff] }
0x19c9   :  { %v5660_v57 = vld [vmem:[%s13039_s11 + $0x178] sm:$0xff] }
0x19ca   :  { %7557 = vmatprep.mubr.msk.f32.mxu1 %vm2650_vm10, %v5310_v54 }
0x19cb   :  { %7558 = vmatmul.mubr.msk.f32.vlgmr.msra.gmra.mrb[66].mxu1 %vm2650_vm10, %v5312_v56  ;;  %v5625_v56 = vld [vmem:[%s13039_s11 + $0x60] sm:$0xff] }
0x19cc   :  { %7564 = vmatprep.mubr.msk.f32.mxu1 %vm829_vm3, %v5000_v47  ;;  %v5627_v47 = vld [vmem:[%s13039_s11 + $0x70] sm:$0xff] }
0x19cf   :  { %8963 = vmatpush3.bf16.xpose.msk.msra.mxu1 %vm11043_vm6, %v8958_v11  ;;  %v5626_v11 = vld [vmem:[%s13039_s11 + $0x68] sm:$0xff] }
0x19d0   :  { %8966 = vmatprep.subr.msk.bf16.mxu1 %vm11058_vm8, %v12104_v39  ;;  %v8982_v54 = vpack.c.bf16 %v5628_v28, %v5626_v11  ;;  %v9014_v28 = vpack.c.bf16 %v5660_v57, %v5658_v14  ;;  %v5854_v57 = vld [vmem:[%s13041_s16 + $0xa0] sm:$0xff] }
0x19d6   :  { %7565 = vmatmul.mubr.msk.f32.vlgmr.msra.gmra.mrb[68].mxu1 %vm829_vm3, %v5002_v33  ;;  %v5630_v33 = vld [vmem:[%s13039_s11 + $0x88] sm:$0xff] }
0x19d7   :  { %8969 = vmatpush3.bf16.msk.msra.mxu1 %vm11058_vm8, %v12104_v39 }
0x19d8   :  { %8971 = vmatprep.subr.bf16.mxu1 %v8970_v63  ;;  %v5641_v63 = vld [vmem:[%s13039_s11 + $0xe0] sm:$0xff] }
0x1a9e   :  { %v7559_v7 = vpop.f32.mrb[66].mxu1 }
0x1a9f   :  { %v5393_v31 = vpop.f32.mrb[67].mxu1 }
0x1aa9   :  { %v7566_v32 = vpop.f32.mrb[68].mxu1 }
0x1aaa   :  { %v5498_v22 = vadd.f32 %v12122_v34, %v7566_v32  ;;  %v5492_v50 = vpop.f32.mrb[69].mxu1 }
0x1aab   :  { %v5493_v17 = vadd.f32 %v12118_v23, %v5492_v50  ;;  %v5631_v50 = vld [vmem:[%s13039_s11 + $0x90] sm:$0xff] }
0x1aac   :  { %v5504_v36 = vsel %vm2654_vm9, %v5498_v22, -inf }
0x1aad   :  { %5505 = vmax.xlane.f32.xlu0 %v5504_v36  ;;  %v5501_v49 = vsel %vm2650_vm10, %v5493_v17, -inf  ;;  %v5636_v36 = vld [vmem:[%s13039_s11 + $0xb8] sm:$0xff] }
0x1aae   :  { %5502 = vmax.xlane.f32.xlu1 %v5501_v49 }
0x1ac3   :  { %5404 = vrot.lane.b32.xlu0 %v5393_v31, %s9709_s29  ;;  %v8984_v31 = vpack.c.bf16 %v5627_v47, %v5625_v56 }
0x1b3a   :  { %v5506_v13 = vpop.xlane.xlu0 %5505 }
0x1b3b   :  { %v5508_v60 = vsub.f32 %v5498_v22, %v5506_v13  ;;  %v5503_v39 = vpop.xlane.xlu1 %5502  ;;  %v5629_v22 = vld [vmem:[%s13039_s11 + $0x80] sm:$0xff] }
0x1b3c   :  { %v5507_v9 = vsub.f32 %v5493_v17, %v5503_v39  ;;  %v5634_v17 = vld [vmem:[%s13039_s11 + $0xa8] sm:$0xff]  ;;  %v8988_v49 = vpack.c.bf16 %v5631_v50, %v5629_v22  ;;  %v5635_v39 = vld [vmem:[%s13039_s11 + $0xb0] sm:$0xff]  ;;  %v5748_v50 = vld [vmem:[%s13040_s15] sm:$0x3] }
0x1b3d   :  { %v5511_v8 = vmul.f32 1.442695, %v5508_v60  ;;  %v8990_v13 = vpack.c.bf16 %v5636_v36, %v5634_v17  ;;  %v5633_v60 = vld [vmem:[%s13039_s11 + $0xa0] sm:$0xff]  ;;  %v5757_v36 = vrot.slane %v5748_v50, %v10375_v26 }
0x1b3e   :  { %v5509_v61 = vmul.f32 1.442695, %v5507_v9  ;;  %v5405_v34 = vpop.permute.xlu0 %5404  ;;  %v5638_v9 = vld [vmem:[%s13039_s11 + $0xc8] sm:$0xff] }
0x1b3f   :  { %5410 = vst.msk [vmem:[#allocation2] sm:$0xff] %vm2968_vm12, %v5405_v34 }
0x1b40   :  { %9575 = vpow2.f32 %v5509_v61  ;;  %v8992_v61 = vpack.c.bf16 %v5635_v39, %v5633_v60 }
0x1b41   :  { %9577 = vpow2.f32 %v5511_v8  ;;  %v5640_v8 = vld [vmem:[%s13039_s11 + $0xd8] sm:$0xff] }
0x1b42   :  { %v8994_v34 = vpack.c.bf16 %v5640_v8, %v5638_v9 }
0x1b4a   :  { %v9576_v23 = vpop.eup %9575 }
0x1b4b   :  { %v5513_v5 = vsel %vm2650_vm10, %v9576_v23, 0.0  ;;  %v9578_v19 = vpop.eup %9577 }
0x1b4c   :  { %5514 = vadd.xlane.f32.xlu1 %v5513_v5  ;;  %v5516_v45 = vsel %vm2654_vm9, %v9578_v19, 0.0  ;;  %v5639_v5 = vld [vmem:[%s13039_s11 + $0xd0] sm:$0xff] }
0x1b50   :  { %5517 = vadd.xlane.f32.xlu1 %v5516_v45  ;;  %v5644_v45 = vld [vmem:[%s13039_s11 + $0xf8] sm:$0xff] }
0x1b61   :  { %5406 = vrot.lane.b32.xlu1 %v7559_v7, %s9709_s29  ;;  %v5632_v7 = vld [vmem:[%s13039_s11 + $0x98] sm:$0xff] }
0x1b62   :  { %v8986_v32 = vpack.c.bf16 %v5632_v7, %v5630_v33 }
0x1bd9   :  { %v5515_v30 = vpop.xlane.xlu1 %5514 }
0x1bda   :  { %9579 = vrcp.f32 %v5515_v30  ;;  %v5643_v30 = vld [vmem:[%s13039_s11 + $0xf0] sm:$0xff] }
0x1bdd   :  { %v5518_v51 = vpop.xlane.xlu1 %5517 }
0x1bde   :  { %9581 = vrcp.f32 %v5518_v51  ;;  %v5646_v51 = vld [vmem:[%s13039_s11 + $0x108] sm:$0xff] }
0x1be1   :  { %v5407_v58 = vpop.permute.xlu1 %5406 }
0x1be2   :  { %5411 = vst.msk [vmem:[#allocation2 + $0x10] sm:$0x3] %vm2970_vm11, %v5407_v58  ;;  %v5648_v58 = vld [vmem:[%s13039_s11 + $0x118] sm:$0xff] }
0x1be4   :  { %v9580_v1 = vpop.eup %9579 }
0x1be5   :  { %v5520_v21 = vmul.f32 %v9580_v1, %v9576_v23  ;;  %v5637_v23 = vld [vmem:[%s13039_s11 + $0xc0] sm:$0xff]  ;;  %v9000_v1 = vpack.c.bf16 %v5643_v30, %v5641_v63  ;;  %v5841_v63 = vld [vmem:[%s13041_s16 + $0x38] sm:$0xff] }
0x1be6   :  { %v8996_v55 = vpack.c.bf16 %v5639_v5, %v5637_v23  ;;  %v5834_v30 = vld [vmem:[%s13041_s16] sm:$0xff] }
0x1be7   :  { %7571 = vmatprep.mubr.msk.f32.mxu1 %vm2650_vm10, %v5520_v21  ;;  %v9002_v21 = vpack.c.bf16 %v5648_v58, %v5646_v51  ;;  %v5840_v58 = vld [vmem:[%s13041_s16 + $0x30] sm:$0xff] }
0x1be8   :  { %v9582_v10 = vpop.eup %9581 }
0x1be9   :  { %v5522_v16 = vmul.f32 %v9582_v10, %v9578_v19  ;;  %v5642_v19 = vld [vmem:[%s13039_s11 + $0xe8] sm:$0xff]  ;;  %v9004_v10 = vpack.c.bf16 %v5647_v43, %v5645_v62  ;;  %v5611_v22 = vld [vmem:[#allocation2 + $0x10] sm:$0x3]  ;;  %v9020_v62 = vpack.c.bf16 %v5840_v58, %v5834_v30 }
0x1bea   :  { %v8998_v3 = vpack.c.bf16 %v5644_v45, %v5642_v19  ;;  %v5888_v58 = vld [vmem:[%s13041_s16 + $0x1b0] sm:$0xff] }
0x1beb   :  { %7572 = vmatmul.mubr.msk.f32.vlgmr.msra.gmra.mrb[70].mxu1 %vm2650_vm10, %v5522_v16  ;;  %v5649_v16 = vld [vmem:[%s13039_s11 + $0x120] sm:$0xff] }
0x1bec   :  { %8973 = vmatpush1.bf16.msra.mxu1 %v8972_v6  ;;  %v9006_v6 = vpack.c.bf16 %v5652_v52, %v5650_v12  ;;  %v5836_v12 = vld [vmem:[%s13041_s16 + $0x10] sm:$0xff]  ;;  %v5842_v52 = vld [vmem:[%s13041_s16 + $0x40] sm:$0xff] }
0x1bed   :  { %8975 = vmatprep.subr.bf16.mxu1 %v8974_v59  ;;  %v5651_v59 = vld [vmem:[%s13039_s11 + $0x130] sm:$0xff] }
0x1bee   :  { %v9008_v25 = vpack.c.bf16 %v5651_v59, %v5649_v16  ;;  %v5853_v16 = vld [vmem:[%s13041_s16 + $0x98] sm:$0xff]  ;;  %v5846_v59 = vld [vmem:[%s13041_s16 + $0x60] sm:$0xff] }
0x1bf0   :  { %8977 = vmatpush1.bf16.msra.mxu1 %v8976_v24  ;;  %v9010_v24 = vpack.c.bf16 %v5656_v27, %v5654_v46 }
0x1bf1   :  { %8979 = vmatprep.subr.bf16.mxu1 %v8978_v15  ;;  %v5655_v15 = vld [vmem:[%s13039_s11 + $0x150] sm:$0xff] }
0x1bf2   :  { %v9012_v11 = vpack.c.bf16 %v5655_v15, %v5653_v44  ;;  %v5849_v44 = vld [vmem:[%s13041_s16 + $0x78] sm:$0xff]  ;;  %v5848_v15 = vld [vmem:[%s13041_s16 + $0x70] sm:$0xff] }
0x1bf4   :  { %8981 = vmatpush1.bf16.msra.mxu1 %v8980_v38  ;;  %v5657_v38 = vld [vmem:[%s13039_s11 + $0x160] sm:$0xff] }
0x1bf5   :  { %8983 = vmatprep.subr.bf16.mxu1 %v8982_v54  ;;  %v5659_v54 = vld [vmem:[%s13039_s11 + $0x170] sm:$0xff] }
0x1bf6   :  { %v9016_v56 = vpack.c.bf16 %v5659_v54, %v5657_v38  ;;  %v9072_v38 = vpack.c.bf16 %v5854_v57, %v5848_v15  ;;  %v5907_v15 = vld [vmem:[%s13041_s16 + $0x248] sm:$0xff]  ;;  %v5909_v57 = vld [vmem:[%s13041_s16 + $0x258] sm:$0xff] }
0x1bf8   :  { %8985 = vmatpush1.bf16.msra.mxu1 %v8984_v31  ;;  %v5609_v31 = vld [vmem:[#allocation2] sm:$0xff] }
0x1bf9   :  { %8987 = vmatprep.subr.bf16.mxu1 %v8986_v32 }
0x1bfc   :  { %8989 = vmatpush1.bf16.msra.mxu1 %v8988_v49 }
0x1bfd   :  { %8991 = vmatprep.subr.bf16.mxu1 %v8990_v13  ;;  %v5753_v13 = vrot.slane %v5748_v50, %v10379_v35 }
0x1c00   :  { %8993 = vmatpush1.bf16.msra.mxu1 %v8992_v61 }
0x1c01   :  { %8995 = vmatprep.subr.bf16.mxu1 %v8994_v34 }
0x1c04   :  { %8997 = vmatpush1.bf16.msra.mxu1 %v8996_v55 }
0x1c05   :  { %8999 = vmatprep.subr.bf16.mxu1 %v8998_v3  ;;  %v5835_v3 = vld [vmem:[%s13041_s16 + $0x8] sm:$0xff] }
0x1c06   :  { %v9018_v51 = vpack.c.bf16 %v5841_v63, %v5835_v3  ;;  %v5891_v3 = vld [vmem:[%s13041_s16 + $0x1c8] sm:$0xff] }
0x1c08   :  { %9001 = vmatpush1.bf16.msra.mxu1 %v9000_v1  ;;  %v5837_v1 = vld [vmem:[%s13041_s16 + $0x18] sm:$0xff]  ;;  %9019 = vmatprep.subr.bf16.mxu0 %v9018_v51  ;;  %v5882_v51 = vld [vmem:[%s13041_s16 + $0x180] sm:$0xff] }
0x1c09   :  { %9003 = vmatprep.subr.bf16.mxu1 %v9002_v21  ;;  %v5843_v21 = vld [vmem:[%s13041_s16 + $0x48] sm:$0xff]  ;;  %9021 = vmatpush1.bf16.msra.mxu0 %v9020_v62  ;;  %v5890_v62 = vld [vmem:[%s13041_s16 + $0x1c0] sm:$0xff] }
0x1c0a   :  { %v9066_v43 = vpack.c.bf16 %v5843_v21, %v5837_v1  ;;  %v5884_v1 = vld [vmem:[%s13041_s16 + $0x190] sm:$0xff] }
0x1c0c   :  { %9005 = vmatpush1.bf16.msra.mxu1 %v9004_v10  ;;  %v5847_v10 = vld [vmem:[%s13041_s16 + $0x68] sm:$0xff] }
0x1c0d   :  { %9007 = vmatprep.subr.bf16.mxu1 %v9006_v6  ;;  %v9068_v6 = vpack.c.bf16 %v5842_v52, %v5836_v12  ;;  %v9022_v46 = vpack.c.bf16 %v5853_v16, %v5847_v10  ;;  %v5901_v12 = vld [vmem:[%s13041_s16 + $0x218] sm:$0xff]  ;;  %v5903_v10 = vld [vmem:[%s13041_s16 + $0x228] sm:$0xff]  ;;  %v9084_v16 = vpack.c.bf16 %v5890_v62, %v5884_v1  ;;  %v5924_v1 = vld [vmem:[%s13041_s16 + $0x2d0] sm:$0xff] }
0x1c0e   :  { %v5897_v52 = vld [vmem:[%s13041_s16 + $0x1f8] sm:$0xff]  ;;  %v5927_v62 = vld [vmem:[%s13041_s16 + $0x2e8] sm:$0xff] }
0x1c0f   :  { %9023 = vmatprep.subr.bf16.mxu0 %v9022_v46  ;;  %v5900_v46 = vld [vmem:[%s13041_s16 + $0x210] sm:$0xff] }
0x1c10   :  { %9009 = vmatpush1.bf16.msra.mxu1 %v9008_v25  ;;  %v5852_v25 = vld [vmem:[%s13041_s16 + $0x90] sm:$0xff] }
0x1c11   :  { %9011 = vmatprep.subr.bf16.mxu1 %v9010_v24  ;;  %v9024_v27 = vpack.c.bf16 %v5852_v25, %v5846_v59  ;;  %v5855_v24 = vld [vmem:[%s13041_s16 + $0xa8] sm:$0xff]  ;;  %v5894_v25 = vld [vmem:[%s13041_s16 + $0x1e0] sm:$0xff] }
0x1c12   :  { %v9070_v14 = vpack.c.bf16 %v5855_v24, %v5849_v44  ;;  %v9086_v44 = vpack.c.bf16 %v5903_v10, %v5897_v52  ;;  %v5902_v24 = vld [vmem:[%s13041_s16 + $0x220] sm:$0xff]  ;;  %v5920_v52 = vld [vmem:[%s13041_s16 + $0x2b0] sm:$0xff] }
0x1c13   :  { %9025 = vmatpush1.bf16.msra.mxu0 %v9024_v27  ;;  %v5896_v27 = vld [vmem:[%s13041_s16 + $0x1f0] sm:$0xff]  ;;  %v5926_v10 = vld [vmem:[%s13041_s16 + $0x2e0] sm:$0xff] }
0x1c14   :  { %9013 = vmatpush1.bf16.msra.mxu1 %v9012_v11  ;;  %v5859_v11 = vld [vmem:[%s13041_s16 + $0xc8] sm:$0xff] }
0x1c15   :  { %9015 = vmatprep.subr.bf16.mxu1 %v9014_v28  ;;  %v5865_v28 = vld [vmem:[%s13041_s16 + $0xf8] sm:$0xff] }
0x1c16   :  { %v9026_v54 = vpack.c.bf16 %v5865_v28, %v5859_v11  ;;  %v5915_v11 = vld [vmem:[%s13041_s16 + $0x288] sm:$0xff]  ;;  %v9040_v28 = vpack.c.bf16 %v5900_v46, %v5894_v25  ;;  %v5930_v25 = vld [vmem:[%s13041_s16 + $0x300] sm:$0xff]  ;;  %v5936_v46 = vld [vmem:[%s13041_s16 + $0x330] sm:$0xff] }
0x1c18   :  { %9017 = vmatpush1.bf16.msra.mxu1 %v9016_v56  ;;  %v5858_v56 = vld [vmem:[%s13041_s16 + $0xc0] sm:$0xff]  ;;  %9027 = vmatprep.subr.bf16.mxu0 %v9026_v54 }
0x1c19   :  { %9067 = vmatprep.subr.bf16.mxu1 %v9066_v43  ;;  %v5895_v43 = vld [vmem:[%s13041_s16 + $0x1e8] sm:$0xff] }
0x1c1a   :  { %v9038_v59 = vpack.c.bf16 %v5901_v12, %v5895_v43 }
0x1cbe   :  { %v7573_v47 = vpop.f32.mrb[70].mxu1 }
0x1cbf   :  { %5608 = vst.msk [vmem:[#allocation2 + $0x18] sm:$0x3] %vm2133_vm5, %v7573_v47  ;;  %v5598_v33 = vpop.f32.mrb[71].mxu1  ;;  %v5864_v47 = vld [vmem:[%s13041_s16 + $0xf0] sm:$0xff] }
0x1cc0   :  { %5607 = vst.msk [vmem:[#allocation2 + $0x8] sm:$0xff] %vm829_vm3, %v5598_v33  ;;  %v5861_v33 = vld [vmem:[%s13041_s16 + $0xd8] sm:$0xff] }
0x1cc6   :  { %v5612_v32 = vld [vmem:[#allocation2 + $0x18] sm:$0x3] }
0x1cc7   :  { %v5610_v7 = vld [vmem:[#allocation2 + $0x8] sm:$0xff] }
0x1cc8   :  { %7291 = vmatprep.mubr.msk.f32.mxu1 %vm829_vm3, %v5610_v7  ;;  %v5867_v7 = vld [vmem:[%s13041_s16 + $0x108] sm:$0xff] }
0x1cc9   :  { %5732 = vmatmul.mubr.f32.vlgmr.msra.gmra.mrb[72].mxu1 %v5609_v31  ;;  %v5860_v31 = vld [vmem:[%s13041_s16 + $0xd0] sm:$0xff]  ;;  %v9074_v50 = vpack.c.bf16 %v5867_v7, %v5861_v33  ;;  %v9090_v33 = vpack.c.bf16 %v5915_v11, %v5909_v57  ;;  %v5938_v11 = vld [vmem:[%s13041_s16 + $0x340] sm:$0xff] }
0x1cca   :  { %7292 = vmatprep.mubr.msk.f32.mxu1 %vm829_vm3, %v5612_v32  ;;  %9069 = vmatpush1.bf16.msra.mxu1 %v9068_v6  ;;  %v5866_v32 = vld [vmem:[%s13041_s16 + $0x100] sm:$0xff]  ;;  %v9036_v6 = vpack.c.bf16 %v5888_v58, %v5882_v51  ;;  %v5908_v7 = vld [vmem:[%s13041_s16 + $0x250] sm:$0xff] }
0x1ccb   :  { %9071 = vmatprep.subr.bf16.mxu1 %v9070_v14  ;;  %v5913_v14 = vld [vmem:[%s13041_s16 + $0x278] sm:$0xff]  ;;  %v5918_v51 = vld [vmem:[%s13041_s16 + $0x2a0] sm:$0xff] }
0x1ccc   :  { %v9042_v54 = vpack.c.bf16 %v5913_v14, %v5907_v15  ;;  %v9048_v43 = vpack.c.bf16 %v5924_v1, %v5918_v51  ;;  %v5939_v15 = vld [vmem:[%s13041_s16 + $0x348] sm:$0xff]  ;;  %v5932_v14 = vld [vmem:[%s13041_s16 + $0x310] sm:$0xff] }
0x1ccd   :  { %5738 = vmatmul.mubr.f32.gmra.mrb[74].mxu1 %v5611_v22  ;;  %v9028_v22 = vpack.c.bf16 %v5864_v47, %v5858_v56  ;;  %v5906_v56 = vld [vmem:[%s13041_s16 + $0x240] sm:$0xff]  ;;  %v5912_v47 = vld [vmem:[%s13041_s16 + $0x270] sm:$0xff]  ;;  %v5975_v1 = vld [vmem:[%s13041_s16 + $0x468] sm:$0xff] }
0x1cce   :  { %9073 = vmatpush1.bf16.msra.mxu1 %v9072_v38  ;;  %v9088_v38 = vpack.c.bf16 %v5902_v24, %v5896_v27  ;;  %v5933_v24 = vld [vmem:[%s13041_s16 + $0x318] sm:$0xff] }
0x1ccf   :  { %9075 = vmatprep.subr.bf16.mxu1 %v9074_v50  ;;  %9029 = vmatpush1.bf16.msra.mxu0 %v9028_v22  ;;  %v9098_v57 = vpack.c.bf16 %v5939_v15, %v5933_v24  ;;  %v6638_v24 = vld [vmem:[%s13042_s18 + $0x218] sm:$0xff] }
0x1d9c   :  { %v5733_v17 = vpop.f32.mrb[72].mxu1 }
0x1d9d   :  { %v5744_v49 = vadd.f32 %v5733_v17, %v11873_v40  ;;  %v5735_v60 = vpop.f32.mrb[73].mxu1  ;;  %v5871_v17 = vld [vmem:[%s13041_s16 + $0x128] sm:$0xff] }
0x1d9e   :  { %v5745_v39 = vadd.f32 %v5735_v60, %v11871_v4 }
0x1d9f   :  { %v12243_v61 = vadd.f32 %v5753_v13, %v5744_v49  ;;  %v5870_v49 = vld [vmem:[%s13041_s16 + $0x120] sm:$0xff] }
0x1da0   :  { %v12241_v9 = vadd.f32 %v5757_v36, %v5745_v39  ;;  %v5739_v8 = vpop.f32.mrb[74].mxu1  ;;  %v5876_v39 = vld [vmem:[%s13041_s16 + $0x150] sm:$0xff] }
0x1da1   :  { %v5746_v34 = vadd.f32 %v5739_v8, %v11879_v48  ;;  %v5741_v23 = vpop.f32.mrb[75].mxu1  ;;  %v5873_v8 = vld [vmem:[%s13041_s16 + $0x138] sm:$0xff] }
0x1da2   :  { %v5747_v40 = vadd.f32 %v5741_v23, %v11882_v0  ;;  %v5764_v5 = vsel %vm829_vm3, %v12241_v9, 0.0 }
0x1da3   :  { %v12249_v4 = vadd.f32 %v5753_v13, %v5746_v34  ;;  %v5765_v19 = vadd.f32 %v5764_v5, %v12243_v61  ;;  %v9076_v13 = vpack.c.bf16 %v5866_v32, %v5860_v31  ;;  %v5879_v34 = vld [vmem:[%s13041_s16 + $0x168] sm:$0xff]  ;;  %v5878_v5 = vld [vmem:[%s13041_s16 + $0x160] sm:$0xff]  ;;  %v9044_v32 = vpack.c.bf16 %v5912_v47, %v5906_v56 }
0x1da4   :  { %v12252_v45 = vadd.f32 %v5757_v36, %v5747_v40  ;;  %v5877_v36 = vld [vmem:[%s13041_s16 + $0x158] sm:$0xff]  ;;  %v9078_v23 = vpack.c.bf16 %v5879_v34, %v5873_v8  ;;  %v5872_v40 = vld [vmem:[%s13041_s16 + $0x130] sm:$0xff]  ;;  %v5914_v31 = vld [vmem:[%s13041_s16 + $0x280] sm:$0xff] }
0x1da5   :  { %5766 = vadd.xlane.f32.xlu1 %v5765_v19  ;;  %v5768_v48 = vsel %vm691_vm1, %v12249_v4, 0.0  ;;  %v9030_v60 = vpack.c.bf16 %v5877_v36, %v5871_v17  ;;  %v5883_v19 = vld [vmem:[%s13041_s16 + $0x188] sm:$0xff]  ;;  %9077 = vmatpush1.bf16.msra.mxu1 %v9076_v13  ;;  %v9080_v63 = vpack.c.bf16 %v5878_v5, %v5872_v40  ;;  %v9092_v22 = vpack.c.bf16 %v5914_v31, %v5908_v7  ;;  %v5942_v47 = vld [vmem:[%s13041_s16 + $0x360] sm:$0xff]  ;;  %v5945_v7 = vld [vmem:[%s13041_s16 + $0x378] sm:$0xff] }
0x1da6   :  { %v5769_v0 = vsel %vm2133_vm5, %v12252_v45, 0.0  ;;  %9079 = vmatprep.subr.bf16.mxu1 %v9078_v23  ;;  %v5951_v31 = vld [vmem:[%s13041_s16 + $0x3a8] sm:$0xff] }
0x1da7   :  { %v5770_v55 = vadd.f32 %v5769_v0, %v5768_v48  ;;  %v5889_v48 = vld [vmem:[%s13041_s16 + $0x1b8] sm:$0xff]  ;;  %v9032_v0 = vpack.c.bf16 %v5876_v39, %v5870_v49  ;;  %9031 = vmatprep.subr.bf16.mxu0 %v9030_v60 }
0x1da8   :  { %v9034_v30 = vpack.c.bf16 %v5889_v48, %v5883_v19 }
0x1da9   :  { %5771 = vadd.xlane.f32.xlu0 %v5770_v55  ;;  %v5885_v55 = vld [vmem:[%s13041_s16 + $0x198] sm:$0xff]  ;;  %9033 = vmatpush1.bf16.msra.mxu0 %v9032_v0 }
0x1daa   :  { %v9082_v21 = vpack.c.bf16 %v5891_v3, %v5885_v55  ;;  %9081 = vmatpush1.bf16.msra.mxu1 %v9080_v63  ;;  %9035 = vmatprep.subr.bf16.mxu0 %v9034_v30  ;;  %v5919_v63 = vld [vmem:[%s13041_s16 + $0x2a8] sm:$0xff]  ;;  %v5925_v30 = vld [vmem:[%s13041_s16 + $0x2d8] sm:$0xff] }
0x1dab   :  { %v9046_v58 = vpack.c.bf16 %v5925_v30, %v5919_v63  ;;  %v5967_v63 = vld [vmem:[%s13041_s16 + $0x428] sm:$0xff]  ;;  %v5973_v30 = vld [vmem:[%s13041_s16 + $0x458] sm:$0xff] }
0x1dac   :  { %9083 = vmatprep.subr.bf16.mxu1 %v9082_v21  ;;  %v5921_v21 = vld [vmem:[%s13041_s16 + $0x2b8] sm:$0xff] }
0x1dad   :  { %9037 = vmatpush1.bf16.msra.mxu0 %v9036_v6  ;;  %v9094_v12 = vpack.c.bf16 %v5927_v62, %v5921_v21  ;;  %v5931_v6 = vld [vmem:[%s13041_s16 + $0x308] sm:$0xff]  ;;  %v9062_v62 = vpack.c.bf16 %v5973_v30, %v5967_v63 }
0x1dae   :  { %9085 = vmatpush1.bf16.msra.mxu1 %v9084_v16  ;;  %9039 = vmatprep.subr.bf16.mxu0 %v9038_v59  ;;  %v9096_v16 = vpack.c.bf16 %v5926_v10, %v5920_v52  ;;  %v5937_v59 = vld [vmem:[%s13041_s16 + $0x338] sm:$0xff]  ;;  %v5968_v52 = vld [vmem:[%s13041_s16 + $0x430] sm:$0xff] }
0x1daf   :  { %9087 = vmatprep.subr.bf16.mxu1 %v9086_v44  ;;  %v9050_v27 = vpack.c.bf16 %v5937_v59, %v5931_v6  ;;  %v9052_v44 = vpack.c.bf16 %v5936_v46, %v5930_v25  ;;  %v5974_v6 = vld [vmem:[%s13041_s16 + $0x460] sm:$0xff]  ;;  %v5845_v59 = vld [vmem:[%s13041_s16 + $0x58] sm:$0xff] }
0x1db0   :  { %v9112_v46 = vpack.c.bf16 %v5974_v6, %v5968_v52  ;;  %v5869_v6 = vld [vmem:[%s13041_s16 + $0x118] sm:$0xff] }
0x1db1   :  { %9041 = vmatpush1.bf16.msra.mxu0 %v9040_v28  ;;  %v5943_v28 = vld [vmem:[%s13041_s16 + $0x368] sm:$0xff] }
0x1db2   :  { %9089 = vmatpush1.bf16.msra.mxu1 %v9088_v38  ;;  %9043 = vmatprep.subr.bf16.mxu0 %v9042_v54  ;;  %v5949_v38 = vld [vmem:[%s13041_s16 + $0x398] sm:$0xff]  ;;  %v9100_v54 = vpack.c.bf16 %v5938_v11, %v5932_v14 }
0x1db3   :  { %9091 = vmatprep.subr.bf16.mxu1 %v9090_v33  ;;  %v9054_v56 = vpack.c.bf16 %v5949_v38, %v5943_v28  ;;  %v5948_v33 = vld [vmem:[%s13041_s16 + $0x390] sm:$0xff] }
0x1db5   :  { %9045 = vmatpush1.bf16.msra.mxu0 %v9044_v32  ;;  %v5944_v32 = vld [vmem:[%s13041_s16 + $0x370] sm:$0xff] }
0x1db6   :  { %9093 = vmatpush1.bf16.msra.mxu1 %v9092_v22  ;;  %9047 = vmatprep.subr.bf16.mxu0 %v9046_v58  ;;  %v5950_v22 = vld [vmem:[%s13041_s16 + $0x3a0] sm:$0xff]  ;;  %v5969_v58 = vld [vmem:[%s13041_s16 + $0x438] sm:$0xff] }
0x1db7   :  { %9095 = vmatprep.subr.bf16.mxu1 %v9094_v12  ;;  %v5972_v12 = vld [vmem:[%s13041_s16 + $0x450] sm:$0xff]  ;;  %v9110_v10 = vpack.c.bf16 %v5975_v1, %v5969_v58 }
0x1db9   :  { %9049 = vmatpush1.bf16.msra.mxu0 %v9048_v43  ;;  %v5966_v43 = vld [vmem:[%s13041_s16 + $0x420] sm:$0xff] }
0x1dba   :  { %9097 = vmatpush1.bf16.msra.mxu1 %v9096_v16  ;;  %9051 = vmatprep.subr.bf16.mxu0 %v9050_v27  ;;  %v5839_v16 = vld [vmem:[%s13041_s16 + $0x28] sm:$0xff]  ;;  %v9064_v25 = vpack.c.bf16 %v5972_v12, %v5966_v43 }
0x1dbb   :  { %9099 = vmatprep.subr.bf16.mxu1 %v9098_v57  ;;  %v9114_v27 = vpack.c.bf16 %v5845_v59, %v5839_v16  ;;  %v5863_v43 = vld [vmem:[%s13041_s16 + $0xe8] sm:$0xff]  ;;  %v6641_v16 = vld [vmem:[%s13042_s18 + $0x230] sm:$0xff]  ;;  %v6646_v59 = vld [vmem:[%s13042_s18 + $0x258] sm:$0xff] }
0x1dbd   :  { %9053 = vmatpush1.bf16.msra.mxu0 %v9052_v44  ;;  %v6636_v44 = vld [vmem:[%s13042_s18 + $0x208] sm:$0xff] }
0x1dbe   :  { %9101 = vmatpush1.bf16.msra.mxu1 %v9100_v54  ;;  %9055 = vmatprep.subr.bf16.mxu0 %v9054_v56  ;;  %v9226_v15 = vpack.c.bf16 %v6638_v24, %v6636_v44  ;;  %v5802_v56 = vld [vmem:[%s13043_s22] sm:$0x3]  ;;  %v9122_v44 = vpack.c.bf16 %v5869_v6, %v5863_v43  ;;  %v5935_v6 = vld [vmem:[%s13041_s16 + $0x328] sm:$0xff] }
0x1dbf   :  { %v5862_v24 = vld [vmem:[%s13041_s16 + $0xe0] sm:$0xff] }
0x1e32   :  { %v5767_v50 = vpop.xlane.xlu1 %5766 }
0x1e33   :  { %v5773_v17 = vmul.f32 0.0052083335, %v5767_v50  ;;  %v9056_v50 = vpack.c.bf16 %v5948_v33, %v5942_v47  ;;  %v5818_v47 = vld [vmem:[%s13044_s23] sm:$0x3]  ;;  %v5807_v33 = vrot.slane %v5802_v56, %v10379_v35 }
0x1e35   :  { %v12315_v36 = vsub.f32 %v12243_v61, %v5773_v17  ;;  %v12318_v49 = vsub.f32 %v12241_v9, %v5773_v17  ;;  %v9102_v17 = vpack.c.bf16 %v5951_v31, %v5945_v7  ;;  %9057 = vmatpush1.bf16.msra.mxu0 %v9056_v50  ;;  %v5811_v7 = vrot.slane %v5802_v56, %v10375_v26  ;;  %v6648_v56 = vld [vmem:[%s13042_s18 + $0x268] sm:$0xff] }
0x1e36   :  { %v5772_v13 = vpop.xlane.xlu0 %5771 }
0x1e37   :  { %v5774_v60 = vmul.f32 0.0052083335, %v5772_v13  ;;  %v5779_v39 = vmul.f32 %v12315_v36, %v12315_v36  ;;  %v5780_v8 = vmul.f32 %v12318_v49, %v12318_v49  ;;  %v5955_v13 = vld [vmem:[%s13041_s16 + $0x3c8] sm:$0xff]  ;;  %9103 = vmatprep.subr.bf16.mxu1 %v9102_v17  ;;  %v5823_v17 = vrot.slane %v5818_v47, %v10379_v35 }
0x1e39   :  { %v12325_v34 = vsub.f32 %v12249_v4, %v5774_v60  ;;  %v12328_v23 = vsub.f32 %v12252_v45, %v5774_v60  ;;  %v5783_v40 = vsel %vm829_vm3, %v5780_v8, 0.0  ;;  %v5961_v60 = vld [vmem:[%s13041_s16 + $0x3f8] sm:$0xff]  ;;  %v9104_v8 = vpack.c.bf16 %v5950_v22, %v5944_v32  ;;  %v5838_v32 = vld [vmem:[%s13041_s16 + $0x20] sm:$0xff] }
0x1e3a   :  { %v5784_v5 = vadd.f32 %v5783_v40, %v5779_v39  ;;  %v5954_v39 = vld [vmem:[%s13041_s16 + $0x3c0] sm:$0xff]  ;;  %v9058_v40 = vpack.c.bf16 %v5961_v60, %v5955_v13  ;;  %v5827_v13 = vrot.slane %v5818_v47, %v10375_v26  ;;  %v5844_v60 = vld [vmem:[%s13041_s16 + $0x50] sm:$0xff]  ;;  %v6650_v47 = vld [vmem:[%s13042_s18 + $0x278] sm:$0xff] }
0x1e3b   :  { %v5781_v19 = vmul.f32 %v12325_v34, %v12325_v34  ;;  %v5782_v48 = vmul.f32 %v12328_v23, %v12328_v23  ;;  %9105 = vmatpush1.bf16.msra.mxu1 %v9104_v8  ;;  %v6637_v8 = vld [vmem:[%s13042_s18 + $0x210] sm:$0xff] }
0x1e3c   :  { %5785 = vadd.xlane.f32.xlu0 %v5784_v5  ;;  %v5960_v5 = vld [vmem:[%s13041_s16 + $0x3f0] sm:$0xff]  ;;  %9059 = vmatprep.subr.bf16.mxu0 %v9058_v40  ;;  %v5851_v40 = vld [vmem:[%s13041_s16 + $0x88] sm:$0xff] }
0x1e3d   :  { %v5787_v0 = vsel %vm691_vm1, %v5781_v19, 0.0  ;;  %v5788_v55 = vsel %vm2133_vm5, %v5782_v48, 0.0  ;;  %v5957_v19 = vld [vmem:[%s13041_s16 + $0x3d8] sm:$0xff]  ;;  %v5963_v48 = vld [vmem:[%s13041_s16 + $0x408] sm:$0xff]  ;;  %v9060_v51 = vpack.c.bf16 %v5960_v5, %v5954_v39  ;;  %v6635_v39 = vld [vmem:[%s13042_s18 + $0x200] sm:$0xff] }
0x1e3e   :  { %v5789_v3 = vadd.f32 %v5788_v55, %v5787_v0  ;;  %v9106_v0 = vpack.c.bf16 %v5963_v48, %v5957_v19  ;;  %v5956_v55 = vld [vmem:[%s13041_s16 + $0x3d0] sm:$0xff]  ;;  %v5857_v48 = vld [vmem:[%s13041_s16 + $0xb8] sm:$0xff] }
0x1e3f   :  { %9061 = vmatpush1.bf16.msra.mxu0 %v9060_v51  ;;  %v9118_v1 = vpack.c.bf16 %v5857_v48, %v5851_v40  ;;  %v5892_v40 = vld [vmem:[%s13041_s16 + $0x1d0] sm:$0xff] }
0x1e40   :  { %5790 = vadd.xlane.f32.xlu1 %v5789_v3  ;;  %v5962_v3 = vld [vmem:[%s13041_s16 + $0x400] sm:$0xff]  ;;  %9107 = vmatprep.subr.bf16.mxu1 %v9106_v0  ;;  %v6640_v0 = vld [vmem:[%s13042_s18 + $0x228] sm:$0xff] }
0x1e41   :  { %v9108_v21 = vpack.c.bf16 %v5962_v3, %v5956_v55  ;;  %9063 = vmatprep.subr.bf16.mxu0 %v9062_v62  ;;  %v6642_v55 = vld [vmem:[%s13042_s18 + $0x238] sm:$0xff]  ;;  %v5856_v62 = vld [vmem:[%s13041_s16 + $0xb0] sm:$0xff] }
0x1e42   :  { %v9230_v12 = vpack.c.bf16 %v6642_v55, %v6640_v0  ;;  %v5898_v55 = vld [vmem:[%s13041_s16 + $0x200] sm:$0xff] }
0x1e43   :  { %9109 = vmatpush1.bf16.msra.mxu1 %v9108_v21  ;;  %9065 = vmatpush1.bf16.msra.mxu0 %v9064_v25  ;;  %v5850_v21 = vld [vmem:[%s13041_s16 + $0x80] sm:$0xff] }
0x1e44   :  { %9111 = vmatprep.subr.bf16.mxu1 %v9110_v10  ;;  %9115 = vmatprep.subr.bf16.mxu0 %v9114_v27  ;;  %v9120_v27 = vpack.c.bf16 %v5856_v62, %v5850_v21  ;;  %v5923_v21 = vld [vmem:[%s13041_s16 + $0x2c8] sm:$0xff]  ;;  %v5929_v62 = vld [vmem:[%s13041_s16 + $0x2f8] sm:$0xff] }
0x1e47   :  { %9113 = vmatpush1.bf16.msra.mxu1 %v9112_v46 }
0x1e48   :  { %9227 = vmatprep.subr.bf16.mxu1 %v9226_v15  ;;  %v5868_v15 = vld [vmem:[%s13041_s16 + $0x110] sm:$0xff] }
0x1ec9   :  { %v5786_v14 = vpop.xlane.xlu0 %5785 }
0x1eca   :  { %v5792_v57 = vmul.f32 0.0052083335, %v5786_v14  ;;  %v5875_v14 = vld [vmem:[%s13041_s16 + $0x148] sm:$0xff] }
0x1ecc   :  { %v5794_v11 = vadd.f32 1e-05, %v5792_v57 }
0x1ecd   :  { %v5791_v28 = vpop.xlane.xlu1 %5790 }
0x1ece   :  { %9583 = vrsqrt.f32 %v5794_v11  ;;  %v5793_v38 = vmul.f32 0.0052083335, %v5791_v28  ;;  %v5881_v11 = vld [vmem:[%s13041_s16 + $0x178] sm:$0xff] }
0x1ed0   :  { %v5795_v54 = vadd.f32 1e-05, %v5793_v38  ;;  %v6643_v38 = vld [vmem:[%s13042_s18 + $0x240] sm:$0xff] }
0x1ed2   :  { %9585 = vrsqrt.f32 %v5795_v54  ;;  %v6645_v54 = vld [vmem:[%s13042_s18 + $0x250] sm:$0xff] }
0x1ed8   :  { %v9584_v31 = vpop.eup %9583 }
0x1ed9   :  { %v5798_v22 = vmul.f32 %v9584_v31, %v12315_v36  ;;  %v5799_v50 = vmul.f32 %v9584_v31, %v12318_v49  ;;  %v9116_v36 = vpack.c.bf16 %v5844_v60, %v5838_v32  ;;  %v9228_v49 = vpack.c.bf16 %v6637_v8, %v6635_v39  ;;  %v5874_v31 = vld [vmem:[%s13041_s16 + $0x140] sm:$0xff]  ;;  %v5880_v32 = vld [vmem:[%s13041_s16 + $0x170] sm:$0xff] }
0x1eda   :  { %v9128_v60 = vpack.c.bf16 %v5880_v32, %v5874_v31  ;;  %v5886_v8 = vld [vmem:[%s13041_s16 + $0x1a0] sm:$0xff]  ;;  %v5977_v31 = vld [vmem:[%s13041_s16 + $0x478] sm:$0xff] }
0x1edb   :  { %v5815_v5 = vmul.f32 %v5811_v7, %v5799_v50  ;;  %v5814_v19 = vmul.f32 %v5807_v33, %v5798_v22  ;;  %v9236_v22 = vpack.c.bf16 %v6645_v54, %v6643_v38  ;;  %v5887_v50 = vld [vmem:[%s13041_s16 + $0x1a8] sm:$0xff]  ;;  %v9132_v48 = vpack.c.bf16 %v5892_v40, %v5886_v8  ;;  %v5965_v38 = vld [vmem:[%s13041_s16 + $0x418] sm:$0xff]  ;;  %v6571_v40 = vld [vmem:[%s13042_s18] sm:$0xff] }
0x1edc   :  { %v9586_v3 = vpop.eup %9585 }
0x1edd   :  { %v5831_v63 = vadd.f32 %v5827_v13, %v5815_v5  ;;  %v12397_v30 = vadd.f32 %v5823_v17, %v5814_v19  ;;  %v5801_v51 = vmul.f32 %v9586_v3, %v12328_v23  ;;  %v5800_v58 = vmul.f32 %v9586_v3, %v12325_v34  ;;  %v6639_v23 = vld [vmem:[%s13042_s18 + $0x220] sm:$0xff]  ;;  %v6644_v34 = vld [vmem:[%s13042_s18 + $0x248] sm:$0xff]  ;;  %v5905_v19 = vld [vmem:[%s13041_s16 + $0x238] sm:$0xff] }
0x1ede   :  { %v9232_v57 = vpack.c.bf16 %v6641_v16, %v6639_v23  ;;  %v9234_v28 = vpack.c.bf16 %v6646_v59, %v6644_v34  ;;  %v5899_v5 = vld [vmem:[%s13041_s16 + $0x208] sm:$0xff]  ;;  %v5904_v3 = vld [vmem:[%s13041_s16 + $0x230] sm:$0xff]  ;;  %v5941_v23 = vld [vmem:[%s13041_s16 + $0x358] sm:$0xff] }
0x1edf   :  { %7293 = vmatprep.mubr.msk.f32.mxu0 %vm829_vm3, %v5831_v63  ;;  %7295 = vmatprep.mubr.msk.f32.mxu1 %vm829_vm3, %v5831_v63  ;;  %v5817_v52 = vmul.f32 %v5811_v7, %v5801_v51  ;;  %v5816_v10 = vmul.f32 %v5807_v33, %v5800_v58  ;;  %v9124_v33 = vpack.c.bf16 %v5868_v15, %v5862_v24  ;;  %v5910_v58 = vld [vmem:[%s13041_s16 + $0x260] sm:$0xff]  ;;  %v5953_v24 = vld [vmem:[%s13041_s16 + $0x3b8] sm:$0xff] }
0x1ee0   :  { %6081 = vmatmul.mubr.f32.vlgmr.msra.gmra.mrb[32].mxu0 %v12397_v30  ;;  %6158 = vmatmul.mubr.f32.vlgmr.msra.gmra.mrb[76].mxu1 %v12397_v30  ;;  %v9126_v7 = vpack.c.bf16 %v5881_v11, %v5875_v14  ;;  %v9134_v0 = vpack.c.bf16 %v5905_v19, %v5899_v5  ;;  %v9146_v34 = vpack.c.bf16 %v5941_v23, %v5935_v6  ;;  %v5934_v59 = vld [vmem:[%s13041_s16 + $0x320] sm:$0xff]  ;;  %v5952_v11 = vld [vmem:[%s13041_s16 + $0x3b0] sm:$0xff]  ;;  %v6576_v19 = vld [vmem:[%s13042_s18 + $0x28] sm:$0xff] }
0x1ee1   :  { %9117 = vmatpush1.bf16.msra.mxu0 %v9116_v36  ;;  %v12413_v25 = vadd.f32 %v5827_v13, %v5817_v52  ;;  %v12415_v46 = vadd.f32 %v5823_v17, %v5816_v10  ;;  %9229 = vmatpush1.bf16.msra.mxu1 %v9228_v49  ;;  %v5893_v17 = vld [vmem:[%s13041_s16 + $0x1d8] sm:$0xff]  ;;  %v9238_v13 = vpack.c.bf16 %v6650_v47, %v6648_v56  ;;  %v5911_v36 = vld [vmem:[%s13041_s16 + $0x268] sm:$0xff]  ;;  %v5922_v52 = vld [vmem:[%s13041_s16 + $0x2c0] sm:$0xff] }
0x1ee2   :  { %9119 = vmatprep.subr.bf16.mxu0 %v9118_v1  ;;  %9231 = vmatprep.subr.bf16.mxu1 %v9230_v12  ;;  %v9130_v39 = vpack.c.bf16 %v5893_v17, %v5887_v50  ;;  %v5917_v49 = vld [vmem:[%s13041_s16 + $0x298] sm:$0xff]  ;;  %v5916_v1 = vld [vmem:[%s13041_s16 + $0x290] sm:$0xff]  ;;  %v9142_v12 = vpack.c.bf16 %v5929_v62, %v5923_v21  ;;  %v5958_v47 = vld [vmem:[%s13041_s16 + $0x3e0] sm:$0xff] }
0x1ee3   :  { %7294 = vmatprep.mubr.msk.f32.mxu0 %vm829_vm3, %v12413_v25  ;;  %7296 = vmatprep.mubr.msk.f32.mxu1 %vm829_vm3, %v12413_v25  ;;  %v9138_v51 = vpack.c.bf16 %v5917_v49, %v5911_v36  ;;  %v9140_v43 = vpack.c.bf16 %v5916_v1, %v5910_v58  ;;  %v5928_v10 = vld [vmem:[%s13041_s16 + $0x2f0] sm:$0xff]  ;;  %v5970_v50 = vld [vmem:[%s13041_s16 + $0x440] sm:$0xff]  ;;  %v6580_v49 = vld [vmem:[%s13042_s18 + $0x48] sm:$0xff] }
0x1ee4   :  { %6087 = vmatmul.mubr.f32.gmra.mrb[34].mxu0 %v12415_v46  ;;  %6164 = vmatmul.mubr.f32.gmra.mrb[78].mxu1 %v12415_v46  ;;  %v9144_v16 = vpack.c.bf16 %v5928_v10, %v5922_v52  ;;  %v5976_v17 = vld [vmem:[%s13041_s16 + $0x470] sm:$0xff]  ;;  %v6579_v1 = vld [vmem:[%s13042_s18 + $0x40] sm:$0xff] }
0x1ee5   :  { %9121 = vmatpush1.bf16.msra.mxu0 %v9120_v27  ;;  %7297 = vmatprep.mubr.msk.f32.mxu0 %vm829_vm3, %v5831_v63  ;;  %v9136_v63 = vpack.c.bf16 %v5904_v3, %v5898_v55  ;;  %v5940_v27 = vld [vmem:[%s13041_s16 + $0x350] sm:$0xff]  ;;  %v6575_v3 = vld [vmem:[%s13042_s18 + $0x20] sm:$0xff] }
0x1ee6   :  { %9123 = vmatprep.subr.bf16.mxu0 %v9122_v44  ;;  %9233 = vmatpush1.bf16.msra.mxu1 %v9232_v57  ;;  %v5947_v44 = vld [vmem:[%s13041_s16 + $0x388] sm:$0xff]  ;;  %v9148_v15 = vpack.c.bf16 %v5940_v27, %v5934_v59  ;;  %v5946_v57 = vld [vmem:[%s13041_s16 + $0x380] sm:$0xff]  ;;  %v6573_v5 = vld [vmem:[%s13042_s18 + $0x10] sm:$0xff] }
0x1ee7   :  { %9235 = vmatprep.subr.bf16.mxu1 %v9234_v28  ;;  %v9150_v14 = vpack.c.bf16 %v5953_v24, %v5947_v44  ;;  %v5959_v28 = vld [vmem:[%s13041_s16 + $0x3e8] sm:$0xff]  ;;  %v9152_v54 = vpack.c.bf16 %v5952_v11, %v5946_v57  ;;  %v6577_v36 = vld [vmem:[%s13042_s18 + $0x30] sm:$0xff]  ;;  %v6583_v10 = vld [vmem:[%s13042_s18 + $0x60] sm:$0xff] }
0x1ee8   :  { %v9154_v56 = vpack.c.bf16 %v5965_v38, %v5959_v28  ;;  %v6581_v21 = vld [vmem:[%s13042_s18 + $0x50] sm:$0xff]  ;;  %v6588_v27 = vld [vmem:[%s13042_s18 + $0x88] sm:$0xff]  ;;  %v6590_v44 = vld [vmem:[%s13042_s18 + $0x98] sm:$0xff] }
0x1ee9   :  { %9125 = vmatpush1.bf16.msra.mxu0 %v9124_v33  ;;  %v5964_v33 = vld [vmem:[%s13041_s16 + $0x410] sm:$0xff]  ;;  %v9172_v62 = vpack.c.bf16 %v6581_v21, %v6579_v1  ;;  %v6651_v24 = vld [vmem:[%s13042_s18 + $0x280] sm:$0xff]  ;;  %v6600_v21 = vld [vmem:[%s13042_s18 + $0xe8] sm:$0xff] }
0x1eea   :  { %9127 = vmatprep.subr.bf16.mxu0 %v9126_v7  ;;  %9237 = vmatpush1.bf16.msra.mxu1 %v9236_v22  ;;  %v5971_v7 = vld [vmem:[%s13041_s16 + $0x448] sm:$0xff]  ;;  %v9156_v32 = vpack.c.bf16 %v5964_v33, %v5958_v47  ;;  %v6649_v52 = vld [vmem:[%s13042_s18 + $0x270] sm:$0xff]  ;;  %v6587_v57 = vld [vmem:[%s13042_s18 + $0x80] sm:$0xff] }
0x1eeb   :  { %9239 = vmatprep.subr.bf16.mxu1 %v9238_v13  ;;  %v9158_v22 = vpack.c.bf16 %v5977_v31, %v5971_v7  ;;  %v6572_v13 = vld [vmem:[%s13042_s18 + $0x8] sm:$0xff]  ;;  %v6585_v6 = vld [vmem:[%s13042_s18 + $0x70] sm:$0xff]  ;;  %v6594_v7 = vld [vmem:[%s13042_s18 + $0xb8] sm:$0xff] }
0x1eec   :  { %v6589_v11 = vld [vmem:[%s13042_s18 + $0x90] sm:$0xff]  ;;  %v6592_v33 = vld [vmem:[%s13042_s18 + $0xa8] sm:$0xff]  ;;  %v6655_v31 = vld [vmem:[%s13042_s18 + $0x2a0] sm:$0xff] }
0x1eed   :  { %9129 = vmatpush1.bf16.msra.mxu0 %v9128_v60  ;;  %v6574_v60 = vld [vmem:[%s13042_s18 + $0x18] sm:$0xff]  ;;  %v9180_v38 = vpack.c.bf16 %v6589_v11, %v6587_v57 }
0x1eee   :  { %9131 = vmatprep.subr.bf16.mxu0 %v9130_v39  ;;  %v9160_v39 = vpack.c.bf16 %v5976_v17, %v5970_v50  ;;  %v9162_v8 = vpack.c.bf16 %v6574_v60, %v6572_v13  ;;  %v6591_v50 = vld [vmem:[%s13042_s18 + $0xa0] sm:$0xff]  ;;  %v6593_v17 = vld [vmem:[%s13042_s18 + $0xb0] sm:$0xff] }
0x1eef   :  { %v9184_v60 = vpack.c.bf16 %v6593_v17, %v6591_v50 }
0x1ef1   :  { %9133 = vmatpush1.bf16.msra.mxu0 %v9132_v48  ;;  %v6578_v48 = vld [vmem:[%s13042_s18 + $0x38] sm:$0xff] }
0x1ef2   :  { %9135 = vmatprep.subr.bf16.mxu0 %v9134_v0  ;;  %v9164_v0 = vpack.c.bf16 %v6573_v5, %v6571_v40  ;;  %v9166_v55 = vpack.c.bf16 %v6578_v48, %v6576_v19  ;;  %v6596_v5 = vld [vmem:[%s13042_s18 + $0xc8] sm:$0xff]  ;;  %v6598_v19 = vld [vmem:[%s13042_s18 + $0xd8] sm:$0xff]  ;;  %v6659_v48 = vld [vmem:[%s13042_s18 + $0x2c0] sm:$0xff] }
0x1ef5   :  { %9137 = vmatpush1.bf16.msra.mxu0 %v9136_v63  ;;  %v6582_v63 = vld [vmem:[%s13042_s18 + $0x58] sm:$0xff] }
0x1ef6   :  { %9139 = vmatprep.subr.bf16.mxu0 %v9138_v51  ;;  %v9168_v51 = vpack.c.bf16 %v6577_v36, %v6575_v3  ;;  %v9170_v58 = vpack.c.bf16 %v6582_v63, %v6580_v49  ;;  %v6595_v3 = vld [vmem:[%s13042_s18 + $0xc0] sm:$0xff]  ;;  %v6597_v36 = vld [vmem:[%s13042_s18 + $0xd0] sm:$0xff] }
0x1ef7   :  { %v9188_v63 = vpack.c.bf16 %v6597_v36, %v6595_v3 }
0x1ef9   :  { %9141 = vmatpush1.bf16.msra.mxu0 %v9140_v43  ;;  %v6647_v43 = vld [vmem:[%s13042_s18 + $0x260] sm:$0xff] }
0x1efa   :  { %9143 = vmatprep.subr.bf16.mxu0 %v9142_v12  ;;  %v9240_v23 = vpack.c.bf16 %v6649_v52, %v6647_v43  ;;  %v6665_v43 = vld [vmem:[%s13042_s18 + $0x2f0] sm:$0xff] }
0x1efb   :  { %v6601_v52 = vld [vmem:[%s13042_s18 + $0xf0] sm:$0xff] }
0x1efc   :  { %9241 = vmatpush1.bf16.msra.mxu1 %v9240_v23  ;;  %v6668_v23 = vld [vmem:[%s13042_s18 + $0x308] sm:$0xff] }
0x1efd   :  { %9145 = vmatpush1.bf16.msra.mxu0 %v9144_v16  ;;  %v6652_v16 = vld [vmem:[%s13042_s18 + $0x288] sm:$0xff] }
0x1efe   :  { %9147 = vmatprep.subr.bf16.mxu0 %v9146_v34  ;;  %v6654_v34 = vld [vmem:[%s13042_s18 + $0x298] sm:$0xff] }
0x1eff   :  { %v9242_v59 = vpack.c.bf16 %v6654_v34, %v6652_v16  ;;  %v6604_v34 = vld [vmem:[%s13042_s18 + $0x108] sm:$0xff] }
0x1f01   :  { %9149 = vmatpush1.bf16.msra.mxu0 %v9148_v15  ;;  %v9178_v15 = vpack.c.bf16 %v6590_v44, %v6588_v27  ;;  %9243 = vmatprep.subr.bf16.mxu1 %v9242_v59  ;;  %v6606_v59 = vld [vmem:[%s13042_s18 + $0x118] sm:$0xff]  ;;  %v6667_v27 = vld [vmem:[%s13042_s18 + $0x300] sm:$0xff] }
0x1f02   :  { %9151 = vmatprep.subr.bf16.mxu0 %v9150_v14  ;;  %v6653_v14 = vld [vmem:[%s13042_s18 + $0x290] sm:$0xff]  ;;  %v9194_v44 = vpack.c.bf16 %v6606_v59, %v6604_v34  ;;  %v6683_v59 = vld [vmem:[%s13042_s18 + $0x380] sm:$0xff] }
0x1f03   :  { %v9244_v28 = vpack.c.bf16 %v6653_v14, %v6651_v24  ;;  %v6669_v24 = vld [vmem:[%s13042_s18 + $0x310] sm:$0xff] }
0x1f04   :  { %v6605_v14 = vld [vmem:[%s13042_s18 + $0x110] sm:$0xff]  ;;  %v9260_v57 = vpack.c.bf16 %v6669_v24, %v6667_v27 }
0x1f05   :  { %9153 = vmatpush1.bf16.msra.mxu0 %v9152_v54  ;;  %v6656_v54 = vld [vmem:[%s13042_s18 + $0x2a8] sm:$0xff]  ;;  %9245 = vmatpush1.bf16.msra.mxu1 %v9244_v28  ;;  %v6685_v27 = vld [vmem:[%s13042_s18 + $0x390] sm:$0xff] }
0x1f06   :  { %9155 = vmatprep.subr.bf16.mxu0 %v9154_v56  ;;  %v6658_v56 = vld [vmem:[%s13042_s18 + $0x2b8] sm:$0xff]  ;;  %v6672_v28 = vld [vmem:[%s13042_s18 + $0x328] sm:$0xff]  ;;  %v9276_v24 = vpack.c.bf16 %v6685_v27, %v6683_v59 }
0x1f07   :  { %v9246_v47 = vpack.c.bf16 %v6658_v56, %v6656_v54  ;;  %v6608_v56 = vld [vmem:[%s13042_s18 + $0x128] sm:$0xff] }
0x1f09   :  { %9157 = vmatpush1.bf16.msra.mxu0 %v9156_v32  ;;  %v9182_v32 = vpack.c.bf16 %v6594_v7, %v6592_v33  ;;  %9247 = vmatprep.subr.bf16.mxu1 %v9246_v47  ;;  %v6610_v47 = vld [vmem:[%s13042_s18 + $0x138] sm:$0xff]  ;;  %v6671_v33 = vld [vmem:[%s13042_s18 + $0x320] sm:$0xff] }
0x1f0a   :  { %9159 = vmatprep.subr.bf16.mxu0 %v9158_v22  ;;  %v6657_v22 = vld [vmem:[%s13042_s18 + $0x2b0] sm:$0xff]  ;;  %v9198_v7 = vpack.c.bf16 %v6610_v47, %v6608_v56  ;;  %v6687_v56 = vld [vmem:[%s13042_s18 + $0x3a0] sm:$0xff] }
0x1f0b   :  { %v9248_v13 = vpack.c.bf16 %v6657_v22, %v6655_v31  ;;  %v6673_v31 = vld [vmem:[%s13042_s18 + $0x330] sm:$0xff] }
0x1f0c   :  { %v6609_v22 = vld [vmem:[%s13042_s18 + $0x130] sm:$0xff]  ;;  %v9264_v50 = vpack.c.bf16 %v6673_v31, %v6671_v33 }
0x1f0d   :  { %9161 = vmatpush1.bf16.msra.mxu0 %v9160_v39  ;;  %v6660_v39 = vld [vmem:[%s13042_s18 + $0x2c8] sm:$0xff]  ;;  %9249 = vmatpush1.bf16.msra.mxu1 %v9248_v13  ;;  %v6689_v33 = vld [vmem:[%s13042_s18 + $0x3b0] sm:$0xff] }
0x1f0e   :  { %9163 = vmatprep.subr.bf16.mxu0 %v9162_v8  ;;  %v6662_v8 = vld [vmem:[%s13042_s18 + $0x2d8] sm:$0xff]  ;;  %v6676_v13 = vld [vmem:[%s13042_s18 + $0x348] sm:$0xff]  ;;  %v6625_v31 = vld [vmem:[%s13042_s18 + $0x1b0] sm:$0xff] }
0x1f0f   :  { %v9250_v40 = vpack.c.bf16 %v6662_v8, %v6660_v39  ;;  %v6612_v8 = vld [vmem:[%s13042_s18 + $0x148] sm:$0xff] }
0x1f10   :  { %6235 = vmatmul.mubr.f32.vlgmr.msra.gmra.mrb[36].mxu0 %v12397_v30  ;;  %v6584_v30 = vld [vmem:[%s13042_s18 + $0x68] sm:$0xff] }
0x1f11   :  { %7298 = vmatprep.mubr.msk.f32.mxu0 %vm829_vm3, %v12413_v25  ;;  %9165 = vmatpush1.bf16.msra.mxu0 %v9164_v0  ;;  %v6586_v25 = vld [vmem:[%s13042_s18 + $0x78] sm:$0xff]  ;;  %v9186_v0 = vpack.c.bf16 %v6598_v19, %v6596_v5  ;;  %v6675_v5 = vld [vmem:[%s13042_s18 + $0x340] sm:$0xff] }
0x1f12   :  { %9167 = vmatprep.subr.bf16.mxu0 %v9166_v55  ;;  %v9174_v12 = vpack.c.bf16 %v6586_v25, %v6584_v30  ;;  %v6661_v55 = vld [vmem:[%s13042_s18 + $0x2d0] sm:$0xff]  ;;  %9251 = vmatprep.subr.bf16.mxu1 %v9250_v40  ;;  %v6663_v30 = vld [vmem:[%s13042_s18 + $0x2e0] sm:$0xff]  ;;  %v6614_v40 = vld [vmem:[%s13042_s18 + $0x158] sm:$0xff] }
0x1f13   :  { %v9252_v49 = vpack.c.bf16 %v6661_v55, %v6659_v48  ;;  %v9202_v19 = vpack.c.bf16 %v6614_v40, %v6612_v8  ;;  %v6677_v48 = vld [vmem:[%s13042_s18 + $0x350] sm:$0xff] }
0x1f14   :  { %6241 = vmatmul.mubr.f32.gmra.mrb[38].mxu0 %v12415_v46  ;;  %v9176_v46 = vpack.c.bf16 %v6585_v6, %v6583_v10  ;;  %v9256_v10 = vpack.c.bf16 %v6665_v43, %v6663_v30  ;;  %v6613_v55 = vld [vmem:[%s13042_s18 + $0x150] sm:$0xff]  ;;  %v9268_v3 = vpack.c.bf16 %v6677_v48, %v6675_v5  ;;  %v6615_v43 = vld [vmem:[%s13042_s18 + $0x160] sm:$0xff] }
0x1f15   :  { %9169 = vmatpush1.bf16.msra.mxu0 %v9168_v51  ;;  %v6664_v51 = vld [vmem:[%s13042_s18 + $0x2e8] sm:$0xff]  ;;  %9253 = vmatpush1.bf16.msra.mxu1 %v9252_v49  ;;  %v6693_v5 = vld [vmem:[%s13042_s18 + $0x3d0] sm:$0xff] }
0x1f16   :  { %9171 = vmatprep.subr.bf16.mxu0 %v9170_v58  ;;  %v6666_v58 = vld [vmem:[%s13042_s18 + $0x2f8] sm:$0xff]  ;;  %v6680_v49 = vld [vmem:[%s13042_s18 + $0x368] sm:$0xff]  ;;  %v6629_v48 = vld [vmem:[%s13042_s18 + $0x1d0] sm:$0xff] }
0x1f17   :  { %v9254_v1 = vpack.c.bf16 %v6666_v58, %v6664_v51  ;;  %v6616_v51 = vld [vmem:[%s13042_s18 + $0x168] sm:$0xff] }
0x1f19   :  { %9173 = vmatpush1.bf16.msra.mxu0 %v9172_v62  ;;  %v6602_v62 = vld [vmem:[%s13042_s18 + $0xf8] sm:$0xff]  ;;  %9255 = vmatprep.subr.bf16.mxu1 %v9254_v1 }
0x1f1a   :  { %9175 = vmatprep.subr.bf16.mxu0 %v9174_v12  ;;  %v9190_v25 = vpack.c.bf16 %v6602_v62, %v6600_v21  ;;  %v6599_v12 = vld [vmem:[%s13042_s18 + $0xe0] sm:$0xff]  ;;  %9257 = vmatpush1.bf16.msra.mxu1 %v9256_v10  ;;  %v6618_v1 = vld [vmem:[%s13042_s18 + $0x178] sm:$0xff]  ;;  %v6681_v62 = vld [vmem:[%s13042_s18 + $0x370] sm:$0xff] }
0x1f1b   :  { %v9192_v6 = vpack.c.bf16 %v6601_v52, %v6599_v12  ;;  %v6679_v21 = vld [vmem:[%s13042_s18 + $0x360] sm:$0xff]  ;;  %v9206_v30 = vpack.c.bf16 %v6618_v1, %v6616_v51  ;;  %v6617_v12 = vld [vmem:[%s13042_s18 + $0x170] sm:$0xff]  ;;  %v6684_v52 = vld [vmem:[%s13042_s18 + $0x388] sm:$0xff] }
0x1f1c   :  { %v9208_v10 = vpack.c.bf16 %v6617_v12, %v6615_v43  ;;  %v6634_v51 = vld [vmem:[%s13042_s18 + $0x1f8] sm:$0xff]  ;;  %v6700_v12 = vld [vmem:[%s13042_s18 + $0x408] sm:$0xff] }
0x1f1d   :  { %9177 = vmatpush1.bf16.msra.mxu0 %v9176_v46  ;;  %v6670_v46 = vld [vmem:[%s13042_s18 + $0x318] sm:$0xff] }
0x1f1e   :  { %9179 = vmatprep.subr.bf16.mxu0 %v9178_v15  ;;  %v9258_v16 = vpack.c.bf16 %v6670_v46, %v6668_v23  ;;  %v6603_v15 = vld [vmem:[%s13042_s18 + $0x100] sm:$0xff]  ;;  %v6620_v23 = vld [vmem:[%s13042_s18 + $0x188] sm:$0xff]  ;;  %v6622_v46 = vld [vmem:[%s13042_s18 + $0x198] sm:$0xff] }
0x1f1f   :  { %v9196_v11 = vpack.c.bf16 %v6605_v14, %v6603_v15  ;;  %v9210_v34 = vpack.c.bf16 %v6622_v46, %v6620_v23  ;;  %v6621_v15 = vld [vmem:[%s13042_s18 + $0x190] sm:$0xff]  ;;  %v6688_v14 = vld [vmem:[%s13042_s18 + $0x3a8] sm:$0xff] }
0x1f20   :  { %9259 = vmatprep.subr.bf16.mxu1 %v9258_v16 }
0x1f21   :  { %9181 = vmatpush1.bf16.msra.mxu0 %v9180_v38  ;;  %v6674_v38 = vld [vmem:[%s13042_s18 + $0x338] sm:$0xff]  ;;  %9261 = vmatpush1.bf16.msra.mxu1 %v9260_v57 }
0x1f22   :  { %9183 = vmatprep.subr.bf16.mxu0 %v9182_v32  ;;  %v9262_v54 = vpack.c.bf16 %v6674_v38, %v6672_v28  ;;  %v6607_v32 = vld [vmem:[%s13042_s18 + $0x120] sm:$0xff]  ;;  %v6690_v57 = vld [vmem:[%s13042_s18 + $0x3b8] sm:$0xff]  ;;  %v6624_v38 = vld [vmem:[%s13042_s18 + $0x1a8] sm:$0xff] }
0x1f23   :  { %v9200_v17 = vpack.c.bf16 %v6609_v22, %v6607_v32  ;;  %v9278_v28 = vpack.c.bf16 %v6690_v57, %v6688_v14  ;;  %v6692_v32 = vld [vmem:[%s13042_s18 + $0x3c8] sm:$0xff]  ;;  %v6694_v22 = vld [vmem:[%s13042_s18 + $0x3d8] sm:$0xff] }
0x1f24   :  { %9263 = vmatprep.subr.bf16.mxu1 %v9262_v54  ;;  %v6626_v54 = vld [vmem:[%s13042_s18 + $0x1b8] sm:$0xff]  ;;  %v9282_v8 = vpack.c.bf16 %v6694_v22, %v6692_v32 }
0x1f25   :  { %9185 = vmatpush1.bf16.msra.mxu0 %v9184_v60  ;;  %v6678_v60 = vld [vmem:[%s13042_s18 + $0x358] sm:$0xff]  ;;  %9265 = vmatpush1.bf16.msra.mxu1 %v9264_v50  ;;  %v9214_v47 = vpack.c.bf16 %v6626_v54, %v6624_v38  ;;  %v6628_v50 = vld [vmem:[%s13042_s18 + $0x1c8] sm:$0xff] }
0x1f26   :  { %9187 = vmatprep.subr.bf16.mxu0 %v9186_v0  ;;  %v9266_v39 = vpack.c.bf16 %v6678_v60, %v6676_v13  ;;  %v6611_v0 = vld [vmem:[%s13042_s18 + $0x140] sm:$0xff]  ;;  %v6630_v60 = vld [vmem:[%s13042_s18 + $0x1d8] sm:$0xff] }
0x1f27   :  { %v9204_v36 = vpack.c.bf16 %v6613_v55, %v6611_v0  ;;  %v9218_v40 = vpack.c.bf16 %v6630_v60, %v6628_v50 }
0x1f28   :  { %9267 = vmatprep.subr.bf16.mxu1 %v9266_v39  ;;  %v6691_v39 = vld [vmem:[%s13042_s18 + $0x3c0] sm:$0xff] }
0x1f29   :  { %9189 = vmatpush1.bf16.msra.mxu0 %v9188_v63  ;;  %v6682_v63 = vld [vmem:[%s13042_s18 + $0x378] sm:$0xff]  ;;  %9269 = vmatpush1.bf16.msra.mxu1 %v9268_v3  ;;  %v9284_v0 = vpack.c.bf16 %v6693_v5, %v6691_v39  ;;  %v6696_v3 = vld [vmem:[%s13042_s18 + $0x3e8] sm:$0xff] }
0x1f2a   :  { %9191 = vmatprep.subr.bf16.mxu0 %v9190_v25  ;;  %v9270_v58 = vpack.c.bf16 %v6682_v63, %v6680_v49  ;;  %v9272_v25 = vpack.c.bf16 %v6681_v62, %v6679_v21  ;;  %v6632_v63 = vld [vmem:[%s13042_s18 + $0x1e8] sm:$0xff]  ;;  %v6697_v21 = vld [vmem:[%s13042_s18 + $0x3f0] sm:$0xff]  ;;  %v6631_v62 = vld [vmem:[%s13042_s18 + $0x1e0] sm:$0xff] }
0x1f2b   :  { %v9222_v1 = vpack.c.bf16 %v6634_v51, %v6632_v63 }
0x1f2c   :  { %9271 = vmatprep.subr.bf16.mxu1 %v9270_v58  ;;  %v6695_v58 = vld [vmem:[%s13042_s18 + $0x3e0] sm:$0xff] }
0x1f2d   :  { %9193 = vmatpush1.bf16.msra.mxu0 %v9192_v6  ;;  %v6686_v6 = vld [vmem:[%s13042_s18 + $0x398] sm:$0xff]  ;;  %9273 = vmatpush1.bf16.msra.mxu1 %v9272_v25  ;;  %v9288_v25 = vpack.c.bf16 %v6697_v21, %v6695_v58 }
0x1f2e   :  { %9195 = vmatprep.subr.bf16.mxu0 %v9194_v44  ;;  %v9274_v16 = vpack.c.bf16 %v6686_v6, %v6684_v52  ;;  %v6619_v44 = vld [vmem:[%s13042_s18 + $0x180] sm:$0xff]  ;;  %v6702_v52 = vld [vmem:[%s13042_s18 + $0x418] sm:$0xff] }
0x1f2f   :  { %v5978_v6 = vld [vmem:[%s13045_s26] sm:$0x3f] }
0x1f30   :  { %9275 = vmatprep.subr.bf16.mxu1 %v9274_v16  ;;  %v5983_v23 = vrot.slane %v5978_v6, %v10379_v35  ;;  %v5991_v46 = vrot.slane %v5978_v6, %v3550_v37  ;;  %v5987_v16 = vrot.slane %v5978_v6, %v10375_v26 }
0x1f31   :  { %9197 = vmatpush1.bf16.msra.mxu0 %v9196_v11  ;;  %v9212_v11 = vpack.c.bf16 %v6621_v15, %v6619_v44  ;;  %9277 = vmatpush1.bf16.msra.mxu1 %v9276_v24 }
0x1f32   :  { %9199 = vmatprep.subr.bf16.mxu0 %v9198_v7  ;;  %v6623_v7 = vld [vmem:[%s13042_s18 + $0x1a0] sm:$0xff]  ;;  %9279 = vmatprep.subr.bf16.mxu1 %v9278_v28 }
0x1f33   :  { %v9216_v13 = vpack.c.bf16 %v6625_v31, %v6623_v7 }
0x1f35   :  { %9201 = vmatpush1.bf16.msra.mxu0 %v9200_v17  ;;  %v9280_v17 = vpack.c.bf16 %v6689_v33, %v6687_v56 }
0x1f36   :  { %9203 = vmatprep.subr.bf16.mxu0 %v9202_v19  ;;  %v6627_v19 = vld [vmem:[%s13042_s18 + $0x1c0] sm:$0xff] }
0x1f37   :  { %9281 = vmatpush1.bf16.msra.mxu1 %v9280_v17  ;;  %v9220_v55 = vpack.c.bf16 %v6629_v48, %v6627_v19 }
0x1f38   :  { %9283 = vmatprep.subr.bf16.mxu1 %v9282_v8 }
0x1f39   :  { %9205 = vmatpush1.bf16.msra.mxu0 %v9204_v36  ;;  %v6698_v36 = vld [vmem:[%s13042_s18 + $0x3f8] sm:$0xff] }
0x1f3a   :  { %9207 = vmatprep.subr.bf16.mxu0 %v9206_v30  ;;  %v9286_v49 = vpack.c.bf16 %v6698_v36, %v6696_v3  ;;  %v6633_v30 = vld [vmem:[%s13042_s18 + $0x1f0] sm:$0xff] }
0x1f3b   :  { %9285 = vmatpush1.bf16.msra.mxu1 %v9284_v0  ;;  %v9224_v43 = vpack.c.bf16 %v6633_v30, %v6631_v62  ;;  %v12634_v30 = vrot.slane %v5978_v6, %v3558_v41 }
0x1f3c   :  { %9287 = vmatprep.subr.bf16.mxu1 %v9286_v49 }
0x1f3d   :  { %9209 = vmatpush1.bf16.msra.mxu0 %v9208_v10  ;;  %v9290_v10 = vpack.c.bf16 %v6702_v52, %v6700_v12 }
0x1f3e   :  { %9211 = vmatprep.subr.bf16.mxu0 %v9210_v34  ;;  %v5995_v34 = vrot.slane %v5978_v6, %v3554_v20 }
0x1f3f   :  { %9289 = vmatpush1.bf16.msra.mxu1 %v9288_v25  ;;  %v12638_v25 = vrot.slane %v5978_v6, %v3562_v2  ;;  %v12653_v2 = vld [vmem:[%s13042_s18 + $0x400] sm:$0xff] }
0x1f40   :  { %9291 = vmatprep.subr.bf16.mxu1 %v9290_v10 }
0x1f41   :  { %9213 = vmatpush1.bf16.msra.mxu0 %v9212_v11 }
0x1f42   :  { %9215 = vmatprep.subr.bf16.mxu0 %v9214_v47 }
0x1f45   :  { %9217 = vmatpush1.bf16.msra.mxu0 %v9216_v13 }
0x1f46   :  { %9219 = vmatprep.subr.bf16.mxu0 %v9218_v40 }
0x1f49   :  { %9221 = vmatpush1.bf16.msra.mxu0 %v9220_v55 }
0x1f4a   :  { %9223 = vmatprep.subr.bf16.mxu0 %v9222_v1 }
0x1f4d   :  { %9225 = vmatpush1.bf16.msra.mxu0 %v9224_v43 }
0x1fb3   :  { %v6082_v59 = vpop.f32.mrb[32].mxu0  ;;  %v6159_v27 = vpop.f32.mrb[76].mxu1 }
0x1fb4   :  { %v6083_v44 = vadd.f32 %v6082_v59, %v5983_v23  ;;  %v12593_v24 = vadd.f32 %v6159_v27, %v5991_v46  ;;  %v6084_v15 = vpop.f32.mrb[33].mxu0  ;;  %v6161_v14 = vpop.f32.mrb[77].mxu1 }
0x1fb5   :  { %v6085_v57 = vadd.f32 %v6084_v15, %v5987_v16  ;;  %v6162_v11 = vadd.f32 %v6161_v14, %v5995_v34  ;;  %v12660_v15 = vld [vmem:[%s13042_s18 + $0x410] sm:$0xff] }
0x1fb6   :  { %v12595_v28 = vmul.f32 0.70710677, %v6083_v44  ;;  %v12598_v38 = vmul.f32 0.70710677, %v12593_v24  ;;  %v12640_v43 = vmul.f32 0.5, %v6083_v44 }
0x1fb7   :  { %v12600_v37 = vmul.f32 0.70710677, %v6085_v57  ;;  %v12605_v47 = vmul.f32 0.70710677, %v6162_v11  ;;  %v6088_v33 = vpop.f32.mrb[34].mxu0  ;;  %v6165_v22 = vpop.f32.mrb[78].mxu1 }
0x1fb8   :  { %v6295_v54 = vand.u32 2147483647, %v12595_v28  ;;  %v6297_v20 = vand.u32 2147483647, %v12598_v38  ;;  %v6090_v13 = vpop.f32.mrb[35].mxu0  ;;  %v6167_v60 = vpop.f32.mrb[79].mxu1  ;;  %v12608_v40 = vadd.f32 %v6088_v33, %v5983_v23  ;;  %v12613_v48 = vadd.f32 %v6165_v22, %v5991_v46 }
0x1fb9   :  { %v6296_v56 = vand.u32 2147483647, %v12600_v37  ;;  %v6298_v39 = vand.u32 2147483647, %v12605_v47  ;;  %v12615_v55 = vadd.f32 %v6090_v13, %v5987_v16  ;;  %v12630_v62 = vadd.f32 %v6167_v60, %v5995_v34 }
0x1fba   :  { %v6307_v7 = vmul.f32 0.3275911, %v6295_v54  ;;  %v6309_v31 = vmul.f32 0.3275911, %v6297_v20  ;;  %v12611_v19 = vmul.f32 0.70710677, %v12608_v40 }
0x1fbb   :  { %v6308_v32 = vmul.f32 0.3275911, %v6296_v56  ;;  %v6310_v5 = vmul.f32 0.3275911, %v6298_v39  ;;  %v12621_v36 = vmul.f32 0.70710677, %v12613_v48 }
0x1fbc   :  { %v6319_v50 = vadd.f32 1.0, %v6307_v7  ;;  %v6321_v17 = vadd.f32 1.0, %v6309_v31  ;;  %v12618_v3 = vand.u32 2147483647, %v12611_v19  ;;  %v6463_v49 = vsub.f32 0.0, %v6295_v54  ;;  %v12668_v31 = vld [vmem:[%s13042_s18 + $0x428] sm:$0xff] }
0x1fbd   :  { %v6320_v8 = vadd.f32 1.0, %v6308_v32  ;;  %v6322_v0 = vadd.f32 1.0, %v6310_v5  ;;  %v6465_v51 = vsub.f32 0.0, %v6297_v20  ;;  %v12625_v58 = vand.u32 2147483647, %v12621_v36 }
0x1fbe   :  { %9587 = vrcp.f32 %v6319_v50  ;;  %v6313_v63 = vmul.f32 0.3275911, %v12618_v3  ;;  %v12628_v1 = vmul.f32 0.70710677, %v12615_v55  ;;  %v6464_v12 = vsub.f32 0.0, %v6296_v56 }
0x1fbf   :  { %9589 = vrcp.f32 %v6321_v17  ;;  %v6315_v52 = vmul.f32 0.3275911, %v12625_v58  ;;  %v6475_v46 = vmul.f32 %v6463_v49, %v6295_v54  ;;  %v12648_v16 = vmul.f32 0.5, %v6085_v57 }
0x1fc0   :  { %9591 = vrcp.f32 %v6320_v8  ;;  %v6325_v21 = vadd.f32 1.0, %v6313_v63  ;;  %v12644_v10 = vand.u32 2147483647, %v12628_v1  ;;  %v12650_v41 = vmul.f32 0.5, %v6162_v11 }
0x1fc1   :  { %9593 = vrcp.f32 %v6322_v0  ;;  %v6477_v59 = vmul.f32 %v6465_v51, %v6297_v20  ;;  %v6327_v27 = vadd.f32 1.0, %v6315_v52  ;;  %vm6271_vm3 = vcmp.ge.f32.partialorder %v12595_v28, 0.0  ;;  %v12671_v20 = vld [vmem:[%s13042_s18 + $0x438] sm:$0xff] }
0x1fc2   :  { %9595 = vrcp.f32 %v6325_v21  ;;  %v6314_v44 = vmul.f32 0.3275911, %v12644_v10  ;;  %v6466_v57 = vsub.f32 0.0, %v6298_v39  ;;  %v12665_v11 = vmul.f32 0.70710677, %v12630_v62 }
0x1fc3   :  { %v6476_v33 = vmul.f32 %v6464_v12, %v6296_v56  ;;  %9597 = vrcp.f32 %v6327_v27  ;;  %v6487_v22 = vmul.f32 1.442695, %v6475_v46  ;;  %vm6273_vm6 = vcmp.ge.f32.partialorder %v12598_v38, 0.0 }
0x1fc4   :  { %v6326_v7 = vadd.f32 1.0, %v6314_v44  ;;  %v12676_v17 = vand.u32 2147483647, %v12665_v11  ;;  %v6491_v56 = vmul.f32 1.442695, %v6477_v59  ;;  %v6478_v49 = vmul.f32 %v6466_v57, %v6298_v39 }
0x1fc5   :  { %v6489_v21 = vmul.f32 1.442695, %v6476_v33  ;;  %v12693_v27 = vsel %vm6271_vm3, 1.0, %v12980_v53  ;;  %v6469_v28 = vsub.f32 0.0, %v12618_v3  ;;  %vm6272_vm9 = vcmp.ge.f32.partialorder %v12600_v37, 0.0 }
0x1fc6   :  { %9599 = vrcp.f32 %v6326_v7  ;;  %v6316_v63 = vmul.f32 0.3275911, %v12676_v17  ;;  %vm6274_vm11 = vcmp.ge.f32.partialorder %v12605_v47, 0.0  ;;  %vm6277_vm12 = vcmp.ge.f32.partialorder %v12611_v19, 0.0 }
0x1fc7   :  { %9601 = vpow2.f32 %v6487_v22  ;;  %v12703_v22 = vsel %vm6273_vm6, 1.0, %v12980_v53  ;;  %vm6278_vm4 = vcmp.ge.f32.partialorder %v12628_v1, 0.0  ;;  %vm6279_vm7 = vcmp.ge.f32.partialorder %v12621_v36, 0.0 }
0x1fc8   :  { %v12646_v23 = vpop.eup %9587  ;;  %9603 = vpow2.f32 %v6491_v56  ;;  %vm6280_vm13 = vcmp.ge.f32.partialorder %v12665_v11, 0.0  ;;  %v6256_v11 = vmul.f32 0.5, %v12630_v62  ;;  %v6728_v62 = vld [vmem:[%s13042_s18 + $0x4e8] sm:$0xff] }
0x1fc9   :  { %v12655_v6 = vpop.eup %9589  ;;  %v6355_v34 = vmul.f32 1.0614054, %v12646_v23 }
0x1fca   :  { %v6357_v14 = vmul.f32 1.0614054, %v12655_v6  ;;  %v12673_v32 = vpop.eup %9591 }
0x1fcb   :  { %v6367_v54 = vadd.f32 -1.4531521, %v6355_v34  ;;  %v6356_v8 = vmul.f32 1.0614054, %v12673_v32  ;;  %v12683_v5 = vpop.eup %9593  ;;  %v6328_v34 = vadd.f32 1.0, %v6316_v63 }
0x1fcc   :  { %v6369_v50 = vadd.f32 -1.4531521, %v6357_v14  ;;  %v6358_v59 = vmul.f32 1.0614054, %v12683_v5  ;;  %v12697_v14 = vpop.eup %9595 }
0x1fcd   :  { %v6379_v60 = vmul.f32 %v12646_v23, %v6367_v54  ;;  %v6368_v12 = vadd.f32 -1.4531521, %v6356_v8  ;;  %v6493_v54 = vmul.f32 1.442695, %v6478_v49  ;;  %9605 = vrcp.f32 %v6328_v34 }
0x1fce   :  { %v6381_v0 = vmul.f32 %v12655_v6, %v6369_v50  ;;  %v6370_v33 = vadd.f32 -1.4531521, %v6358_v59  ;;  %9607 = vpow2.f32 %v6489_v21  ;;  %v6361_v8 = vmul.f32 1.0614054, %v12697_v14 }
0x1fcf   :  { %v6391_v51 = vadd.f32 1.4214138, %v6379_v60  ;;  %v6380_v44 = vmul.f32 %v12673_v32, %v6368_v12  ;;  %9609 = vpow2.f32 %v6493_v54  ;;  %v6481_v34 = vmul.f32 %v6469_v28, %v12618_v3 }
0x1fd0   :  { %v6393_v46 = vadd.f32 1.4214138, %v6381_v0  ;;  %v6382_v56 = vmul.f32 %v12683_v5, %v6370_v33  ;;  %v12708_v0 = vpop.eup %9597  ;;  %v6373_v12 = vadd.f32 -1.4531521, %v6361_v8 }
0x1fd1   :  { %v6403_v39 = vmul.f32 %v12646_v23, %v6391_v51  ;;  %v6392_v50 = vadd.f32 1.4214138, %v6380_v44  ;;  %v6363_v21 = vmul.f32 1.0614054, %v12708_v0  ;;  %v6499_v13 = vmul.f32 1.442695, %v6481_v34 }
0x1fd2   :  { %v6405_v57 = vmul.f32 %v12655_v6, %v6393_v46  ;;  %v6394_v51 = vadd.f32 1.4214138, %v6382_v56 }
0x1fd3   :  { %v6415_v7 = vadd.f32 -0.28449672, %v6403_v39  ;;  %v6404_v38 = vmul.f32 %v12673_v32, %v6392_v50  ;;  %v12717_v39 = vpop.eup %9599  ;;  %9611 = vpow2.f32 %v6499_v13 }
0x1fd4   :  { %v6417_v60 = vadd.f32 -0.28449672, %v6405_v57  ;;  %v6470_v57 = vsub.f32 0.0, %v12644_v10  ;;  %v6406_v33 = vmul.f32 %v12683_v5, %v6394_v51  ;;  %v6362_v54 = vmul.f32 1.0614054, %v12717_v39  ;;  %v9602_v8 = vpop.eup %9601 }
0x1fd5   :  { %v6427_v49 = vmul.f32 %v12646_v23, %v6415_v7  ;;  %v6416_v59 = vadd.f32 -0.28449672, %v6404_v38  ;;  %v6385_v7 = vmul.f32 %v12697_v14, %v6373_v12  ;;  %v6375_v38 = vadd.f32 -1.4531521, %v6363_v21 }
0x1fd6   :  { %v6429_v63 = vmul.f32 %v12655_v6, %v6417_v60  ;;  %v6471_v60 = vsub.f32 0.0, %v12625_v58  ;;  %v6418_v28 = vadd.f32 -0.28449672, %v6406_v33  ;;  %v6374_v53 = vadd.f32 -1.4531521, %v6362_v54 }
0x1fd7   :  { %v6439_v46 = vadd.f32 0.2548296, %v6427_v49  ;;  %v6428_v56 = vmul.f32 %v12673_v32, %v6416_v59  ;;  %v6397_v49 = vadd.f32 1.4214138, %v6385_v7 }
0x1fd8   :  { %v6441_v44 = vadd.f32 0.2548296, %v6429_v63  ;;  %v9604_v63 = vpop.eup %9603  ;;  %v6430_v59 = vmul.f32 %v12683_v5, %v6418_v28  ;;  %v6483_v34 = vmul.f32 %v6471_v60, %v12625_v58 }
0x1fd9   :  { %v6451_v50 = vmul.f32 %v12646_v23, %v6439_v46  ;;  %v6440_v51 = vadd.f32 0.2548296, %v6428_v56  ;;  %v12727_v12 = vpop.eup %9605  ;;  %v6482_v46 = vmul.f32 %v6470_v57, %v12644_v10  ;;  %v6409_v18 = vmul.f32 %v12697_v14, %v6397_v49 }
0x1fda   :  { %v6453_v3 = vmul.f32 %v12655_v6, %v6441_v44  ;;  %v6386_v44 = vmul.f32 %v12717_v39, %v6374_v53  ;;  %v6364_v21 = vmul.f32 1.0614054, %v12727_v12  ;;  %v9608_v33 = vpop.eup %9607  ;;  %v6442_v7 = vadd.f32 0.2548296, %v6430_v59 }
0x1fdb   :  { %v6511_v52 = vmul.f32 %v9602_v8, %v6451_v50  ;;  %v6452_v6 = vmul.f32 %v12673_v32, %v6440_v51  ;;  %v6421_v50 = vadd.f32 -0.28449672, %v6409_v18  ;;  %v6387_v56 = vmul.f32 %v12708_v0, %v6375_v38  ;;  %v9610_v60 = vpop.eup %9609 }
0x1fdc   :  { %v6513_v23 = vmul.f32 %v9604_v63, %v6453_v3  ;;  %v6398_v8 = vadd.f32 1.4214138, %v6386_v44  ;;  %v13046_v3 = vmov -1.0   ;;  %v6454_v58 = vmul.f32 %v12683_v5, %v6442_v7 }
0x1fdd   :  { %v6523_v42 = vsub.f32 1.0, %v6511_v52  ;;  %v6512_v54 = vmul.f32 %v9608_v33, %v6452_v6  ;;  %v6284_v32 = vsel %vm6272_vm9, 1.0, %v13046_v3  ;;  %v6286_v53 = vsel %vm6274_vm11, 1.0, %v13046_v3 }
0x1fde   :  { %v6525_v57 = vsub.f32 1.0, %v6513_v23  ;;  %v6501_v52 = vmul.f32 1.442695, %v6482_v46  ;;  %v6472_v18 = vsub.f32 0.0, %v12676_v17  ;;  %v6514_v49 = vmul.f32 %v9610_v60, %v6454_v58 }
0x1fdf   :  { %v6535_v10 = vmul.f32 %v6523_v42, %v12693_v27  ;;  %v6524_v28 = vsub.f32 1.0, %v6512_v54  ;;  %v6410_v42 = vmul.f32 %v12717_v39, %v6398_v8  ;;  %v6376_v27 = vadd.f32 -1.4531521, %v6364_v21 }
0x1fe0   :  { %v6433_v38 = vmul.f32 %v12697_v14, %v6421_v50  ;;  %v6399_v37 = vadd.f32 1.4214138, %v6387_v56  ;;  %v6537_v51 = vmul.f32 %v6525_v57, %v12703_v22  ;;  %v6503_v47 = vmul.f32 1.442695, %v6483_v34 }
0x1fe1   :  { %v6547_v63 = vadd.f32 1.0, %v6535_v10  ;;  %v6536_v46 = vmul.f32 %v6524_v28, %v6284_v32  ;;  %9613 = vpow2.f32 %v6501_v52  ;;  %v6526_v6 = vsub.f32 1.0, %v6514_v49  ;;  %v6703_v49 = vld [vmem:[%s13042_s18 + $0x420] sm:$0xff] }
0x1fe2   :  { %v6422_v44 = vadd.f32 -0.28449672, %v6410_v42  ;;  %v6484_v21 = vmul.f32 %v6472_v18, %v12676_v17  ;;  %v6388_v7 = vmul.f32 %v12727_v12, %v6376_v27  ;;  %v6445_v50 = vadd.f32 0.2548296, %v6433_v38 }
0x1fe3   :  { %v6236_v23 = vpop.f32.mrb[36].mxu0  ;;  %v6548_v33 = vadd.f32 1.0, %v6536_v46  ;;  %v6538_v34 = vmul.f32 %v6526_v6, %v6286_v53  ;;  %v6411_v56 = vmul.f32 %v12708_v0, %v6399_v37  ;;  %v6559_v10 = vmul.f32 %v6547_v63, %v12640_v43  ;;  %v6705_v46 = vld [vmem:[%s13042_s18 + $0x430] sm:$0xff] }
0x1fe4   :  { %v12750_v5 = vadd.f32 %v6236_v23, %v12634_v30  ;;  %v6238_v59 = vpop.f32.mrb[37].mxu0  ;;  %v6549_v57 = vadd.f32 1.0, %v6537_v51  ;;  %v6434_v60 = vmul.f32 %v12717_v39, %v6422_v44  ;;  %v6505_v18 = vmul.f32 1.442695, %v6484_v21  ;;  %v9612_v51 = vpop.eup %9611  ;;  %v6710_v21 = vld [vmem:[%s13042_s18 + $0x458] sm:$0xff] }
0x1fe5   :  { %v12754_v13 = vadd.f32 %v6238_v59, %v12638_v25  ;;  %v6560_v8 = vmul.f32 %v6548_v33, %v12648_v16  ;;  %v6550_v53 = vadd.f32 1.0, %v6538_v34  ;;  %v6400_v16 = vadd.f32 1.4214138, %v6388_v7  ;;  %v6707_v34 = vld [vmem:[%s13042_s18 + $0x440] sm:$0xff] }
0x1fe6   :  { %v12758_v22 = vmul.f32 0.70710677, %v12750_v5  ;;  %v6249_v42 = vmul.f32 0.5, %v12593_v24  ;;  %9615 = vpow2.f32 %v6503_v47  ;;  %v6457_v27 = vmul.f32 %v12697_v14, %v6445_v50  ;;  %v6709_v50 = vld [vmem:[%s13042_s18 + $0x450] sm:$0xff] }
0x1fe7   :  { %v12763_v54 = vmul.f32 0.70710677, %v12754_v13  ;;  %v6242_v17 = vpop.f32.mrb[38].mxu0  ;;  %6827 = vmatprep.mubr.f32.mxu0 %v6560_v8  ;;  %v6423_v63 = vadd.f32 -0.28449672, %v6411_v56  ;;  %9617 = vpow2.f32 %v6505_v18  ;;  %v6412_v44 = vmul.f32 %v12727_v12, %v6400_v16  ;;  %v6712_v16 = vld [vmem:[%s13042_s18 + $0x468] sm:$0xff] }
0x1fe8   :  { %v12767_v32 = vand.u32 2147483647, %v12758_v22  ;;  %v12770_v52 = vadd.f32 %v6242_v17, %v12634_v30  ;;  %v6244_v58 = vpop.f32.mrb[39].mxu0  ;;  %6828 = vmatmul.mubr.f32.vlgmr.msra.gmra.mrb[40].mxu0 %v6559_v10  ;;  %v6561_v23 = vmul.f32 %v6549_v57, %v6249_v42  ;;  %v6446_v14 = vadd.f32 0.2548296, %v6434_v60  ;;  %v6714_v42 = vld [vmem:[%s13042_s18 + $0x478] sm:$0xff] }
0x1fe9   :  { %v12774_v43 = vand.u32 2147483647, %v12763_v54  ;;  %v12777_v28 = vadd.f32 %v6244_v58, %v12638_v25  ;;  %v6562_v25 = vmul.f32 %v6550_v53, %v12650_v41  ;;  %v6708_v41 = vld [vmem:[%s13042_s18 + $0x448] sm:$0xff]  ;;  %v6517_v7 = vmul.f32 %v9612_v51, %v6457_v27 }
0x1fea   :  { %v6311_v30 = vmul.f32 0.3275911, %v12767_v32  ;;  %v12785_v37 = vmul.f32 0.70710677, %v12770_v52  ;;  %v13047_v10 = vpack.c.bf16 %v12660_v15, %v12653_v2  ;;  %v6435_v57 = vmul.f32 %v12708_v0, %v6423_v63  ;;  %v6718_v63 = vld [vmem:[%s13042_s18 + $0x498] sm:$0xff] }
0x1feb   :  { %v6312_v38 = vmul.f32 0.3275911, %v12774_v43  ;;  %v12789_v47 = vmul.f32 0.70710677, %v12777_v28  ;;  %6904 = vmatprep.mubr.f32.mxu1 %v6562_v25  ;;  %v9614_v33 = vpop.eup %9613  ;;  %v9296_v17 = vpack.c.bf16 %v6705_v46, %v6703_v49  ;;  %v6458_v53 = vmul.f32 %v12717_v39, %v6446_v14  ;;  %v6711_v39 = vld [vmem:[%s13042_s18 + $0x460] sm:$0xff]  ;;  %v6716_v25 = vld [vmem:[%s13042_s18 + $0x488] sm:$0xff] }
0x1fec   :  { %v6323_v24 = vadd.f32 1.0, %v6311_v30  ;;  %v12793_v6 = vand.u32 2147483647, %v12785_v37  ;;  %6905 = vmatmul.mubr.f32.vlgmr.msra.gmra.mrb[80].mxu1 %v6561_v23  ;;  %v13048_v58 = vpack.c.bf16 %v12671_v20, %v12668_v31  ;;  %v9298_v60 = vpack.c.bf16 %v6710_v21, %v6708_v41 }
0x1fed   :  { %v6324_v59 = vadd.f32 1.0, %v6312_v38  ;;  %9293 = vmatpush1.bf16.msra.mxu1 %v13047_v10  ;;  %v12807_v8 = vand.u32 2147483647, %v12789_v47  ;;  %v6424_v2 = vadd.f32 -0.28449672, %v6412_v44  ;;  %v9300_v15 = vpack.c.bf16 %v6709_v50, %v6707_v34  ;;  %v6713_v38 = vld [vmem:[%s13042_s18 + $0x470] sm:$0xff] }
0x1fee   :  { %9619 = vrcp.f32 %v6323_v24  ;;  %v6317_v56 = vmul.f32 0.3275911, %v12793_v6  ;;  %9295 = vmatprep.subr.bf16.mxu1 %v13048_v58  ;;  %v6518_v30 = vmul.f32 %v9614_v33, %v6458_v53  ;;  %v6529_v27 = vsub.f32 1.0, %v6517_v7  ;;  %v6715_v58 = vld [vmem:[%s13042_s18 + $0x480] sm:$0xff] }
0x1fef   :  { %9621 = vrcp.f32 %v6324_v59  ;;  %v6318_v19 = vmul.f32 0.3275911, %v12807_v8  ;;  %v6289_v49 = vsel %vm6277_vm12, 1.0, %v13046_v3  ;;  %v6436_v31 = vmul.f32 %v12727_v12, %v6424_v2 }
0x1ff0   :  { %v6329_v18 = vadd.f32 1.0, %v6317_v56  ;;  %v6447_v20 = vadd.f32 0.2548296, %v6435_v57  ;;  %v9616_v51 = vpop.eup %9615  ;;  %v6530_v24 = vsub.f32 1.0, %v6518_v30  ;;  %v6541_v14 = vmul.f32 %v6529_v27, %v6289_v49 }
0x1ff1   :  { %9297 = vmatpush1.bf16.msra.mxu1 %v9296_v17  ;;  %v6330_v23 = vadd.f32 1.0, %v6318_v19  ;;  %v9302_v46 = vpack.c.bf16 %v6714_v42, %v6712_v16  ;;  %v6290_v59 = vsel %vm6278_vm4, 1.0, %v13046_v3  ;;  %v6468_v44 = vsub.f32 0.0, %v12774_v43  ;;  %v9618_v50 = vpop.eup %9617  ;;  %v6722_v42 = vld [vmem:[%s13042_s18 + $0x4b8] sm:$0xff] }
0x1ff2   :  { %9623 = vrcp.f32 %v6329_v18  ;;  %9299 = vmatprep.subr.bf16.mxu1 %v9298_v60  ;;  %v6448_v41 = vadd.f32 0.2548296, %v6436_v31  ;;  %v6459_v21 = vmul.f32 %v12708_v0, %v6447_v20  ;;  %v6542_v33 = vmul.f32 %v6530_v24, %v6290_v59  ;;  %v6717_v60 = vld [vmem:[%s13042_s18 + $0x490] sm:$0xff]  ;;  %v6719_v20 = vld [vmem:[%s13042_s18 + $0x4a0] sm:$0xff] }
0x1ff3   :  { %9625 = vrcp.f32 %v6330_v23  ;;  %v9304_v7 = vpack.c.bf16 %v6713_v38, %v6711_v39  ;;  %v9306_v34 = vpack.c.bf16 %v6718_v63, %v6716_v25  ;;  %v6553_v10 = vadd.f32 1.0, %v6541_v14  ;;  %v6721_v38 = vld [vmem:[%s13042_s18 + $0x4b0] sm:$0xff] }
0x1ff4   :  { %v6460_v56 = vmul.f32 %v12727_v12, %v6448_v41  ;;  %v6519_v1 = vmul.f32 %v9616_v51, %v6459_v21  ;;  %v6253_v0 = vmul.f32 0.5, %v12608_v40  ;;  %v6254_v17 = vmul.f32 0.5, %v12615_v55  ;;  %v6720_v40 = vld [vmem:[%s13042_s18 + $0x4a8] sm:$0xff]  ;;  %v6726_v51 = vld [vmem:[%s13042_s18 + $0x4d8] sm:$0xff] }
0x1ff5   :  { %9301 = vmatpush1.bf16.msra.mxu1 %v9300_v15  ;;  %v6554_v53 = vadd.f32 1.0, %v6542_v33  ;;  %v6480_v2 = vmul.f32 %v6468_v44, %v12774_v43  ;;  %v6291_v55 = vsel %vm6279_vm7, 1.0, %v13046_v3  ;;  %v9308_v31 = vpack.c.bf16 %v6717_v60, %v6715_v58  ;;  %v6724_v43 = vld [vmem:[%s13042_s18 + $0x4c8] sm:$0xff] }
0x1ff6   :  { %9303 = vmatprep.subr.bf16.mxu1 %v9302_v46  ;;  %v6520_v15 = vmul.f32 %v9618_v50, %v6460_v56  ;;  %v6531_v16 = vsub.f32 1.0, %v6519_v1  ;;  %v6565_v39 = vmul.f32 %v6553_v10, %v6253_v0  ;;  %v6292_v25 = vsel %vm6280_vm13, 1.0, %v13046_v3  ;;  %v6725_v1 = vld [vmem:[%s13042_s18 + $0x4d0] sm:$0xff] }
0x1ff7   :  { %v6566_v19 = vmul.f32 %v6554_v53, %v6254_v17  ;;  %v9310_v36 = vpack.c.bf16 %v6722_v42, %v6720_v40  ;;  %v6497_v14 = vmul.f32 1.442695, %v6480_v2  ;;  %v9312_v33 = vpack.c.bf16 %v6721_v38, %v6719_v20  ;;  %v6730_v53 = vld [vmem:[%s13042_s18 + $0x4f8] sm:$0xff]  ;;  %v6727_v40 = vld [vmem:[%s13042_s18 + $0x4e0] sm:$0xff]  ;;  %v6729_v42 = vld [vmem:[%s13042_s18 + $0x4f0] sm:$0xff] }
0x1ff8   :  { %v12830_v57 = vpop.eup %9619  ;;  %v6532_v27 = vsub.f32 1.0, %v6520_v15  ;;  %v6543_v49 = vmul.f32 %v6531_v16, %v6291_v55  ;;  %v6255_v56 = vmul.f32 0.5, %v12613_v48  ;;  %v9318_v16 = vpack.c.bf16 %v6730_v53, %v6728_v62  ;;  %v6740_v62 = vld [vmem:[%s13042_s18 + $0x548] sm:$0xff] }
0x1ff9   :  { %v12837_v18 = vpop.eup %9621  ;;  %v6359_v12 = vmul.f32 1.0614054, %v12830_v57  ;;  %9305 = vmatpush1.bf16.msra.mxu1 %v9304_v7  ;;  %6833 = vmatprep.mubr.f32.mxu0 %v6566_v19  ;;  %v9314_v7 = vpack.c.bf16 %v6726_v51, %v6724_v43  ;;  %9627 = vpow2.f32 %v6497_v14  ;;  %v9320_v38 = vpack.c.bf16 %v6729_v42, %v6727_v40  ;;  %v6731_v43 = vld [vmem:[%s13042_s18 + $0x500] sm:$0xff]  ;;  %v6738_v14 = vld [vmem:[%s13042_s18 + $0x538] sm:$0xff] }
0x1ffa   :  { %v6360_v30 = vmul.f32 1.0614054, %v12837_v18  ;;  %9307 = vmatprep.subr.bf16.mxu1 %v9306_v34  ;;  %v6544_v46 = vmul.f32 %v6532_v27, %v6292_v25  ;;  %6834 = vmatmul.mubr.f32.gmra.mrb[42].mxu0 %v6565_v39  ;;  %v6555_v59 = vadd.f32 1.0, %v6543_v49  ;;  %v6723_v34 = vld [vmem:[%s13042_s18 + $0x4c0] sm:$0xff]  ;;  %v6732_v27 = vld [vmem:[%s13042_s18 + $0x508] sm:$0xff]  ;;  %v6734_v39 = vld [vmem:[%s13042_s18 + $0x518] sm:$0xff] }
0x1ffb   :  { %v6371_v63 = vadd.f32 -1.4531521, %v6359_v12  ;;  %7088 = vmatprep.mubr.f32.mxu0 %v13013_v29  ;;  %v9316_v48 = vpack.c.bf16 %v6725_v1, %v6723_v34  ;;  %v6733_v25 = vld [vmem:[%s13042_s18 + $0x510] sm:$0xff]  ;;  %v9322_v51 = vpack.c.bf16 %v6734_v39, %v6732_v27  ;;  %vm6276_vm14 = vcmp.ge.f32.partialorder %v12763_v54, 0.0  ;;  %v6735_v1 = vld [vmem:[%s13042_s18 + $0x520] sm:$0xff] }
0x1ffc   :  { %v6372_v23 = vadd.f32 -1.4531521, %v6360_v30  ;;  %v12854_v24 = vpop.eup %9623  ;;  %v6556_v21 = vadd.f32 1.0, %v6544_v46  ;;  %v6567_v60 = vmul.f32 %v6555_v59, %v6255_v56  ;;  %v6467_v30 = vsub.f32 0.0, %v12767_v32 }
0x1ffd   :  { %v6365_v41 = vmul.f32 1.0614054, %v12854_v24  ;;  %9309 = vmatpush1.bf16.msra.mxu1 %v9308_v31  ;;  %v12861_v50 = vpop.eup %9625  ;;  %v6383_v10 = vmul.f32 %v12830_v57, %v6371_v63  ;;  %v6474_v31 = vsub.f32 0.0, %v12807_v8  ;;  %v9324_v34 = vpack.c.bf16 %v6733_v25, %v6731_v43  ;;  %v6745_v43 = vld [vmem:[%s13042_s18 + $0x570] sm:$0xff] }
0x1ffe   :  { %v6384_v44 = vmul.f32 %v12837_v18, %v6372_v23  ;;  %9311 = vmatprep.subr.bf16.mxu1 %v9310_v36  ;;  %v6568_v29 = vmul.f32 %v6556_v21, %v6256_v11  ;;  %v6366_v58 = vmul.f32 1.0614054, %v12861_v50  ;;  %v6736_v23 = vld [vmem:[%s13042_s18 + $0x528] sm:$0xff]  ;;  %v6288_v54 = vsel %vm6276_vm14, 1.0, %v13046_v3 }
0x1fff   :  { %v6377_v17 = vadd.f32 -1.4531521, %v6365_v41  ;;  %v6395_v15 = vadd.f32 1.4214138, %v6383_v10  ;;  %v6473_v41 = vsub.f32 0.0, %v12793_v6  ;;  %v6486_v21 = vmul.f32 %v6474_v31, %v12807_v8 }
0x2000   :  { %v6396_v0 = vadd.f32 1.4214138, %v6384_v44  ;;  %6910 = vmatprep.mubr.f32.mxu1 %v6568_v29  ;;  %v6378_v2 = vadd.f32 -1.4531521, %v6366_v58  ;;  %v6479_v44 = vmul.f32 %v6467_v30, %v12767_v32  ;;  %v9326_v56 = vpack.c.bf16 %v6738_v14, %v6736_v23  ;;  %v6737_v32 = vld [vmem:[%s13042_s18 + $0x530] sm:$0xff] }
0x2001   :  { %9313 = vmatpush1.bf16.msra.mxu1 %v9312_v33  ;;  %v6389_v19 = vmul.f32 %v12854_v24, %v6377_v17  ;;  %v6407_v36 = vmul.f32 %v12830_v57, %v6395_v15  ;;  %v6485_v8 = vmul.f32 %v6473_v41, %v12793_v6  ;;  %v6509_v58 = vmul.f32 1.442695, %v6486_v21  ;;  %v6739_v15 = vld [vmem:[%s13042_s18 + $0x540] sm:$0xff]  ;;  %v6754_v21 = vld [vmem:[%s13042_s18 + $0x5b8] sm:$0xff] }
0x2002   :  { %v6408_v12 = vmul.f32 %v12837_v18, %v6396_v0  ;;  %6911 = vmatmul.mubr.f32.gmra.mrb[82].mxu1 %v6567_v60  ;;  %9315 = vmatprep.subr.bf16.mxu1 %v9314_v7  ;;  %v6390_v49 = vmul.f32 %v12861_v50, %v6378_v2  ;;  %v6495_v29 = vmul.f32 1.442695, %v6479_v44  ;;  %v6252_v27 = vmul.f32 0.5, %v12754_v13  ;;  %v6749_v44 = vld [vmem:[%s13042_s18 + $0x590] sm:$0xff] }
0x2003   :  { %v6401_v59 = vadd.f32 1.4214138, %v6389_v19  ;;  %v9628_v7 = vpop.eup %9627  ;;  %v6419_v10 = vadd.f32 -0.28449672, %v6407_v36  ;;  %v6507_v42 = vmul.f32 1.442695, %v6485_v8 }
0x2004   :  { %v6420_v55 = vadd.f32 -0.28449672, %v6408_v12  ;;  %v6402_v63 = vadd.f32 1.4214138, %v6390_v49  ;;  %v9328_v12 = vpack.c.bf16 %v6737_v32, %v6735_v1  ;;  %9629 = vpow2.f32 %v6495_v29  ;;  %v6746_v19 = vld [vmem:[%s13042_s18 + $0x578] sm:$0xff]  ;;  %v6748_v36 = vld [vmem:[%s13042_s18 + $0x588] sm:$0xff] }
0x2005   :  { %9317 = vmatpush1.bf16.msra.mxu1 %v9316_v48  ;;  %v6413_v17 = vmul.f32 %v12854_v24, %v6401_v59  ;;  %v6431_v48 = vmul.f32 %v12830_v57, %v6419_v10  ;;  %9631 = vpow2.f32 %v6509_v58  ;;  %v6747_v59 = vld [vmem:[%s13042_s18 + $0x580] sm:$0xff]  ;;  %v6753_v32 = vld [vmem:[%s13042_s18 + $0x5b0] sm:$0xff]  ;;  %v6758_v29 = vld [vmem:[%s13042_s18 + $0x5d8] sm:$0xff]  ;;  %vm6275_vm15 = vcmp.ge.f32.partialorder %v12758_v22, 0.0 }
0x2006   :  { %v6432_v20 = vmul.f32 %v12837_v18, %v6420_v55  ;;  %9319 = vmatprep.subr.bf16.mxu1 %v9318_v16  ;;  %v6414_v11 = vmul.f32 %v12861_v50, %v6402_v63  ;;  %v6741_v16 = vld [vmem:[%s13042_s18 + $0x550] sm:$0xff]  ;;  %v6744_v55 = vld [vmem:[%s13042_s18 + $0x568] sm:$0xff]  ;;  %9633 = vpow2.f32 %v6507_v42  ;;  %v6751_v1 = vld [vmem:[%s13042_s18 + $0x5a0] sm:$0xff]  ;;  %vm6282_vm0 = vcmp.ge.f32.partialorder %v12789_v47, 0.0 }
0x2007   :  { %v6425_v6 = vadd.f32 -0.28449672, %v6413_v17  ;;  %v9332_v49 = vpack.c.bf16 %v6741_v16, %v6739_v15  ;;  %v6443_v31 = vadd.f32 0.2548296, %v6431_v48  ;;  %v6756_v17 = vld [vmem:[%s13042_s18 + $0x5c8] sm:$0xff]  ;;  %vm6281_vm2 = vcmp.ge.f32.partialorder %v12785_v37, 0.0 }
0x2008   :  { %v6444_v46 = vadd.f32 0.2548296, %v6432_v20  ;;  %v6426_v53 = vadd.f32 -0.28449672, %v6414_v11  ;;  %v9334_v20 = vpack.c.bf16 %v6746_v19, %v6744_v55  ;;  %v6752_v11 = vld [vmem:[%s13042_s18 + $0x5a8] sm:$0xff]  ;;  %v9346_v58 = vpack.c.bf16 %v6758_v29, %v6756_v17  ;;  %v6761_v42 = vld [vmem:[%s13042_s18 + $0x5f0] sm:$0xff] }
0x2009   :  { %9321 = vmatpush1.bf16.msra.mxu1 %v9320_v38  ;;  %v6743_v38 = vld [vmem:[%s13042_s18 + $0x560] sm:$0xff]  ;;  %v6437_v63 = vmul.f32 %v12854_v24, %v6425_v6  ;;  %v6455_v14 = vmul.f32 %v12830_v57, %v6443_v31  ;;  %v9342_v57 = vpack.c.bf16 %v6754_v21, %v6752_v11  ;;  %v6294_v22 = vsel %vm6282_vm0, 1.0, %v13046_v3 }
0x200a   :  { %v6456_v33 = vmul.f32 %v12837_v18, %v6444_v46  ;;  %9323 = vmatprep.subr.bf16.mxu1 %v9322_v51  ;;  %v6742_v18 = vld [vmem:[%s13042_s18 + $0x558] sm:$0xff]  ;;  %v6438_v30 = vmul.f32 %v12861_v50, %v6426_v53  ;;  %v9336_v23 = vpack.c.bf16 %v6745_v43, %v6743_v38  ;;  %v6759_v6 = vld [vmem:[%s13042_s18 + $0x5e0] sm:$0xff]  ;;  %v6251_v31 = vmul.f32 0.5, %v12750_v5 }
0x200b   :  { %v9330_v2 = vpack.c.bf16 %v6742_v18, %v6740_v62  ;;  %v6750_v51 = vld [vmem:[%s13042_s18 + $0x598] sm:$0xff]  ;;  %v6449_v41 = vadd.f32 0.2548296, %v6437_v63  ;;  %v6755_v18 = vld [vmem:[%s13042_s18 + $0x5c0] sm:$0xff]  ;;  %v9352_v47 = vpack.c.bf16 %v6761_v42, %v6759_v6  ;;  %v9712_v6 = vmov 1983009808  }
0x200c   :  { %v6516_v0 = vmul.f32 %v9628_v7, %v6456_v33  ;;  %v6450_v13 = vadd.f32 0.2548296, %v6438_v30  ;;  %v9338_v46 = vpack.c.bf16 %v6750_v51, %v6748_v36  ;;  %v6293_v30 = vsel %vm6281_vm2, 1.0, %v13046_v3 }
0x200d   :  { %9325 = vmatpush1.bf16.msra.mxu1 %v9324_v34  ;;  %v9340_v34 = vpack.c.bf16 %v6749_v44, %v6747_v59  ;;  %v7147_v42 = vunpack.c.l.s4 %v9712_v6 }
0x200e   :  { %v6528_v60 = vsub.f32 1.0, %v6516_v0  ;;  %9327 = vmatprep.subr.bf16.mxu1 %v9326_v56  ;;  %v6462_v33 = vmul.f32 %v12861_v50, %v6450_v13  ;;  %v9630_v7 = vpop.eup %9629  ;;  %v6461_v0 = vmul.f32 %v12854_v24, %v6449_v41  ;;  %v9344_v50 = vpack.c.bf16 %v6753_v32, %v6751_v1 }
0x200f   :  { %v9632_v56 = vpop.eup %9631  ;;  %v6515_v10 = vmul.f32 %v9630_v7, %v6455_v14 }
0x2010   :  { %v6540_v40 = vmul.f32 %v6528_v60, %v6288_v54  ;;  %v6522_v8 = vmul.f32 %v9632_v56, %v6462_v33  ;;  %v9634_v62 = vpop.eup %9633  ;;  %v6757_v60 = vld [vmem:[%s13042_s18 + $0x5d0] sm:$0xff]  ;;  %v6760_v54 = vld [vmem:[%s13042_s18 + $0x5e8] sm:$0xff] }
0x2011   :  { %9329 = vmatpush1.bf16.msra.mxu1 %v9328_v12  ;;  %v6527_v53 = vsub.f32 1.0, %v6515_v10  ;;  %v6762_v12 = vld [vmem:[%s13042_s18 + $0x5f8] sm:$0xff]  ;;  %v6521_v48 = vmul.f32 %v9634_v62, %v6461_v0  ;;  %v9348_v15 = vpack.c.bf16 %v6757_v60, %v6755_v18 }
0x2012   :  { %v6552_v39 = vadd.f32 1.0, %v6540_v40  ;;  %9331 = vmatprep.subr.bf16.mxu1 %v9330_v2  ;;  %v6534_v24 = vsub.f32 1.0, %v6522_v8  ;;  %v6287_v2 = vsel %vm6275_vm15, 1.0, %v13046_v3  ;;  %v9350_v16 = vpack.c.bf16 %v6762_v12, %v6760_v54 }
0x2013   :  { %v6539_v40 = vmul.f32 %v6527_v53, %v6287_v2  ;;  %v6533_v55 = vsub.f32 1.0, %v6521_v48 }
0x2014   :  { %v6564_v25 = vmul.f32 %v6552_v39, %v6252_v27  ;;  %v6546_v19 = vmul.f32 %v6534_v24, %v6294_v22  ;;  %v7129_v22 = vld [vmem:[%s9937_s24] sm:$0x3]  ;;  %s9713_s24 = smov [#allocation3]  }
0x2015   :  { %9333 = vmatpush1.bf16.msra.mxu1 %v9332_v49  ;;  %v6551_v27 = vadd.f32 1.0, %v6539_v40  ;;  %v6545_v39 = vmul.f32 %v6533_v55, %v6293_v30  ;;  %v7115_v40 = vld [vmem:[%s9932_s6] sm:$0x3]  ;;  %s7163_s6 = sshll.u32 %s9713_s24, 4  ;;  %s7164_s6 = int_to_ptr.vmem [resolvable:$true] %s7163_s6 }
0x2016   :  { %6981 = vmatprep.mubr.f32.mxu1 %v6564_v25  ;;  %9335 = vmatprep.subr.bf16.mxu1 %v9334_v20  ;;  %v6558_v49 = vadd.f32 1.0, %v6546_v19  ;;  %v6258_v20 = vmul.f32 0.5, %v12777_v28  ;;  %v6257_v25 = vmul.f32 0.5, %v12770_v52  ;;  %v7120_v55 = vrot.slane %v7115_v40, %v10379_v35  ;;  %p9644_p1 = scmp.lt.s32.totalorder %s7164_s6, %s7164_s6 }
0x2017   :  { %v6563_v37 = vmul.f32 %v6551_v27, %v6251_v31  ;;  %v6557_v38 = vadd.f32 1.0, %v6545_v39  ;;  %v7124_v19 = vrot.slane %v7115_v40, %v10375_v26  ;;  %v7148_v31 = vunpack.c.0.s8 %v7147_v42 }
0x2018   :  { %v6570_v43 = vmul.f32 %v6558_v49, %v6258_v20  ;;  %v7138_v49 = vrot.slane %v7129_v22, %v10375_v26 }
0x2019   :  { %9337 = vmatpush1.bf16.msra.mxu1 %v9336_v23  ;;  %v6569_v3 = vmul.f32 %v6557_v38, %v6257_v25  ;;  %v13051_v25 = vld [vmem:[#allocation33_spill] sm:$0xff] }
0x201a   :  { %9339 = vmatprep.subr.bf16.mxu1 %v9338_v46  ;;  %v6998_v46 = vld [vmem:[%s9927_s4] sm:$0x3]  ;;  %s9639_s4 = scalar_lea.vmem %s7164_s6, 64 }
0x201b   :  { %v7003_v41 = vrot.slane %v6998_v46, %v10379_v35  ;;  %v7007_v33 = vrot.slane %v6998_v46, %v10375_v26  ;;  %p9640_p0 = scmp.ne.s32.totalorder %s7164_s6, %s9639_s4  ;;  %p9645_p2 = scmp.lt.s32.totalorder %s9639_s4, %s9639_s4 }
0x201d   :  { %9341 = vmatpush1.bf16.msra.mxu1 %v9340_v34  ;;  %p9646_p3 = por %p9645_p2, %p9644_p1 }
0x201e   :  { %9343 = vmatprep.subr.bf16.mxu1 %v9342_v57 }
0x201f   :  { %p9647_p4 = pnand %p9646_p3, %p9640_p0 }
0x2021   :  { %9345 = vmatpush1.bf16.msra.mxu1 %v9344_v50 }
0x2022   :  { %9347 = vmatprep.subr.bf16.mxu1 %v9346_v58 }
0x2025   :  { %9349 = vmatpush1.bf16.msra.mxu1 %v9348_v15 }
0x2026   :  { %9351 = vmatprep.subr.bf16.mxu1 %v9350_v16 }
0x2029   :  { %9353 = vmatpush1.bf16.msra.mxu1 %v9352_v47  ;;  %v7134_v47 = vrot.slane %v7129_v22, %v10379_v35 }
0x202c   :  { %6982 = vmatmul.mubr.f32.vlgmr.msra.gmra.mrb[80].mxu1 %v6563_v37 }
0x202d   :  { %6987 = vmatprep.mubr.f32.mxu1 %v6570_v43 }
0x2030   :  { %6988 = vmatmul.mubr.f32.gmra.mrb[82].mxu1 %v6569_v3  ;;  %v7151_v3 = vsub.s32 %v7148_v31, %v13051_v25 }
0x20bb   :  { %v6829_v63 = vpop.f32.mrb[40].mxu0 }
0x20bc   :  { %v6831_v36 = vpop.f32.mrb[41].mxu0 }
0x20cd   :  { %v6835_v51 = vpop.f32.mrb[42].mxu0 }
0x20ce   :  { %v6837_v13 = vpop.f32.mrb[43].mxu0 }
0x20ff   :  { %v6983_v23 = vpop.f32.mrb[80].mxu1 }
0x2100   :  { %v9362_v14 = vadd.f32 %v6983_v23, %v6829_v63  ;;  %v6985_v5 = vpop.f32.mrb[81].mxu1 }
0x2101   :  { %v9363_v28 = vadd.f32 %v6985_v5, %v6831_v36 }
0x2102   :  { %v6994_v44 = vadd.f32 %v9362_v14, %v12243_v61 }
0x2103   :  { %v6989_v59 = vpop.f32.mrb[82].mxu1  ;;  %v6995_v21 = vadd.f32 %v9363_v28, %v12241_v9  ;;  %v7014_v9 = vld [vmem:[%s13049_s0] sm:$0x3] }
0x2104   :  { %v9364_v52 = vadd.f32 %v6989_v59, %v6835_v51  ;;  %v6991_v11 = vpop.f32.mrb[83].mxu1  ;;  %v7010_v10 = vadd.f32 %v7003_v41, %v6994_v44 }
0x2105   :  { %v9365_v7 = vadd.f32 %v6991_v11, %v6837_v13  ;;  %v7011_v1 = vadd.f32 %v7007_v33, %v6995_v21 }
0x2106   :  { %v6996_v34 = vadd.f32 %v9364_v52, %v12249_v4 }
0x2107   :  { %v6997_v56 = vadd.f32 %v9365_v7, %v12252_v45 }
0x2108   :  { %v7012_v57 = vadd.f32 %v7003_v41, %v6996_v34 }
0x2109   :  { %v7013_v32 = vadd.f32 %v7007_v33, %v6997_v56 }
0x210a   :  { %v9357_v0 = vpack.c.bf16 %v7012_v57, %v7010_v10 }
0x210b   :  { %v9354_v61 = vpack.c.bf16 %v7013_v32, %v7011_v1 }
0x210d   :  { %9356 = vmatprep.subr.msk.bf16.mxu0 %vm11058_vm8, %v9354_v61 }
0x210e   :  { %9359 = vmatpush1.bf16.msk.msra.mxu0 %vm11058_vm8, %v9357_v0 }
0x2111   :  { %7301 = vmatmul.mubr.msk.f32.vlgmr.msra.gmra.mrb[44].mxu0 %vm2650_vm10, %v7014_v9 }
0x21e4   :  { %v7090_v29 = vpop.f32.mrb[44].mxu0 }
0x21e5   :  { %v7095_v4 = vsel %vm691_vm1, %v7090_v29, 0.0  ;;  %v7092_v8 = vpop.f32.mrb[45].mxu0 }
0x21e6   :  { %v7096_v45 = vsel %vm2133_vm5, %v7092_v8, 0.0 }
0x21e7   :  { %v7097_v62 = vadd.f32 %v7096_v45, %v7095_v4 }
0x21e9   :  { %7098 = vadd.xlane.f32.xlu0 %v7097_v62 }
0x2276   :  { %v7099_v50 = vpop.xlane.xlu0 %7098 }
0x2277   :  { %v7100_v18 = vmul.f32 0.0052083335, %v7099_v50 }
0x2279   :  { %v7101_v53 = vsub.f32 %v7090_v29, %v7100_v18  ;;  %v7102_v58 = vsub.f32 %v7092_v8, %v7100_v18 }
0x227b   :  { %v7103_v60 = vmul.f32 %v7101_v53, %v7101_v53  ;;  %v7104_v54 = vmul.f32 %v7102_v58, %v7102_v58 }
0x227d   :  { %v7105_v12 = vsel %vm691_vm1, %v7103_v60, 0.0  ;;  %v7106_v48 = vsel %vm2133_vm5, %v7104_v54, 0.0  ;;  %vm7154_vm5 = vcmask 519170  }
0x227e   :  { %v7107_v24 = vadd.f32 %v7106_v48, %v7105_v12  ;;  %vm7155_vm8 = vmor %vm7154_vm5, %vm691_vm1 }
0x2280   :  { %7108 = vadd.xlane.f32.xlu1 %v7107_v24 }
0x230d   :  { %v7109_v2 = vpop.xlane.xlu1 %7108 }
0x230e   :  { %v7110_v15 = vmul.f32 0.0052083335, %v7109_v2 }
0x2310   :  { %v7111_v16 = vadd.f32 1e-05, %v7110_v15 }
0x2312   :  { %9635 = vrsqrt.f32 %v7111_v16 }
0x231c   :  { %v9636_v30 = vpop.eup %9635 }
0x231d   :  { %v7113_v27 = vmul.f32 %v9636_v30, %v7101_v53  ;;  %v7114_v39 = vmul.f32 %v9636_v30, %v7102_v58 }
0x231f   :  { %v7127_v20 = vmul.f32 %v7120_v55, %v7113_v27  ;;  %v7128_v37 = vmul.f32 %v7124_v19, %v7114_v39 }
0x2321   :  { %v7141_v38 = vadd.f32 %v7134_v47, %v7127_v20  ;;  %v7142_v43 = vadd.f32 %v7138_v49, %v7128_v37 }
0x2323   :  { %v7145_v63 = vcombine.low %v7141_v38, %v7142_v43 }
0x2325   :  { %v7152_v36 = vrot.slane %v7145_v63, %v7151_v3 }
0x2327   :  { %7156 = vst.msk [vmem:[#allocation3] sm:$0xf] %vm7155_vm8, %v7152_v36 }
0x2328   :  { %9650 = shalt.err (!%p9647_p4)
}
0x2329   :  { %s9651_s5 = scalar_lea.hbm %s9942_s27, 64 }
0x232a   :  { %p9652_p5 = scmp.ne.s32.totalorder %s9942_s27, %s9651_s5  ;;  %p9655_p6 = scmp.lt.u32.totalorder %s9651_s5, %s9942_s27 }
0x232c   :  { %p9657_p7 = pnand %p9655_p6, %p9652_p5 }
0x232e   :  { %9660 = shalt.err (!%p9657_p7)
}
0x232f   :  { %7166 = dma.vmem_to_hbm [thread:$0]  %s7164_s6, 64, %s9942_s27, [#allocation4]  }
0x2330   :  { %9661 = dma.done.wait [#allocation4], 64  }
0x2331   :  { %9662 = vsyncadd [#allocation4], 4294967232 }
0x2332   :  { %7170 = vsyncpa [#allocation4], 1 }

</bundles_post_ra>
